<compile_context>
chip_gen: v5e
topology: v5e:2x2
jax: 0.10.0
libtpu: 0.0.40
codegen_flags: <defaults>
</compile_context>

<pallas_src>
import functools

import numpy as np

import jax
import jax.numpy as jnp
from jax.experimental import pallas as pl
from jax.experimental.pallas import tpu as pltpu


# --------------------------------------------------------------------------
# Fused kernel: Linear+ReLU -> (ConvT + view + nearest) as 2 matmuls/group -> sigmoid
# --------------------------------------------------------------------------
def _decoder_kernel(z_ref, w3_ref, b2_ref, c_ref, g_ref, bias_ref, o_ref,
                    acat_ref, *, nb):
    # z_ref   : (1, NB, 10)      SMEM  (per-step latent scalars)
    # w3_ref  : (10, 64, 128)    linear weight in padded post-view layout
    # b2_ref  : (64, 128)        linear bias in padded post-view layout
    # c_ref   : (4, 128, 384)    one-hot column gather (3 conv column taps x 128)
    # g_ref   : (4, 241, 192)    banded conv-row / row-gather matrices (K=3*64)
    # bias_ref: (4, 241, 1)      conv bias per output row (per group)
    # o_ref   : (NB, 4, 241, 128) lane-dense output block
    # acat_ref: (4, 192, 128)    VMEM scratch: taps re-stacked along K (aligned)
    for s in range(nb):                      # static unroll over samples in step
        # ---- Linear(10 -> 7200) + ReLU, produced directly in the padded
        #      (64, 128) post-view layout: 10 scalar-broadcast VPU FMAs.
        acc = b2_ref[...]
        for k in range(10):
            acc = acc + z_ref[0, s, k] * w3_ref[k]
        h = jnp.maximum(acc, 0.0)            # (64, 128); padding rows/cols stay 0

        for q in range(4):                   # 4 column groups of the output
            # Stage A: nearest-neighbour column gather for the 3 conv column
            # taps as ONE one-hot matmul: (64,128) @ (128,384) -> (64,384).
            a = jnp.dot(h, c_ref[q], preferred_element_type=jnp.float32)
            # Re-stack taps along K with fully aligned (64,128) stores.
            acat_ref[q, 0:64, :] = a[:, 0:128]
            acat_ref[q, 64:128, :] = a[:, 128:256]
            acat_ref[q, 128:192, :] = a[:, 256:384]
            # Stage B: banded conv rows + nearest row gather, ONE matmul
            # (241,192) @ (192,128); add conv bias; sigmoid via tanh (EUP).
            res = jnp.dot(g_ref[q], acat_ref[q],
                          preferred_element_type=jnp.float32)
            res = res + bias_ref[q]
            o_ref[s, q] = 0.5 * (jnp.tanh(0.5 * res) + 1.0)


# --------------------------------------------------------------------------
# Host-side exact folding of pad / conv-transpose / view / nearest-interp
# --------------------------------------------------------------------------
def _build_constants(lin_w, lin_b, ct_w, ct_b):
    lin_w = np.asarray(lin_w, np.float32)    # (7200, 10)
    lin_b = np.asarray(lin_b, np.float32)    # (7200,)
    ct_w = np.asarray(ct_w, np.float32)      # (1, 16, 3, 3)  PyTorch (Cin,Cout,KH,KW)
    ct_b = np.asarray(ct_b, np.float32)      # (16,)

    # Linear weight/bias in the padded post-view (64, 128) layout; valid (60,120).
    W3 = np.zeros((10, 64, 128), np.float32)
    W3[:, :60, :120] = lin_w.T.reshape(10, 60, 120)
    B2 = np.zeros((64, 128), np.float32)
    B2[:60, :120] = lin_b.reshape(60, 120)

    # ConvTranspose == VALID correlation of the pad-2 input with the flipped kernel.
    wf = ct_w[0, :, ::-1, ::-1]              # (16, 3, 3)

    # PyTorch nearest-neighbour source indices: floor(dst * in / out).
    ri = (np.arange(241) * 248) // 241       # rows of the (248, 488) view
    ci = (np.arange(481) * 488) // 481       # cols of the (248, 488) view
    # View index algebra: V[R, C] = ct[m // 62, m % 62, C % 122], m = 4R + C//122.
    grp = ci // 122                          # column group (0..3), monotone in c
    col_starts = tuple(int(np.searchsorted(grp, q)) for q in range(4))
    col_counts = tuple(int(np.sum(grp == q)) for q in range(4))
    assert sum(col_counts) == 481 and max(col_counts) <= 128

    C = np.zeros((4, 128, 384), np.float32)    # one-hot column gather per tap
    G = np.zeros((4, 241, 192), np.float32)    # banded row taps + row gather
    BIAS = np.zeros((4, 241, 1), np.float32)   # conv bias per output row
    rows = np.arange(241)
    for q in range(4):
        cq = col_counts[q]
        w_col = ci[col_starts[q]:col_starts[q] + cq] - 122 * q   # (cq,) in [0,122)
        m = 4 * ri + q
        co = m // 62                         # conv output channel per output row
        hh = m % 62                          # conv output row per output row
        for qp in range(3):                  # kernel column tap
            src = w_col + qp - 2             # source column in unpadded h
            ok = (src >= 0) & (src < 120)
            C[q, src[ok], qp * 128 + np.nonzero(ok)[0]] = 1.0
            for p in range(3):               # kernel row tap
                i = hh + p - 2               # source row in unpadded h
                okr = (i >= 0) & (i < 60)
                G[q, rows[okr], qp * 64 + i[okr]] += wf[co[okr], p, qp]
        BIAS[q, :, 0] = ct_b[co]
    return (jnp.asarray(W3), jnp.asarray(B2), jnp.asarray(C), jnp.asarray(G),
            jnp.asarray(BIAS), col_counts)


# --------------------------------------------------------------------------
# pallas_call wrapper: constants built once, jitted forward closes over them
# --------------------------------------------------------------------------
def make_decoder(params, samples_per_step=2):
    w3, b2, cmat, gmat, bias, col_counts = _build_constants(
        params["lin_w"], params["lin_b"], params["ct_w"], params["ct_b"])
    nb = int(samples_per_step)
    kernel = functools.partial(_decoder_kernel, nb=nb)

    def forward(z):
        z = z.astype(jnp.float32)
        n = z.shape[0]
        npad = ((n + nb - 1) // nb) * nb
        if npad != n:
            z = jnp.pad(z, ((0, npad - n), (0, 0)))
        zs = z.reshape(npad // nb, nb, 10)   # per-step (NB,10) SMEM blocks
        padded = pl.pallas_call(
            kernel,
            out_shape=jax.ShapeDtypeStruct((npad, 4, 241, 128), jnp.float32),
            grid=(npad // nb,),
            in_specs=[
                pl.BlockSpec((1, nb, 10), lambda i: (i, 0, 0),
                             memory_space=pltpu.SMEM),
                pl.BlockSpec((10, 64, 128), lambda i: (0, 0, 0)),
                pl.BlockSpec((64, 128), lambda i: (0, 0)),
                pl.BlockSpec((4, 128, 384), lambda i: (0, 0, 0)),
                pl.BlockSpec((4, 241, 192), lambda i: (0, 0, 0)),
                pl.BlockSpec((4, 241, 1), lambda i: (0, 0, 0)),
            ],
            out_specs=pl.BlockSpec((nb, 4, 241, 128), lambda i: (i, 0, 0, 0)),
            scratch_shapes=[pltpu.VMEM((4, 192, 128), jnp.float32)],
            compiler_params=pltpu.CompilerParams(
                dimension_semantics=("parallel",)),
        )(zs, w3, b2, cmat, gmat, bias)
        # Single crop/concat of the lane-dense group blocks to (N,1,241,481).
        parts = [padded[:, q, :, :col_counts[q]] for q in range(4)]
        out = jnp.concatenate(parts, axis=-1)[:, None, :, :]
        return out[:n]

    return jax.jit(forward)


# --------------------------------------------------------------------------
# Parameters (deterministic init, shapes match the PyTorch module)
# --------------------------------------------------------------------------
def init_params(key):
    k1, k2, k3, k4 = jax.random.split(key, 4)
    lim_l = 1.0 / np.sqrt(10.0)                  # Linear(10, 7200)
    lim_c = 1.0 / np.sqrt(16.0 * 3.0 * 3.0)      # ConvTranspose2d(1, 16, k=3)
    return {
        "lin_w": jax.random.uniform(k1, (7200, 10), jnp.float32, -lim_l, lim_l),
        "lin_b": jax.random.uniform(k2, (7200,), jnp.float32, -lim_l, lim_l),
        "ct_w": jax.random.uniform(k3, (1, 16, 3, 3), jnp.float32, -lim_c, lim_c),
        "ct_b": jax.random.uniform(k4, (16,), jnp.float32, -lim_c, lim_c),
    }


# --------------------------------------------------------------------------
# Pure-JAX reference (faithful port of the PyTorch forward, for checking)
# --------------------------------------------------------------------------
def decoder_forward_ref(params, z):
    N = z.shape[0]
    y = jnp.maximum(jnp.dot(z, params["lin_w"].T) + params["lin_b"], 0.0)
    h = y.reshape(N, 1, 60, 120)
    wf = params["ct_w"][0, :, ::-1, ::-1]            # (16, 3, 3) flipped
    ct = jax.lax.conv_general_dilated(
        h, wf[:, None, :, :], window_strides=(1, 1),
        padding=((2, 2), (2, 2)),
        dimension_numbers=("NCHW", "OIHW", "NCHW"))
    ct = ct + params["ct_b"][None, :, None, None]    # (N, 16, 62, 122)
    v = ct.reshape(N, 1, 248, 488)
    ri = (np.arange(241) * 248) // 241               # torch nearest: floor(i*in/out)
    ci = (np.arange(481) * 488) // 481
    out = v[:, :, ri[:, None], ci[None, :]]
    return jax.nn.sigmoid(out)


if __name__ == "__main__":
    key = jax.random.PRNGKey(0)
    pkey, zkey = jax.random.split(key)

    params = init_params(pkey)
    z = jax.random.normal(zkey, (4, 10), jnp.float32)   # latent dim fixed at 10

    decoder = make_decoder(params, samples_per_step=2)  # grid=(2,), 2 samples/step
    out = jax.block_until_ready(decoder(z))
    ref = jax.block_until_ready(decoder_forward_ref(params, z))

    assert out.shape == (4, 1, 241, 481), out.shape
    err = float(jnp.max(jnp.abs(out - ref)))
    assert jnp.allclose(out, ref, atol=1e-4, rtol=1e-4), err
    print("KERNEL_OK")
</pallas_src>

<mosaic_0001>
module attributes {stable_mosaic.version = 11 : i64} {
  func.func @_decoder_kernel(%arg0: i32, %arg1: memref<1x2x10xf32, #tpu.memory_space<smem>>, %arg2: memref<10x64x128xf32, #tpu.memory_space<vmem>>, %arg3: memref<64x128xf32, #tpu.memory_space<vmem>>, %arg4: memref<4x128x384xf32, #tpu.memory_space<vmem>>, %arg5: memref<4x241x192xf32, #tpu.memory_space<vmem>>, %arg6: memref<4x241x1xf32, #tpu.memory_space<vmem>>, %arg7: memref<2x4x241x128xf32, #tpu.memory_space<vmem>>, %arg8: memref<4x192x128xf32, #tpu.memory_space<vmem>>) attributes {dimension_semantics = [#tpu.dimension_semantics<parallel>], iteration_bounds = array<i64: 2>, scalar_prefetch = 0 : i64, scratch_operands = 1 : i64, tpu.core_type = #tpu.core_type<tc>, window_params = [{transform_indices = @transform_0, window_bounds = array<i64: 1, 2, 10>}, {pipeline_mode = #tpu.pipeline_mode<synchronous>, transform_indices = @transform_1, window_bounds = array<i64: 10, 64, 128>}, {pipeline_mode = #tpu.pipeline_mode<synchronous>, transform_indices = @transform_2, window_bounds = array<i64: 64, 128>}, {pipeline_mode = #tpu.pipeline_mode<synchronous>, transform_indices = @transform_3, window_bounds = array<i64: 4, 128, 384>}, {pipeline_mode = #tpu.pipeline_mode<synchronous>, transform_indices = @transform_4, window_bounds = array<i64: 4, 241, 192>}, {pipeline_mode = #tpu.pipeline_mode<synchronous>, transform_indices = @transform_5, window_bounds = array<i64: 4, 241, 1>}, {transform_indices = @transform_6, window_bounds = array<i64: 2, 4, 241, 128>}]} {
    %c0 = arith.constant 0 : index
    %c0_0 = arith.constant 0 : index
    %0 = vector.load %arg3[%c0, %c0_0] : memref<64x128xf32, #tpu.memory_space<vmem>>, vector<64x128xf32>
    %c0_1 = arith.constant 0 : index
    %c0_2 = arith.constant 0 : index
    %c0_3 = arith.constant 0 : index
    %1 = memref.load %arg1[%c0_1, %c0_2, %c0_3] : memref<1x2x10xf32, #tpu.memory_space<smem>>
    %c0_4 = arith.constant 0 : index
    %c0_5 = arith.constant 0 : index
    %c0_6 = arith.constant 0 : index
    %2 = vector.load %arg2[%c0_4, %c0_5, %c0_6] : memref<10x64x128xf32, #tpu.memory_space<vmem>>, vector<1x64x128xf32>
    %3 = vector.shape_cast %2 : vector<1x64x128xf32> to vector<64x128xf32>
    %4 = vector.broadcast %1 : f32 to vector<64x128xf32>
    %5 = arith.mulf %4, %3 : vector<64x128xf32>
    %6 = arith.addf %0, %5 : vector<64x128xf32>
    %c0_7 = arith.constant 0 : index
    %c0_8 = arith.constant 0 : index
    %c1 = arith.constant 1 : index
    %7 = memref.load %arg1[%c0_7, %c0_8, %c1] : memref<1x2x10xf32, #tpu.memory_space<smem>>
    %c1_9 = arith.constant 1 : index
    %c0_10 = arith.constant 0 : index
    %c0_11 = arith.constant 0 : index
    %8 = vector.load %arg2[%c1_9, %c0_10, %c0_11] : memref<10x64x128xf32, #tpu.memory_space<vmem>>, vector<1x64x128xf32>
    %9 = vector.shape_cast %8 : vector<1x64x128xf32> to vector<64x128xf32>
    %10 = vector.broadcast %7 : f32 to vector<64x128xf32>
    %11 = arith.mulf %10, %9 : vector<64x128xf32>
    %12 = arith.addf %6, %11 : vector<64x128xf32>
    %c0_12 = arith.constant 0 : index
    %c0_13 = arith.constant 0 : index
    %c2 = arith.constant 2 : index
    %13 = memref.load %arg1[%c0_12, %c0_13, %c2] : memref<1x2x10xf32, #tpu.memory_space<smem>>
    %c2_14 = arith.constant 2 : index
    %c0_15 = arith.constant 0 : index
    %c0_16 = arith.constant 0 : index
    %14 = vector.load %arg2[%c2_14, %c0_15, %c0_16] : memref<10x64x128xf32, #tpu.memory_space<vmem>>, vector<1x64x128xf32>
    %15 = vector.shape_cast %14 : vector<1x64x128xf32> to vector<64x128xf32>
    %16 = vector.broadcast %13 : f32 to vector<64x128xf32>
    %17 = arith.mulf %16, %15 : vector<64x128xf32>
    %18 = arith.addf %12, %17 : vector<64x128xf32>
    %c0_17 = arith.constant 0 : index
    %c0_18 = arith.constant 0 : index
    %c3 = arith.constant 3 : index
    %19 = memref.load %arg1[%c0_17, %c0_18, %c3] : memref<1x2x10xf32, #tpu.memory_space<smem>>
    %c3_19 = arith.constant 3 : index
    %c0_20 = arith.constant 0 : index
    %c0_21 = arith.constant 0 : index
    %20 = vector.load %arg2[%c3_19, %c0_20, %c0_21] : memref<10x64x128xf32, #tpu.memory_space<vmem>>, vector<1x64x128xf32>
    %21 = vector.shape_cast %20 : vector<1x64x128xf32> to vector<64x128xf32>
    %22 = vector.broadcast %19 : f32 to vector<64x128xf32>
    %23 = arith.mulf %22, %21 : vector<64x128xf32>
    %24 = arith.addf %18, %23 : vector<64x128xf32>
    %c0_22 = arith.constant 0 : index
    %c0_23 = arith.constant 0 : index
    %c4 = arith.constant 4 : index
    %25 = memref.load %arg1[%c0_22, %c0_23, %c4] : memref<1x2x10xf32, #tpu.memory_space<smem>>
    %c4_24 = arith.constant 4 : index
    %c0_25 = arith.constant 0 : index
    %c0_26 = arith.constant 0 : index
    %26 = vector.load %arg2[%c4_24, %c0_25, %c0_26] : memref<10x64x128xf32, #tpu.memory_space<vmem>>, vector<1x64x128xf32>
    %27 = vector.shape_cast %26 : vector<1x64x128xf32> to vector<64x128xf32>
    %28 = vector.broadcast %25 : f32 to vector<64x128xf32>
    %29 = arith.mulf %28, %27 : vector<64x128xf32>
    %30 = arith.addf %24, %29 : vector<64x128xf32>
    %c0_27 = arith.constant 0 : index
    %c0_28 = arith.constant 0 : index
    %c5 = arith.constant 5 : index
    %31 = memref.load %arg1[%c0_27, %c0_28, %c5] : memref<1x2x10xf32, #tpu.memory_space<smem>>
    %c5_29 = arith.constant 5 : index
    %c0_30 = arith.constant 0 : index
    %c0_31 = arith.constant 0 : index
    %32 = vector.load %arg2[%c5_29, %c0_30, %c0_31] : memref<10x64x128xf32, #tpu.memory_space<vmem>>, vector<1x64x128xf32>
    %33 = vector.shape_cast %32 : vector<1x64x128xf32> to vector<64x128xf32>
    %34 = vector.broadcast %31 : f32 to vector<64x128xf32>
    %35 = arith.mulf %34, %33 : vector<64x128xf32>
    %36 = arith.addf %30, %35 : vector<64x128xf32>
    %c0_32 = arith.constant 0 : index
    %c0_33 = arith.constant 0 : index
    %c6 = arith.constant 6 : index
    %37 = memref.load %arg1[%c0_32, %c0_33, %c6] : memref<1x2x10xf32, #tpu.memory_space<smem>>
    %c6_34 = arith.constant 6 : index
    %c0_35 = arith.constant 0 : index
    %c0_36 = arith.constant 0 : index
    %38 = vector.load %arg2[%c6_34, %c0_35, %c0_36] : memref<10x64x128xf32, #tpu.memory_space<vmem>>, vector<1x64x128xf32>
    %39 = vector.shape_cast %38 : vector<1x64x128xf32> to vector<64x128xf32>
    %40 = vector.broadcast %37 : f32 to vector<64x128xf32>
    %41 = arith.mulf %40, %39 : vector<64x128xf32>
    %42 = arith.addf %36, %41 : vector<64x128xf32>
    %c0_37 = arith.constant 0 : index
    %c0_38 = arith.constant 0 : index
    %c7 = arith.constant 7 : index
    %43 = memref.load %arg1[%c0_37, %c0_38, %c7] : memref<1x2x10xf32, #tpu.memory_space<smem>>
    %c7_39 = arith.constant 7 : index
    %c0_40 = arith.constant 0 : index
    %c0_41 = arith.constant 0 : index
    %44 = vector.load %arg2[%c7_39, %c0_40, %c0_41] : memref<10x64x128xf32, #tpu.memory_space<vmem>>, vector<1x64x128xf32>
    %45 = vector.shape_cast %44 : vector<1x64x128xf32> to vector<64x128xf32>
    %46 = vector.broadcast %43 : f32 to vector<64x128xf32>
    %47 = arith.mulf %46, %45 : vector<64x128xf32>
    %48 = arith.addf %42, %47 : vector<64x128xf32>
    %c0_42 = arith.constant 0 : index
    %c0_43 = arith.constant 0 : index
    %c8 = arith.constant 8 : index
    %49 = memref.load %arg1[%c0_42, %c0_43, %c8] : memref<1x2x10xf32, #tpu.memory_space<smem>>
    %c8_44 = arith.constant 8 : index
    %c0_45 = arith.constant 0 : index
    %c0_46 = arith.constant 0 : index
    %50 = vector.load %arg2[%c8_44, %c0_45, %c0_46] : memref<10x64x128xf32, #tpu.memory_space<vmem>>, vector<1x64x128xf32>
    %51 = vector.shape_cast %50 : vector<1x64x128xf32> to vector<64x128xf32>
    %52 = vector.broadcast %49 : f32 to vector<64x128xf32>
    %53 = arith.mulf %52, %51 : vector<64x128xf32>
    %54 = arith.addf %48, %53 : vector<64x128xf32>
    %c0_47 = arith.constant 0 : index
    %c0_48 = arith.constant 0 : index
    %c9 = arith.constant 9 : index
    %55 = memref.load %arg1[%c0_47, %c0_48, %c9] : memref<1x2x10xf32, #tpu.memory_space<smem>>
    %c9_49 = arith.constant 9 : index
    %c0_50 = arith.constant 0 : index
    %c0_51 = arith.constant 0 : index
    %56 = vector.load %arg2[%c9_49, %c0_50, %c0_51] : memref<10x64x128xf32, #tpu.memory_space<vmem>>, vector<1x64x128xf32>
    %57 = vector.shape_cast %56 : vector<1x64x128xf32> to vector<64x128xf32>
    %58 = vector.broadcast %55 : f32 to vector<64x128xf32>
    %59 = arith.mulf %58, %57 : vector<64x128xf32>
    %60 = arith.addf %54, %59 : vector<64x128xf32>
    %cst = arith.constant 0.000000e+00 : f32
    %61 = vector.broadcast %cst : f32 to vector<64x128xf32>
    %62 = arith.maximumf %60, %61 : vector<64x128xf32>
    %c0_52 = arith.constant 0 : index
    %c0_53 = arith.constant 0 : index
    %c0_54 = arith.constant 0 : index
    %63 = vector.load %arg4[%c0_52, %c0_53, %c0_54] : memref<4x128x384xf32, #tpu.memory_space<vmem>>, vector<1x128x384xf32>
    %64 = vector.shape_cast %63 : vector<1x128x384xf32> to vector<128x384xf32>
    %cst_55 = arith.constant dense<0.000000e+00> : vector<64x384xf32>
    %65 = tpu.matmul %62, %64, %cst_55 {dimension_numbers = #tpu.dot_dimension_numbers<[1], [0], [0], [1], [0, 0, 1, 1], [], []>} : vector<64x128xf32>, vector<128x384xf32>, vector<64x384xf32> -> vector<64x384xf32>
    %66 = vector.extract_strided_slice %65 {offsets = [0, 0], sizes = [64, 128], strides = [1, 1]} : vector<64x384xf32> to vector<64x128xf32>
    %c0_56 = arith.constant 0 : index
    %c0_57 = arith.constant 0 : index
    %c0_58 = arith.constant 0 : index
    %67 = vector.load %arg8[%c0_56, %c0_57, %c0_58] : memref<4x192x128xf32, #tpu.memory_space<vmem>>, vector<1x64x128xf32>
    %68 = vector.shape_cast %67 : vector<1x64x128xf32> to vector<64x128xf32>
    %69 = vector.shape_cast %66 : vector<64x128xf32> to vector<1x64x128xf32>
    tpu.vector_store %arg8[%c0_56, %c0_57, %c0_58], %69 {strides = array<i32>} : memref<4x192x128xf32, #tpu.memory_space<vmem>>, vector<1x64x128xf32>,
    %70 = vector.extract_strided_slice %65 {offsets = [0, 128], sizes = [64, 128], strides = [1, 1]} : vector<64x384xf32> to vector<64x128xf32>
    %c0_59 = arith.constant 0 : index
    %c64 = arith.constant 64 : index
    %c0_60 = arith.constant 0 : index
    %71 = vector.load %arg8[%c0_59, %c64, %c0_60] : memref<4x192x128xf32, #tpu.memory_space<vmem>>, vector<1x64x128xf32>
    %72 = vector.shape_cast %71 : vector<1x64x128xf32> to vector<64x128xf32>
    %73 = vector.shape_cast %70 : vector<64x128xf32> to vector<1x64x128xf32>
    tpu.vector_store %arg8[%c0_59, %c64, %c0_60], %73 {strides = array<i32>} : memref<4x192x128xf32, #tpu.memory_space<vmem>>, vector<1x64x128xf32>,
    %74 = vector.extract_strided_slice %65 {offsets = [0, 256], sizes = [64, 128], strides = [1, 1]} : vector<64x384xf32> to vector<64x128xf32>
    %c0_61 = arith.constant 0 : index
    %c128 = arith.constant 128 : index
    %c0_62 = arith.constant 0 : index
    %75 = vector.load %arg8[%c0_61, %c128, %c0_62] : memref<4x192x128xf32, #tpu.memory_space<vmem>>, vector<1x64x128xf32>
    %76 = vector.shape_cast %75 : vector<1x64x128xf32> to vector<64x128xf32>
    %77 = vector.shape_cast %74 : vector<64x128xf32> to vector<1x64x128xf32>
    tpu.vector_store %arg8[%c0_61, %c128, %c0_62], %77 {strides = array<i32>} : memref<4x192x128xf32, #tpu.memory_space<vmem>>, vector<1x64x128xf32>,
    %c0_63 = arith.constant 0 : index
    %c0_64 = arith.constant 0 : index
    %c0_65 = arith.constant 0 : index
    %78 = vector.load %arg5[%c0_63, %c0_64, %c0_65] : memref<4x241x192xf32, #tpu.memory_space<vmem>>, vector<1x241x192xf32>
    %79 = vector.shape_cast %78 : vector<1x241x192xf32> to vector<241x192xf32>
    %c0_66 = arith.constant 0 : index
    %c0_67 = arith.constant 0 : index
    %c0_68 = arith.constant 0 : index
    %80 = vector.load %arg8[%c0_66, %c0_67, %c0_68] : memref<4x192x128xf32, #tpu.memory_space<vmem>>, vector<1x192x128xf32>
    %81 = vector.shape_cast %80 : vector<1x192x128xf32> to vector<192x128xf32>
    %cst_69 = arith.constant dense<0.000000e+00> : vector<241x128xf32>
    %82 = tpu.matmul %79, %81, %cst_69 {dimension_numbers = #tpu.dot_dimension_numbers<[1], [0], [0], [1], [0, 0, 1, 1], [], []>} : vector<241x192xf32>, vector<192x128xf32>, vector<241x128xf32> -> vector<241x128xf32>
    %c0_70 = arith.constant 0 : index
    %c0_71 = arith.constant 0 : index
    %c0_72 = arith.constant 0 : index
    %83 = vector.load %arg6[%c0_70, %c0_71, %c0_72] : memref<4x241x1xf32, #tpu.memory_space<vmem>>, vector<1x241x1xf32>
    %84 = vector.shape_cast %83 : vector<1x241x1xf32> to vector<241x1xf32>
    %85 = vector.broadcast %84 : vector<241x1xf32> to vector<241x128xf32>
    %86 = arith.addf %82, %85 : vector<241x128xf32>
    %cst_73 = arith.constant 5.000000e-01 : f32
    %87 = vector.broadcast %cst_73 : f32 to vector<241x128xf32>
    %88 = arith.mulf %87, %86 : vector<241x128xf32>
    %89 = math.tanh %88 : vector<241x128xf32>
    %cst_74 = arith.constant 1.000000e+00 : f32
    %90 = vector.broadcast %cst_74 : f32 to vector<241x128xf32>
    %91 = arith.addf %89, %90 : vector<241x128xf32>
    %cst_75 = arith.constant 5.000000e-01 : f32
    %92 = vector.broadcast %cst_75 : f32 to vector<241x128xf32>
    %93 = arith.mulf %92, %91 : vector<241x128xf32>
    %c0_76 = arith.constant 0 : index
    %c0_77 = arith.constant 0 : index
    %c0_78 = arith.constant 0 : index
    %c0_79 = arith.constant 0 : index
    %94 = vector.load %arg7[%c0_76, %c0_77, %c0_78, %c0_79] : memref<2x4x241x128xf32, #tpu.memory_space<vmem>>, vector<1x1x241x128xf32>
    %95 = vector.shape_cast %94 : vector<1x1x241x128xf32> to vector<241x128xf32>
    %96 = vector.shape_cast %93 : vector<241x128xf32> to vector<1x1x241x128xf32>
    tpu.vector_store %arg7[%c0_76, %c0_77, %c0_78, %c0_79], %96 {strides = array<i32>} : memref<2x4x241x128xf32, #tpu.memory_space<vmem>>, vector<1x1x241x128xf32>,
    %c1_80 = arith.constant 1 : index
    %c0_81 = arith.constant 0 : index
    %c0_82 = arith.constant 0 : index
    %97 = vector.load %arg4[%c1_80, %c0_81, %c0_82] : memref<4x128x384xf32, #tpu.memory_space<vmem>>, vector<1x128x384xf32>
    %98 = vector.shape_cast %97 : vector<1x128x384xf32> to vector<128x384xf32>
    %cst_83 = arith.constant dense<0.000000e+00> : vector<64x384xf32>
    %99 = tpu.matmul %62, %98, %cst_83 {dimension_numbers = #tpu.dot_dimension_numbers<[1], [0], [0], [1], [0, 0, 1, 1], [], []>} : vector<64x128xf32>, vector<128x384xf32>, vector<64x384xf32> -> vector<64x384xf32>
    %100 = vector.extract_strided_slice %99 {offsets = [0, 0], sizes = [64, 128], strides = [1, 1]} : vector<64x384xf32> to vector<64x128xf32>
    %c1_84 = arith.constant 1 : index
    %c0_85 = arith.constant 0 : index
    %c0_86 = arith.constant 0 : index
    %101 = vector.load %arg8[%c1_84, %c0_85, %c0_86] : memref<4x192x128xf32, #tpu.memory_space<vmem>>, vector<1x64x128xf32>
    %102 = vector.shape_cast %101 : vector<1x64x128xf32> to vector<64x128xf32>
    %103 = vector.shape_cast %100 : vector<64x128xf32> to vector<1x64x128xf32>
    tpu.vector_store %arg8[%c1_84, %c0_85, %c0_86], %103 {strides = array<i32>} : memref<4x192x128xf32, #tpu.memory_space<vmem>>, vector<1x64x128xf32>,
    %104 = vector.extract_strided_slice %99 {offsets = [0, 128], sizes = [64, 128], strides = [1, 1]} : vector<64x384xf32> to vector<64x128xf32>
    %c1_87 = arith.constant 1 : index
    %c64_88 = arith.constant 64 : index
    %c0_89 = arith.constant 0 : index
    %105 = vector.load %arg8[%c1_87, %c64_88, %c0_89] : memref<4x192x128xf32, #tpu.memory_space<vmem>>, vector<1x64x128xf32>
    %106 = vector.shape_cast %105 : vector<1x64x128xf32> to vector<64x128xf32>
    %107 = vector.shape_cast %104 : vector<64x128xf32> to vector<1x64x128xf32>
    tpu.vector_store %arg8[%c1_87, %c64_88, %c0_89], %107 {strides = array<i32>} : memref<4x192x128xf32, #tpu.memory_space<vmem>>, vector<1x64x128xf32>,
    %108 = vector.extract_strided_slice %99 {offsets = [0, 256], sizes = [64, 128], strides = [1, 1]} : vector<64x384xf32> to vector<64x128xf32>
    %c1_90 = arith.constant 1 : index
    %c128_91 = arith.constant 128 : index
    %c0_92 = arith.constant 0 : index
    %109 = vector.load %arg8[%c1_90, %c128_91, %c0_92] : memref<4x192x128xf32, #tpu.memory_space<vmem>>, vector<1x64x128xf32>
    %110 = vector.shape_cast %109 : vector<1x64x128xf32> to vector<64x128xf32>
    %111 = vector.shape_cast %108 : vector<64x128xf32> to vector<1x64x128xf32>
    tpu.vector_store %arg8[%c1_90, %c128_91, %c0_92], %111 {strides = array<i32>} : memref<4x192x128xf32, #tpu.memory_space<vmem>>, vector<1x64x128xf32>,
    %c1_93 = arith.constant 1 : index
    %c0_94 = arith.constant 0 : index
    %c0_95 = arith.constant 0 : index
    %112 = vector.load %arg5[%c1_93, %c0_94, %c0_95] : memref<4x241x192xf32, #tpu.memory_space<vmem>>, vector<1x241x192xf32>
    %113 = vector.shape_cast %112 : vector<1x241x192xf32> to vector<241x192xf32>
    %c1_96 = arith.constant 1 : index
    %c0_97 = arith.constant 0 : index
    %c0_98 = arith.constant 0 : index
    %114 = vector.load %arg8[%c1_96, %c0_97, %c0_98] : memref<4x192x128xf32, #tpu.memory_space<vmem>>, vector<1x192x128xf32>
    %115 = vector.shape_cast %114 : vector<1x192x128xf32> to vector<192x128xf32>
    %cst_99 = arith.constant dense<0.000000e+00> : vector<241x128xf32>
    %116 = tpu.matmul %113, %115, %cst_99 {dimension_numbers = #tpu.dot_dimension_numbers<[1], [0], [0], [1], [0, 0, 1, 1], [], []>} : vector<241x192xf32>, vector<192x128xf32>, vector<241x128xf32> -> vector<241x128xf32>
    %c1_100 = arith.constant 1 : index
    %c0_101 = arith.constant 0 : index
    %c0_102 = arith.constant 0 : index
    %117 = vector.load %arg6[%c1_100, %c0_101, %c0_102] : memref<4x241x1xf32, #tpu.memory_space<vmem>>, vector<1x241x1xf32>
    %118 = vector.shape_cast %117 : vector<1x241x1xf32> to vector<241x1xf32>
    %119 = vector.broadcast %118 : vector<241x1xf32> to vector<241x128xf32>
    %120 = arith.addf %116, %119 : vector<241x128xf32>
    %cst_103 = arith.constant 5.000000e-01 : f32
    %121 = vector.broadcast %cst_103 : f32 to vector<241x128xf32>
    %122 = arith.mulf %121, %120 : vector<241x128xf32>
    %123 = math.tanh %122 : vector<241x128xf32>
    %cst_104 = arith.constant 1.000000e+00 : f32
    %124 = vector.broadcast %cst_104 : f32 to vector<241x128xf32>
    %125 = arith.addf %123, %124 : vector<241x128xf32>
    %cst_105 = arith.constant 5.000000e-01 : f32
    %126 = vector.broadcast %cst_105 : f32 to vector<241x128xf32>
    %127 = arith.mulf %126, %125 : vector<241x128xf32>
    %c0_106 = arith.constant 0 : index
    %c1_107 = arith.constant 1 : index
    %c0_108 = arith.constant 0 : index
    %c0_109 = arith.constant 0 : index
    %128 = vector.load %arg7[%c0_106, %c1_107, %c0_108, %c0_109] : memref<2x4x241x128xf32, #tpu.memory_space<vmem>>, vector<1x1x241x128xf32>
    %129 = vector.shape_cast %128 : vector<1x1x241x128xf32> to vector<241x128xf32>
    %130 = vector.shape_cast %127 : vector<241x128xf32> to vector<1x1x241x128xf32>
    tpu.vector_store %arg7[%c0_106, %c1_107, %c0_108, %c0_109], %130 {strides = array<i32>} : memref<2x4x241x128xf32, #tpu.memory_space<vmem>>, vector<1x1x241x128xf32>,
    %c2_110 = arith.constant 2 : index
    %c0_111 = arith.constant 0 : index
    %c0_112 = arith.constant 0 : index
    %131 = vector.load %arg4[%c2_110, %c0_111, %c0_112] : memref<4x128x384xf32, #tpu.memory_space<vmem>>, vector<1x128x384xf32>
    %132 = vector.shape_cast %131 : vector<1x128x384xf32> to vector<128x384xf32>
    %cst_113 = arith.constant dense<0.000000e+00> : vector<64x384xf32>
    %133 = tpu.matmul %62, %132, %cst_113 {dimension_numbers = #tpu.dot_dimension_numbers<[1], [0], [0], [1], [0, 0, 1, 1], [], []>} : vector<64x128xf32>, vector<128x384xf32>, vector<64x384xf32> -> vector<64x384xf32>
    %134 = vector.extract_strided_slice %133 {offsets = [0, 0], sizes = [64, 128], strides = [1, 1]} : vector<64x384xf32> to vector<64x128xf32>
    %c2_114 = arith.constant 2 : index
    %c0_115 = arith.constant 0 : index
    %c0_116 = arith.constant 0 : index
    %135 = vector.load %arg8[%c2_114, %c0_115, %c0_116] : memref<4x192x128xf32, #tpu.memory_space<vmem>>, vector<1x64x128xf32>
    %136 = vector.shape_cast %135 : vector<1x64x128xf32> to vector<64x128xf32>
    %137 = vector.shape_cast %134 : vector<64x128xf32> to vector<1x64x128xf32>
    tpu.vector_store %arg8[%c2_114, %c0_115, %c0_116], %137 {strides = array<i32>} : memref<4x192x128xf32, #tpu.memory_space<vmem>>, vector<1x64x128xf32>,
    %138 = vector.extract_strided_slice %133 {offsets = [0, 128], sizes = [64, 128], strides = [1, 1]} : vector<64x384xf32> to vector<64x128xf32>
    %c2_117 = arith.constant 2 : index
    %c64_118 = arith.constant 64 : index
    %c0_119 = arith.constant 0 : index
    %139 = vector.load %arg8[%c2_117, %c64_118, %c0_119] : memref<4x192x128xf32, #tpu.memory_space<vmem>>, vector<1x64x128xf32>
    %140 = vector.shape_cast %139 : vector<1x64x128xf32> to vector<64x128xf32>
    %141 = vector.shape_cast %138 : vector<64x128xf32> to vector<1x64x128xf32>
    tpu.vector_store %arg8[%c2_117, %c64_118, %c0_119], %141 {strides = array<i32>} : memref<4x192x128xf32, #tpu.memory_space<vmem>>, vector<1x64x128xf32>,
    %142 = vector.extract_strided_slice %133 {offsets = [0, 256], sizes = [64, 128], strides = [1, 1]} : vector<64x384xf32> to vector<64x128xf32>
    %c2_120 = arith.constant 2 : index
    %c128_121 = arith.constant 128 : index
    %c0_122 = arith.constant 0 : index
    %143 = vector.load %arg8[%c2_120, %c128_121, %c0_122] : memref<4x192x128xf32, #tpu.memory_space<vmem>>, vector<1x64x128xf32>
    %144 = vector.shape_cast %143 : vector<1x64x128xf32> to vector<64x128xf32>
    %145 = vector.shape_cast %142 : vector<64x128xf32> to vector<1x64x128xf32>
    tpu.vector_store %arg8[%c2_120, %c128_121, %c0_122], %145 {strides = array<i32>} : memref<4x192x128xf32, #tpu.memory_space<vmem>>, vector<1x64x128xf32>,
    %c2_123 = arith.constant 2 : index
    %c0_124 = arith.constant 0 : index
    %c0_125 = arith.constant 0 : index
    %146 = vector.load %arg5[%c2_123, %c0_124, %c0_125] : memref<4x241x192xf32, #tpu.memory_space<vmem>>, vector<1x241x192xf32>
    %147 = vector.shape_cast %146 : vector<1x241x192xf32> to vector<241x192xf32>
    %c2_126 = arith.constant 2 : index
    %c0_127 = arith.constant 0 : index
    %c0_128 = arith.constant 0 : index
    %148 = vector.load %arg8[%c2_126, %c0_127, %c0_128] : memref<4x192x128xf32, #tpu.memory_space<vmem>>, vector<1x192x128xf32>
    %149 = vector.shape_cast %148 : vector<1x192x128xf32> to vector<192x128xf32>
    %cst_129 = arith.constant dense<0.000000e+00> : vector<241x128xf32>
    %150 = tpu.matmul %147, %149, %cst_129 {dimension_numbers = #tpu.dot_dimension_numbers<[1], [0], [0], [1], [0, 0, 1, 1], [], []>} : vector<241x192xf32>, vector<192x128xf32>, vector<241x128xf32> -> vector<241x128xf32>
    %c2_130 = arith.constant 2 : index
    %c0_131 = arith.constant 0 : index
    %c0_132 = arith.constant 0 : index
    %151 = vector.load %arg6[%c2_130, %c0_131, %c0_132] : memref<4x241x1xf32, #tpu.memory_space<vmem>>, vector<1x241x1xf32>
    %152 = vector.shape_cast %151 : vector<1x241x1xf32> to vector<241x1xf32>
    %153 = vector.broadcast %152 : vector<241x1xf32> to vector<241x128xf32>
    %154 = arith.addf %150, %153 : vector<241x128xf32>
    %cst_133 = arith.constant 5.000000e-01 : f32
    %155 = vector.broadcast %cst_133 : f32 to vector<241x128xf32>
    %156 = arith.mulf %155, %154 : vector<241x128xf32>
    %157 = math.tanh %156 : vector<241x128xf32>
    %cst_134 = arith.constant 1.000000e+00 : f32
    %158 = vector.broadcast %cst_134 : f32 to vector<241x128xf32>
    %159 = arith.addf %157, %158 : vector<241x128xf32>
    %cst_135 = arith.constant 5.000000e-01 : f32
    %160 = vector.broadcast %cst_135 : f32 to vector<241x128xf32>
    %161 = arith.mulf %160, %159 : vector<241x128xf32>
    %c0_136 = arith.constant 0 : index
    %c2_137 = arith.constant 2 : index
    %c0_138 = arith.constant 0 : index
    %c0_139 = arith.constant 0 : index
    %162 = vector.load %arg7[%c0_136, %c2_137, %c0_138, %c0_139] : memref<2x4x241x128xf32, #tpu.memory_space<vmem>>, vector<1x1x241x128xf32>
    %163 = vector.shape_cast %162 : vector<1x1x241x128xf32> to vector<241x128xf32>
    %164 = vector.shape_cast %161 : vector<241x128xf32> to vector<1x1x241x128xf32>
    tpu.vector_store %arg7[%c0_136, %c2_137, %c0_138, %c0_139], %164 {strides = array<i32>} : memref<2x4x241x128xf32, #tpu.memory_space<vmem>>, vector<1x1x241x128xf32>,
    %c3_140 = arith.constant 3 : index
    %c0_141 = arith.constant 0 : index
    %c0_142 = arith.constant 0 : index
    %165 = vector.load %arg4[%c3_140, %c0_141, %c0_142] : memref<4x128x384xf32, #tpu.memory_space<vmem>>, vector<1x128x384xf32>
    %166 = vector.shape_cast %165 : vector<1x128x384xf32> to vector<128x384xf32>
    %cst_143 = arith.constant dense<0.000000e+00> : vector<64x384xf32>
    %167 = tpu.matmul %62, %166, %cst_143 {dimension_numbers = #tpu.dot_dimension_numbers<[1], [0], [0], [1], [0, 0, 1, 1], [], []>} : vector<64x128xf32>, vector<128x384xf32>, vector<64x384xf32> -> vector<64x384xf32>
    %168 = vector.extract_strided_slice %167 {offsets = [0, 0], sizes = [64, 128], strides = [1, 1]} : vector<64x384xf32> to vector<64x128xf32>
    %c3_144 = arith.constant 3 : index
    %c0_145 = arith.constant 0 : index
    %c0_146 = arith.constant 0 : index
    %169 = vector.load %arg8[%c3_144, %c0_145, %c0_146] : memref<4x192x128xf32, #tpu.memory_space<vmem>>, vector<1x64x128xf32>
    %170 = vector.shape_cast %169 : vector<1x64x128xf32> to vector<64x128xf32>
    %171 = vector.shape_cast %168 : vector<64x128xf32> to vector<1x64x128xf32>
    tpu.vector_store %arg8[%c3_144, %c0_145, %c0_146], %171 {strides = array<i32>} : memref<4x192x128xf32, #tpu.memory_space<vmem>>, vector<1x64x128xf32>,
    %172 = vector.extract_strided_slice %167 {offsets = [0, 128], sizes = [64, 128], strides = [1, 1]} : vector<64x384xf32> to vector<64x128xf32>
    %c3_147 = arith.constant 3 : index
    %c64_148 = arith.constant 64 : index
    %c0_149 = arith.constant 0 : index
    %173 = vector.load %arg8[%c3_147, %c64_148, %c0_149] : memref<4x192x128xf32, #tpu.memory_space<vmem>>, vector<1x64x128xf32>
    %174 = vector.shape_cast %173 : vector<1x64x128xf32> to vector<64x128xf32>
    %175 = vector.shape_cast %172 : vector<64x128xf32> to vector<1x64x128xf32>
    tpu.vector_store %arg8[%c3_147, %c64_148, %c0_149], %175 {strides = array<i32>} : memref<4x192x128xf32, #tpu.memory_space<vmem>>, vector<1x64x128xf32>,
    %176 = vector.extract_strided_slice %167 {offsets = [0, 256], sizes = [64, 128], strides = [1, 1]} : vector<64x384xf32> to vector<64x128xf32>
    %c3_150 = arith.constant 3 : index
    %c128_151 = arith.constant 128 : index
    %c0_152 = arith.constant 0 : index
    %177 = vector.load %arg8[%c3_150, %c128_151, %c0_152] : memref<4x192x128xf32, #tpu.memory_space<vmem>>, vector<1x64x128xf32>
    %178 = vector.shape_cast %177 : vector<1x64x128xf32> to vector<64x128xf32>
    %179 = vector.shape_cast %176 : vector<64x128xf32> to vector<1x64x128xf32>
    tpu.vector_store %arg8[%c3_150, %c128_151, %c0_152], %179 {strides = array<i32>} : memref<4x192x128xf32, #tpu.memory_space<vmem>>, vector<1x64x128xf32>,
    %c3_153 = arith.constant 3 : index
    %c0_154 = arith.constant 0 : index
    %c0_155 = arith.constant 0 : index
    %180 = vector.load %arg5[%c3_153, %c0_154, %c0_155] : memref<4x241x192xf32, #tpu.memory_space<vmem>>, vector<1x241x192xf32>
    %181 = vector.shape_cast %180 : vector<1x241x192xf32> to vector<241x192xf32>
    %c3_156 = arith.constant 3 : index
    %c0_157 = arith.constant 0 : index
    %c0_158 = arith.constant 0 : index
    %182 = vector.load %arg8[%c3_156, %c0_157, %c0_158] : memref<4x192x128xf32, #tpu.memory_space<vmem>>, vector<1x192x128xf32>
    %183 = vector.shape_cast %182 : vector<1x192x128xf32> to vector<192x128xf32>
    %cst_159 = arith.constant dense<0.000000e+00> : vector<241x128xf32>
    %184 = tpu.matmul %181, %183, %cst_159 {dimension_numbers = #tpu.dot_dimension_numbers<[1], [0], [0], [1], [0, 0, 1, 1], [], []>} : vector<241x192xf32>, vector<192x128xf32>, vector<241x128xf32> -> vector<241x128xf32>
    %c3_160 = arith.constant 3 : index
    %c0_161 = arith.constant 0 : index
    %c0_162 = arith.constant 0 : index
    %185 = vector.load %arg6[%c3_160, %c0_161, %c0_162] : memref<4x241x1xf32, #tpu.memory_space<vmem>>, vector<1x241x1xf32>
    %186 = vector.shape_cast %185 : vector<1x241x1xf32> to vector<241x1xf32>
    %187 = vector.broadcast %186 : vector<241x1xf32> to vector<241x128xf32>
    %188 = arith.addf %184, %187 : vector<241x128xf32>
    %cst_163 = arith.constant 5.000000e-01 : f32
    %189 = vector.broadcast %cst_163 : f32 to vector<241x128xf32>
    %190 = arith.mulf %189, %188 : vector<241x128xf32>
    %191 = math.tanh %190 : vector<241x128xf32>
    %cst_164 = arith.constant 1.000000e+00 : f32
    %192 = vector.broadcast %cst_164 : f32 to vector<241x128xf32>
    %193 = arith.addf %191, %192 : vector<241x128xf32>
    %cst_165 = arith.constant 5.000000e-01 : f32
    %194 = vector.broadcast %cst_165 : f32 to vector<241x128xf32>
    %195 = arith.mulf %194, %193 : vector<241x128xf32>
    %c0_166 = arith.constant 0 : index
    %c3_167 = arith.constant 3 : index
    %c0_168 = arith.constant 0 : index
    %c0_169 = arith.constant 0 : index
    %196 = vector.load %arg7[%c0_166, %c3_167, %c0_168, %c0_169] : memref<2x4x241x128xf32, #tpu.memory_space<vmem>>, vector<1x1x241x128xf32>
    %197 = vector.shape_cast %196 : vector<1x1x241x128xf32> to vector<241x128xf32>
    %198 = vector.shape_cast %195 : vector<241x128xf32> to vector<1x1x241x128xf32>
    tpu.vector_store %arg7[%c0_166, %c3_167, %c0_168, %c0_169], %198 {strides = array<i32>} : memref<2x4x241x128xf32, #tpu.memory_space<vmem>>, vector<1x1x241x128xf32>,
    %c0_170 = arith.constant 0 : index
    %c0_171 = arith.constant 0 : index
    %199 = vector.load %arg3[%c0_170, %c0_171] : memref<64x128xf32, #tpu.memory_space<vmem>>, vector<64x128xf32>
    %c0_172 = arith.constant 0 : index
    %c1_173 = arith.constant 1 : index
    %c0_174 = arith.constant 0 : index
    %200 = memref.load %arg1[%c0_172, %c1_173, %c0_174] : memref<1x2x10xf32, #tpu.memory_space<smem>>
    %c0_175 = arith.constant 0 : index
    %c0_176 = arith.constant 0 : index
    %c0_177 = arith.constant 0 : index
    %201 = vector.load %arg2[%c0_175, %c0_176, %c0_177] : memref<10x64x128xf32, #tpu.memory_space<vmem>>, vector<1x64x128xf32>
    %202 = vector.shape_cast %201 : vector<1x64x128xf32> to vector<64x128xf32>
    %203 = vector.broadcast %200 : f32 to vector<64x128xf32>
    %204 = arith.mulf %203, %202 : vector<64x128xf32>
    %205 = arith.addf %199, %204 : vector<64x128xf32>
    %c0_178 = arith.constant 0 : index
    %c1_179 = arith.constant 1 : index
    %c1_180 = arith.constant 1 : index
    %206 = memref.load %arg1[%c0_178, %c1_179, %c1_180] : memref<1x2x10xf32, #tpu.memory_space<smem>>
    %c1_181 = arith.constant 1 : index
    %c0_182 = arith.constant 0 : index
    %c0_183 = arith.constant 0 : index
    %207 = vector.load %arg2[%c1_181, %c0_182, %c0_183] : memref<10x64x128xf32, #tpu.memory_space<vmem>>, vector<1x64x128xf32>
    %208 = vector.shape_cast %207 : vector<1x64x128xf32> to vector<64x128xf32>
    %209 = vector.broadcast %206 : f32 to vector<64x128xf32>
    %210 = arith.mulf %209, %208 : vector<64x128xf32>
    %211 = arith.addf %205, %210 : vector<64x128xf32>
    %c0_184 = arith.constant 0 : index
    %c1_185 = arith.constant 1 : index
    %c2_186 = arith.constant 2 : index
    %212 = memref.load %arg1[%c0_184, %c1_185, %c2_186] : memref<1x2x10xf32, #tpu.memory_space<smem>>
    %c2_187 = arith.constant 2 : index
    %c0_188 = arith.constant 0 : index
    %c0_189 = arith.constant 0 : index
    %213 = vector.load %arg2[%c2_187, %c0_188, %c0_189] : memref<10x64x128xf32, #tpu.memory_space<vmem>>, vector<1x64x128xf32>
    %214 = vector.shape_cast %213 : vector<1x64x128xf32> to vector<64x128xf32>
    %215 = vector.broadcast %212 : f32 to vector<64x128xf32>
    %216 = arith.mulf %215, %214 : vector<64x128xf32>
    %217 = arith.addf %211, %216 : vector<64x128xf32>
    %c0_190 = arith.constant 0 : index
    %c1_191 = arith.constant 1 : index
    %c3_192 = arith.constant 3 : index
    %218 = memref.load %arg1[%c0_190, %c1_191, %c3_192] : memref<1x2x10xf32, #tpu.memory_space<smem>>
    %c3_193 = arith.constant 3 : index
    %c0_194 = arith.constant 0 : index
    %c0_195 = arith.constant 0 : index
    %219 = vector.load %arg2[%c3_193, %c0_194, %c0_195] : memref<10x64x128xf32, #tpu.memory_space<vmem>>, vector<1x64x128xf32>
    %220 = vector.shape_cast %219 : vector<1x64x128xf32> to vector<64x128xf32>
    %221 = vector.broadcast %218 : f32 to vector<64x128xf32>
    %222 = arith.mulf %221, %220 : vector<64x128xf32>
    %223 = arith.addf %217, %222 : vector<64x128xf32>
    %c0_196 = arith.constant 0 : index
    %c1_197 = arith.constant 1 : index
    %c4_198 = arith.constant 4 : index
    %224 = memref.load %arg1[%c0_196, %c1_197, %c4_198] : memref<1x2x10xf32, #tpu.memory_space<smem>>
    %c4_199 = arith.constant 4 : index
    %c0_200 = arith.constant 0 : index
    %c0_201 = arith.constant 0 : index
    %225 = vector.load %arg2[%c4_199, %c0_200, %c0_201] : memref<10x64x128xf32, #tpu.memory_space<vmem>>, vector<1x64x128xf32>
    %226 = vector.shape_cast %225 : vector<1x64x128xf32> to vector<64x128xf32>
    %227 = vector.broadcast %224 : f32 to vector<64x128xf32>
    %228 = arith.mulf %227, %226 : vector<64x128xf32>
    %229 = arith.addf %223, %228 : vector<64x128xf32>
    %c0_202 = arith.constant 0 : index
    %c1_203 = arith.constant 1 : index
    %c5_204 = arith.constant 5 : index
    %230 = memref.load %arg1[%c0_202, %c1_203, %c5_204] : memref<1x2x10xf32, #tpu.memory_space<smem>>
    %c5_205 = arith.constant 5 : index
    %c0_206 = arith.constant 0 : index
    %c0_207 = arith.constant 0 : index
    %231 = vector.load %arg2[%c5_205, %c0_206, %c0_207] : memref<10x64x128xf32, #tpu.memory_space<vmem>>, vector<1x64x128xf32>
    %232 = vector.shape_cast %231 : vector<1x64x128xf32> to vector<64x128xf32>
    %233 = vector.broadcast %230 : f32 to vector<64x128xf32>
    %234 = arith.mulf %233, %232 : vector<64x128xf32>
    %235 = arith.addf %229, %234 : vector<64x128xf32>
    %c0_208 = arith.constant 0 : index
    %c1_209 = arith.constant 1 : index
    %c6_210 = arith.constant 6 : index
    %236 = memref.load %arg1[%c0_208, %c1_209, %c6_210] : memref<1x2x10xf32, #tpu.memory_space<smem>>
    %c6_211 = arith.constant 6 : index
    %c0_212 = arith.constant 0 : index
    %c0_213 = arith.constant 0 : index
    %237 = vector.load %arg2[%c6_211, %c0_212, %c0_213] : memref<10x64x128xf32, #tpu.memory_space<vmem>>, vector<1x64x128xf32>
    %238 = vector.shape_cast %237 : vector<1x64x128xf32> to vector<64x128xf32>
    %239 = vector.broadcast %236 : f32 to vector<64x128xf32>
    %240 = arith.mulf %239, %238 : vector<64x128xf32>
    %241 = arith.addf %235, %240 : vector<64x128xf32>
    %c0_214 = arith.constant 0 : index
    %c1_215 = arith.constant 1 : index
    %c7_216 = arith.constant 7 : index
    %242 = memref.load %arg1[%c0_214, %c1_215, %c7_216] : memref<1x2x10xf32, #tpu.memory_space<smem>>
    %c7_217 = arith.constant 7 : index
    %c0_218 = arith.constant 0 : index
    %c0_219 = arith.constant 0 : index
    %243 = vector.load %arg2[%c7_217, %c0_218, %c0_219] : memref<10x64x128xf32, #tpu.memory_space<vmem>>, vector<1x64x128xf32>
    %244 = vector.shape_cast %243 : vector<1x64x128xf32> to vector<64x128xf32>
    %245 = vector.broadcast %242 : f32 to vector<64x128xf32>
    %246 = arith.mulf %245, %244 : vector<64x128xf32>
    %247 = arith.addf %241, %246 : vector<64x128xf32>
    %c0_220 = arith.constant 0 : index
    %c1_221 = arith.constant 1 : index
    %c8_222 = arith.constant 8 : index
    %248 = memref.load %arg1[%c0_220, %c1_221, %c8_222] : memref<1x2x10xf32, #tpu.memory_space<smem>>
    %c8_223 = arith.constant 8 : index
    %c0_224 = arith.constant 0 : index
    %c0_225 = arith.constant 0 : index
    %249 = vector.load %arg2[%c8_223, %c0_224, %c0_225] : memref<10x64x128xf32, #tpu.memory_space<vmem>>, vector<1x64x128xf32>
    %250 = vector.shape_cast %249 : vector<1x64x128xf32> to vector<64x128xf32>
    %251 = vector.broadcast %248 : f32 to vector<64x128xf32>
    %252 = arith.mulf %251, %250 : vector<64x128xf32>
    %253 = arith.addf %247, %252 : vector<64x128xf32>
    %c0_226 = arith.constant 0 : index
    %c1_227 = arith.constant 1 : index
    %c9_228 = arith.constant 9 : index
    %254 = memref.load %arg1[%c0_226, %c1_227, %c9_228] : memref<1x2x10xf32, #tpu.memory_space<smem>>
    %c9_229 = arith.constant 9 : index
    %c0_230 = arith.constant 0 : index
    %c0_231 = arith.constant 0 : index
    %255 = vector.load %arg2[%c9_229, %c0_230, %c0_231] : memref<10x64x128xf32, #tpu.memory_space<vmem>>, vector<1x64x128xf32>
    %256 = vector.shape_cast %255 : vector<1x64x128xf32> to vector<64x128xf32>
    %257 = vector.broadcast %254 : f32 to vector<64x128xf32>
    %258 = arith.mulf %257, %256 : vector<64x128xf32>
    %259 = arith.addf %253, %258 : vector<64x128xf32>
    %cst_232 = arith.constant 0.000000e+00 : f32
    %260 = vector.broadcast %cst_232 : f32 to vector<64x128xf32>
    %261 = arith.maximumf %259, %260 : vector<64x128xf32>
    %c0_233 = arith.constant 0 : index
    %c0_234 = arith.constant 0 : index
    %c0_235 = arith.constant 0 : index
    %262 = vector.load %arg4[%c0_233, %c0_234, %c0_235] : memref<4x128x384xf32, #tpu.memory_space<vmem>>, vector<1x128x384xf32>
    %263 = vector.shape_cast %262 : vector<1x128x384xf32> to vector<128x384xf32>
    %cst_236 = arith.constant dense<0.000000e+00> : vector<64x384xf32>
    %264 = tpu.matmul %261, %263, %cst_236 {dimension_numbers = #tpu.dot_dimension_numbers<[1], [0], [0], [1], [0, 0, 1, 1], [], []>} : vector<64x128xf32>, vector<128x384xf32>, vector<64x384xf32> -> vector<64x384xf32>
    %265 = vector.extract_strided_slice %264 {offsets = [0, 0], sizes = [64, 128], strides = [1, 1]} : vector<64x384xf32> to vector<64x128xf32>
    %c0_237 = arith.constant 0 : index
    %c0_238 = arith.constant 0 : index
    %c0_239 = arith.constant 0 : index
    %266 = vector.load %arg8[%c0_237, %c0_238, %c0_239] : memref<4x192x128xf32, #tpu.memory_space<vmem>>, vector<1x64x128xf32>
    %267 = vector.shape_cast %266 : vector<1x64x128xf32> to vector<64x128xf32>
    %268 = vector.shape_cast %265 : vector<64x128xf32> to vector<1x64x128xf32>
    tpu.vector_store %arg8[%c0_237, %c0_238, %c0_239], %268 {strides = array<i32>} : memref<4x192x128xf32, #tpu.memory_space<vmem>>, vector<1x64x128xf32>,
    %269 = vector.extract_strided_slice %264 {offsets = [0, 128], sizes = [64, 128], strides = [1, 1]} : vector<64x384xf32> to vector<64x128xf32>
    %c0_240 = arith.constant 0 : index
    %c64_241 = arith.constant 64 : index
    %c0_242 = arith.constant 0 : index
    %270 = vector.load %arg8[%c0_240, %c64_241, %c0_242] : memref<4x192x128xf32, #tpu.memory_space<vmem>>, vector<1x64x128xf32>
    %271 = vector.shape_cast %270 : vector<1x64x128xf32> to vector<64x128xf32>
    %272 = vector.shape_cast %269 : vector<64x128xf32> to vector<1x64x128xf32>
    tpu.vector_store %arg8[%c0_240, %c64_241, %c0_242], %272 {strides = array<i32>} : memref<4x192x128xf32, #tpu.memory_space<vmem>>, vector<1x64x128xf32>,
    %273 = vector.extract_strided_slice %264 {offsets = [0, 256], sizes = [64, 128], strides = [1, 1]} : vector<64x384xf32> to vector<64x128xf32>
    %c0_243 = arith.constant 0 : index
    %c128_244 = arith.constant 128 : index
    %c0_245 = arith.constant 0 : index
    %274 = vector.load %arg8[%c0_243, %c128_244, %c0_245] : memref<4x192x128xf32, #tpu.memory_space<vmem>>, vector<1x64x128xf32>
    %275 = vector.shape_cast %274 : vector<1x64x128xf32> to vector<64x128xf32>
    %276 = vector.shape_cast %273 : vector<64x128xf32> to vector<1x64x128xf32>
    tpu.vector_store %arg8[%c0_243, %c128_244, %c0_245], %276 {strides = array<i32>} : memref<4x192x128xf32, #tpu.memory_space<vmem>>, vector<1x64x128xf32>,
    %c0_246 = arith.constant 0 : index
    %c0_247 = arith.constant 0 : index
    %c0_248 = arith.constant 0 : index
    %277 = vector.load %arg5[%c0_246, %c0_247, %c0_248] : memref<4x241x192xf32, #tpu.memory_space<vmem>>, vector<1x241x192xf32>
    %278 = vector.shape_cast %277 : vector<1x241x192xf32> to vector<241x192xf32>
    %c0_249 = arith.constant 0 : index
    %c0_250 = arith.constant 0 : index
    %c0_251 = arith.constant 0 : index
    %279 = vector.load %arg8[%c0_249, %c0_250, %c0_251] : memref<4x192x128xf32, #tpu.memory_space<vmem>>, vector<1x192x128xf32>
    %280 = vector.shape_cast %279 : vector<1x192x128xf32> to vector<192x128xf32>
    %cst_252 = arith.constant dense<0.000000e+00> : vector<241x128xf32>
    %281 = tpu.matmul %278, %280, %cst_252 {dimension_numbers = #tpu.dot_dimension_numbers<[1], [0], [0], [1], [0, 0, 1, 1], [], []>} : vector<241x192xf32>, vector<192x128xf32>, vector<241x128xf32> -> vector<241x128xf32>
    %c0_253 = arith.constant 0 : index
    %c0_254 = arith.constant 0 : index
    %c0_255 = arith.constant 0 : index
    %282 = vector.load %arg6[%c0_253, %c0_254, %c0_255] : memref<4x241x1xf32, #tpu.memory_space<vmem>>, vector<1x241x1xf32>
    %283 = vector.shape_cast %282 : vector<1x241x1xf32> to vector<241x1xf32>
    %284 = vector.broadcast %283 : vector<241x1xf32> to vector<241x128xf32>
    %285 = arith.addf %281, %284 : vector<241x128xf32>
    %cst_256 = arith.constant 5.000000e-01 : f32
    %286 = vector.broadcast %cst_256 : f32 to vector<241x128xf32>
    %287 = arith.mulf %286, %285 : vector<241x128xf32>
    %288 = math.tanh %287 : vector<241x128xf32>
    %cst_257 = arith.constant 1.000000e+00 : f32
    %289 = vector.broadcast %cst_257 : f32 to vector<241x128xf32>
    %290 = arith.addf %288, %289 : vector<241x128xf32>
    %cst_258 = arith.constant 5.000000e-01 : f32
    %291 = vector.broadcast %cst_258 : f32 to vector<241x128xf32>
    %292 = arith.mulf %291, %290 : vector<241x128xf32>
    %c1_259 = arith.constant 1 : index
    %c0_260 = arith.constant 0 : index
    %c0_261 = arith.constant 0 : index
    %c0_262 = arith.constant 0 : index
    %293 = vector.load %arg7[%c1_259, %c0_260, %c0_261, %c0_262] : memref<2x4x241x128xf32, #tpu.memory_space<vmem>>, vector<1x1x241x128xf32>
    %294 = vector.shape_cast %293 : vector<1x1x241x128xf32> to vector<241x128xf32>
    %295 = vector.shape_cast %292 : vector<241x128xf32> to vector<1x1x241x128xf32>
    tpu.vector_store %arg7[%c1_259, %c0_260, %c0_261, %c0_262], %295 {strides = array<i32>} : memref<2x4x241x128xf32, #tpu.memory_space<vmem>>, vector<1x1x241x128xf32>,
    %c1_263 = arith.constant 1 : index
    %c0_264 = arith.constant 0 : index
    %c0_265 = arith.constant 0 : index
    %296 = vector.load %arg4[%c1_263, %c0_264, %c0_265] : memref<4x128x384xf32, #tpu.memory_space<vmem>>, vector<1x128x384xf32>
    %297 = vector.shape_cast %296 : vector<1x128x384xf32> to vector<128x384xf32>
    %cst_266 = arith.constant dense<0.000000e+00> : vector<64x384xf32>
    %298 = tpu.matmul %261, %297, %cst_266 {dimension_numbers = #tpu.dot_dimension_numbers<[1], [0], [0], [1], [0, 0, 1, 1], [], []>} : vector<64x128xf32>, vector<128x384xf32>, vector<64x384xf32> -> vector<64x384xf32>
    %299 = vector.extract_strided_slice %298 {offsets = [0, 0], sizes = [64, 128], strides = [1, 1]} : vector<64x384xf32> to vector<64x128xf32>
    %c1_267 = arith.constant 1 : index
    %c0_268 = arith.constant 0 : index
    %c0_269 = arith.constant 0 : index
    %300 = vector.load %arg8[%c1_267, %c0_268, %c0_269] : memref<4x192x128xf32, #tpu.memory_space<vmem>>, vector<1x64x128xf32>
    %301 = vector.shape_cast %300 : vector<1x64x128xf32> to vector<64x128xf32>
    %302 = vector.shape_cast %299 : vector<64x128xf32> to vector<1x64x128xf32>
    tpu.vector_store %arg8[%c1_267, %c0_268, %c0_269], %302 {strides = array<i32>} : memref<4x192x128xf32, #tpu.memory_space<vmem>>, vector<1x64x128xf32>,
    %303 = vector.extract_strided_slice %298 {offsets = [0, 128], sizes = [64, 128], strides = [1, 1]} : vector<64x384xf32> to vector<64x128xf32>
    %c1_270 = arith.constant 1 : index
    %c64_271 = arith.constant 64 : index
    %c0_272 = arith.constant 0 : index
    %304 = vector.load %arg8[%c1_270, %c64_271, %c0_272] : memref<4x192x128xf32, #tpu.memory_space<vmem>>, vector<1x64x128xf32>
    %305 = vector.shape_cast %304 : vector<1x64x128xf32> to vector<64x128xf32>
    %306 = vector.shape_cast %303 : vector<64x128xf32> to vector<1x64x128xf32>
    tpu.vector_store %arg8[%c1_270, %c64_271, %c0_272], %306 {strides = array<i32>} : memref<4x192x128xf32, #tpu.memory_space<vmem>>, vector<1x64x128xf32>,
    %307 = vector.extract_strided_slice %298 {offsets = [0, 256], sizes = [64, 128], strides = [1, 1]} : vector<64x384xf32> to vector<64x128xf32>
    %c1_273 = arith.constant 1 : index
    %c128_274 = arith.constant 128 : index
    %c0_275 = arith.constant 0 : index
    %308 = vector.load %arg8[%c1_273, %c128_274, %c0_275] : memref<4x192x128xf32, #tpu.memory_space<vmem>>, vector<1x64x128xf32>
    %309 = vector.shape_cast %308 : vector<1x64x128xf32> to vector<64x128xf32>
    %310 = vector.shape_cast %307 : vector<64x128xf32> to vector<1x64x128xf32>
    tpu.vector_store %arg8[%c1_273, %c128_274, %c0_275], %310 {strides = array<i32>} : memref<4x192x128xf32, #tpu.memory_space<vmem>>, vector<1x64x128xf32>,
    %c1_276 = arith.constant 1 : index
    %c0_277 = arith.constant 0 : index
    %c0_278 = arith.constant 0 : index
    %311 = vector.load %arg5[%c1_276, %c0_277, %c0_278] : memref<4x241x192xf32, #tpu.memory_space<vmem>>, vector<1x241x192xf32>
    %312 = vector.shape_cast %311 : vector<1x241x192xf32> to vector<241x192xf32>
    %c1_279 = arith.constant 1 : index
    %c0_280 = arith.constant 0 : index
    %c0_281 = arith.constant 0 : index
    %313 = vector.load %arg8[%c1_279, %c0_280, %c0_281] : memref<4x192x128xf32, #tpu.memory_space<vmem>>, vector<1x192x128xf32>
    %314 = vector.shape_cast %313 : vector<1x192x128xf32> to vector<192x128xf32>
    %cst_282 = arith.constant dense<0.000000e+00> : vector<241x128xf32>
    %315 = tpu.matmul %312, %314, %cst_282 {dimension_numbers = #tpu.dot_dimension_numbers<[1], [0], [0], [1], [0, 0, 1, 1], [], []>} : vector<241x192xf32>, vector<192x128xf32>, vector<241x128xf32> -> vector<241x128xf32>
    %c1_283 = arith.constant 1 : index
    %c0_284 = arith.constant 0 : index
    %c0_285 = arith.constant 0 : index
    %316 = vector.load %arg6[%c1_283, %c0_284, %c0_285] : memref<4x241x1xf32, #tpu.memory_space<vmem>>, vector<1x241x1xf32>
    %317 = vector.shape_cast %316 : vector<1x241x1xf32> to vector<241x1xf32>
    %318 = vector.broadcast %317 : vector<241x1xf32> to vector<241x128xf32>
    %319 = arith.addf %315, %318 : vector<241x128xf32>
    %cst_286 = arith.constant 5.000000e-01 : f32
    %320 = vector.broadcast %cst_286 : f32 to vector<241x128xf32>
    %321 = arith.mulf %320, %319 : vector<241x128xf32>
    %322 = math.tanh %321 : vector<241x128xf32>
    %cst_287 = arith.constant 1.000000e+00 : f32
    %323 = vector.broadcast %cst_287 : f32 to vector<241x128xf32>
    %324 = arith.addf %322, %323 : vector<241x128xf32>
    %cst_288 = arith.constant 5.000000e-01 : f32
    %325 = vector.broadcast %cst_288 : f32 to vector<241x128xf32>
    %326 = arith.mulf %325, %324 : vector<241x128xf32>
    %c1_289 = arith.constant 1 : index
    %c1_290 = arith.constant 1 : index
    %c0_291 = arith.constant 0 : index
    %c0_292 = arith.constant 0 : index
    %327 = vector.load %arg7[%c1_289, %c1_290, %c0_291, %c0_292] : memref<2x4x241x128xf32, #tpu.memory_space<vmem>>, vector<1x1x241x128xf32>
    %328 = vector.shape_cast %327 : vector<1x1x241x128xf32> to vector<241x128xf32>
    %329 = vector.shape_cast %326 : vector<241x128xf32> to vector<1x1x241x128xf32>
    tpu.vector_store %arg7[%c1_289, %c1_290, %c0_291, %c0_292], %329 {strides = array<i32>} : memref<2x4x241x128xf32, #tpu.memory_space<vmem>>, vector<1x1x241x128xf32>,
    %c2_293 = arith.constant 2 : index
    %c0_294 = arith.constant 0 : index
    %c0_295 = arith.constant 0 : index
    %330 = vector.load %arg4[%c2_293, %c0_294, %c0_295] : memref<4x128x384xf32, #tpu.memory_space<vmem>>, vector<1x128x384xf32>
    %331 = vector.shape_cast %330 : vector<1x128x384xf32> to vector<128x384xf32>
    %cst_296 = arith.constant dense<0.000000e+00> : vector<64x384xf32>
    %332 = tpu.matmul %261, %331, %cst_296 {dimension_numbers = #tpu.dot_dimension_numbers<[1], [0], [0], [1], [0, 0, 1, 1], [], []>} : vector<64x128xf32>, vector<128x384xf32>, vector<64x384xf32> -> vector<64x384xf32>
    %333 = vector.extract_strided_slice %332 {offsets = [0, 0], sizes = [64, 128], strides = [1, 1]} : vector<64x384xf32> to vector<64x128xf32>
    %c2_297 = arith.constant 2 : index
    %c0_298 = arith.constant 0 : index
    %c0_299 = arith.constant 0 : index
    %334 = vector.load %arg8[%c2_297, %c0_298, %c0_299] : memref<4x192x128xf32, #tpu.memory_space<vmem>>, vector<1x64x128xf32>
    %335 = vector.shape_cast %334 : vector<1x64x128xf32> to vector<64x128xf32>
    %336 = vector.shape_cast %333 : vector<64x128xf32> to vector<1x64x128xf32>
    tpu.vector_store %arg8[%c2_297, %c0_298, %c0_299], %336 {strides = array<i32>} : memref<4x192x128xf32, #tpu.memory_space<vmem>>, vector<1x64x128xf32>,
    %337 = vector.extract_strided_slice %332 {offsets = [0, 128], sizes = [64, 128], strides = [1, 1]} : vector<64x384xf32> to vector<64x128xf32>
    %c2_300 = arith.constant 2 : index
    %c64_301 = arith.constant 64 : index
    %c0_302 = arith.constant 0 : index
    %338 = vector.load %arg8[%c2_300, %c64_301, %c0_302] : memref<4x192x128xf32, #tpu.memory_space<vmem>>, vector<1x64x128xf32>
    %339 = vector.shape_cast %338 : vector<1x64x128xf32> to vector<64x128xf32>
    %340 = vector.shape_cast %337 : vector<64x128xf32> to vector<1x64x128xf32>
    tpu.vector_store %arg8[%c2_300, %c64_301, %c0_302], %340 {strides = array<i32>} : memref<4x192x128xf32, #tpu.memory_space<vmem>>, vector<1x64x128xf32>,
    %341 = vector.extract_strided_slice %332 {offsets = [0, 256], sizes = [64, 128], strides = [1, 1]} : vector<64x384xf32> to vector<64x128xf32>
    %c2_303 = arith.constant 2 : index
    %c128_304 = arith.constant 128 : index
    %c0_305 = arith.constant 0 : index
    %342 = vector.load %arg8[%c2_303, %c128_304, %c0_305] : memref<4x192x128xf32, #tpu.memory_space<vmem>>, vector<1x64x128xf32>
    %343 = vector.shape_cast %342 : vector<1x64x128xf32> to vector<64x128xf32>
    %344 = vector.shape_cast %341 : vector<64x128xf32> to vector<1x64x128xf32>
    tpu.vector_store %arg8[%c2_303, %c128_304, %c0_305], %344 {strides = array<i32>} : memref<4x192x128xf32, #tpu.memory_space<vmem>>, vector<1x64x128xf32>,
    %c2_306 = arith.constant 2 : index
    %c0_307 = arith.constant 0 : index
    %c0_308 = arith.constant 0 : index
    %345 = vector.load %arg5[%c2_306, %c0_307, %c0_308] : memref<4x241x192xf32, #tpu.memory_space<vmem>>, vector<1x241x192xf32>
    %346 = vector.shape_cast %345 : vector<1x241x192xf32> to vector<241x192xf32>
    %c2_309 = arith.constant 2 : index
    %c0_310 = arith.constant 0 : index
    %c0_311 = arith.constant 0 : index
    %347 = vector.load %arg8[%c2_309, %c0_310, %c0_311] : memref<4x192x128xf32, #tpu.memory_space<vmem>>, vector<1x192x128xf32>
    %348 = vector.shape_cast %347 : vector<1x192x128xf32> to vector<192x128xf32>
    %cst_312 = arith.constant dense<0.000000e+00> : vector<241x128xf32>
    %349 = tpu.matmul %346, %348, %cst_312 {dimension_numbers = #tpu.dot_dimension_numbers<[1], [0], [0], [1], [0, 0, 1, 1], [], []>} : vector<241x192xf32>, vector<192x128xf32>, vector<241x128xf32> -> vector<241x128xf32>
    %c2_313 = arith.constant 2 : index
    %c0_314 = arith.constant 0 : index
    %c0_315 = arith.constant 0 : index
    %350 = vector.load %arg6[%c2_313, %c0_314, %c0_315] : memref<4x241x1xf32, #tpu.memory_space<vmem>>, vector<1x241x1xf32>
    %351 = vector.shape_cast %350 : vector<1x241x1xf32> to vector<241x1xf32>
    %352 = vector.broadcast %351 : vector<241x1xf32> to vector<241x128xf32>
    %353 = arith.addf %349, %352 : vector<241x128xf32>
    %cst_316 = arith.constant 5.000000e-01 : f32
    %354 = vector.broadcast %cst_316 : f32 to vector<241x128xf32>
    %355 = arith.mulf %354, %353 : vector<241x128xf32>
    %356 = math.tanh %355 : vector<241x128xf32>
    %cst_317 = arith.constant 1.000000e+00 : f32
    %357 = vector.broadcast %cst_317 : f32 to vector<241x128xf32>
    %358 = arith.addf %356, %357 : vector<241x128xf32>
    %cst_318 = arith.constant 5.000000e-01 : f32
    %359 = vector.broadcast %cst_318 : f32 to vector<241x128xf32>
    %360 = arith.mulf %359, %358 : vector<241x128xf32>
    %c1_319 = arith.constant 1 : index
    %c2_320 = arith.constant 2 : index
    %c0_321 = arith.constant 0 : index
    %c0_322 = arith.constant 0 : index
    %361 = vector.load %arg7[%c1_319, %c2_320, %c0_321, %c0_322] : memref<2x4x241x128xf32, #tpu.memory_space<vmem>>, vector<1x1x241x128xf32>
    %362 = vector.shape_cast %361 : vector<1x1x241x128xf32> to vector<241x128xf32>
    %363 = vector.shape_cast %360 : vector<241x128xf32> to vector<1x1x241x128xf32>
    tpu.vector_store %arg7[%c1_319, %c2_320, %c0_321, %c0_322], %363 {strides = array<i32>} : memref<2x4x241x128xf32, #tpu.memory_space<vmem>>, vector<1x1x241x128xf32>,
    %c3_323 = arith.constant 3 : index
    %c0_324 = arith.constant 0 : index
    %c0_325 = arith.constant 0 : index
    %364 = vector.load %arg4[%c3_323, %c0_324, %c0_325] : memref<4x128x384xf32, #tpu.memory_space<vmem>>, vector<1x128x384xf32>
    %365 = vector.shape_cast %364 : vector<1x128x384xf32> to vector<128x384xf32>
    %cst_326 = arith.constant dense<0.000000e+00> : vector<64x384xf32>
    %366 = tpu.matmul %261, %365, %cst_326 {dimension_numbers = #tpu.dot_dimension_numbers<[1], [0], [0], [1], [0, 0, 1, 1], [], []>} : vector<64x128xf32>, vector<128x384xf32>, vector<64x384xf32> -> vector<64x384xf32>
    %367 = vector.extract_strided_slice %366 {offsets = [0, 0], sizes = [64, 128], strides = [1, 1]} : vector<64x384xf32> to vector<64x128xf32>
    %c3_327 = arith.constant 3 : index
    %c0_328 = arith.constant 0 : index
    %c0_329 = arith.constant 0 : index
    %368 = vector.load %arg8[%c3_327, %c0_328, %c0_329] : memref<4x192x128xf32, #tpu.memory_space<vmem>>, vector<1x64x128xf32>
    %369 = vector.shape_cast %368 : vector<1x64x128xf32> to vector<64x128xf32>
    %370 = vector.shape_cast %367 : vector<64x128xf32> to vector<1x64x128xf32>
    tpu.vector_store %arg8[%c3_327, %c0_328, %c0_329], %370 {strides = array<i32>} : memref<4x192x128xf32, #tpu.memory_space<vmem>>, vector<1x64x128xf32>,
    %371 = vector.extract_strided_slice %366 {offsets = [0, 128], sizes = [64, 128], strides = [1, 1]} : vector<64x384xf32> to vector<64x128xf32>
    %c3_330 = arith.constant 3 : index
    %c64_331 = arith.constant 64 : index
    %c0_332 = arith.constant 0 : index
    %372 = vector.load %arg8[%c3_330, %c64_331, %c0_332] : memref<4x192x128xf32, #tpu.memory_space<vmem>>, vector<1x64x128xf32>
    %373 = vector.shape_cast %372 : vector<1x64x128xf32> to vector<64x128xf32>
    %374 = vector.shape_cast %371 : vector<64x128xf32> to vector<1x64x128xf32>
    tpu.vector_store %arg8[%c3_330, %c64_331, %c0_332], %374 {strides = array<i32>} : memref<4x192x128xf32, #tpu.memory_space<vmem>>, vector<1x64x128xf32>,
    %375 = vector.extract_strided_slice %366 {offsets = [0, 256], sizes = [64, 128], strides = [1, 1]} : vector<64x384xf32> to vector<64x128xf32>
    %c3_333 = arith.constant 3 : index
    %c128_334 = arith.constant 128 : index
    %c0_335 = arith.constant 0 : index
    %376 = vector.load %arg8[%c3_333, %c128_334, %c0_335] : memref<4x192x128xf32, #tpu.memory_space<vmem>>, vector<1x64x128xf32>
    %377 = vector.shape_cast %376 : vector<1x64x128xf32> to vector<64x128xf32>
    %378 = vector.shape_cast %375 : vector<64x128xf32> to vector<1x64x128xf32>
    tpu.vector_store %arg8[%c3_333, %c128_334, %c0_335], %378 {strides = array<i32>} : memref<4x192x128xf32, #tpu.memory_space<vmem>>, vector<1x64x128xf32>,
    %c3_336 = arith.constant 3 : index
    %c0_337 = arith.constant 0 : index
    %c0_338 = arith.constant 0 : index
    %379 = vector.load %arg5[%c3_336, %c0_337, %c0_338] : memref<4x241x192xf32, #tpu.memory_space<vmem>>, vector<1x241x192xf32>
    %380 = vector.shape_cast %379 : vector<1x241x192xf32> to vector<241x192xf32>
    %c3_339 = arith.constant 3 : index
    %c0_340 = arith.constant 0 : index
    %c0_341 = arith.constant 0 : index
    %381 = vector.load %arg8[%c3_339, %c0_340, %c0_341] : memref<4x192x128xf32, #tpu.memory_space<vmem>>, vector<1x192x128xf32>
    %382 = vector.shape_cast %381 : vector<1x192x128xf32> to vector<192x128xf32>
    %cst_342 = arith.constant dense<0.000000e+00> : vector<241x128xf32>
    %383 = tpu.matmul %380, %382, %cst_342 {dimension_numbers = #tpu.dot_dimension_numbers<[1], [0], [0], [1], [0, 0, 1, 1], [], []>} : vector<241x192xf32>, vector<192x128xf32>, vector<241x128xf32> -> vector<241x128xf32>
    %c3_343 = arith.constant 3 : index
    %c0_344 = arith.constant 0 : index
    %c0_345 = arith.constant 0 : index
    %384 = vector.load %arg6[%c3_343, %c0_344, %c0_345] : memref<4x241x1xf32, #tpu.memory_space<vmem>>, vector<1x241x1xf32>
    %385 = vector.shape_cast %384 : vector<1x241x1xf32> to vector<241x1xf32>
    %386 = vector.broadcast %385 : vector<241x1xf32> to vector<241x128xf32>
    %387 = arith.addf %383, %386 : vector<241x128xf32>
    %cst_346 = arith.constant 5.000000e-01 : f32
    %388 = vector.broadcast %cst_346 : f32 to vector<241x128xf32>
    %389 = arith.mulf %388, %387 : vector<241x128xf32>
    %390 = math.tanh %389 : vector<241x128xf32>
    %cst_347 = arith.constant 1.000000e+00 : f32
    %391 = vector.broadcast %cst_347 : f32 to vector<241x128xf32>
    %392 = arith.addf %390, %391 : vector<241x128xf32>
    %cst_348 = arith.constant 5.000000e-01 : f32
    %393 = vector.broadcast %cst_348 : f32 to vector<241x128xf32>
    %394 = arith.mulf %393, %392 : vector<241x128xf32>
    %c1_349 = arith.constant 1 : index
    %c3_350 = arith.constant 3 : index
    %c0_351 = arith.constant 0 : index
    %c0_352 = arith.constant 0 : index
    %395 = vector.load %arg7[%c1_349, %c3_350, %c0_351, %c0_352] : memref<2x4x241x128xf32, #tpu.memory_space<vmem>>, vector<1x1x241x128xf32>
    %396 = vector.shape_cast %395 : vector<1x1x241x128xf32> to vector<241x128xf32>
    %397 = vector.shape_cast %394 : vector<241x128xf32> to vector<1x1x241x128xf32>
    tpu.vector_store %arg7[%c1_349, %c3_350, %c0_351, %c0_352], %397 {strides = array<i32>} : memref<2x4x241x128xf32, #tpu.memory_space<vmem>>, vector<1x1x241x128xf32>,
    return
  }
  func.func @transform_0(%arg0: i32) -> (i32, i32, i32) {
    %c0_i32 = arith.constant 0 : i32
    %c0_i32_0 = arith.constant 0 : i32
    %c0_i32_1 = arith.constant 0 : i32
    return %arg0, %c0_i32, %c0_i32_0 : i32, i32, i32
  }
  func.func @transform_1(%arg0: i32) -> (i32, i32, i32) {
    %c0_i32 = arith.constant 0 : i32
    %c0_i32_0 = arith.constant 0 : i32
    %c0_i32_1 = arith.constant 0 : i32
    %c0_i32_2 = arith.constant 0 : i32
    return %c0_i32, %c0_i32_0, %c0_i32_1 : i32, i32, i32
  }
  func.func @transform_2(%arg0: i32) -> (i32, i32) {
    %c0_i32 = arith.constant 0 : i32
    %c0_i32_0 = arith.constant 0 : i32
    %c0_i32_1 = arith.constant 0 : i32
    return %c0_i32, %c0_i32_0 : i32, i32
  }
  func.func @transform_3(%arg0: i32) -> (i32, i32, i32) {
    %c0_i32 = arith.constant 0 : i32
    %c0_i32_0 = arith.constant 0 : i32
    %c0_i32_1 = arith.constant 0 : i32
    %c0_i32_2 = arith.constant 0 : i32
    return %c0_i32, %c0_i32_0, %c0_i32_1 : i32, i32, i32
  }
  func.func @transform_4(%arg0: i32) -> (i32, i32, i32) {
    %c0_i32 = arith.constant 0 : i32
    %c0_i32_0 = arith.constant 0 : i32
    %c0_i32_1 = arith.constant 0 : i32
    %c0_i32_2 = arith.constant 0 : i32
    return %c0_i32, %c0_i32_0, %c0_i32_1 : i32, i32, i32
  }
  func.func @transform_5(%arg0: i32) -> (i32, i32, i32) {
    %c0_i32 = arith.constant 0 : i32
    %c0_i32_0 = arith.constant 0 : i32
    %c0_i32_1 = arith.constant 0 : i32
    %c0_i32_2 = arith.constant 0 : i32
    return %c0_i32, %c0_i32_0, %c0_i32_1 : i32, i32, i32
  }
  func.func @transform_6(%arg0: i32) -> (i32, i32, i32, i32) {
    %c0_i32 = arith.constant 0 : i32
    %c0_i32_0 = arith.constant 0 : i32
    %c0_i32_1 = arith.constant 0 : i32
    %c0_i32_2 = arith.constant 0 : i32
    return %arg0, %c0_i32, %c0_i32_0, %c0_i32_1 : i32, i32, i32, i32
  }
}

</mosaic_0001>

<bundles_post_ra>
// kernel: forward.1
= control target key start
LH: loop header
LB: loop body
LE: loop exit
PB: predicated region body
PF: predicated region fallthrough
CT: control target
= control target key end

     0   :  { %11 = vsyncpa [#allocation5], 0  ;;  %s12389_s0 = inlined_call_operand.hbm [shape: f32[2,2,10], index: 0, kind: input, shape index: {}]   ;;  %s12390_s1 = inlined_call_operand.hbm [shape: f32[10,64,128], index: 1, kind: input, shape index: {}]   ;;  %s12391_s2 = inlined_call_operand.hbm [shape: f32[64,128], index: 2, kind: input, shape index: {}]   ;;  %s12392_s3 = inlined_call_operand.hbm [shape: f32[4,128,384], index: 3, kind: input, shape index: {}]   ;;  %s12393_s4 = inlined_call_operand.hbm [shape: f32[4,241,192], index: 4, kind: input, shape index: {}]   ;;  %s12394_s5 = inlined_call_operand.hbm [shape: f32[4,241,1], index: 5, kind: input, shape index: {}]   ;;  %s12395_s6 = inlined_call_operand.vmem [shape: f32[4,4,241,128], index: 6, kind: output, shape index: {}]  }
   0x1   :  { %13 = vsyncpa [#allocation5 + $0x1], 0 }
   0x2   :  { %14 = vsyncpa [#allocation4], 0 }
   0x3   :  { %15 = vsyncpa [#allocation8], 0 }
   0x4   :  { %16 = vsyncpa [#allocation11], 0  ;;  %s9935_s21 = smov 0   ;;  %s9937_s22 = smov 0  }
   0x5   :  { %s9939_s23 = smov 0   ;;  %s9941_s24 = smov 0  }
   0x6 LB: > { %s8536_s25 = sadd.s32 4294967295, %s9867_s24   ;;  %p8538_p0 = scmp.ge.s32.totalorder %s9867_s24, 1  ;;  %s9867_s24 = sphi %s9941_s24, %s12452_s24   ;;  %s9863_s23 = sphi %s9939_s23, %s12451_s23   ;;  %s9859_s22 = sphi %s9937_s22, %s12450_s22   ;;  %s9855_s21 = sphi %s9935_s21, %s12449_s21  }
   0x7   : > { %p9959_p1 = scmp.eq.s32.totalorder %s8536_s25, 0  ;;  %p184_p2 = scmp.lt.s32.totalorder %s9867_s24, 3 }
   0x8   : > { %s209_s29 = sshll.u32 %s12391_s2, 4  ;;  %s9869_s7 = smov [#allocation7]   ;;  %s210_s29 = int_to_ptr.hbm [resolvable:$true] %s209_s29 }
   0x9   : > { %p9967_p3 = pnand %p8538_p0, %p184_p2  ;;  %s211_s8 = sshll.u32 %s9869_s7, 4  ;;  %s212_s8 = int_to_ptr.vmem [resolvable:$true] %s211_s8 }
   0xa   : > { %s237_s11 = sshll.u32 %s12393_s4, 4  ;;  %s9870_s13 = smov [#allocation10]   ;;  %s238_s11 = int_to_ptr.hbm [resolvable:$true] %s237_s11 }
   0xb   : > { %p9063_p4 = pneg %p9967_p3  ;;  %s239_s14 = sshll.u32 %s9870_s13, 4  ;;  %s240_s14 = int_to_ptr.vmem [resolvable:$true] %s239_s14 }
   0xc   : > { %s9871_s15 = smov 128   ;;  %s9872_s16 = smov 8  }
   0xd   : > { %p9978_p5 = pnand %p9063_p4, %p9959_p1  ;;  %s9873_s17 = smov 256  }
   0xe   : > { %s9874_s18 = smov 16   ;;  %s195_s27 = sshll.u32 %s12390_s1, 4  ;;  %s196_s27 = int_to_ptr.hbm [resolvable:$true] %s195_s27 }
   0xf   : > { %9069 = dma.hbm_to_vmem [thread:$0]  (!%p9978_p5), %s210_s29, 1024, %s212_s8, [#allocation8], %s9871_s15, %s9871_s15, %s9872_s16  }
  0x10   : > { %9075 = dma.hbm_to_vmem [thread:$0]  (!%p9978_p5), %s238_s11, 31744, %s240_s14, [#allocation11], %s9873_s17, %s9873_s17, %s9874_s18  }
  0x11   : > { %s9875_s28 = smov [#allocation6]   ;;  %s223_s29 = sshll.u32 %s12392_s3, 4  ;;  %s224_s29 = int_to_ptr.hbm [resolvable:$true] %s223_s29 }
  0x12   : > { %s197_s7 = sshll.u32 %s9875_s28, 4  ;;  %s9876_s8 = smov [#allocation9]   ;;  %s198_s7 = int_to_ptr.vmem [resolvable:$true] %s197_s7 }
  0x13   : > { %9066 = dma.hbm_to_vmem [thread:$0]  (!%p9978_p5), %s196_s27, 10240, %s198_s7, [#allocation4], %s9871_s15, %s9871_s15, %s9872_s16  }
  0x14   : > { %s225_s11 = sshll.u32 %s9876_s8, 4  ;;  %s9877_s13 = smov 384   ;;  %s226_s11 = int_to_ptr.vmem [resolvable:$true] %s225_s11 }
  0x15   : > { %s9878_s14 = smov 24   ;;  %s251_s19 = sshll.u32 %s12394_s5, 4  ;;  %s252_s19 = int_to_ptr.hbm [resolvable:$true] %s251_s19 }
  0x16   : > { %9072 = dma.hbm_to_vmem [thread:$0]  (!%p9978_p5), %s224_s29, 24576, %s226_s11, [#allocation8], %s9877_s13, %s9877_s13, %s9878_s14  }
  0x17   : > { %s9879_s20 = smov [#allocation12]   ;;  %s10002_s28 = sadd.s32 1, %s9867_s24  }
  0x18   : > { %s253_s27 = sshll.u32 %s9879_s20, 4  ;;  %s26_s7 = ssub.s32 %s9867_s24, %s10002_s28  ;;  %s254_s27 = int_to_ptr.vmem [resolvable:$true] %s253_s27 }
  0x19   : > { %9078 = dma.hbm_to_vmem [thread:$0]  (!%p9978_p5), %s252_s19, 15872, %s254_s27, [#allocation11], %s9871_s15, %s9871_s15, %s9872_s16  }
  0x1a   : > { %s29_s9 = sadd.s32 1, %s9863_s23  ;;  %p27_p6 = scmp.eq.s32.totalorder %s26_s7, 0 }
  0x1b   : > { %p36_p7 = scmp.ne.s32.totalorder %s9863_s23, %s9859_s22  ;;  %p37_p8 = scmp.eq.s32.totalorder %s9867_s24, 0 }
  0x1c   : > { %p42_p9 = scmp.ne.s32.totalorder %s9859_s22, %s9855_s21  ;;  %p9088_p12 = scmp.lt.s32.totalorder %s9867_s24, 2 }
  0x1d   : > { %s10013_s10 = scalar_select %p27_p6, %s9863_s23, %s29_s9  }
  0x1e   : > { %p38_p10 = por %p37_p8, %p36_p7  ;;  %p10017_p11 = por %p9959_p1, %p42_p9 }
  0x1f   : > { %s267_s12 = sand.u32 1, %s9863_s23   ;;  %s8546_s16 = sshll.u32 %s9867_s24, 1 }
  0x20   : > { %s8545_s15 = sshll.u32 %s267_s12, 8  ;;  %s275_s13 = scalar_lea.hbm %s12389_s0, %s8546_s16 }
  0x21   : > { %p10027_p13 = pnand %p9088_p12, %p38_p10  ;;  %s277_s21 = sshll.u32 %s275_s13, 4  ;;  %s278_s21 = int_to_ptr.hbm [resolvable:$true] %s277_s21 }
  0x22   : > { %s271_s17 = scalar_lea.smem [#allocation3], %s8545_s15  ;;  %s268_s18 = scalar_lea.sflag [#allocation5], %s267_s12 }
  0x23   : > { %s9806_s19 = sshra.s32 %s278_s21, 4  ;;  %p9810_p2 = pneg %p10027_p13  ;;  %s9807_s19 = int_to_ptr.hbm [resolvable:$true] %s9806_s19 }
  0x24   : > { %s9808_s20 = scalar_lea.hbm %s9807_s19, 2  ;;  %s9813_s9 = scalar_lea.hbm %s12389_s0, 4 }
  0x25   : > { %p9809_p0 = scmp.ne.s32.totalorder %s9807_s19, %s9808_s20  ;;  %p9814_p6 = scmp.lt.s32.totalorder %s9807_s19, %s12389_s0 }
  0x26   : > { %p9815_p7 = scmp.lt.s32.totalorder %s9813_s9, %s9808_s20 }
  0x27   : > { %p9811_p4 = pnand %p9810_p2, %p9809_p0 }
  0x28   : > { %p9816_p8 = por %p9815_p7, %p9814_p6 }
  0x29   : > { %p9812_p5 = pneg %p9811_p4 }
  0x2b   : > { %p9817_p9 = pnand %p9816_p8, %p9812_p5 }
  0x2d   : > { %9820 = shalt.err (!%p9817_p9)
}
  0x2e   : > { %9082 = dma.hbm_to_smem (!%p10027_p13), %s278_s21, 32, %s271_s17, %s268_s18  }
  0x2f   : > { %286 = sbr.rel (%p9967_p3) target bundleno = 2323 (0x913), region = 44 }
  0x34   : > { %s288_s12 = sand.u32 1, %s9859_s22  }
  0x35   : > { %s8548_s15 = sshll.u32 %s288_s12, 8  ;;  %s289_s11 = scalar_lea.sflag [#allocation5], %s288_s12 }
  0x36   : > { %s10044_s13 = scalar_lea.smem [#allocation3], %s8548_s15 }
  0x37   : > { %9838 = dma.done.wait (%p10017_p11), %s289_s11, 32  }
  0x38   : > { %9840 = vsyncadd (%p10017_p11), %s289_s11, 4294967264 }
  0x39   : > { %9842 = dma.done.wait (%p9959_p1), [#allocation4], 10240  }
  0x3a   : > { %9844 = vsyncadd (%p9959_p1), [#allocation4], 4294957056 }
  0x3b   : > { %9846 = dma.done.wait (%p9959_p1), [#allocation8], 25600  }
  0x3c   : > { %9848 = vsyncadd (%p9959_p1), [#allocation8], 4294941696 }
  0x3d   : > { %9850 = dma.done.wait (%p9959_p1), [#allocation11], 47616  }
  0x3e   : > { %9852 = vsyncadd (%p9959_p1), [#allocation11], 4294919680 }
  0x3f   : > { %323 = sfence }
  0x40   : > { %v686_v0 = vld [vmem:[#allocation9 + $0x168] sm:$0xff]  ;;  %v688_v1 = vld [vmem:[#allocation9 + $0x178] sm:$0xff]  ;;  %v683_v2 = vld [vmem:[#allocation9 + $0x150] sm:$0xff]  ;;  %s10062_s30 = sld [smem:[#allocation3 + %s8548_s15]]  ;;  %s9880_s29 = smov 1   ;;  %vm1108_vm0 = vcmask 523264  }
  0x41   : > { %689 = vmatpush.msra.mxu0 %v686_v0  ;;  %771 = vmatpush.msra.mxu2 %v688_v1  ;;  %v685_v3 = vld [vmem:[#allocation9 + $0x160] sm:$0xff]  ;;  %s10065_s14 = sld [smem:[%s10044_s13 + %s9880_s29]]  ;;  %v680_v4 = vld [vmem:[#allocation9 + $0x138] sm:$0xff]  ;;  %v682_v5 = vld [vmem:[#allocation9 + $0x148] sm:$0xff]  ;;  %s9881_s26 = smov 2  }
  0x42   : > { %s10068_s21 = sld [smem:[%s10044_s13 + %s9881_s26]]  ;;  %s9882_s17 = smov 3   ;;  %v677_v6 = vld [vmem:[#allocation9 + $0x120] sm:$0xff]  ;;  %v679_v7 = vld [vmem:[#allocation9 + $0x130] sm:$0xff]  ;;  %v674_v8 = vld [vmem:[#allocation9 + $0x108] sm:$0xff] }
  0x43   : > { %690 = vmatpush.msra.mxu0 %v683_v2  ;;  %772 = vmatpush.msra.mxu2 %v685_v3  ;;  %s10071_s18 = sld [smem:[%s10044_s13 + %s9882_s17]]  ;;  %s9883_s19 = smov 4   ;;  %v676_v9 = vld [vmem:[#allocation9 + $0x118] sm:$0xff]  ;;  %v671_v10 = vld [vmem:[#allocation9 + $0xf0] sm:$0xff]  ;;  %v673_v11 = vld [vmem:[#allocation9 + $0x100] sm:$0xff] }
  0x44   : > { %s10074_s20 = sld [smem:[%s10044_s13 + %s9883_s19]]  ;;  %s9884_s27 = smov 5   ;;  %v668_v12 = vld [vmem:[#allocation9 + $0xd8] sm:$0xff]  ;;  %v670_v15 = vld [vmem:[#allocation9 + $0xe8] sm:$0xff]  ;;  %v665_v16 = vld [vmem:[#allocation9 + $0xc0] sm:$0xff] }
  0x45   : > { %691 = vmatpush.msra.mxu0 %v680_v4  ;;  %773 = vmatpush.msra.mxu2 %v682_v5  ;;  %s10077_s7 = sld [smem:[%s10044_s13 + %s9884_s27]]  ;;  %s9885_s9 = smov 6   ;;  %v356_v17 = vld [vmem:[#allocation7] sm:$0xff]  ;;  %v667_v22 = vld [vmem:[#allocation9 + $0xd0] sm:$0xff]  ;;  %v662_v23 = vld [vmem:[#allocation9 + $0xa8] sm:$0xff] }
  0x46   : > { %s10080_s16 = sld [smem:[%s10044_s13 + %s9885_s9]]  ;;  %s9886_s8 = smov 7   ;;  %v10089_v13 = vstv %s10062_s30  ;;  %v365_v18 = vld [vmem:[#allocation6] sm:$0xff]  ;;  %v664_v24 = vld [vmem:[#allocation9 + $0xb8] sm:$0xff]  ;;  %v659_v31 = vld [vmem:[#allocation9 + $0x90] sm:$0xff] }
  0x47   : > { %692 = vmatpush.msra.mxu0 %v677_v6  ;;  %774 = vmatpush.msra.mxu2 %v679_v7  ;;  %s10083_s12 = sld [smem:[%s10044_s13 + %s9886_s8]]  ;;  %s9887_s15 = smov 8   ;;  %v10092_v14 = vstv %s10065_s14  ;;  %v392_v19 = vld [vmem:[#allocation6 + $0x40] sm:$0xff]  ;;  %v374_v25 = vmul.f32 %v10089_v13, %v365_v18  ;;  %v357_v37 = vld [vmem:[#allocation7 + $0x8] sm:$0xff]  ;;  %v656_v46 = vld [vmem:[#allocation9 + $0x78] sm:$0xff] }
  0x48   : > { %s10086_s11 = sld [smem:[%s10044_s13 + %s9887_s15]]  ;;  %s9888_s29 = smov 9   ;;  %v419_v20 = vld [vmem:[#allocation6 + $0x80] sm:$0xff]  ;;  %v10098_v21 = vstv %s10068_s21  ;;  %v401_v26 = vmul.f32 %v10092_v14, %v392_v19  ;;  %v366_v38 = vld [vmem:[#allocation6 + $0x8] sm:$0xff]  ;;  %v367_v2 = vld [vmem:[#allocation6 + $0x10] sm:$0xff] }
  0x49   : > { %693 = vmatpush.msra.mxu0 %v674_v8  ;;  %775 = vmatpush.msra.mxu2 %v676_v9  ;;  %s10095_s26 = sld [smem:[%s10044_s13 + %s9888_s29]]  ;;  %v446_v27 = vld [vmem:[#allocation6 + $0xc0] sm:$0xff]  ;;  %v10103_v28 = vstv %s10071_s18  ;;  %v382_v33 = vadd.f32 %v374_v25, %v356_v17  ;;  %v428_v34 = vmul.f32 %v10098_v21, %v419_v20  ;;  %v375_v43 = vmul.f32 %v10089_v13, %v366_v38  ;;  %v393_v44 = vld [vmem:[#allocation6 + $0x48] sm:$0xff]  ;;  %v394_v3 = vld [vmem:[#allocation6 + $0x50] sm:$0xff]  ;;  %s10415_s30 = sshll.u32 %s8536_s25, 1 }
  0x4a   : > { %v473_v29 = vld [vmem:[#allocation6 + $0x100] sm:$0xff]  ;;  %v10107_v35 = vstv %s10074_s20  ;;  %v420_v45 = vld [vmem:[#allocation6 + $0x88] sm:$0xff]  ;;  %v455_v48 = vmul.f32 %v10103_v28, %v446_v27  ;;  %v402_v51 = vmul.f32 %v10092_v14, %v393_v44  ;;  %v358_v8 = vld [vmem:[#allocation7 + $0x10] sm:$0xff]  ;;  %v376_v17 = vmul.f32 %v10089_v13, %v367_v2  ;;  %p350_p1 = scmp.lt.s32.totalorder %s10415_s30, 3  ;;  %s9890_s17 = smov 128  }
  0x4b   : > { %694 = vmatpush.msra.mxu0 %v671_v10  ;;  %776 = vmatpush.msra.mxu2 %v673_v11  ;;  %v500_v30 = vld [vmem:[#allocation6 + $0x140] sm:$0xff]  ;;  %v10110_v39 = vstv %s10077_s7  ;;  %v409_v47 = vadd.f32 %v401_v26, %v382_v33  ;;  %v447_v52 = vld [vmem:[#allocation6 + $0xc8] sm:$0xff]  ;;  %v482_v54 = vmul.f32 %v10107_v35, %v473_v29  ;;  %v383_v57 = vadd.f32 %v375_v43, %v357_v37  ;;  %v421_v9 = vld [vmem:[#allocation6 + $0x90] sm:$0xff]  ;;  %s10923_s18 = sld [smem:[%s10044_s13 + %s9890_s17]]  ;;  %s9891_s19 = smov 129  }
  0x4c   : > { %v661_v32 = vld [vmem:[#allocation9 + $0xa0] sm:$0xff]  ;;  %v10113_v40 = vstv %s10080_s16  ;;  %v658_v53 = vld [vmem:[#allocation9 + $0x88] sm:$0xff]  ;;  %v429_v58 = vmul.f32 %v10098_v21, %v420_v45  ;;  %v509_v62 = vmul.f32 %v10110_v39, %v500_v30  ;;  %v456_v6 = vmul.f32 %v10103_v28, %v447_v52  ;;  %v655_v10 = vld [vmem:[#allocation9 + $0x70] sm:$0xff]  ;;  %s12454_s30 = smov (!%p350_p1, %s10415_s30), 3  ;;  %s10929_s20 = sld [smem:[%s10044_s13 + %s9891_s19]] }
  0x4d   : > { %695 = vmatpush.msra.mxu0 %v668_v12  ;;  %777 = vmatpush.msra.mxu2 %v670_v15  ;;  %v527_v36 = vld [vmem:[#allocation6 + $0x180] sm:$0xff]  ;;  %v10116_v42 = vstv %s10083_s12  ;;  %v474_v59 = vld [vmem:[#allocation6 + $0x108] sm:$0xff]  ;;  %v436_v61 = vadd.f32 %v428_v34, %v409_v47  ;;  %v410_v5 = vadd.f32 %v402_v51, %v383_v57  ;;  %v403_v18 = vmul.f32 %v10092_v14, %v394_v3  ;;  %v652_v20 = vld [vmem:[#allocation9 + $0x58] sm:$0xff]  ;;  %s9040_s24 = smul.u32 992, %s12454_s30  ;;  %s9892_s27 = smov 130  }
  0x4e   : > { %v554_v41 = vld [vmem:[#allocation6 + $0x1c0] sm:$0xff]  ;;  %v10121_v50 = vstv %s10086_s11  ;;  %v536_v63 = vmul.f32 %v10113_v40, %v527_v36  ;;  %v501_v1 = vld [vmem:[#allocation6 + $0x148] sm:$0xff]  ;;  %v448_v25 = vld [vmem:[#allocation6 + $0xd0] sm:$0xff]  ;;  %v384_v29 = vadd.f32 %v376_v17, %v358_v8  ;;  %v430_v30 = vmul.f32 %v10098_v21, %v421_v9  ;;  %s10938_s7 = sld [smem:[%s10044_s13 + %s9892_s27]]  ;;  %s9893_s9 = smov 131  }
  0x4f   : > { %696 = vmatpush.msra.mxu0 %v665_v16  ;;  %778 = vmatpush.msra.mxu2 %v667_v22  ;;  %v581_v49 = vld [vmem:[#allocation6 + $0x200] sm:$0xff]  ;;  %v10126_v56 = vstv %s10095_s26  ;;  %v10132_v0 = vmul.f32 %v10116_v42, %v554_v41  ;;  %v528_v7 = vld [vmem:[#allocation6 + $0x188] sm:$0xff]  ;;  %v463_v11 = vadd.f32 %v455_v48, %v436_v61  ;;  %v437_v22 = vadd.f32 %v429_v58, %v410_v5  ;;  %v395_v33 = vld [vmem:[#allocation6 + $0x58] sm:$0xff]  ;;  %s10442_s21 = scalar_lea.vmem %s12395_s6, %s9040_s24  ;;  %s10945_s16 = sld [smem:[%s10044_s13 + %s9893_s9]] }
  0x50   : > { %v608_v55 = vld [vmem:[#allocation6 + $0x240] sm:$0xff]  ;;  %v10135_v4 = vmul.f32 %v10121_v50, %v581_v49  ;;  %v555_v15 = vld [vmem:[#allocation6 + $0x1c8] sm:$0xff]  ;;  %v537_v27 = vmul.f32 %v10113_v40, %v528_v7  ;;  %v647_v34 = vld [vmem:[#allocation9 + $0x30] sm:$0xff]  ;;  %v411_v47 = vadd.f32 %v403_v18, %v384_v29  ;;  %v457_v48 = vmul.f32 %v10103_v28, %v448_v25  ;;  %s9894_s8 = smov 132   ;;  %s9895_s15 = smov 133  }
  0x51   : > { %697 = vmatpush.msra.mxu0 %v662_v23  ;;  %779 = vmatpush.msra.mxu2 %v664_v24  ;;  %v653_v60 = vld [vmem:[#allocation9 + $0x60] sm:$0xff]  ;;  %v10139_v12 = vmul.f32 %v10126_v56, %v608_v55  ;;  %v582_v16 = vld [vmem:[#allocation6 + $0x208] sm:$0xff]  ;;  %v483_v23 = vmul.f32 %v10107_v35, %v474_v59  ;;  %v510_v24 = vmul.f32 %v10110_v39, %v501_v1  ;;  %v359_v41 = vld [vmem:[#allocation7 + $0x18] sm:$0xff]  ;;  %s10951_s12 = sld [smem:[%s10044_s13 + %s9894_s8]]  ;;  %s9896_s29 = smov 134  }
  0x52   : > { %v650_v19 = vld [vmem:[#allocation9 + $0x48] sm:$0xff]  ;;  %v490_v26 = vadd.f32 %v482_v54, %v463_v11  ;;  %v464_v36 = vadd.f32 %v456_v6, %v437_v22  ;;  %v564_v37 = vmul.f32 %v10116_v42, %v555_v15  ;;  %v591_v38 = vmul.f32 %v10121_v50, %v582_v16  ;;  %v422_v43 = vld [vmem:[#allocation6 + $0x98] sm:$0xff]  ;;  %v649_v44 = vld [vmem:[#allocation9 + $0x40] sm:$0xff]  ;;  %s10963_s11 = sld [smem:[%s10044_s13 + %s9895_s15]]  ;;  %s9897_s30 = smov 135  }
  0x53   : > { %698 = vmatpush.msra.mxu0 %v659_v31  ;;  %780 = vmatpush.msra.mxu2 %v661_v32  ;;  %v475_v31 = vld [vmem:[#allocation6 + $0x110] sm:$0xff]  ;;  %v368_v32 = vld [vmem:[#allocation6 + $0x18] sm:$0xff]  ;;  %v404_v55 = vmul.f32 %v10092_v14, %v395_v33  ;;  %v646_v58 = vld [vmem:[#allocation9 + $0x28] sm:$0xff]  ;;  %v431_v2 = vmul.f32 %v10098_v21, %v422_v43  ;;  %s10974_s26 = sld [smem:[%s10044_s13 + %s9896_s29]]  ;;  %s9898_s25 = smov 136  }
  0x54   : > { %v517_v45 = vadd.f32 %v509_v62, %v490_v26  ;;  %v502_v49 = vld [vmem:[#allocation6 + $0x150] sm:$0xff]  ;;  %v377_v51 = vmul.f32 %v10089_v13, %v368_v32  ;;  %v644_v52 = vld [vmem:[#allocation9 + $0x18] sm:$0xff]  ;;  %v484_v54 = vmul.f32 %v10107_v35, %v475_v31  ;;  %v641_v3 = vld [vmem:[#allocation9] sm:$0xff]  ;;  %s10985_s24 = sld [smem:[%s10044_s13 + %s9897_s30]]  ;;  %s9899_s17 = smov 137  }
  0x55   : > { %699 = vmatpush.msra.mxu0 %v656_v46  ;;  %781 = vmatpush.msra.mxu2 %v658_v53  ;;  %v609_v46 = vld [vmem:[#allocation6 + $0x248] sm:$0xff]  ;;  %v491_v53 = vadd.f32 %v483_v23, %v464_v36  ;;  %v449_v57 = vld [vmem:[#allocation6 + $0xd8] sm:$0xff]  ;;  %v529_v61 = vld [vmem:[#allocation6 + $0x190] sm:$0xff]  ;;  %v511_v7 = vmul.f32 %v10110_v39, %v502_v49  ;;  %s10995_s14 = sld [smem:[%s10044_s13 + %s9898_s25]] }
  0x56   : > { %v544_v59 = vadd.f32 %v536_v63, %v517_v45  ;;  %v556_v62 = vld [vmem:[#allocation6 + $0x1d0] sm:$0xff]  ;;  %v385_v1 = vadd.f32 %v377_v51, %v359_v41  ;;  %v618_v6 = vmul.f32 %v10126_v56, %v609_v46  ;;  %v476_v8 = vld [vmem:[#allocation6 + $0x118] sm:$0xff]  ;;  %v458_v15 = vmul.f32 %v10103_v28, %v449_v57  ;;  %v369_v16 = vld [vmem:[#allocation6 + $0x20] sm:$0xff] }
  0x57   : > { %700 = vmatpush.msra.mxu0 %v653_v60  ;;  %782 = vmatpush.msra.mxu2 %v655_v10  ;;  %v438_v60 = vadd.f32 %v430_v30, %v411_v47  ;;  %v518_v5 = vadd.f32 %v510_v24, %v491_v53  ;;  %v643_v9 = vld [vmem:[#allocation9 + $0x10] sm:$0xff]  ;;  %v396_v17 = vld [vmem:[#allocation6 + $0x60] sm:$0xff]  ;;  %v503_v22 = vld [vmem:[#allocation6 + $0x158] sm:$0xff]  ;;  %v378_v32 = vmul.f32 %v10089_v13, %v369_v16 }
  0x58   : > { %v571_v10 = vadd.f32 %v10132_v0, %v544_v59  ;;  %v412_v63 = vadd.f32 %v404_v55, %v385_v1  ;;  %v485_v0 = vmul.f32 %v10107_v35, %v476_v8  ;;  %v360_v26 = vld [vmem:[#allocation7 + $0x20] sm:$0xff]  ;;  %v530_v31 = vld [vmem:[#allocation6 + $0x198] sm:$0xff]  ;;  %v583_v36 = vld [vmem:[#allocation6 + $0x210] sm:$0xff] }
  0x59   : > { %701 = vmatpush.msra.mxu0 %v650_v19  ;;  %783 = vmatpush.msra.mxu2 %v652_v20  ;;  %v465_v11 = vadd.f32 %v457_v48, %v438_v60  ;;  %v545_v18 = vadd.f32 %v537_v27, %v518_v5  ;;  %v538_v19 = vmul.f32 %v10113_v40, %v529_v61  ;;  %v423_v29 = vld [vmem:[#allocation6 + $0xa0] sm:$0xff]  ;;  %v557_v51 = vld [vmem:[#allocation6 + $0x1d8] sm:$0xff]  ;;  %v370_v53 = vld [vmem:[#allocation6 + $0x28] sm:$0xff] }
  0x5a   : > { %v565_v20 = vmul.f32 %v10116_v42, %v556_v62  ;;  %v598_v23 = vadd.f32 %v10135_v4, %v571_v10  ;;  %v439_v25 = vadd.f32 %v431_v2, %v412_v63  ;;  %v405_v27 = vmul.f32 %v10092_v14, %v396_v17  ;;  %v450_v43 = vld [vmem:[#allocation6 + $0xe0] sm:$0xff]  ;;  %v687_v62 = vld [vmem:[#allocation9 + $0x170] sm:$0xff]  ;;  %v684_v1 = vld [vmem:[#allocation9 + $0x158] sm:$0xff] }
  0x5b   : > { %702 = vmatpush.msra.mxu0 %v647_v34  ;;  %784 = vmatpush.msra.mxu2 %v649_v44  ;;  %v492_v24 = vadd.f32 %v484_v54, %v465_v11  ;;  %v572_v30 = vadd.f32 %v564_v37, %v545_v18  ;;  %v512_v4 = vmul.f32 %v10110_v39, %v503_v22  ;;  %v504_v57 = vld [vmem:[#allocation6 + $0x160] sm:$0xff]  ;;  %v424_v2 = vld [vmem:[#allocation6 + $0xa8] sm:$0xff]  ;;  %v584_v16 = vld [vmem:[#allocation6 + $0x218] sm:$0xff] }
  0x5c   : > { %v625_v33 = vadd.f32 %v10139_v12, %v598_v23  ;;  %v466_v41 = vadd.f32 %v458_v15, %v439_v25  ;;  %v386_v45 = vadd.f32 %v378_v32, %v360_v26  ;;  %v432_v46 = vmul.f32 %v10098_v21, %v423_v29  ;;  %v1623_v8 = vld [vmem:[#allocation9 + $0x2e8] sm:$0xff]  ;;  %v681_v63 = vld [vmem:[#allocation9 + $0x140] sm:$0xff]  ;;  %v371_v23 = vld [vmem:[#allocation6 + $0x30] sm:$0xff] }
  0x5d   : > { %703 = vmatpush.msra.mxu0 %v644_v52  ;;  %785 = vmatpush.msra.mxu2 %v646_v58  ;;  %v519_v34 = vadd.f32 %v511_v7, %v492_v24  ;;  %v599_v44 = vadd.f32 %v591_v38, %v572_v30  ;;  %v539_v49 = vmul.f32 %v10113_v40, %v530_v31  ;;  %v477_v52 = vld [vmem:[#allocation6 + $0x120] sm:$0xff]  ;;  %v361_v58 = vld [vmem:[#allocation7 + $0x28] sm:$0xff]  ;;  %v398_v30 = vld [vmem:[#allocation6 + $0x70] sm:$0xff] }
  0x5e   : > { %v10167_v47 = vmax.f32 %v625_v33, 0.0  ;;  %v493_v48 = vadd.f32 %v485_v0, %v466_v41  ;;  %v592_v12 = vmul.f32 %v10121_v50, %v583_v36  ;;  %v413_v54 = vadd.f32 %v405_v27, %v386_v45  ;;  %v397_v38 = vld [vmem:[#allocation6 + $0x68] sm:$0xff]  ;;  %1626 = vmatpush.msra.mxu1 %v1623_v8  ;;  %v362_v33 = vld [vmem:[#allocation7 + $0x30] sm:$0xff] }
  0x5f   : > { %704 = vmatpush.msra.mxu0 %v641_v3  ;;  %786 = vmatpush.msra.mxu2 %v643_v9  ;;  %v546_v37 = vadd.f32 %v538_v19, %v519_v34  ;;  %v459_v55 = vmul.f32 %v10103_v28, %v450_v43  ;;  %v626_v59 = vadd.f32 %v618_v6, %v599_v44  ;;  %v610_v3 = vld [vmem:[#allocation6 + $0x250] sm:$0xff]  ;;  %v451_v15 = vld [vmem:[#allocation6 + $0xe8] sm:$0xff]  ;;  %v531_v19 = vld [vmem:[#allocation6 + $0x1a0] sm:$0xff] }
  0x60   : > { %705 = vmatmul.f32.vlgmr.msra.gmra.mxu0 %v10167_v47  ;;  %787 = vmatmul.f32.vlgmr.msra.gmra.mxu2 %v10167_v47  ;;  %v520_v61 = vadd.f32 %v512_v4, %v493_v48  ;;  %v440_v5 = vadd.f32 %v432_v46, %v413_v54  ;;  %v486_v7 = vmul.f32 %v10107_v35, %v477_v52  ;;  %v678_v26 = vld [vmem:[#allocation9 + $0x128] sm:$0xff]  ;;  %v425_v34 = vld [vmem:[#allocation6 + $0xb0] sm:$0xff]  ;;  %v611_v44 = vld [vmem:[#allocation6 + $0x258] sm:$0xff] }
  0x61   : > { %v573_v60 = vadd.f32 %v565_v20, %v546_v37  ;;  %730 = vmatpush.msrb.mxu0 %v687_v62  ;;  %v379_v9 = vmul.f32 %v10089_v13, %v370_v53  ;;  %v566_v11 = vmul.f32 %v10116_v42, %v557_v51  ;;  %v406_v6 = vmul.f32 %v10092_v14, %v397_v38  ;;  %v478_v29 = vld [vmem:[#allocation6 + $0x128] sm:$0xff]  ;;  %v558_v46 = vld [vmem:[#allocation6 + $0x1e0] sm:$0xff]  ;;  %v675_v53 = vld [vmem:[#allocation9 + $0x110] sm:$0xff] }
  0x62   : > { %v547_v10 = vadd.f32 %v539_v49, %v520_v61  ;;  %v467_v17 = vadd.f32 %v459_v55, %v440_v5  ;;  %v513_v18 = vmul.f32 %v10110_v39, %v504_v57  ;;  %v433_v22 = vmul.f32 %v10098_v21, %v424_v2  ;;  %v505_v49 = vld [vmem:[#allocation6 + $0x168] sm:$0xff]  ;;  %v672_v54 = vld [vmem:[#allocation9 + $0xf8] sm:$0xff]  ;;  %v669_v2 = vld [vmem:[#allocation9 + $0xe0] sm:$0xff] }
  0x63   : > { %731 = vmatpush.msrb.mxu0 %v684_v1  ;;  %v387_v20 = vadd.f32 %v379_v9, %v361_v58  ;;  %v10180_v24 = vmax.f32 %v626_v59, 0.0  ;;  %v600_v25 = vadd.f32 %v592_v12, %v573_v60  ;;  %v619_v0 = vmul.f32 %v10126_v56, %v610_v3  ;;  %v1620_v12 = vld [vmem:[#allocation9 + $0x2d0] sm:$0xff]  ;;  %v1617_v38 = vld [vmem:[#allocation9 + $0x2b8] sm:$0xff]  ;;  %v1614_v3 = vld [vmem:[#allocation9 + $0x2a0] sm:$0xff] }
  0x64   : > { %v494_v31 = vadd.f32 %v486_v7, %v467_v17  ;;  %v460_v27 = vmul.f32 %v10103_v28, %v451_v15  ;;  %v574_v36 = vadd.f32 %v566_v11, %v547_v10  ;;  %v593_v41 = vmul.f32 %v10121_v50, %v584_v16  ;;  %1627 = vmatpush.msra.mxu1 %v1620_v12  ;;  %v452_v59 = vld [vmem:[#allocation6 + $0xf0] sm:$0xff]  ;;  %v372_v60 = vld [vmem:[#allocation6 + $0x38] sm:$0xff]  ;;  %v585_v9 = vld [vmem:[#allocation6 + $0x220] sm:$0xff] }
  0x65   : > { %732 = vmatpush.msrb.mxu0 %v681_v63  ;;  %v414_v32 = vadd.f32 %v406_v6, %v387_v20  ;;  %v540_v4 = vmul.f32 %v10113_v40, %v531_v19  ;;  %v380_v43 = vmul.f32 %v10089_v13, %v371_v23  ;;  %v487_v48 = vmul.f32 %v10107_v35, %v478_v29  ;;  %v399_v7 = vld [vmem:[#allocation6 + $0x78] sm:$0xff]  ;;  %v532_v63 = vld [vmem:[#allocation6 + $0x1a8] sm:$0xff]  ;;  %v479_v20 = vld [vmem:[#allocation6 + $0x130] sm:$0xff] }
  0x66   : > { %v521_v45 = vadd.f32 %v513_v18, %v494_v31  ;;  %v407_v51 = vmul.f32 %v10092_v14, %v398_v30  ;;  %v627_v52 = vadd.f32 %v619_v0, %v600_v25  ;;  %v434_v57 = vmul.f32 %v10098_v21, %v425_v34  ;;  %1628 = vmatpush.msra.mxu1 %v1617_v38  ;;  %v363_v6 = vld [vmem:[#allocation7 + $0x38] sm:$0xff]  ;;  %v666_v16 = vld [vmem:[#allocation9 + $0xc8] sm:$0xff] }
  0x67   : > { %733 = vmatpush.msrb.mxu0 %v678_v26  ;;  %v441_v37 = vadd.f32 %v433_v22, %v414_v32  ;;  %v388_v55 = vadd.f32 %v380_v43, %v362_v33  ;;  %v601_v61 = vadd.f32 %v593_v41, %v574_v36  ;;  %v620_v62 = vmul.f32 %v10126_v56, %v611_v44  ;;  %v1611_v17 = vld [vmem:[#allocation9 + $0x288] sm:$0xff]  ;;  %v426_v25 = vld [vmem:[#allocation6 + $0xb8] sm:$0xff]  ;;  %v612_v32 = vld [vmem:[#allocation6 + $0x260] sm:$0xff] }
  0x68   : > { %708 = vmatmul.f32.gmra.mxu0 %v10180_v24  ;;  %790 = vmatmul.f32.gmra.mxu2 %v10180_v24  ;;  %v567_v1 = vmul.f32 %v10116_v42, %v558_v46  ;;  %v548_v8 = vadd.f32 %v540_v4, %v521_v45  ;;  %v514_v11 = vmul.f32 %v10110_v39, %v505_v49  ;;  %v10195_v15 = vmax.f32 %v627_v52, 0.0  ;;  %v559_v33 = vld [vmem:[#allocation6 + $0x1e8] sm:$0xff]  ;;  %v663_v36 = vld [vmem:[#allocation9 + $0xb0] sm:$0xff]  ;;  %v660_v4 = vld [vmem:[#allocation9 + $0x98] sm:$0xff] }
  0x69   : > { %v468_v58 = vadd.f32 %v460_v27, %v441_v37  ;;  %734 = vmatpush.msrb.mxu0 %v675_v53  ;;  %v415_v5 = vadd.f32 %v407_v51, %v388_v55  ;;  %v461_v19 = vmul.f32 %v10103_v28, %v452_v59  ;;  %v381_v22 = vmul.f32 %v10089_v13, %v372_v60  ;;  %v506_v13 = vld [vmem:[#allocation6 + $0x170] sm:$0xff]  ;;  %v1605_v45 = vld [vmem:[#allocation9 + $0x258] sm:$0xff]  ;;  %v1602_v49 = vld [vmem:[#allocation9 + $0x240] sm:$0xff] }
  0x6a   : > { %1629 = vmatpush.msra.mxu1 %v1614_v3  ;;  %v408_v23 = vmul.f32 %v10092_v14, %v399_v7  ;;  %v628_v0 = vadd.f32 %v620_v62, %v601_v61  ;;  %v594_v26 = vmul.f32 %v10121_v50, %v585_v9  ;;  %v541_v29 = vmul.f32 %v10113_v40, %v532_v63  ;;  %v1608_v41 = vld [vmem:[#allocation9 + $0x270] sm:$0xff]  ;;  %v453_v46 = vld [vmem:[#allocation6 + $0xf8] sm:$0xff]  ;;  %v586_v12 = vld [vmem:[#allocation6 + $0x228] sm:$0xff] }
  0x6b   : > { %v495_v10 = vadd.f32 %v487_v48, %v468_v58  ;;  %735 = vmatpush.msrb.mxu0 %v672_v54  ;;  %v442_v18 = vadd.f32 %v434_v57, %v415_v5  ;;  %v389_v30 = vadd.f32 %v381_v22, %v363_v6  ;;  %v575_v31 = vadd.f32 %v567_v1, %v548_v8  ;;  %v657_v48 = vld [vmem:[#allocation9 + $0x80] sm:$0xff]  ;;  %v533_v55 = vld [vmem:[#allocation6 + $0x1b0] sm:$0xff]  ;;  %v654_v58 = vld [vmem:[#allocation9 + $0x68] sm:$0xff] }
  0x6c   : > { %1630 = vmatpush.msra.mxu1 %v1611_v17  ;;  %v488_v34 = vmul.f32 %v10107_v35, %v479_v20  ;;  %v435_v44 = vmul.f32 %v10098_v21, %v426_v25  ;;  %v621_v37 = vmul.f32 %v10126_v56, %v612_v32  ;;  %v10207_v51 = vmax.f32 %v628_v0, 0.0  ;;  %v1599_v38 = vld [vmem:[#allocation9 + $0x228] sm:$0xff]  ;;  %v480_v61 = vld [vmem:[#allocation6 + $0x138] sm:$0xff]  ;;  %v560_v5 = vld [vmem:[#allocation6 + $0x1f0] sm:$0xff] }
  0x6d   : > { %736 = vmatpush.msrb.mxu0 %v669_v2  ;;  %v522_v27 = vadd.f32 %v514_v11, %v495_v10  ;;  %v469_v14 = vadd.f32 %v461_v19, %v442_v18  ;;  %v416_v43 = vadd.f32 %v408_v23, %v389_v30  ;;  %v602_v52 = vadd.f32 %v594_v26, %v575_v31  ;;  %v613_v2 = vld [vmem:[#allocation6 + $0x268] sm:$0xff]  ;;  %v507_v8 = vld [vmem:[#allocation6 + $0x178] sm:$0xff]  ;;  %v651_v11 = vld [vmem:[#allocation9 + $0x50] sm:$0xff] }
  0x6e   : > { %1631 = vmatpush.msra.mxu1 %v1608_v41  ;;  %v568_v53 = vmul.f32 %v10116_v42, %v559_v33  ;;  %v515_v54 = vmul.f32 %v10110_v39, %v506_v13  ;;  %v462_v60 = vmul.f32 %v10103_v28, %v453_v46  ;;  %v595_v62 = vmul.f32 %v10121_v50, %v586_v12  ;;  %v1596_v63 = vld [vmem:[#allocation9 + $0x210] sm:$0xff]  ;;  %v648_v6 = vld [vmem:[#allocation9 + $0x38] sm:$0xff]  ;;  %v645_v17 = vld [vmem:[#allocation9 + $0x20] sm:$0xff] }
  0x6f   : > { %737 = vmatpush.msrb.mxu0 %v666_v16  ;;  %v549_v21 = vadd.f32 %v541_v29, %v522_v27  ;;  %v496_v57 = vadd.f32 %v488_v34, %v469_v14  ;;  %v443_v59 = vadd.f32 %v435_v44, %v416_v43  ;;  %v629_v1 = vadd.f32 %v621_v37, %v602_v52  ;;  %v1593_v16 = vld [vmem:[#allocation9 + $0x1f8] sm:$0xff]  ;;  %v1590_v18 = vld [vmem:[#allocation9 + $0x1e0] sm:$0xff]  ;;  %v587_v20 = vld [vmem:[#allocation6 + $0x230] sm:$0xff] }
  0x70   : > { %711 = vmatmul.f32.gmra.mxu0 %v10195_v15  ;;  %793 = vmatmul.f32.gmra.mxu2 %v10195_v15  ;;  %v542_v3 = vmul.f32 %v10113_v40, %v533_v55  ;;  %v489_v7 = vmul.f32 %v10107_v35, %v480_v61  ;;  %v622_v19 = vmul.f32 %v10126_v56, %v613_v2  ;;  %v534_v29 = vld [vmem:[#allocation6 + $0x1b8] sm:$0xff]  ;;  %v642_v30 = vld [vmem:[#allocation9 + $0x8] sm:$0xff]  ;;  %v614_v34 = vld [vmem:[#allocation6 + $0x270] sm:$0xff] }
  0x71   : > { %738 = vmatpush.msrb.mxu0 %v663_v36  ;;  %1632 = vmatpush.msra.mxu1 %v1605_v45  ;;  %v576_v28 = vadd.f32 %v568_v53, %v549_v21  ;;  %v523_v9 = vadd.f32 %v515_v54, %v496_v57  ;;  %v470_v10 = vadd.f32 %v462_v60, %v443_v59  ;;  %v10220_v23 = vmax.f32 %v629_v1, 0.0  ;;  %v1587_v31 = vld [vmem:[#allocation9 + $0x1c8] sm:$0xff]  ;;  %v1584_v14 = vld [vmem:[#allocation9 + $0x1b0] sm:$0xff]  ;;  %v1581_v36 = vld [vmem:[#allocation9 + $0x198] sm:$0xff] }
  0x72   : > { %v569_v35 = vmul.f32 %v10116_v42, %v560_v5  ;;  %v516_v22 = vmul.f32 %v10110_v39, %v507_v8  ;;  %v596_v32 = vmul.f32 %v10121_v50, %v587_v20  ;;  %v543_v27 = vmul.f32 %v10113_v40, %v534_v29  ;;  %v561_v41 = vld [vmem:[#allocation6 + $0x1f8] sm:$0xff]  ;;  %v1619_v57 = vld [vmem:[#allocation9 + $0x2c8] sm:$0xff]  ;;  %v1610_v59 = vld [vmem:[#allocation9 + $0x280] sm:$0xff] }
  0x73   : > { %739 = vmatpush.msrb.mxu0 %v660_v4  ;;  %1633 = vmatpush.msra.mxu1 %v1602_v49  ;;  %v603_v25 = vadd.f32 %v595_v62, %v576_v28  ;;  %v550_v0 = vadd.f32 %v542_v3, %v523_v9  ;;  %v497_v26 = vadd.f32 %v489_v7, %v470_v10  ;;  %v1578_v4 = vld [vmem:[#allocation9 + $0x180] sm:$0xff]  ;;  %v588_v37 = vld [vmem:[#allocation6 + $0x238] sm:$0xff]  ;;  %v1607_v60 = vld [vmem:[#allocation9 + $0x268] sm:$0xff] }
  0x74   : > { %v623_v43 = vmul.f32 %v10126_v56, %v614_v34  ;;  %v570_v46 = vmul.f32 %v10116_v42, %v561_v41  ;;  %v597_v52 = vmul.f32 %v10121_v50, %v588_v37  ;;  %v615_v53 = vld [vmem:[#allocation6 + $0x278] sm:$0xff]  ;;  %v1604_v61 = vld [vmem:[#allocation9 + $0x250] sm:$0xff]  ;;  %v1598_v1 = vld [vmem:[#allocation9 + $0x220] sm:$0xff] }
  0x75   : > { %740 = vmatpush.msrb.mxu0 %v657_v48  ;;  %1634 = vmatpush.msra.mxu1 %v1599_v38  ;;  %v630_v39 = vadd.f32 %v622_v19, %v603_v25  ;;  %v577_v33 = vadd.f32 %v569_v35, %v550_v0  ;;  %v524_v13 = vadd.f32 %v516_v22, %v497_v26  ;;  %v1625_v50 = vld [vmem:[#allocation9 + $0x2f8] sm:$0xff]  ;;  %v1595_v2 = vld [vmem:[#allocation9 + $0x208] sm:$0xff]  ;;  %v1592_v3 = vld [vmem:[#allocation9 + $0x1f0] sm:$0xff] }
  0x76   : > { %v624_v55 = vmul.f32 %v10126_v56, %v615_v53  ;;  %v1622_v56 = vld [vmem:[#allocation9 + $0x2e0] sm:$0xff]  ;;  %v1613_v38 = vld [vmem:[#allocation9 + $0x298] sm:$0xff]  ;;  %v1583_v8 = vld [vmem:[#allocation9 + $0x1a8] sm:$0xff] }
  0x77   : > { %741 = vmatpush.msrb.mxu0 %v654_v58  ;;  %1635 = vmatpush.msra.mxu1 %v1596_v63  ;;  %v10227_v44 = vmax.f32 %v630_v39, 0.0  ;;  %v604_v40 = vadd.f32 %v596_v32, %v577_v33  ;;  %v551_v45 = vadd.f32 %v543_v27, %v524_v13  ;;  %v1616_v58 = vld [vmem:[#allocation9 + $0x2b0] sm:$0xff]  ;;  %v1601_v62 = vld [vmem:[#allocation9 + $0x238] sm:$0xff]  ;;  %v1586_v7 = vld [vmem:[#allocation9 + $0x1c0] sm:$0xff] }
  0x78   : > { %714 = vmatmul.f32.gmra.mxu0 %v10207_v51  ;;  %796 = vmatmul.f32.gmra.mxu2 %v10207_v51  ;;  %v1589_v5 = vld [vmem:[#allocation9 + $0x1d8] sm:$0xff]  ;;  %v1580_v28 = vld [vmem:[#allocation9 + $0x190] sm:$0xff]  ;;  %v837_v13 = vld [vmem:[#allocation10 + $0x8] sm:$0xff] }
  0x79   : > { %742 = vmatpush.msrb.mxu0 %v651_v11  ;;  %1636 = vmatpush.msra.mxu1 %v1593_v16  ;;  %v631_v48 = vadd.f32 %v623_v43, %v604_v40  ;;  %v578_v49 = vadd.f32 %v570_v46, %v551_v45  ;;  %v839_v41 = vld [vmem:[#allocation10 + $0x18] sm:$0xff]  ;;  %v841_v40 = vld [vmem:[#allocation10 + $0x28] sm:$0xff] }
  0x7a   : > { %v843_v37 = vld [vmem:[#allocation10 + $0x38] sm:$0xff] }
  0x7b   : > { %743 = vmatpush.msrb.mxu0 %v648_v6  ;;  %1637 = vmatpush.msra.mxu1 %v1590_v18  ;;  %v10234_v12 = vmax.f32 %v631_v48, 0.0  ;;  %v605_v54 = vadd.f32 %v597_v52, %v578_v49  ;;  %v845_v52 = vld [vmem:[#allocation10 + $0x48] sm:$0xff] }
  0x7d   : > { %744 = vmatpush.msrb.mxu0 %v645_v17  ;;  %1638 = vmatpush.msra.mxu1 %v1587_v31  ;;  %v632_v42 = vadd.f32 %v624_v55, %v605_v54  ;;  %v847_v55 = vld [vmem:[#allocation10 + $0x58] sm:$0xff] }
  0x7f   : > { %745 = vmatpush.msrb.mxu0 %v642_v30  ;;  %1639 = vmatpush.msra.mxu1 %v1584_v14  ;;  %v10240_v21 = vmax.f32 %v632_v42, 0.0 }
  0x80   : > { %717 = vmatmul.f32.gmra.mxu0 %v10220_v23  ;;  %799 = vmatmul.f32.gmra.mxu2 %v10220_v23 }
  0x81   : > { %1640 = vmatpush.msra.mxu1 %v1581_v36 }
  0x83   : > { %1641 = vmatpush.msra.mxu1 %v1578_v4 }
  0x84   : > { %1642 = vmatmul.f32.vlgmr.msra.gmra.mxu1 %v10167_v47 }
  0x85   : > { %1708 = vmatpush.msrb.mxu1 %v1625_v50 }
  0x87   : > { %1709 = vmatpush.msrb.mxu1 %v1622_v56  ;;  %v9889_v56 = vmov 0  }
  0x88   : > { %720 = vmatmul.f32.gmra.mxu0 %v10227_v44  ;;  %802 = vmatmul.f32.gmra.mxu2 %v10227_v44 }
  0x89   : > { %1710 = vmatpush.msrb.mxu1 %v1619_v57  ;;  %9157 = vset.pattern.permute.xlu0 %v9889_v56  ;;  %v922_v57 = vld [vmem:[#allocation12] sm:$0xff] }
  0x8a   : > { %9158 = vset.pattern.permute.xlu1 %v9889_v56  ;;  %955 = vperm.xlu0 %9157, %v922_v57   ;;  %v1588_v57 = vld [vmem:[#allocation9 + $0x1d0] sm:$0xff] }
  0x8b   : > { %1711 = vmatpush.msrb.mxu1 %v1616_v58  ;;  %9159 = vset.pattern.permute.xlu2 %v9889_v56  ;;  %v849_v58 = vld [vmem:[#allocation10 + $0x68] sm:$0xff] }
  0x8c   : > { %1645 = vmatmul.f32.gmra.mxu1 %v10180_v24  ;;  %v1591_v56 = vld [vmem:[#allocation9 + $0x1e8] sm:$0xff] }
  0x8d   : > { %1712 = vmatpush.msrb.mxu1 %v1613_v38 }
  0x8f   : > { %1713 = vmatpush.msrb.mxu1 %v1610_v59  ;;  %v924_v59 = vld [vmem:[#allocation12 + $0x10] sm:$0xff] }
  0x90   : > { %723 = vmatmul.f32.gmra.mxu0 %v10234_v12  ;;  %805 = vmatmul.f32.gmra.mxu2 %v10234_v12 }
  0x91   : > { %1714 = vmatpush.msrb.mxu1 %v1607_v60  ;;  %v923_v60 = vld [vmem:[#allocation12 + $0x8] sm:$0xff]  ;;  %965 = vperm.xlu1 %9158, %v924_v59   ;;  %v844_v59 = vld [vmem:[#allocation10 + $0x40] sm:$0xff] }
  0x92   : > { %960 = vperm.xlu0 %9157, %v923_v60   ;;  %v860_v60 = vld [vmem:[#allocation10 + $0xc0] sm:$0xff] }
  0x93   : > { %1715 = vmatpush.msrb.mxu1 %v1604_v61  ;;  %v851_v61 = vld [vmem:[#allocation10 + $0x78] sm:$0xff] }
  0x94   : > { %1648 = vmatmul.f32.gmra.mxu1 %v10195_v15 }
  0x95   : > { %1716 = vmatpush.msrb.mxu1 %v1601_v62 }
  0x97   : > { %1717 = vmatpush.msrb.mxu1 %v1598_v1  ;;  %v925_v1 = vld [vmem:[#allocation12 + $0x18] sm:$0xff] }
  0x98   : > { %726 = vmatmul.f32.gmra.mxu0 %v10240_v21  ;;  %808 = vmatmul.f32.gmra.mxu2 %v10240_v21 }
  0x99   : > { %1718 = vmatpush.msrb.mxu1 %v1595_v2  ;;  %v928_v2 = vld [vmem:[#allocation12 + $0x30] sm:$0xff]  ;;  %970 = vperm.xlu1 %9158, %v925_v1   ;;  %v865_v1 = vld [vmem:[#allocation10 + $0xe8] sm:$0xff] }
  0x9a   : > { %985 = vperm.xlu0 %9157, %v928_v2   ;;  %v846_v2 = vld [vmem:[#allocation10 + $0x50] sm:$0xff] }
  0x9b   : > { %1719 = vmatpush.msrb.mxu1 %v1592_v3  ;;  %v853_v3 = vld [vmem:[#allocation10 + $0x88] sm:$0xff] }
  0x9c   : > { %1651 = vmatmul.f32.gmra.mxu1 %v10207_v51 }
  0x9d   : > { %1720 = vmatpush.msrb.mxu1 %v1589_v5 }
  0x9f   : > { %1721 = vmatpush.msrb.mxu1 %v1586_v7  ;;  %v926_v7 = vld [vmem:[#allocation12 + $0x20] sm:$0xff] }
  0xa0   : > { %746 = vmatmul.f32.vlgmr.msrb.gmra.mxu0 %v10167_v47  ;;  %975 = vperm.xlu2 %9159, %v926_v7   ;;  %v937_v7 = vld [vmem:[#allocation12 + $0x78] sm:$0xff] }
  0xa1   : > { %1722 = vmatpush.msrb.mxu1 %v1583_v8  ;;  %v929_v8 = vld [vmem:[#allocation12 + $0x38] sm:$0xff] }
  0xa2   : > { %990 = vperm.xlu1 %9158, %v929_v8   ;;  %v867_v8 = vld [vmem:[#allocation10 + $0xf8] sm:$0xff] }
  0xa3   : > { %1723 = vmatpush.msrb.mxu1 %v1580_v28  ;;  %v931_v28 = vld [vmem:[#allocation12 + $0x48] sm:$0xff] }
  0xa4   : > { %1654 = vmatmul.f32.gmra.mxu1 %v10220_v23  ;;  %1000 = vperm.xlu0 %9157, %v931_v28   ;;  %v848_v28 = vld [vmem:[#allocation10 + $0x60] sm:$0xff] }
  0xa8   : > { %749 = vmatmul.f32.gmra.mxu0 %v10180_v24 }
  0xac   : > { %1657 = vmatmul.f32.gmra.mxu1 %v10227_v44 }
  0xb0   : > { %752 = vmatmul.f32.gmra.mxu0 %v10195_v15 }
  0xb4   : > { %1660 = vmatmul.f32.gmra.mxu1 %v10234_v12 }
  0xb8   : > { %755 = vmatmul.f32.gmra.mxu0 %v10207_v51 }
  0xbc   : > { %1663 = vmatmul.f32.gmra.mxu1 %v10240_v21 }
  0xc0   : > { %758 = vmatmul.f32.gmra.mxu0 %v10220_v23 }
  0xc4   : > { %1724 = vmatmul.f32.vlgmr.msrb.gmra.mxu1 %v10167_v47 }
  0xc8   : > { %761 = vmatmul.f32.gmra.mxu0 %v10227_v44 }
  0xcc   : > { %1727 = vmatmul.f32.gmra.mxu1 %v10180_v24 }
  0xd0   : > { %764 = vmatmul.f32.gmra.mxu0 %v10234_v12 }
  0xd4   : > { %1730 = vmatmul.f32.gmra.mxu1 %v10195_v15 }
  0xd8   : > { %767 = vmatmul.f32.gmra.mxu0 %v10240_v21 }
  0xdc   : > { %1733 = vmatmul.f32.gmra.mxu1 %v10207_v51 }
  0xdd   : > { %v10261_v9 = vpop.f32.mrf.mxu0 }
  0xe3   : > { %v788_v10 = vpop.f32.mrf.mxu2 }
  0xe4   : > { %1736 = vmatmul.f32.gmra.mxu1 %v10220_v23 }
  0xe5   : > { %v10264_v11 = vpop.f32.mrf.mxu0 }
  0xeb   : > { %v791_v63 = vpop.f32.mrf.mxu2 }
  0xec   : > { %1739 = vmatmul.f32.gmra.mxu1 %v10227_v44 }
  0xed   : > { %v10267_v6 = vpop.f32.mrf.mxu0 }
  0xf3   : > { %v794_v16 = vpop.f32.mrf.mxu2 }
  0xf4   : > { %1742 = vmatmul.f32.gmra.mxu1 %v10234_v12 }
  0xf5   : > { %v10270_v17 = vpop.f32.mrf.mxu0 }
  0xfb   : > { %v797_v18 = vpop.f32.mrf.mxu2 }
  0xfc   : > { %1745 = vmatmul.f32.gmra.mxu1 %v10240_v21 }
  0xfd   : > { %v10273_v19 = vpop.f32.mrf.mxu0 }
 0x101   : > { %v10276_v20 = vpop.f32.mrf.mxu1 }
 0x103   : > { %v800_v35 = vpop.f32.mrf.mxu2 }
 0x105   : > { %v10278_v22 = vpop.f32.mrf.mxu0 }
 0x109   : > { %v10280_v0 = vpop.f32.mrf.mxu1 }
 0x10b   : > { %v803_v25 = vpop.f32.mrf.mxu2 }
 0x10d   : > { %v10282_v26 = vpop.f32.mrf.mxu0 }
 0x111   : > { %v10284_v30 = vpop.f32.mrf.mxu1 }
 0x113   : > { %v806_v29 = vpop.f32.mrf.mxu2 }
 0x115   : > { %v10286_v31 = vpop.f32.mrf.mxu0 }
 0x119   : > { %v10288_v27 = vpop.f32.mrf.mxu1 }
 0x11b   : > { %v809_v32 = vpop.f32.mrf.mxu2 }
 0x11c   : > { %1320 = vmatpush.msra.mxu0 %v809_v32  ;;  %v1612_v32 = vld [vmem:[#allocation9 + $0x290] sm:$0xff] }
 0x11d   : > { %v10290_v39 = vpop.f32.mrf.mxu0 }
 0x11e   : > { %1321 = vmatpush.msra.mxu0 %v806_v29 }
 0x120   : > { %1322 = vmatpush.msra.mxu0 %v803_v25  ;;  %v838_v25 = vld [vmem:[#allocation10 + $0x10] sm:$0xff] }
 0x121   : > { %v10292_v33 = vpop.f32.mrf.mxu1 }
 0x122   : > { %1323 = vmatpush.msra.mxu0 %v800_v35  ;;  %v1621_v35 = vld [vmem:[#allocation9 + $0x2d8] sm:$0xff] }
 0x124   : > { %1324 = vmatpush.msra.mxu0 %v797_v18 }
 0x125   : > { %v750_v34 = vpop.f32.mrf.mxu0 }
 0x126   : > { %1325 = vmatpush.msra.mxu0 %v794_v16  ;;  %v852_v16 = vld [vmem:[#allocation10 + $0x80] sm:$0xff] }
 0x128   : > { %1326 = vmatpush.msra.mxu0 %v791_v63  ;;  %v836_v63 = vld [vmem:[#allocation10] sm:$0xff] }
 0x129   : > { %v10295_v14 = vpop.f32.mrf.mxu1 }
 0x12a   : > { %1327 = vmatpush.msra.mxu0 %v788_v10  ;;  %v855_v10 = vld [vmem:[#allocation10 + $0x98] sm:$0xff] }
 0x12b   : > { %8557 = vmatmul.msk.f32.vlgmr.msra.gmra.mxu0 %vm1108_vm0, %v837_v13  ;;  %v859_v13 = vld [vmem:[#allocation10 + $0xb8] sm:$0xff] }
 0x12d   : > { %v753_v36 = vpop.f32.mrf.mxu0 }
 0x131   : > { %v10298_v4 = vpop.f32.mrf.mxu1 }
 0x133   : > { %8558 = vmatmul.msk.f32.gmra.mxu0 %vm1108_vm0, %v839_v41  ;;  %v856_v41 = vld [vmem:[#allocation10 + $0xa0] sm:$0xff] }
 0x135   : > { %v756_v43 = vpop.f32.mrf.mxu0 }
 0x139   : > { %v10301_v45 = vpop.f32.mrf.mxu1 }
 0x13b   : > { %8559 = vmatmul.msk.f32.gmra.mxu0 %vm1108_vm0, %v841_v40  ;;  %v934_v40 = vld [vmem:[#allocation12 + $0x60] sm:$0xff] }
 0x13c   : > { %1015 = vperm.xlu0 %9157, %v934_v40   ;;  %v872_v40 = vld [vmem:[#allocation10 + $0x120] sm:$0xff] }
 0x13d   : > { %v759_v46 = vpop.f32.mrf.mxu0 }
 0x141   : > { %v10304_v48 = vpop.f32.mrf.mxu1 }
 0x143   : > { %8560 = vmatmul.msk.f32.gmra.mxu0 %vm1108_vm0, %v843_v37  ;;  %v1597_v37 = vld [vmem:[#allocation9 + $0x218] sm:$0xff] }
 0x144   : > { %1030 = vperm.xlu0 %9157, %v937_v7   ;;  %v880_v7 = vld [vmem:[#allocation10 + $0x160] sm:$0xff] }
 0x145   : > { %v762_v49 = vpop.f32.mrf.mxu0 }
 0x149   : > { %v10307_v53 = vpop.f32.mrf.mxu1 }
 0x14b   : > { %8561 = vmatmul.msk.f32.gmra.mxu0 %vm1108_vm0, %v845_v52  ;;  %v1594_v52 = vld [vmem:[#allocation9 + $0x200] sm:$0xff] }
 0x14d   : > { %v765_v54 = vpop.f32.mrf.mxu0 }
 0x151   : > { %v10310_v42 = vpop.f32.mrf.mxu1 }
 0x153   : > { %8562 = vmatmul.msk.f32.gmra.mxu0 %vm1108_vm0, %v847_v55  ;;  %v858_v55 = vld [vmem:[#allocation10 + $0xb0] sm:$0xff] }
 0x155   : > { %v768_v50 = vpop.f32.mrf.mxu0 }
 0x156   : > { %1202 = vmatpush.msrb.mxu2 %v768_v50  ;;  %9024 = vmatpush.msra.mxu3 %v768_v50  ;;  %v1776_v50 = vld [vmem:[#allocation10 + $0x1f8] sm:$0xff] }
 0x158   : > { %1203 = vmatpush.msrb.mxu2 %v765_v54  ;;  %9025 = vmatpush.msra.mxu3 %v765_v54  ;;  %v842_v54 = vld [vmem:[#allocation10 + $0x30] sm:$0xff] }
 0x159   : > { %v10313_v38 = vpop.f32.mrf.mxu1 }
 0x15a   : > { %1204 = vmatpush.msrb.mxu2 %v762_v49  ;;  %9026 = vmatpush.msra.mxu3 %v762_v49  ;;  %v861_v49 = vld [vmem:[#allocation10 + $0xc8] sm:$0xff] }
 0x15b   : > { %8563 = vmatmul.msk.f32.gmra.mxu0 %vm1108_vm0, %v849_v58  ;;  %v1585_v58 = vld [vmem:[#allocation9 + $0x1b8] sm:$0xff] }
 0x15c   : > { %1205 = vmatpush.msrb.mxu2 %v759_v46  ;;  %9027 = vmatpush.msra.mxu3 %v759_v46  ;;  %v1600_v46 = vld [vmem:[#allocation9 + $0x230] sm:$0xff] }
 0x15e   : > { %1206 = vmatpush.msrb.mxu2 %v756_v43  ;;  %9028 = vmatpush.msra.mxu3 %v756_v43  ;;  %v1603_v43 = vld [vmem:[#allocation9 + $0x248] sm:$0xff] }
 0x160   : > { %1207 = vmatpush.msrb.mxu2 %v753_v36  ;;  %9029 = vmatpush.msra.mxu3 %v753_v36  ;;  %v840_v36 = vld [vmem:[#allocation10 + $0x20] sm:$0xff] }
 0x161   : > { %v10316_v62 = vpop.f32.mrf.mxu1 }
 0x162   : > { %1208 = vmatpush.msrb.mxu2 %v750_v34  ;;  %9030 = vmatpush.msra.mxu3 %v750_v34  ;;  %v1606_v34 = vld [vmem:[#allocation9 + $0x260] sm:$0xff] }
 0x163   : > { %8564 = vmatmul.msk.f32.gmra.mxu0 %vm1108_vm0, %v851_v61  ;;  %v1778_v61 = vld [vmem:[#allocation10 + $0x208] sm:$0xff] }
 0x164   : > { %1209 = vmatpush.msrb.mxu2 %v10290_v39  ;;  %9031 = vmatpush.msra.mxu3 %v10290_v39  ;;  %v1609_v39 = vld [vmem:[#allocation9 + $0x278] sm:$0xff] }
 0x166   : > { %1210 = vmatpush.msrb.mxu2 %v10286_v31  ;;  %9032 = vmatpush.msra.mxu3 %v10286_v31  ;;  %v1615_v31 = vld [vmem:[#allocation9 + $0x2a8] sm:$0xff] }
 0x168   : > { %1211 = vmatpush.msrb.mxu2 %v10282_v26  ;;  %9033 = vmatpush.msra.mxu3 %v10282_v26  ;;  %v854_v26 = vld [vmem:[#allocation10 + $0x90] sm:$0xff] }
 0x169   : > { %v1740_v5 = vpop.f32.mrf.mxu1 }
 0x16a   : > { %1212 = vmatpush.msrb.mxu2 %v10278_v22  ;;  %9034 = vmatpush.msra.mxu3 %v10278_v22  ;;  %v1618_v22 = vld [vmem:[#allocation9 + $0x2c0] sm:$0xff] }
 0x16b   : > { %8565 = vmatmul.msk.f32.gmra.mxu0 %vm1108_vm0, %v853_v3  ;;  %v862_v3 = vld [vmem:[#allocation10 + $0xd0] sm:$0xff] }
 0x16c   : > { %1213 = vmatpush.msrb.mxu2 %v10273_v19  ;;  %9035 = vmatpush.msra.mxu3 %v10273_v19  ;;  %v932_v19 = vld [vmem:[#allocation12 + $0x50] sm:$0xff] }
 0x16d   : > { %1005 = vperm.xlu1 %9158, %v932_v19   ;;  %v850_v19 = vld [vmem:[#allocation10 + $0x70] sm:$0xff] }
 0x16e   : > { %1214 = vmatpush.msrb.mxu2 %v10270_v17  ;;  %9036 = vmatpush.msra.mxu3 %v10270_v17  ;;  %v927_v17 = vld [vmem:[#allocation12 + $0x28] sm:$0xff] }
 0x16f   : > { %980 = vperm.xlu2 %9159, %v927_v17   ;;  %v869_v17 = vld [vmem:[#allocation10 + $0x108] sm:$0xff] }
 0x170   : > { %1215 = vmatpush.msrb.mxu2 %v10267_v6  ;;  %9037 = vmatpush.msra.mxu3 %v10267_v6  ;;  %v1624_v6 = vld [vmem:[#allocation9 + $0x2f0] sm:$0xff] }
 0x171   : > { %v1743_v18 = vpop.f32.mrf.mxu1 }
 0x172   : > { %1216 = vmatpush.msrb.mxu2 %v10264_v11  ;;  %9038 = vmatpush.msra.mxu3 %v10264_v11  ;;  %v857_v11 = vld [vmem:[#allocation10 + $0xa8] sm:$0xff] }
 0x173   : > { %8566 = vmatmul.msk.f32.gmra.mxu0 %vm1108_vm0, %v855_v10  ;;  %v864_v10 = vld [vmem:[#allocation10 + $0xe0] sm:$0xff] }
 0x174   : > { %1217 = vmatpush.msrb.mxu2 %v10261_v9  ;;  %9039 = vmatpush.msra.mxu3 %v10261_v9  ;;  %v930_v9 = vld [vmem:[#allocation12 + $0x40] sm:$0xff] }
 0x175   : > { %1218 = vmatmul.f32.vlgmr.msrb.gmra.mxu2 %v836_v63  ;;  %1242 = vmatmul.f32.vlgmr.msra.gmra.mxu3 %v852_v16  ;;  %v1782_v63 = vld [vmem:[#allocation10 + $0x228] sm:$0xff]  ;;  %v938_v16 = vld [vmem:[#allocation12 + $0x80] sm:$0xff] }
 0x176   : > { %1667 = vmatpush.msra.mxu2 %v1624_v6  ;;  %v866_v6 = vld [vmem:[#allocation10 + $0xf0] sm:$0xff] }
 0x177   : > { %995 = vperm.xlu2 %9159, %v930_v9  }
 0x178   : > { %1668 = vmatpush.msra.mxu2 %v1621_v35  ;;  %v1784_v35 = vld [vmem:[#allocation10 + $0x238] sm:$0xff] }
 0x179   : > { %v1746_v29 = vpop.f32.mrf.mxu1 }
 0x17a   : > { %1669 = vmatpush.msra.mxu2 %v1618_v22  ;;  %2259 = vmatpush.msra.mxu1 %v1746_v29  ;;  %v936_v22 = vld [vmem:[#allocation12 + $0x70] sm:$0xff]  ;;  %v1786_v29 = vld [vmem:[#allocation10 + $0x248] sm:$0xff] }
 0x17b   : > { %8567 = vmatmul.msk.f32.gmra.mxu0 %vm1108_vm0, %v857_v11 }
 0x17c   : > { %1670 = vmatpush.msra.mxu2 %v1615_v31  ;;  %2260 = vmatpush.msra.mxu1 %v1743_v18  ;;  %v940_v31 = vld [vmem:[#allocation12 + $0x90] sm:$0xff] }
 0x17d   : > { %1221 = vmatmul.f32.gmra.mxu2 %v838_v25  ;;  %1245 = vmatmul.f32.gmra.mxu3 %v854_v26  ;;  %v871_v25 = vld [vmem:[#allocation10 + $0x118] sm:$0xff]  ;;  %v868_v26 = vld [vmem:[#allocation10 + $0x100] sm:$0xff] }
 0x17e   : > { %1671 = vmatpush.msra.mxu2 %v1612_v32  ;;  %2261 = vmatpush.msra.mxu1 %v1740_v5  ;;  %v1780_v5 = vld [vmem:[#allocation10 + $0x218] sm:$0xff]  ;;  %v873_v32 = vld [vmem:[#allocation10 + $0x128] sm:$0xff] }
 0x17f   : > { %1045 = vperm.xlu0 %9157, %v940_v31  }
 0x180   : > { %1672 = vmatpush.msra.mxu2 %v1609_v39  ;;  %2262 = vmatpush.msra.mxu1 %v10316_v62  ;;  %v933_v62 = vld [vmem:[#allocation12 + $0x58] sm:$0xff]  ;;  %v870_v39 = vld [vmem:[#allocation10 + $0x110] sm:$0xff] }
 0x181   : > { %1010 = vperm.xlu2 %9159, %v933_v62   ;;  %v1796_v62 = vld [vmem:[#allocation10 + $0x298] sm:$0xff] }
 0x182   : > { %1673 = vmatpush.msra.mxu2 %v1606_v34  ;;  %2263 = vmatpush.msra.mxu1 %v10313_v38  ;;  %v1582_v38 = vld [vmem:[#allocation9 + $0x1a0] sm:$0xff]  ;;  %v1788_v34 = vld [vmem:[#allocation10 + $0x258] sm:$0xff] }
 0x183   : > { %8568 = vmatmul.msk.f32.gmra.mxu0 %vm1108_vm0, %v859_v13  ;;  %v941_v13 = vld [vmem:[#allocation12 + $0x98] sm:$0xff] }
 0x184   : > { %1674 = vmatpush.msra.mxu2 %v1603_v43  ;;  %2264 = vmatpush.msra.mxu1 %v10310_v42  ;;  %v935_v42 = vld [vmem:[#allocation12 + $0x68] sm:$0xff]  ;;  %v875_v43 = vld [vmem:[#allocation10 + $0x138] sm:$0xff] }
 0x185   : > { %1224 = vmatmul.f32.gmra.mxu2 %v840_v36  ;;  %1248 = vmatmul.f32.gmra.mxu3 %v856_v41  ;;  %v2563_v36 = vld [vmem:[#allocation9 + $0x468] sm:$0xff] }
 0x186   : > { %1675 = vmatpush.msra.mxu2 %v1600_v46  ;;  %2265 = vmatpush.msra.mxu1 %v10307_v53  ;;  %v863_v53 = vld [vmem:[#allocation10 + $0xd8] sm:$0xff]  ;;  %v1790_v46 = vld [vmem:[#allocation10 + $0x268] sm:$0xff] }
 0x187   : > { %1020 = vperm.xlu1 %9158, %v935_v42   ;;  %2566 = vmatpush.msrb.mxu3 %v2563_v36  ;;  %v887_v36 = vld [vmem:[#allocation10 + $0x198] sm:$0xff] }
 0x188   : > { %1676 = vmatpush.msra.mxu2 %v1597_v37  ;;  %2266 = vmatpush.msra.mxu1 %v10304_v48  ;;  %v1579_v48 = vld [vmem:[#allocation9 + $0x188] sm:$0xff] }
 0x189   : > { %8588 = vmatmul.msk.f32.vlgmr.msra.gmra.mxu1 %vm1108_vm0, %v1776_v50  ;;  %1025 = vperm.xlu2 %9159, %v936_v22   ;;  %v939_v37 = vld [vmem:[#allocation12 + $0x88] sm:$0xff]  ;;  %v1792_v50 = vld [vmem:[#allocation10 + $0x278] sm:$0xff]  ;;  %v882_v22 = vld [vmem:[#allocation10 + $0x170] sm:$0xff] }
 0x18a   : > { %1677 = vmatpush.msra.mxu2 %v1594_v52  ;;  %v877_v52 = vld [vmem:[#allocation10 + $0x148] sm:$0xff] }
 0x18b   : > { %8569 = vmatmul.msk.f32.gmra.mxu0 %vm1108_vm0, %v861_v49 }
 0x18c   : > { %1678 = vmatpush.msra.mxu2 %v1591_v56  ;;  %v943_v56 = vld [vmem:[#allocation12 + $0xa8] sm:$0xff] }
 0x18d   : > { %1227 = vmatmul.f32.gmra.mxu2 %v842_v54  ;;  %1251 = vmatmul.f32.gmra.mxu3 %v858_v55  ;;  %v2560_v54 = vld [vmem:[#allocation9 + $0x450] sm:$0xff] }
 0x18e   : > { %1679 = vmatpush.msra.mxu2 %v1588_v57  ;;  %2567 = vmatpush.msrb.mxu3 %v2560_v54  ;;  %v874_v55 = vld [vmem:[#allocation10 + $0x130] sm:$0xff]  ;;  %v879_v57 = vld [vmem:[#allocation10 + $0x158] sm:$0xff]  ;;  %v1802_v54 = vld [vmem:[#allocation10 + $0x2c8] sm:$0xff] }
 0x18f   : > { %1035 = vperm.xlu1 %9158, %v938_v16   ;;  %1060 = vperm.xlu0 %9157, %v943_v56   ;;  %v2561_v16 = vld [vmem:[#allocation9 + $0x458] sm:$0xff] }
 0x190   : > { %1680 = vmatpush.msra.mxu2 %v1585_v58  ;;  %v876_v58 = vld [vmem:[#allocation10 + $0x140] sm:$0xff] }
 0x191   : > { %8589 = vmatmul.msk.f32.gmra.mxu1 %vm1108_vm0, %v1778_v61  ;;  %1040 = vperm.xlu2 %9159, %v939_v37   ;;  %v881_v61 = vld [vmem:[#allocation10 + $0x168] sm:$0xff] }
 0x192   : > { %1681 = vmatpush.msra.mxu2 %v1582_v38  ;;  %v2557_v38 = vld [vmem:[#allocation9 + $0x438] sm:$0xff]  ;;  %v2543_v37 = vld [vmem:[#allocation9 + $0x3c8] sm:$0xff] }
 0x193   : > { %8570 = vmatmul.msk.f32.gmra.mxu0 %vm1108_vm0, %v863_v53  ;;  %v1794_v53 = vld [vmem:[#allocation10 + $0x288] sm:$0xff]  ;;  %2568 = vmatpush.msrb.mxu3 %v2557_v38 }
 0x194   : > { %1682 = vmatpush.msra.mxu2 %v1579_v48  ;;  %v878_v48 = vld [vmem:[#allocation10 + $0x150] sm:$0xff] }
 0x195   : > { %1230 = vmatmul.f32.gmra.mxu2 %v844_v59  ;;  %1254 = vmatmul.f32.gmra.mxu3 %v860_v60  ;;  %v944_v59 = vld [vmem:[#allocation12 + $0xb0] sm:$0xff] }
 0x197   : > { %1050 = vperm.xlu1 %9158, %v941_v13  }
 0x199   : > { %8590 = vmatmul.msk.f32.gmra.mxu1 %vm1108_vm0, %v1780_v5  ;;  %v10389_v5 = vpop.permute.xlu0 %955 }
 0x19b   : > { %8571 = vmatmul.msk.f32.gmra.mxu0 %vm1108_vm0, %v865_v1  ;;  %v942_v1 = vld [vmem:[#allocation12 + $0xa0] sm:$0xff] }
 0x19c   : > { %1055 = vperm.xlu2 %9159, %v942_v1  }
 0x19d   : > { %1233 = vmatmul.f32.gmra.mxu2 %v846_v2  ;;  %1257 = vmatmul.f32.gmra.mxu3 %v862_v3  ;;  %v883_v3 = vld [vmem:[#allocation10 + $0x178] sm:$0xff] }
 0x19f   : > { %1065 = vperm.xlu1 %9158, %v944_v59  }
 0x1a1   : > { %8591 = vmatmul.msk.f32.gmra.mxu1 %vm1108_vm0, %v1782_v63  ;;  %v946_v63 = vld [vmem:[#allocation12 + $0xc0] sm:$0xff] }
 0x1a2   : > { %1075 = vperm.xlu0 %9157, %v946_v63   ;;  %v2531_v63 = vld [vmem:[#allocation9 + $0x368] sm:$0xff] }
 0x1a3   : > { %8572 = vmatmul.msk.f32.gmra.mxu0 %vm1108_vm0, %v867_v8  ;;  %v10391_v8 = vpop.permute.xlu2 %975 }
 0x1a5   : > { %1236 = vmatmul.f32.gmra.mxu2 %v848_v28  ;;  %1260 = vmatmul.f32.gmra.mxu3 %v864_v10  ;;  %v1798_v28 = vld [vmem:[#allocation10 + $0x2a8] sm:$0xff]  ;;  %v2564_v10 = vld [vmem:[#allocation9 + $0x470] sm:$0xff] }
 0x1a6   : > { %2607 = vmatpush.msrb.mxu0 %v2564_v10  ;;  %v2545_v10 = vld [vmem:[#allocation9 + $0x3d8] sm:$0xff] }
 0x1a8   : > { %v10353_v18 = vpop.f32.mrf.mxu0  ;;  %2608 = vmatpush.msrb.mxu0 %v2561_v16 }
 0x1a9   : > { %8592 = vmatmul.msk.f32.gmra.mxu1 %vm1108_vm0, %v1784_v35  ;;  %v2558_v35 = vld [vmem:[#allocation9 + $0x440] sm:$0xff] }
 0x1aa   : > { %2609 = vmatpush.msrb.mxu0 %v2558_v35  ;;  %v1804_v35 = vld [vmem:[#allocation10 + $0x2d8] sm:$0xff] }
 0x1ab   : > { %8573 = vmatmul.msk.f32.gmra.mxu0 %vm1108_vm0, %v869_v17 }
 0x1ad   : > { %1239 = vmatmul.f32.gmra.mxu2 %v850_v19  ;;  %1263 = vmatmul.f32.gmra.mxu3 %v866_v6  ;;  %v885_v19 = vld [vmem:[#allocation10 + $0x188] sm:$0xff]  ;;  %v10396_v6 = vpop.permute.xlu1 %965 }
 0x1b0   : > { %v10357_v11 = vpop.f32.mrf.mxu0 }
 0x1b1   : > { %8593 = vmatmul.msk.f32.gmra.mxu1 %vm1108_vm0, %v1786_v29  ;;  %v1800_v29 = vld [vmem:[#allocation10 + $0x2b8] sm:$0xff] }
 0x1b3   : > { %8574 = vmatmul.msk.f32.gmra.mxu0 %vm1108_vm0, %v871_v25  ;;  %v10398_v25 = vpop.permute.xlu0 %960 }
 0x1b5   : > { %1266 = vmatmul.f32.gmra.mxu3 %v868_v26  ;;  %1683 = vmatmul.f32.vlgmr.msra.gmra.mxu2 %v10167_v47  ;;  %v2555_v26 = vld [vmem:[#allocation9 + $0x428] sm:$0xff] }
 0x1b6   : > { %2610 = vmatpush.msrb.mxu0 %v2555_v26  ;;  %v2528_v26 = vld [vmem:[#allocation9 + $0x350] sm:$0xff] }
 0x1b8   : > { %v10362_v9 = vpop.f32.mrf.mxu0 }
 0x1b9   : > { %8594 = vmatmul.msk.f32.gmra.mxu1 %vm1108_vm0, %v1788_v34  ;;  %v2549_v34 = vld [vmem:[#allocation9 + $0x3f8] sm:$0xff] }
 0x1bb   : > { %8575 = vmatmul.msk.f32.gmra.mxu0 %vm1108_vm0, %v873_v32  ;;  %v2552_v32 = vld [vmem:[#allocation9 + $0x410] sm:$0xff] }
 0x1bc   : > { %2611 = vmatpush.msrb.mxu0 %v2552_v32 }
 0x1bd   : > { %1269 = vmatmul.f32.gmra.mxu3 %v870_v39  ;;  %1686 = vmatmul.f32.gmra.mxu2 %v10180_v24  ;;  %v947_v39 = vld [vmem:[#allocation12 + $0xc8] sm:$0xff] }
 0x1be   : > { %1080 = vperm.xlu1 %9158, %v947_v39   ;;  %2612 = vmatpush.msrb.mxu0 %v2549_v34  ;;  %v2525_v34 = vld [vmem:[#allocation9 + $0x338] sm:$0xff] }
 0x1c0   : > { %v10367_v41 = vpop.f32.mrf.mxu0 }
 0x1c1   : > { %8595 = vmatmul.msk.f32.gmra.mxu1 %vm1108_vm0, %v1790_v46  ;;  %v10407_v46 = vpop.permute.xlu1 %970 }
 0x1c3   : > { %8576 = vmatmul.msk.f32.gmra.mxu0 %vm1108_vm0, %v875_v43  ;;  %v2546_v43 = vld [vmem:[#allocation9 + $0x3e0] sm:$0xff] }
 0x1c4   : > { %2613 = vmatpush.msrb.mxu0 %v2546_v43 }
 0x1c5   : > { %1272 = vmatmul.f32.gmra.mxu3 %v872_v40  ;;  %1689 = vmatmul.f32.gmra.mxu2 %v10195_v15  ;;  %v884_v40 = vld [vmem:[#allocation10 + $0x180] sm:$0xff] }
 0x1c6   : > { %2614 = vmatpush.msrb.mxu0 %v2543_v37  ;;  %v2536_v37 = vld [vmem:[#allocation9 + $0x390] sm:$0xff] }
 0x1c8   : > { %v10372_v49 = vpop.f32.mrf.mxu0 }
 0x1c9   : > { %8596 = vmatmul.msk.f32.gmra.mxu1 %vm1108_vm0, %v1792_v50  ;;  %v10401_v31 = vpop.permute.xlu2 %980  ;;  %v2540_v50 = vld [vmem:[#allocation9 + $0x3b0] sm:$0xff] }
 0x1ca   : > { %2615 = vmatpush.msrb.mxu0 %v2540_v50 }
 0x1cb   : > { %8577 = vmatmul.msk.f32.gmra.mxu0 %vm1108_vm0, %v877_v52  ;;  %v2554_v52 = vld [vmem:[#allocation9 + $0x420] sm:$0xff] }
 0x1cc   : > { %2569 = vmatpush.msrb.mxu3 %v2554_v52  ;;  %v2522_v52 = vld [vmem:[#allocation9 + $0x320] sm:$0xff] }
 0x1cd   : > { %1275 = vmatmul.f32.gmra.mxu3 %v874_v55  ;;  %1692 = vmatmul.f32.gmra.mxu2 %v10207_v51  ;;  %v10410_v55 = vpop.permute.xlu0 %985 }
 0x1d0   : > { %v10377_v42 = vpop.f32.mrf.mxu0 }
 0x1d1   : > { %8597 = vmatmul.msk.f32.gmra.mxu1 %vm1108_vm0, %v1794_v53  ;;  %v996_v56 = vpop.permute.xlu2 %995  ;;  %v2537_v53 = vld [vmem:[#allocation9 + $0x398] sm:$0xff] }
 0x1d2   : > { %2616 = vmatpush.msrb.mxu0 %v2537_v53  ;;  %v2519_v53 = vld [vmem:[#allocation9 + $0x308] sm:$0xff] }
 0x1d3   : > { %8578 = vmatmul.msk.f32.gmra.mxu0 %vm1108_vm0, %v879_v57  ;;  %v2551_v57 = vld [vmem:[#allocation9 + $0x408] sm:$0xff] }
 0x1d4   : > { %2570 = vmatpush.msrb.mxu3 %v2551_v57  ;;  %v888_v57 = vld [vmem:[#allocation10 + $0x1a0] sm:$0xff] }
 0x1d5   : > { %1278 = vmatmul.f32.gmra.mxu3 %v876_v58  ;;  %1695 = vmatmul.f32.gmra.mxu2 %v10220_v23  ;;  %v945_v58 = vld [vmem:[#allocation12 + $0xb8] sm:$0xff]  ;;  %v1001_v39 = vpop.permute.xlu0 %1000 }
 0x1d6   : > { %1070 = vperm.xlu2 %9159, %v945_v58   ;;  %v2533_v58 = vld [vmem:[#allocation9 + $0x378] sm:$0xff] }
 0x1d8   : > { %v10382_v60 = vpop.f32.mrf.mxu0 }
 0x1d9   : > { %8598 = vmatmul.msk.f32.gmra.mxu1 %vm1108_vm0, %v1796_v62  ;;  %v2534_v62 = vld [vmem:[#allocation9 + $0x380] sm:$0xff] }
 0x1da   : > { %2617 = vmatpush.msrb.mxu0 %v2534_v62 }
 0x1db   : > { %8579 = vmatmul.msk.f32.gmra.mxu0 %vm1108_vm0, %v881_v61  ;;  %v889_v61 = vld [vmem:[#allocation10 + $0x1a8] sm:$0xff] }
 0x1dc   : > { %2618 = vmatpush.msrb.mxu0 %v2531_v63  ;;  %v2527_v63 = vld [vmem:[#allocation9 + $0x348] sm:$0xff] }
 0x1dd   : > { %1281 = vmatmul.f32.gmra.mxu3 %v878_v48  ;;  %1698 = vmatmul.f32.gmra.mxu2 %v10227_v44  ;;  %v2548_v48 = vld [vmem:[#allocation9 + $0x3f0] sm:$0xff] }
 0x1de   : > { %2571 = vmatpush.msrb.mxu3 %v2548_v48  ;;  %2619 = vmatpush.msrb.mxu0 %v2528_v26  ;;  %v2530_v48 = vld [vmem:[#allocation9 + $0x360] sm:$0xff]  ;;  %v2524_v26 = vld [vmem:[#allocation9 + $0x330] sm:$0xff] }
 0x1e0   : > { %v10387_v2 = vpop.f32.mrf.mxu0  ;;  %2572 = vmatpush.msrb.mxu3 %v2545_v10  ;;  %2620 = vmatpush.msrb.mxu0 %v2525_v34 }
 0x1e1   : > { %8599 = vmatmul.msk.f32.gmra.mxu1 %vm1108_vm0, %v1798_v28  ;;  %v886_v28 = vld [vmem:[#allocation10 + $0x190] sm:$0xff] }
 0x1e2   : > { %2621 = vmatpush.msrb.mxu0 %v2522_v52  ;;  %v2518_v52 = vld [vmem:[#allocation9 + $0x300] sm:$0xff] }
 0x1e3   : > { %8580 = vmatmul.msk.f32.gmra.mxu0 %vm1108_vm0, %v883_v3 }
 0x1e4   : > { %2622 = vmatpush.msrb.mxu0 %v2519_v53  ;;  %v1011_v53 = vpop.permute.xlu2 %1010 }
 0x1e5   : > { %1284 = vmatmul.f32.gmra.mxu3 %v880_v7  ;;  %1701 = vmatmul.f32.gmra.mxu2 %v10234_v12 }
 0x1e8   : > { %v1353_v17 = vpop.f32.mrf.mxu0 }
 0x1e9   : > { %8600 = vmatmul.msk.f32.gmra.mxu1 %vm1108_vm0, %v1800_v29 }
 0x1eb   : > { %8581 = vmatmul.msk.f32.gmra.mxu0 %vm1108_vm0, %v885_v19 }
 0x1ed   : > { %1287 = vmatmul.f32.gmra.mxu3 %v882_v22  ;;  %1704 = vmatmul.f32.gmra.mxu2 %v10240_v21  ;;  %v10423_v22 = vpop.permute.xlu1 %990 }
 0x1f0   : > { %v10405_v13 = vpop.f32.mrf.mxu0 }
 0x1f1   : > { %8601 = vmatmul.msk.f32.gmra.mxu1 %vm1108_vm0, %v1802_v54 }
 0x1f3   : > { %8582 = vmatmul.msk.f32.gmra.mxu0 %vm1108_vm0, %v887_v36 }
 0x1f5   : > { %1290 = vmatmul.f32.gmra.mxu3 %v884_v40  ;;  %v891_v40 = vld [vmem:[#allocation10 + $0x1b8] sm:$0xff]  ;;  %v1006_v10 = vpop.permute.xlu1 %1005 }
 0x1f8   : > { %v1219_v38 = vpop.f32.mrf.mxu2  ;;  %v1243_v59 = vpop.f32.mrf.mxu3 }
 0x1f9   : > { %v1220_v1 = vadd.f32 %v1219_v38, %v10389_v5  ;;  %v1244_v3 = vadd.f32 %v1243_v59, %v996_v56  ;;  %v10418_v7 = vpop.f32.mrf.mxu0  ;;  %v2542_v5 = vld [vmem:[#allocation9 + $0x3c0] sm:$0xff]  ;;  %8602 = vmatmul.msk.f32.gmra.mxu1 %vm1108_vm0, %v1804_v35 }
 0x1fa   : > { %2573 = vmatpush.msrb.mxu3 %v2542_v5  ;;  %v893_v5 = vld [vmem:[#allocation10 + $0x1c8] sm:$0xff] }
 0x1fb   : > { %v1330_v16 = vadd.f32 %v10353_v18, %v1220_v1  ;;  %v1354_v19 = vadd.f32 %v1353_v17, %v1244_v3  ;;  %8583 = vmatmul.msk.f32.gmra.mxu0 %vm1108_vm0, %v889_v61  ;;  %v949_v18 = vld [vmem:[#allocation12 + $0xd8] sm:$0xff]  ;;  %v2539_v17 = vld [vmem:[#allocation9 + $0x3a8] sm:$0xff] }
 0x1fc   : > { %1090 = vperm.xlu0 %9157, %v949_v18   ;;  %2574 = vmatpush.msrb.mxu3 %v2539_v17  ;;  %v1806_v61 = vld [vmem:[#allocation10 + $0x2e8] sm:$0xff]  ;;  %v890_v17 = vld [vmem:[#allocation10 + $0x1b0] sm:$0xff] }
 0x1fd   : > { %v1422_v29 = vmul.f32 0.5, %v1330_v16  ;;  %v1430_v32 = vmul.f32 0.5, %v1354_v19  ;;  %1293 = vmatmul.f32.gmra.mxu3 %v886_v28 }
 0x1fe   : > { %2575 = vmatpush.msrb.mxu3 %v2536_v37  ;;  %v1808_v37 = vld [vmem:[#allocation10 + $0x2f8] sm:$0xff] }
 0x1ff   : > { %9160 = vtanh.f32 %v1422_v29 }
 0x200   : > { %9162 = vtanh.f32 %v1430_v32  ;;  %v1222_v36 = vpop.f32.mrf.mxu2  ;;  %v1246_v43 = vpop.f32.mrf.mxu3  ;;  %2576 = vmatpush.msrb.mxu3 %v2533_v58 }
 0x201   : > { %v1223_v54 = vadd.f32 %v1222_v36, %v10398_v25  ;;  %v1247_v50 = vadd.f32 %v1246_v43, %v1001_v39  ;;  %v10432_v56 = vpop.f32.mrf.mxu0  ;;  %8603 = vmatmul.msk.f32.gmra.mxu1 %vm1108_vm0, %v1806_v61  ;;  %v2521_v36 = vld [vmem:[#allocation9 + $0x318] sm:$0xff] }
 0x202   : > { %2577 = vmatpush.msrb.mxu3 %v2530_v48  ;;  %v895_v48 = vld [vmem:[#allocation10 + $0x1d8] sm:$0xff] }
 0x203   : > { %v1333_v38 = vadd.f32 %v10357_v11, %v1223_v54  ;;  %v1357_v59 = vadd.f32 %v10405_v13, %v1247_v50  ;;  %8584 = vmatmul.msk.f32.gmra.mxu0 %vm1108_vm0, %v891_v40  ;;  %v950_v11 = vld [vmem:[#allocation12 + $0xe0] sm:$0xff] }
 0x204   : > { %1095 = vperm.xlu1 %9158, %v950_v11   ;;  %2578 = vmatpush.msrb.mxu3 %v2527_v63 }
 0x205   : > { %v9161_v25 = vpop.eup %9160  ;;  %v1423_v62 = vmul.f32 0.5, %v1333_v38  ;;  %v1431_v1 = vmul.f32 0.5, %v1357_v59  ;;  %1296 = vmatmul.f32.gmra.mxu3 %v888_v57  ;;  %v948_v38 = vld [vmem:[#allocation12 + $0xd0] sm:$0xff] }
 0x206   : > { %v9163_v3 = vpop.eup %9162  ;;  %v1484_v28 = vadd.f32 1.0, %v9161_v25  ;;  %v10448_v34 = vpop.f32.mrf.mxu1  ;;  %2579 = vmatpush.msrb.mxu3 %v2524_v26  ;;  %1085 = vperm.xlu2 %9159, %v948_v38  }
 0x207   : > { %v1492_v13 = vadd.f32 1.0, %v9163_v3  ;;  %9164 = vtanh.f32 %v1423_v62  ;;  %v1016_v26 = vpop.permute.xlu0 %1015 }
 0x208   : > { %v1515_v16 = vmul.f32 0.5, %v1484_v28  ;;  %9166 = vtanh.f32 %v1431_v1  ;;  %v1225_v19 = vpop.f32.mrf.mxu2  ;;  %v1249_v35 = vpop.f32.mrf.mxu3  ;;  %2580 = vmatpush.msrb.mxu3 %v2521_v36  ;;  %v892_v28 = vld [vmem:[#allocation10 + $0x1c0] sm:$0xff] }
 0x209   : > { %v1523_v29 = vmul.f32 0.5, %v1492_v13  ;;  %v1226_v32 = vadd.f32 %v1225_v19, %v10396_v6  ;;  %v1250_v39 = vadd.f32 %v1249_v35, %v1006_v10  ;;  %v10445_v18 = vpop.f32.mrf.mxu0  ;;  %8604 = vmatmul.msk.f32.gmra.mxu1 %vm1108_vm0, %v1808_v37  ;;  %v1810_v13 = vld [vmem:[#allocation10 + $0x308] sm:$0xff] }
 0x20a   : > { %1546 = vst [vmem:[%s10442_s21] sm:$0xff] %v1515_v16  ;;  %2581 = vmatpush.msrb.mxu3 %v2518_v52  ;;  %v894_v52 = vld [vmem:[#allocation10 + $0x1d0] sm:$0xff] }
 0x20b   : > { %1554 = vst [vmem:[%s10442_s21 + $0x40] sm:$0xff] %v1523_v29  ;;  %v1336_v43 = vadd.f32 %v10362_v9, %v1226_v32  ;;  %v1360_v40 = vadd.f32 %v10418_v7, %v1250_v39  ;;  %8585 = vmatmul.msk.f32.gmra.mxu0 %vm1108_vm0, %v893_v5  ;;  %v952_v29 = vld [vmem:[#allocation12 + $0xf0] sm:$0x1] }
 0x20c   : > { %1105 = vperm.xlu0 %9157, %v952_v29   ;;  %v951_v29 = vld [vmem:[#allocation12 + $0xe8] sm:$0xff] }
 0x20d   : > { %v9165_v6 = vpop.eup %9164  ;;  %v1424_v54 = vmul.f32 0.5, %v1336_v43  ;;  %v1432_v50 = vmul.f32 0.5, %v1360_v40  ;;  %1299 = vmatmul.f32.gmra.mxu3 %v890_v17  ;;  %v897_v17 = vld [vmem:[#allocation10 + $0x1e8] sm:$0x1] }
 0x20e   : > { %v9167_v57 = vpop.eup %9166  ;;  %v1485_v58 = vadd.f32 1.0, %v9165_v6  ;;  %v10457_v10 = vpop.f32.mrf.mxu1  ;;  %1100 = vperm.xlu2 %9159, %v951_v29  }
 0x20f   : > { %v1493_v9 = vadd.f32 1.0, %v9167_v57  ;;  %9168 = vtanh.f32 %v1424_v54  ;;  %v1812_v57 = vld [vmem:[#allocation10 + $0x318] sm:$0xff] }
 0x210   : > { %v1516_v7 = vmul.f32 0.5, %v1485_v58  ;;  %9170 = vtanh.f32 %v1432_v50  ;;  %v1228_v59 = vpop.f32.mrf.mxu2  ;;  %v1252_v61 = vpop.f32.mrf.mxu3 }
 0x211   : > { %v1524_v25 = vmul.f32 0.5, %v1493_v9  ;;  %v1229_v62 = vadd.f32 %v1228_v59, %v10407_v46  ;;  %v1253_v1 = vadd.f32 %v1252_v61, %v1011_v53  ;;  %v1368_v3 = vpop.f32.mrf.mxu0  ;;  %8605 = vmatmul.msk.f32.gmra.mxu1 %vm1108_vm0, %v1810_v13 }
 0x212   : > { %1547 = vst [vmem:[%s10442_s21 + $0x8] sm:$0xff] %v1516_v7  ;;  %v1021_v7 = vpop.permute.xlu1 %1020 }
 0x213   : > { %1555 = vst [vmem:[%s10442_s21 + $0x48] sm:$0xff] %v1524_v25  ;;  %v1339_v11 = vadd.f32 %v10367_v41, %v1229_v62  ;;  %v1363_v63 = vadd.f32 %v10432_v56, %v1253_v1  ;;  %8586 = vmatmul.msk.f32.gmra.mxu0 %vm1108_vm0, %v895_v48 }
 0x215   : > { %v9169_v16 = vpop.eup %9168  ;;  %v1425_v19 = vmul.f32 0.5, %v1339_v11  ;;  %v1433_v35 = vmul.f32 0.5, %v1363_v63  ;;  %1302 = vmatmul.f32.gmra.mxu3 %v892_v28  ;;  %v896_v28 = vld [vmem:[#allocation10 + $0x1e0] sm:$0x1] }
 0x216   : > { %v9171_v46 = vpop.eup %9170  ;;  %v1486_v5 = vadd.f32 1.0, %v9169_v16  ;;  %v10466_v6 = vpop.f32.mrf.mxu1  ;;  %v1814_v16 = vld [vmem:[#allocation10 + $0x328] sm:$0xff] }
 0x217   : > { %v1494_v32 = vadd.f32 1.0, %v9171_v46  ;;  %9172 = vtanh.f32 %v1425_v19 }
 0x218   : > { %v1517_v41 = vmul.f32 0.5, %v1486_v5  ;;  %9174 = vtanh.f32 %v1433_v35  ;;  %v1231_v56 = vpop.f32.mrf.mxu2  ;;  %v1255_v39 = vpop.f32.mrf.mxu3 }
 0x219   : > { %v1525_v36 = vmul.f32 0.5, %v1494_v32  ;;  %v1232_v43 = vadd.f32 %v1231_v56, %v10391_v8  ;;  %v1256_v40 = vadd.f32 %v1255_v39, %v1016_v26  ;;  %v1371_v37 = vpop.f32.mrf.mxu0  ;;  %8606 = vmatmul.msk.f32.gmra.mxu1 %vm1108_vm0, %v1812_v57  ;;  %v1026_v26 = vpop.permute.xlu2 %1025 }
 0x21a   : > { %1548 = vst [vmem:[%s10442_s21 + $0x10] sm:$0xff] %v1517_v41 }
 0x21b   : > { %1556 = vst [vmem:[%s10442_s21 + $0x50] sm:$0xff] %v1525_v36  ;;  %v1342_v54 = vadd.f32 %v10372_v49, %v1232_v43  ;;  %v1366_v50 = vadd.f32 %v10445_v18, %v1256_v40  ;;  %8587 = vmatmul.msk.f32.gmra.mxu0 %vm1108_vm0, %v897_v17 }
 0x21d   : > { %v9173_v58 = vpop.eup %9172  ;;  %v1426_v53 = vmul.f32 0.5, %v1342_v54  ;;  %v1434_v38 = vmul.f32 0.5, %v1366_v50  ;;  %1305 = vmatmul.f32.gmra.mxu3 %v894_v52  ;;  %v1816_v54 = vld [vmem:[#allocation10 + $0x338] sm:$0xff] }
 0x21e   : > { %v9175_v8 = vpop.eup %9174  ;;  %v1487_v9 = vadd.f32 1.0, %v9173_v58  ;;  %v10477_v11 = vpop.f32.mrf.mxu1 }
 0x21f   : > { %v1495_v59 = vadd.f32 1.0, %v9175_v8  ;;  %9176 = vtanh.f32 %v1426_v53  ;;  %v2565_v8 = vld [vmem:[#allocation9 + $0x478] sm:$0xff] }
 0x220   : > { %v1518_v61 = vmul.f32 0.5, %v1487_v9  ;;  %9178 = vtanh.f32 %v1434_v38  ;;  %v1234_v49 = vpop.f32.mrf.mxu2  ;;  %v1258_v18 = vpop.f32.mrf.mxu3  ;;  %2648 = vmatpush.msra.mxu3 %v2565_v8 }
 0x221   : > { %v1526_v48 = vmul.f32 0.5, %v1495_v59  ;;  %v1235_v25 = vadd.f32 %v1234_v49, %v10401_v31  ;;  %v1259_v62 = vadd.f32 %v1258_v18, %v1021_v7  ;;  %v10474_v1 = vpop.f32.mrf.mxu0  ;;  %8607 = vmatmul.msk.f32.gmra.mxu1 %vm1108_vm0, %v1814_v16  ;;  %v1031_v38 = vpop.permute.xlu0 %1030  ;;  %v2562_v59 = vld [vmem:[#allocation9 + $0x460] sm:$0xff]  ;;  %v2556_v16 = vld [vmem:[#allocation9 + $0x430] sm:$0xff] }
 0x222   : > { %1549 = vst [vmem:[%s10442_s21 + $0x18] sm:$0xff] %v1518_v61  ;;  %2649 = vmatpush.msra.mxu3 %v2562_v59 }
 0x223   : > { %1557 = vst [vmem:[%s10442_s21 + $0x58] sm:$0xff] %v1526_v48  ;;  %v1345_v63 = vadd.f32 %v10377_v42, %v1235_v25  ;;  %v1369_v13 = vadd.f32 %v1368_v3, %v1259_v62  ;;  %2623 = vmatmul.f32.vlgmr.msrb.gmra.mxu0 %v10167_v47  ;;  %v2559_v62 = vld [vmem:[#allocation9 + $0x448] sm:$0xff] }
 0x224   : > { %2650 = vmatpush.msra.mxu3 %v2559_v62 }
 0x225   : > { %v9177_v19 = vpop.eup %9176  ;;  %v1427_v35 = vmul.f32 0.5, %v1345_v63  ;;  %v1435_v46 = vmul.f32 0.5, %v1369_v13  ;;  %1308 = vmatmul.f32.gmra.mxu3 %v896_v28  ;;  %v1818_v13 = vld [vmem:[#allocation10 + $0x348] sm:$0xff] }
 0x226   : > { %v9179_v31 = vpop.eup %9178  ;;  %v1488_v5 = vadd.f32 1.0, %v9177_v19  ;;  %v10487_v43 = vpop.f32.mrf.mxu1  ;;  %2651 = vmatpush.msra.mxu3 %v2556_v16 }
 0x227   : > { %v1496_v32 = vadd.f32 1.0, %v9179_v31  ;;  %9180 = vtanh.f32 %v1427_v35 }
 0x228   : > { %v1519_v42 = vmul.f32 0.5, %v1488_v5  ;;  %9182 = vtanh.f32 %v1435_v46  ;;  %v1237_v3 = vpop.f32.mrf.mxu2  ;;  %v1261_v41 = vpop.f32.mrf.mxu3 }
 0x229   : > { %v1527_v56 = vmul.f32 0.5, %v1496_v32  ;;  %v1238_v39 = vadd.f32 %v1237_v3, %v10410_v55  ;;  %v1262_v17 = vadd.f32 %v1261_v41, %v1026_v26  ;;  %v10484_v36 = vpop.f32.mrf.mxu0  ;;  %8608 = vmatmul.msk.f32.gmra.mxu1 %vm1108_vm0, %v1816_v54  ;;  %v1036_v5 = vpop.permute.xlu1 %1035  ;;  %v2544_v54 = vld [vmem:[#allocation9 + $0x3d0] sm:$0xff] }
 0x22a   : > { %1550 = vst [vmem:[%s10442_s21 + $0x20] sm:$0xff] %v1519_v42  ;;  %v2550_v42 = vld [vmem:[#allocation9 + $0x400] sm:$0xff] }
 0x22b   : > { %1558 = vst [vmem:[%s10442_s21 + $0x60] sm:$0xff] %v1527_v56  ;;  %v1348_v40 = vadd.f32 %v10382_v60, %v1238_v39  ;;  %v1372_v52 = vadd.f32 %v1371_v37, %v1262_v17  ;;  %2626 = vmatmul.f32.gmra.mxu0 %v10180_v24  ;;  %v2547_v17 = vld [vmem:[#allocation9 + $0x3e8] sm:$0xff] }
 0x22d   : > { %v9181_v50 = vpop.eup %9180  ;;  %v1428_v57 = vmul.f32 0.5, %v1348_v40  ;;  %v1436_v58 = vmul.f32 0.5, %v1372_v52  ;;  %2582 = vmatmul.f32.vlgmr.msrb.gmra.mxu3 %v10167_v47  ;;  %v1820_v52 = vld [vmem:[#allocation10 + $0x358] sm:$0xff] }
 0x22e   : > { %v9183_v55 = vpop.eup %9182  ;;  %v1489_v53 = vadd.f32 1.0, %v9181_v50  ;;  %v10498_v25 = vpop.f32.mrf.mxu1 }
 0x22f   : > { %v1497_v9 = vadd.f32 1.0, %v9183_v55  ;;  %9184 = vtanh.f32 %v1428_v57 }
 0x230   : > { %v1520_v60 = vmul.f32 0.5, %v1489_v53  ;;  %9186 = vtanh.f32 %v1436_v58  ;;  %v1240_v37 = vpop.f32.mrf.mxu2  ;;  %v1264_v7 = vpop.f32.mrf.mxu3 }
 0x231   : > { %v1528_v61 = vmul.f32 0.5, %v1497_v9  ;;  %v1241_v49 = vadd.f32 %v1240_v37, %v10423_v22  ;;  %v1265_v18 = vadd.f32 %v1264_v7, %v1031_v38  ;;  %v10495_v48 = vpop.f32.mrf.mxu0  ;;  %8609 = vmatmul.msk.f32.gmra.mxu1 %vm1108_vm0, %v1818_v13  ;;  %v1041_v53 = vpop.permute.xlu2 %1040  ;;  %v2541_v38 = vld [vmem:[#allocation9 + $0x3b8] sm:$0xff]  ;;  %v2538_v37 = vld [vmem:[#allocation9 + $0x3a0] sm:$0xff] }
 0x232   : > { %1551 = vst [vmem:[%s10442_s21 + $0x28] sm:$0xff] %v1520_v60 }
 0x233   : > { %1559 = vst [vmem:[%s10442_s21 + $0x68] sm:$0xff] %v1528_v61  ;;  %v1351_v28 = vadd.f32 %v10387_v2, %v1241_v49  ;;  %v1375_v63 = vadd.f32 %v10474_v1, %v1265_v18  ;;  %2629 = vmatmul.f32.gmra.mxu0 %v10195_v15  ;;  %v2553_v2 = vld [vmem:[#allocation9 + $0x418] sm:$0xff]  ;;  %v2535_v18 = vld [vmem:[#allocation9 + $0x388] sm:$0xff] }
 0x234   : > { %2652 = vmatpush.msra.mxu3 %v2553_v2 }
 0x235   : > { %v9185_v19 = vpop.eup %9184  ;;  %v1429_v22 = vmul.f32 0.5, %v1351_v28  ;;  %v1437_v35 = vmul.f32 0.5, %v1375_v63  ;;  %2585 = vmatmul.f32.gmra.mxu3 %v10180_v24  ;;  %v1822_v28 = vld [vmem:[#allocation10 + $0x368] sm:$0xff]  ;;  %v2532_v63 = vld [vmem:[#allocation9 + $0x370] sm:$0xff] }
 0x236   : > { %v9187_v46 = vpop.eup %9186  ;;  %v1490_v31 = vadd.f32 1.0, %v9185_v19  ;;  %v10509_v39 = vpop.f32.mrf.mxu1  ;;  %2653 = vmatpush.msra.mxu3 %v2550_v42 }
 0x237   : > { %v1498_v1 = vadd.f32 1.0, %v9187_v46  ;;  %9188 = vtanh.f32 %v1429_v22  ;;  %v1046_v22 = vpop.permute.xlu0 %1045 }
 0x238   : > { %v1521_v26 = vmul.f32 0.5, %v1490_v31  ;;  %9190 = vtanh.f32 %v1437_v35  ;;  %v1267_v29 = vpop.f32.mrf.mxu3  ;;  %v10506_v32 = vpop.f32.mrf.mxu2  ;;  %2654 = vmatpush.msra.mxu3 %v2547_v17  ;;  %v2529_v35 = vld [vmem:[#allocation9 + $0x358] sm:$0xff] }
 0x239   : > { %v1529_v3 = vmul.f32 0.5, %v1498_v1  ;;  %v1268_v41 = vadd.f32 %v1267_v29, %v1036_v5  ;;  %v1383_v56 = vpop.f32.mrf.mxu0  ;;  %8610 = vmatmul.msk.f32.gmra.mxu1 %vm1108_vm0, %v1820_v52  ;;  %v2526_v5 = vld [vmem:[#allocation9 + $0x340] sm:$0xff]  ;;  %v2523_v29 = vld [vmem:[#allocation9 + $0x328] sm:$0xff] }
 0x23a   : > { %1552 = vst [vmem:[%s10442_s21 + $0x30] sm:$0xff] %v1521_v26  ;;  %2655 = vmatpush.msra.mxu3 %v2544_v54  ;;  %v1051_v54 = vpop.permute.xlu1 %1050 }
 0x23b   : > { %1560 = vst [vmem:[%s10442_s21 + $0x70] sm:$0xff] %v1529_v3  ;;  %v1378_v40 = vadd.f32 %v10484_v36, %v1268_v41  ;;  %2632 = vmatmul.f32.gmra.mxu0 %v10207_v51  ;;  %v1824_v3 = vld [vmem:[#allocation10 + $0x378] sm:$0xff]  ;;  %v2520_v41 = vld [vmem:[#allocation9 + $0x310] sm:$0xff] }
 0x23c   : > { %2656 = vmatpush.msra.mxu3 %v2541_v38 }
 0x23d   : > { %v9189_v50 = vpop.eup %9188  ;;  %v1438_v57 = vmul.f32 0.5, %v1378_v40  ;;  %2588 = vmatmul.f32.gmra.mxu3 %v10195_v15 }
 0x23e   : > { %v9191_v58 = vpop.eup %9190  ;;  %v1491_v55 = vadd.f32 1.0, %v9189_v50  ;;  %v10519_v49 = vpop.f32.mrf.mxu1  ;;  %2657 = vmatpush.msra.mxu3 %v2538_v37 }
 0x23f   : > { %v1499_v8 = vadd.f32 1.0, %v9191_v58  ;;  %9192 = vtanh.f32 %v1438_v57 }
 0x240   : > { %v1522_v36 = vmul.f32 0.5, %v1491_v55  ;;  %v1270_v9 = vpop.f32.mrf.mxu3  ;;  %v10516_v60 = vpop.f32.mrf.mxu2  ;;  %2658 = vmatpush.msra.mxu3 %v2535_v18 }
 0x241   : > { %v1530_v7 = vmul.f32 0.5, %v1499_v8  ;;  %v1271_v59 = vadd.f32 %v1270_v9, %v1041_v53  ;;  %v1386_v61 = vpop.f32.mrf.mxu0  ;;  %8611 = vmatmul.msk.f32.gmra.mxu1 %vm1108_vm0, %v1822_v28  ;;  %v3504_v53 = vld [vmem:[#allocation9 + $0x5f0] sm:$0xff] }
 0x242   : > { %1553 = vst [vmem:[%s10442_s21 + $0x38] sm:$0xff] %v1522_v36  ;;  %2659 = vmatpush.msra.mxu3 %v2532_v63  ;;  %3547 = vmatpush.msrb.mxu1 %v3504_v53  ;;  %v1826_v36 = vld [vmem:[#allocation10 + $0x388] sm:$0xff] }
 0x243   : > { %1561 = vst [vmem:[%s10442_s21 + $0x78] sm:$0xff] %v1530_v7  ;;  %v1381_v62 = vadd.f32 %v10495_v48, %v1271_v59  ;;  %2635 = vmatmul.f32.gmra.mxu0 %v10220_v23  ;;  %v1056_v59 = vpop.permute.xlu2 %1055 }
 0x244   : > { %2660 = vmatpush.msra.mxu3 %v2529_v35 }
 0x245   : > { %v9193_v13 = vpop.eup %9192  ;;  %v1439_v16 = vmul.f32 0.5, %v1381_v62  ;;  %2591 = vmatmul.f32.gmra.mxu3 %v10207_v51 }
 0x246   : > { %v1500_v19 = vadd.f32 1.0, %v9193_v13  ;;  %v10529_v26 = vpop.f32.mrf.mxu1  ;;  %2661 = vmatpush.msra.mxu3 %v2526_v5 }
 0x247   : > { %9194 = vtanh.f32 %v1439_v16 }
 0x248   : > { %v1531_v46 = vmul.f32 0.5, %v1500_v19  ;;  %v1273_v31 = vpop.f32.mrf.mxu3  ;;  %v10526_v48 = vpop.f32.mrf.mxu2  ;;  %2662 = vmatpush.msra.mxu3 %v2523_v29  ;;  %v1828_v19 = vld [vmem:[#allocation10 + $0x398] sm:$0xff] }
 0x249   : > { %v1274_v2 = vadd.f32 %v1273_v31, %v1046_v22  ;;  %v1389_v1 = vpop.f32.mrf.mxu0  ;;  %8612 = vmatmul.msk.f32.gmra.mxu1 %vm1108_vm0, %v1824_v3  ;;  %v1061_v31 = vpop.permute.xlu0 %1060 }
 0x24a   : > { %1562 = vst [vmem:[%s10442_s21 + $0x80] sm:$0xff] %v1531_v46  ;;  %2663 = vmatpush.msra.mxu3 %v2520_v41 }
 0x24b   : > { %v1384_v42 = vadd.f32 %v1383_v56, %v1274_v2  ;;  %2638 = vmatmul.f32.gmra.mxu0 %v10227_v44 }
 0x24d   : > { %v9195_v17 = vpop.eup %9194  ;;  %v1440_v40 = vmul.f32 0.5, %v1384_v42  ;;  %2594 = vmatmul.f32.gmra.mxu3 %v10220_v23 }
 0x24e   : > { %v1501_v52 = vadd.f32 1.0, %v9195_v17  ;;  %v10537_v38 = vpop.f32.mrf.mxu1 }
 0x24f   : > { %9196 = vtanh.f32 %v1440_v40  ;;  %v1830_v40 = vld [vmem:[#allocation10 + $0x3a8] sm:$0xff] }
 0x250   : > { %v1532_v50 = vmul.f32 0.5, %v1501_v52  ;;  %v1276_v57 = vpop.f32.mrf.mxu3  ;;  %v10534_v58 = vpop.f32.mrf.mxu2 }
 0x251   : > { %v1277_v56 = vadd.f32 %v1276_v57, %v1051_v54  ;;  %v1392_v55 = vpop.f32.mrf.mxu0  ;;  %8613 = vmatmul.msk.f32.gmra.mxu1 %vm1108_vm0, %v1826_v36  ;;  %v1066_v57 = vpop.permute.xlu1 %1065  ;;  %v3498_v36 = vld [vmem:[#allocation9 + $0x5c0] sm:$0xff] }
 0x252   : > { %1563 = vst [vmem:[%s10442_s21 + $0x88] sm:$0xff] %v1532_v50 }
 0x253   : > { %v1387_v8 = vadd.f32 %v1386_v61, %v1277_v56  ;;  %2641 = vmatmul.f32.gmra.mxu0 %v10234_v12 }
 0x255   : > { %v9197_v9 = vpop.eup %9196  ;;  %v1441_v37 = vmul.f32 0.5, %v1387_v8  ;;  %2597 = vmatmul.f32.gmra.mxu3 %v10227_v44 }
 0x256   : > { %v1502_v7 = vadd.f32 1.0, %v9197_v9  ;;  %v10545_v13 = vpop.f32.mrf.mxu1 }
 0x257   : > { %9198 = vtanh.f32 %v1441_v37 }
 0x258   : > { %v1533_v18 = vmul.f32 0.5, %v1502_v7  ;;  %v1279_v62 = vpop.f32.mrf.mxu3  ;;  %v10542_v28 = vpop.f32.mrf.mxu2  ;;  %v3495_v7 = vld [vmem:[#allocation9 + $0x5a8] sm:$0xff] }
 0x259   : > { %v1280_v63 = vadd.f32 %v1279_v62, %v1056_v59  ;;  %v1395_v61 = vpop.f32.mrf.mxu0  ;;  %8614 = vmatmul.msk.f32.gmra.mxu1 %vm1108_vm0, %v1828_v19  ;;  %v3492_v62 = vld [vmem:[#allocation9 + $0x590] sm:$0xff] }
 0x25a   : > { %1564 = vst [vmem:[%s10442_s21 + $0x90] sm:$0xff] %v1533_v18  ;;  %v1832_v18 = vld [vmem:[#allocation10 + $0x3b8] sm:$0xff] }
 0x25b   : > { %v1390_v16 = vadd.f32 %v1389_v1, %v1280_v63  ;;  %2644 = vmatmul.f32.gmra.mxu0 %v10240_v21  ;;  %v3501_v1 = vld [vmem:[#allocation9 + $0x5d8] sm:$0xff] }
 0x25c   : > { %3548 = vmatpush.msrb.mxu1 %v3501_v1 }
 0x25d   : > { %v9199_v22 = vpop.eup %9198  ;;  %v1442_v35 = vmul.f32 0.5, %v1390_v16  ;;  %2600 = vmatmul.f32.gmra.mxu3 %v10234_v12 }
 0x25e   : > { %v1503_v46 = vadd.f32 1.0, %v9199_v22  ;;  %v10553_v41 = vpop.f32.mrf.mxu1  ;;  %3549 = vmatpush.msrb.mxu1 %v3498_v36  ;;  %v1071_v22 = vpop.permute.xlu2 %1070 }
 0x25f   : > { %9200 = vtanh.f32 %v1442_v35  ;;  %v3503_v35 = vld [vmem:[#allocation9 + $0x5e8] sm:$0xff] }
 0x260   : > { %v1534_v5 = vmul.f32 0.5, %v1503_v46  ;;  %v1282_v2 = vpop.f32.mrf.mxu3  ;;  %v10550_v29 = vpop.f32.mrf.mxu2  ;;  %3550 = vmatpush.msrb.mxu1 %v3495_v7  ;;  %v3489_v46 = vld [vmem:[#allocation9 + $0x578] sm:$0xff]  ;;  %3506 = vmatpush.msrb.mxu3 %v3503_v35 }
 0x261   : > { %v1283_v42 = vadd.f32 %v1282_v2, %v1061_v31  ;;  %v1398_v3 = vpop.f32.mrf.mxu0  ;;  %8615 = vmatmul.msk.f32.gmra.mxu1 %vm1108_vm0, %v1830_v40  ;;  %v3500_v2 = vld [vmem:[#allocation9 + $0x5d0] sm:$0xff]  ;;  %v3485_v35 = vld [vmem:[#allocation9 + $0x558] sm:$0xff] }
 0x262   : > { %1565 = vst [vmem:[%s10442_s21 + $0x98] sm:$0xff] %v1534_v5  ;;  %3551 = vmatpush.msrb.mxu1 %v3492_v62  ;;  %3507 = vmatpush.msrb.mxu3 %v3500_v2 }
 0x263   : > { %v1393_v17 = vadd.f32 %v1392_v55, %v1283_v42  ;;  %v3486_v42 = vld [vmem:[#allocation9 + $0x560] sm:$0xff] }
 0x264   : > { %3552 = vmatpush.msrb.mxu1 %v3489_v46 }
 0x265   : > { %v9201_v52 = vpop.eup %9200  ;;  %v1443_v54 = vmul.f32 0.5, %v1393_v17  ;;  %2603 = vmatmul.f32.gmra.mxu3 %v10240_v21 }
 0x266   : > { %v1504_v50 = vadd.f32 1.0, %v9201_v52  ;;  %v10560_v55 = vpop.f32.mrf.mxu1  ;;  %3553 = vmatpush.msrb.mxu1 %v3486_v42  ;;  %v3497_v52 = vld [vmem:[#allocation9 + $0x5b8] sm:$0xff] }
 0x267   : > { %9202 = vtanh.f32 %v1443_v54  ;;  %v3483_v54 = vld [vmem:[#allocation9 + $0x548] sm:$0xff]  ;;  %3508 = vmatpush.msrb.mxu3 %v3497_v52 }
 0x268   : > { %v1535_v56 = vmul.f32 0.5, %v1504_v50  ;;  %v1285_v53 = vpop.f32.mrf.mxu3  ;;  %v1702_v8 = vpop.f32.mrf.mxu2  ;;  %3554 = vmatpush.msrb.mxu1 %v3483_v54 }
 0x269   : > { %v1286_v9 = vadd.f32 %v1285_v53, %v1066_v57  ;;  %v10557_v37 = vpop.f32.mrf.mxu0  ;;  %8616 = vmatmul.msk.f32.gmra.mxu1 %vm1108_vm0, %v1832_v18  ;;  %v1834_v57 = vld [vmem:[#allocation10 + $0x3c8] sm:$0xff]  ;;  %v3480_v53 = vld [vmem:[#allocation9 + $0x530] sm:$0xff] }
 0x26a   : > { %1566 = vst [vmem:[%s10442_s21 + $0xa0] sm:$0xff] %v1535_v56  ;;  %v3494_v56 = vld [vmem:[#allocation9 + $0x5a0] sm:$0xff]  ;;  %v3491_v18 = vld [vmem:[#allocation9 + $0x588] sm:$0xff]  ;;  %3555 = vmatpush.msrb.mxu1 %v3480_v53  ;;  %v1862_v53 = vld [vmem:[#allocation12 + $0xf8] sm:$0xff] }
 0x26b   : > { %v1396_v59 = vadd.f32 %v1395_v61, %v1286_v9  ;;  %3509 = vmatpush.msrb.mxu3 %v3494_v56  ;;  %v3462_v56 = vld [vmem:[#allocation9 + $0x4a0] sm:$0xff]  ;;  %1895 = vperm.xlu1 %9158, %v1862_v53  }
 0x26d   : > { %v9203_v63 = vpop.eup %9202  ;;  %v1444_v16 = vmul.f32 0.5, %v1396_v59  ;;  %2664 = vmatmul.f32.vlgmr.msra.gmra.mxu3 %v10167_v47  ;;  %v1076_v59 = vpop.permute.xlu0 %1075 }
 0x26e   : > { %v1505_v19 = vadd.f32 1.0, %v9203_v63  ;;  %v10567_v40 = vpop.f32.mrf.mxu1  ;;  %3510 = vmatpush.msrb.mxu3 %v3491_v18  ;;  %v3488_v63 = vld [vmem:[#allocation9 + $0x570] sm:$0xff] }
 0x26f   : > { %9204 = vtanh.f32 %v1444_v16  ;;  %v3474_v16 = vld [vmem:[#allocation9 + $0x500] sm:$0xff] }
 0x270   : > { %v1536_v31 = vmul.f32 0.5, %v1505_v19  ;;  %v1288_v5 = vpop.f32.mrf.mxu3  ;;  %v1705_v61 = vpop.f32.mrf.mxu2  ;;  %3511 = vmatpush.msrb.mxu3 %v3488_v63  ;;  %v3464_v63 = vld [vmem:[#allocation9 + $0x4b0] sm:$0xff] }
 0x271   : > { %v1289_v1 = vadd.f32 %v1288_v5, %v1071_v22  ;;  %v10564_v17 = vpop.f32.mrf.mxu0  ;;  %2141 = vmatpush.msrb.mxu2 %v1705_v61  ;;  %8617 = vmatmul.msk.f32.gmra.mxu1 %vm1108_vm0, %v1834_v57  ;;  %v3482_v5 = vld [vmem:[#allocation9 + $0x540] sm:$0xff] }
 0x272   : > { %1567 = vst [vmem:[%s10442_s21 + $0xa8] sm:$0xff] %v1536_v31  ;;  %3512 = vmatpush.msrb.mxu3 %v3485_v35  ;;  %v1836_v31 = vld [vmem:[#allocation10 + $0x3d8] sm:$0x1] }
 0x273   : > { %v1399_v50 = vadd.f32 %v1398_v3, %v1289_v1  ;;  %2142 = vmatpush.msrb.mxu2 %v1702_v8  ;;  %v3477_v3 = vld [vmem:[#allocation9 + $0x518] sm:$0xff]  ;;  %v1081_v1 = vpop.permute.xlu1 %1080 }
 0x274   : > { %3556 = vmatpush.msrb.mxu1 %v3477_v3  ;;  %3513 = vmatpush.msrb.mxu3 %v3482_v5  ;;  %v3461_v35 = vld [vmem:[#allocation9 + $0x498] sm:$0xff]  ;;  %v1775_v5 = vld [vmem:[#allocation10 + $0x1f0] sm:$0xff] }
 0x275   : > { %v9205_v36 = vpop.eup %9204  ;;  %v1445_v9 = vmul.f32 0.5, %v1399_v50  ;;  %2143 = vmatpush.msrb.mxu2 %v10550_v29  ;;  %2667 = vmatmul.f32.gmra.mxu3 %v10180_v24 }
 0x276   : > { %v1506_v7 = vadd.f32 1.0, %v9205_v36  ;;  %v10577_v22 = vpop.f32.mrf.mxu1  ;;  %3557 = vmatpush.msrb.mxu1 %v3474_v16 }
 0x277   : > { %9206 = vtanh.f32 %v1445_v9  ;;  %2144 = vmatpush.msrb.mxu2 %v10542_v28  ;;  %v3471_v28 = vld [vmem:[#allocation9 + $0x4e8] sm:$0xff] }
 0x278   : > { %v1537_v8 = vmul.f32 0.5, %v1506_v7  ;;  %v1291_v62 = vpop.f32.mrf.mxu3  ;;  %3558 = vmatpush.msrb.mxu1 %v3471_v28  ;;  %v3459_v7 = vld [vmem:[#allocation9 + $0x488] sm:$0xff] }
 0x279   : > { %v1292_v29 = vadd.f32 %v1291_v62, %v1076_v59  ;;  %v10573_v19 = vpop.f32.mrf.mxu0  ;;  %2145 = vmatpush.msrb.mxu2 %v10534_v58  ;;  %v3468_v58 = vld [vmem:[#allocation9 + $0x4d0] sm:$0xff]  ;;  %8618 = vmatmul.msk.f32.gmra.mxu1 %vm1108_vm0, %v1836_v31  ;;  %v3470_v59 = vld [vmem:[#allocation9 + $0x4e0] sm:$0xff]  ;;  %v3467_v62 = vld [vmem:[#allocation9 + $0x4c8] sm:$0xff] }
 0x27a   : > { %1568 = vst [vmem:[%s10442_s21 + $0xb0] sm:$0xff] %v1537_v8  ;;  %3559 = vmatpush.msrb.mxu1 %v3468_v58  ;;  %v1086_v8 = vpop.permute.xlu2 %1085 }
 0x27b   : > { %v1402_v46 = vadd.f32 %v10557_v37, %v1292_v29  ;;  %2146 = vmatpush.msrb.mxu2 %v10526_v48  ;;  %v3479_v37 = vld [vmem:[#allocation9 + $0x528] sm:$0xff]  ;;  %v3465_v48 = vld [vmem:[#allocation9 + $0x4b8] sm:$0xff] }
 0x27c   : > { %3514 = vmatpush.msrb.mxu3 %v3479_v37  ;;  %3560 = vmatpush.msrb.mxu1 %v3465_v48 }
 0x27d   : > { %v9207_v61 = vpop.eup %9206  ;;  %v1446_v2 = vmul.f32 0.5, %v1402_v46  ;;  %2147 = vmatpush.msrb.mxu2 %v10516_v60  ;;  %2670 = vmatmul.f32.gmra.mxu3 %v10195_v15  ;;  %v3476_v60 = vld [vmem:[#allocation9 + $0x510] sm:$0xff] }
 0x27e   : > { %v1507_v42 = vadd.f32 1.0, %v9207_v61  ;;  %v10589_v36 = vpop.f32.mrf.mxu1  ;;  %3515 = vmatpush.msrb.mxu3 %v3476_v60  ;;  %3561 = vmatpush.msrb.mxu1 %v3462_v56  ;;  %v1091_v61 = vpop.permute.xlu0 %1090 }
 0x27f   : > { %9208 = vtanh.f32 %v1446_v2  ;;  %2148 = vmatpush.msrb.mxu2 %v10506_v32  ;;  %v3473_v32 = vld [vmem:[#allocation9 + $0x4f8] sm:$0xff] }
 0x280   : > { %v1538_v52 = vmul.f32 0.5, %v1507_v42  ;;  %v1294_v54 = vpop.f32.mrf.mxu3  ;;  %3516 = vmatpush.msrb.mxu3 %v3473_v32  ;;  %3562 = vmatpush.msrb.mxu1 %v3459_v7  ;;  %v1864_v42 = vld [vmem:[#allocation12 + $0x108] sm:$0xff]  ;;  %v1865_v32 = vld [vmem:[#allocation12 + $0x110] sm:$0xff] }
 0x281   : > { %v1295_v50 = vadd.f32 %v1294_v54, %v1081_v1  ;;  %v10585_v57 = vpop.f32.mrf.mxu0  ;;  %2149 = vmatpush.msrb.mxu2 %v10301_v45  ;;  %3563 = vmatmul.f32.vlgmr.msrb.gmra.mxu1 %v10167_v47  ;;  %v1096_v54 = vpop.permute.xlu1 %1095 }
 0x282   : > { %1569 = vst [vmem:[%s10442_s21 + $0xb8] sm:$0xff] %v1538_v52  ;;  %3517 = vmatpush.msrb.mxu3 %v3470_v59  ;;  %1905 = vperm.xlu0 %9157, %v1864_v42  }
 0x283   : > { %v1405_v9 = vadd.f32 %v10564_v17, %v1295_v50  ;;  %2150 = vmatpush.msrb.mxu2 %v10298_v4  ;;  %1910 = vperm.xlu1 %9158, %v1865_v32  }
 0x284   : > { %3518 = vmatpush.msrb.mxu3 %v3467_v62 }
 0x285   : > { %v9209_v18 = vpop.eup %9208  ;;  %v1447_v3 = vmul.f32 0.5, %v1405_v9  ;;  %2151 = vmatpush.msrb.mxu2 %v10295_v14  ;;  %2673 = vmatmul.f32.gmra.mxu3 %v10207_v51 }
 0x286   : > { %v1508_v45 = vadd.f32 1.0, %v9209_v18  ;;  %v10599_v14 = vpop.f32.mrf.mxu1  ;;  %3519 = vmatpush.msrb.mxu3 %v3464_v63  ;;  %v1779_v18 = vld [vmem:[#allocation10 + $0x210] sm:$0xff]  ;;  %v1863_v63 = vld [vmem:[#allocation12 + $0x100] sm:$0xff] }
 0x287   : > { %9210 = vtanh.f32 %v1447_v3  ;;  %2152 = vmatpush.msrb.mxu2 %v10292_v33  ;;  %v3458_v33 = vld [vmem:[#allocation9 + $0x480] sm:$0xff]  ;;  %1900 = vperm.xlu2 %9159, %v1863_v63   ;;  %v1866_v63 = vld [vmem:[#allocation12 + $0x118] sm:$0xff] }
 0x288   : > { %v1539_v4 = vmul.f32 0.5, %v1508_v45  ;;  %v1297_v17 = vpop.f32.mrf.mxu3  ;;  %3520 = vmatpush.msrb.mxu3 %v3461_v35  ;;  %v1101_v45 = vpop.permute.xlu2 %1100 }
 0x289   : > { %v1298_v16 = vadd.f32 %v1297_v17, %v1086_v8  ;;  %v1413_v29 = vpop.f32.mrf.mxu0  ;;  %2153 = vmatpush.msrb.mxu2 %v10288_v27  ;;  %3566 = vmatmul.f32.gmra.mxu1 %v10180_v24 }
 0x28a   : > { %1570 = vst [vmem:[%s10442_s21 + $0xc0] sm:$0xff] %v1539_v4  ;;  %3521 = vmatpush.msrb.mxu3 %v3458_v33  ;;  %v1781_v33 = vld [vmem:[#allocation10 + $0x220] sm:$0xff] }
 0x28b   : > { %v1408_v46 = vadd.f32 %v10573_v19, %v1298_v16  ;;  %2154 = vmatpush.msrb.mxu2 %v10284_v30 }
 0x28d   : > { %v9211_v28 = vpop.eup %9210  ;;  %v1448_v31 = vmul.f32 0.5, %v1408_v46  ;;  %2155 = vmatpush.msrb.mxu2 %v10280_v0  ;;  %2676 = vmatmul.f32.gmra.mxu3 %v10220_v23 }
 0x28e   : > { %v1509_v27 = vadd.f32 1.0, %v9211_v28  ;;  %v10608_v1 = vpop.f32.mrf.mxu1 }
 0x28f   : > { %9212 = vtanh.f32 %v1448_v31  ;;  %2156 = vmatpush.msrb.mxu2 %v10276_v20  ;;  %v1777_v20 = vld [vmem:[#allocation10 + $0x200] sm:$0xff]  ;;  %v1106_v31 = vpop.permute.xlu0 %1105  ;;  %1915 = vperm.xlu2 %9159, %v1866_v63  }
 0x290   : > { %v1540_v19 = vmul.f32 0.5, %v1509_v27  ;;  %v1300_v30 = vpop.f32.mrf.mxu3  ;;  %2157 = vmatmul.f32.vlgmr.msrb.gmra.mxu2 %v1775_v5 }
 0x291   : > { %v1301_v2 = vadd.f32 %v1300_v30, %v1091_v61  ;;  %v1416_v58 = vpop.f32.mrf.mxu0  ;;  %3569 = vmatmul.f32.gmra.mxu1 %v10195_v15  ;;  %v1867_v30 = vld [vmem:[#allocation12 + $0x120] sm:$0xff] }
 0x292   : > { %1571 = vst [vmem:[%s10442_s21 + $0xc8] sm:$0xff] %v1540_v19  ;;  %1920 = vperm.xlu0 %9157, %v1867_v30  }
 0x293   : > { %v1411_v0 = vadd.f32 %v10585_v57, %v1301_v2 }
 0x295   : > { %v9213_v37 = vpop.eup %9212  ;;  %v1449_v48 = vmul.f32 0.5, %v1411_v0  ;;  %2679 = vmatmul.f32.gmra.mxu3 %v10227_v44 }
 0x296   : > { %v1510_v52 = vadd.f32 1.0, %v9213_v37  ;;  %v10614_v9 = vpop.f32.mrf.mxu1  ;;  %v1783_v37 = vld [vmem:[#allocation10 + $0x230] sm:$0xff] }
 0x297   : > { %9214 = vtanh.f32 %v1449_v48  ;;  %v3505_v48 = vld [vmem:[#allocation9 + $0x5f8] sm:$0xff] }
 0x298   : > { %v1541_v60 = vmul.f32 0.5, %v1510_v52  ;;  %v1303_v50 = vpop.f32.mrf.mxu3  ;;  %2160 = vmatmul.f32.gmra.mxu2 %v1777_v20  ;;  %3588 = vmatpush.msra.mxu3 %v3505_v48 }
 0x299   : > { %v1304_v56 = vadd.f32 %v1303_v50, %v1096_v54  ;;  %v1419_v53 = vpop.f32.mrf.mxu0  ;;  %3572 = vmatmul.f32.gmra.mxu1 %v10207_v51 }
 0x29a   : > { %1572 = vst [vmem:[%s10442_s21 + $0xd0] sm:$0xff] %v1541_v60  ;;  %v3502_v60 = vld [vmem:[#allocation9 + $0x5e0] sm:$0xff] }
 0x29b   : > { %v1414_v57 = vadd.f32 %v1413_v29, %v1304_v56  ;;  %3589 = vmatpush.msra.mxu3 %v3502_v60  ;;  %v1868_v56 = vld [vmem:[#allocation12 + $0x128] sm:$0xff] }
 0x29c   : > { %1925 = vperm.xlu1 %9158, %v1868_v56  }
 0x29d   : > { %v9215_v7 = vpop.eup %9214  ;;  %v1450_v59 = vmul.f32 0.5, %v1414_v57  ;;  %2682 = vmatmul.f32.gmra.mxu3 %v10234_v12  ;;  %v3496_v57 = vld [vmem:[#allocation9 + $0x5b0] sm:$0xff] }
 0x29e   : > { %v1511_v3 = vadd.f32 1.0, %v9215_v7  ;;  %v10621_v16 = vpop.f32.mrf.mxu1 }
 0x29f   : > { %9216 = vtanh.f32 %v1450_v59  ;;  %v1785_v59 = vld [vmem:[#allocation10 + $0x240] sm:$0xff] }
 0x2a0   : > { %v1542_v8 = vmul.f32 0.5, %v1511_v3  ;;  %v1306_v62 = vpop.f32.mrf.mxu3  ;;  %2163 = vmatmul.f32.gmra.mxu2 %v1779_v18  ;;  %v3493_v18 = vld [vmem:[#allocation9 + $0x598] sm:$0xff] }
 0x2a1   : > { %v1307_v4 = vadd.f32 %v1306_v62, %v1101_v45  ;;  %v10618_v17 = vpop.f32.mrf.mxu0  ;;  %3575 = vmatmul.f32.gmra.mxu1 %v10220_v23  ;;  %v3490_v62 = vld [vmem:[#allocation9 + $0x580] sm:$0xff] }
 0x2a2   : > { %1573 = vst [vmem:[%s10442_s21 + $0xd8] sm:$0xff] %v1542_v8 }
 0x2a3   : > { %v1417_v29 = vadd.f32 %v1416_v58, %v1307_v4 }
 0x2a5   : > { %v9217_v35 = vpop.eup %9216  ;;  %v1451_v46 = vmul.f32 0.5, %v1417_v29  ;;  %2685 = vmatmul.f32.gmra.mxu3 %v10240_v21 }
 0x2a6   : > { %v1512_v28 = vadd.f32 1.0, %v9217_v35  ;;  %v10628_v2 = vpop.f32.mrf.mxu1  ;;  %v3487_v35 = vld [vmem:[#allocation9 + $0x568] sm:$0xff] }
 0x2a7   : > { %9218 = vtanh.f32 %v1451_v46  ;;  %v3484_v46 = vld [vmem:[#allocation9 + $0x550] sm:$0xff] }
 0x2a8   : > { %v1543_v5 = vmul.f32 0.5, %v1512_v28  ;;  %v1309_v27 = vpop.f32.mrf.mxu3  ;;  %2166 = vmatmul.f32.gmra.mxu2 %v1781_v33  ;;  %v1787_v33 = vld [vmem:[#allocation10 + $0x250] sm:$0xff]  ;;  %v3481_v28 = vld [vmem:[#allocation9 + $0x538] sm:$0xff] }
 0x2a9   : > { %v1310_v61 = vadd.f32 %v1309_v27, %v1106_v31  ;;  %v10625_v19 = vpop.f32.mrf.mxu0  ;;  %3578 = vmatmul.f32.gmra.mxu1 %v10227_v44  ;;  %v1870_v27 = vld [vmem:[#allocation12 + $0x138] sm:$0xff] }
 0x2aa   : > { %1574 = vst [vmem:[%s10442_s21 + $0xe0] sm:$0xff] %v1543_v5  ;;  %v3478_v5 = vld [vmem:[#allocation9 + $0x520] sm:$0xff]  ;;  %1935 = vperm.xlu0 %9157, %v1870_v27   ;;  %v1874_v27 = vld [vmem:[#allocation12 + $0x158] sm:$0xff] }
 0x2ab   : > { %v1420_v58 = vadd.f32 %v1419_v53, %v1310_v61  ;;  %v3499_v53 = vld [vmem:[#allocation9 + $0x5c8] sm:$0xff] }
 0x2ac   : > { %3590 = vmatpush.msra.mxu3 %v3499_v53  ;;  %v3463_v53 = vld [vmem:[#allocation9 + $0x4a8] sm:$0xff] }
 0x2ad   : > { %v9219_v42 = vpop.eup %9218  ;;  %v1452_v0 = vmul.f32 0.5, %v1420_v58  ;;  %3522 = vmatmul.f32.vlgmr.msrb.gmra.mxu3 %v10167_v47  ;;  %v3475_v58 = vld [vmem:[#allocation9 + $0x508] sm:$0xff] }
 0x2ae   : > { %v1513_v20 = vadd.f32 1.0, %v9219_v42  ;;  %v10637_v32 = vpop.f32.mrf.mxu1  ;;  %3591 = vmatpush.msra.mxu3 %v3496_v57  ;;  %v3472_v42 = vld [vmem:[#allocation9 + $0x4f0] sm:$0xff] }
 0x2af   : > { %9220 = vtanh.f32 %v1452_v0  ;;  %v1789_v0 = vld [vmem:[#allocation10 + $0x260] sm:$0xff]  ;;  %v3460_v57 = vld [vmem:[#allocation9 + $0x490] sm:$0xff] }
 0x2b0   : > { %v1544_v52 = vmul.f32 0.5, %v1513_v20  ;;  %2169 = vmatmul.f32.gmra.mxu2 %v1783_v37  ;;  %v10632_v54 = vpop.f32.mrf.mxu3  ;;  %3592 = vmatpush.msra.mxu3 %v3493_v18  ;;  %v3469_v37 = vld [vmem:[#allocation9 + $0x4d8] sm:$0xff]  ;;  %v3466_v20 = vld [vmem:[#allocation9 + $0x4c0] sm:$0xff]  ;;  %v1869_v18 = vld [vmem:[#allocation12 + $0x130] sm:$0xff] }
 0x2b1   : > { %v10634_v50 = vpop.f32.mrf.mxu0  ;;  %3581 = vmatmul.f32.gmra.mxu1 %v10234_v12  ;;  %1930 = vperm.xlu2 %9159, %v1869_v18  }
 0x2b2   : > { %1575 = vst [vmem:[%s10442_s21 + $0xe8] sm:$0xff] %v1544_v52  ;;  %3593 = vmatpush.msra.mxu3 %v3490_v62  ;;  %v1871_v52 = vld [vmem:[#allocation12 + $0x140] sm:$0xff] }
 0x2b3   : > { %1940 = vperm.xlu1 %9158, %v1871_v52   ;;  %v1793_v62 = vld [vmem:[#allocation10 + $0x280] sm:$0xff]  ;;  %v1877_v52 = vld [vmem:[#allocation12 + $0x170] sm:$0xff] }
 0x2b4   : > { %3594 = vmatpush.msra.mxu3 %v3487_v35  ;;  %v1873_v35 = vld [vmem:[#allocation12 + $0x150] sm:$0xff] }
 0x2b5   : > { %v9221_v7 = vpop.eup %9220  ;;  %3525 = vmatmul.f32.gmra.mxu3 %v10180_v24  ;;  %1950 = vperm.xlu0 %9157, %v1873_v35  }
 0x2b6   : > { %v1514_v3 = vadd.f32 1.0, %v9221_v7  ;;  %v10646_v29 = vpop.f32.mrf.mxu1  ;;  %3595 = vmatpush.msra.mxu3 %v3484_v46  ;;  %v1791_v7 = vld [vmem:[#allocation10 + $0x270] sm:$0xff] }
 0x2b8   : > { %v1545_v45 = vmul.f32 0.5, %v1514_v3  ;;  %2172 = vmatmul.f32.gmra.mxu2 %v1785_v59  ;;  %v10641_v8 = vpop.f32.mrf.mxu3  ;;  %3596 = vmatpush.msra.mxu3 %v3481_v28  ;;  %v1795_v28 = vld [vmem:[#allocation10 + $0x290] sm:$0xff] }
 0x2b9   : > { %v10643_v4 = vpop.f32.mrf.mxu0  ;;  %3584 = vmatmul.f32.gmra.mxu1 %v10240_v21 }
 0x2ba   : > { %1576 = vst [vmem:[%s10442_s21 + $0xf0] sm:$0x1] %v1545_v45  ;;  %3597 = vmatpush.msra.mxu3 %v3478_v5 }
 0x2bb   : > { %1955 = vperm.xlu1 %9158, %v1874_v27  }
 0x2bc   : > { %3598 = vmatpush.msra.mxu3 %v3475_v58 }
 0x2bd   : > { %3528 = vmatmul.f32.gmra.mxu3 %v10195_v15 }
 0x2be   : > { %v10652_v30 = vpop.f32.mrf.mxu1  ;;  %3599 = vmatpush.msra.mxu3 %v3472_v42  ;;  %v1797_v42 = vld [vmem:[#allocation10 + $0x2a0] sm:$0xff] }
 0x2c0   : > { %2175 = vmatmul.f32.gmra.mxu2 %v1787_v33  ;;  %v10650_v31 = vpop.f32.mrf.mxu3  ;;  %3600 = vmatpush.msra.mxu3 %v3469_v37 }
 0x2c1   : > { %v2636_v61 = vpop.f32.mrf.mxu0 }
 0x2c2   : > { %3601 = vmatpush.msra.mxu3 %v3466_v20  ;;  %v1876_v20 = vld [vmem:[#allocation12 + $0x168] sm:$0xff] }
 0x2c3   : > { %1965 = vperm.xlu0 %9157, %v1876_v20   ;;  %1970 = vperm.xlu1 %9158, %v1877_v52  }
 0x2c4   : > { %3602 = vmatpush.msra.mxu3 %v3463_v53 }
 0x2c5   : > { %3531 = vmatmul.f32.gmra.mxu3 %v10207_v51 }
 0x2c6   : > { %v10655_v56 = vpop.f32.mrf.mxu1  ;;  %3603 = vmatpush.msra.mxu3 %v3460_v57  ;;  %v1879_v57 = vld [vmem:[#allocation12 + $0x180] sm:$0xff] }
 0x2c8   : > { %2178 = vmatmul.f32.gmra.mxu2 %v1789_v0  ;;  %v2592_v48 = vpop.f32.mrf.mxu3 }
 0x2c9   : > { %v2639_v60 = vpop.f32.mrf.mxu0 }
 0x2cb   : > { %1980 = vperm.xlu0 %9157, %v1879_v57  }
 0x2cd   : > { %3534 = vmatmul.f32.gmra.mxu3 %v10220_v23 }
 0x2ce   : > { %v10658_v45 = vpop.f32.mrf.mxu1 }
 0x2d0   : > { %2181 = vmatmul.f32.gmra.mxu2 %v1791_v7  ;;  %v2595_v59 = vpop.f32.mrf.mxu3 }
 0x2d1   : > { %v2642_v3 = vpop.f32.mrf.mxu0 }
 0x2d5   : > { %3537 = vmatmul.f32.gmra.mxu3 %v10227_v44 }
 0x2d6   : > { %v10661_v33 = vpop.f32.mrf.mxu1 }
 0x2d8   : > { %2184 = vmatmul.f32.gmra.mxu2 %v1793_v62  ;;  %v2598_v63 = vpop.f32.mrf.mxu3 }
 0x2d9   : > { %v2645_v46 = vpop.f32.mrf.mxu0 }
 0x2da   : > { %3081 = vmatpush.msra.mxu0 %v2645_v46 }
 0x2dc   : > { %3082 = vmatpush.msra.mxu0 %v2642_v3  ;;  %v1880_v3 = vld [vmem:[#allocation12 + $0x188] sm:$0xff] }
 0x2dd   : > { %3540 = vmatmul.f32.gmra.mxu3 %v10234_v12  ;;  %v1896_v18 = vpop.permute.xlu1 %1895  ;;  %1985 = vperm.xlu1 %9158, %v1880_v3  }
 0x2de   : > { %3083 = vmatpush.msra.mxu0 %v2639_v60  ;;  %v10665_v58 = vpop.f32.mrf.mxu1 }
 0x2e0   : > { %3084 = vmatpush.msra.mxu0 %v2636_v61  ;;  %2187 = vmatmul.f32.gmra.mxu2 %v1795_v28  ;;  %v2601_v5 = vpop.f32.mrf.mxu3  ;;  %v1872_v61 = vld [vmem:[#allocation12 + $0x148] sm:$0xff] }
 0x2e1   : > { %1945 = vperm.xlu2 %9159, %v1872_v61   ;;  %v1901_v27 = vpop.permute.xlu2 %1900 }
 0x2e2   : > { %3085 = vmatpush.msra.mxu0 %v10643_v4  ;;  %v1799_v4 = vld [vmem:[#allocation10 + $0x2b0] sm:$0xff] }
 0x2e4   : > { %3086 = vmatpush.msra.mxu0 %v10634_v50 }
 0x2e5   : > { %3543 = vmatmul.f32.gmra.mxu3 %v10240_v21 }
 0x2e6   : > { %3087 = vmatpush.msra.mxu0 %v10625_v19  ;;  %v10671_v37 = vpop.f32.mrf.mxu1  ;;  %v1801_v19 = vld [vmem:[#allocation10 + $0x2c0] sm:$0xff] }
 0x2e8   : > { %3088 = vmatpush.msra.mxu0 %v10618_v17  ;;  %2190 = vmatmul.f32.gmra.mxu2 %v1797_v42  ;;  %v2604_v0 = vpop.f32.mrf.mxu3 }
 0x2ea   : > { %3089 = vmatpush.msra.mxu0 %v2604_v0 }
 0x2ec   : > { %3090 = vmatpush.msra.mxu0 %v2601_v5 }
 0x2ed   : > { %3604 = vmatmul.f32.vlgmr.msra.gmra.mxu3 %v10167_v47 }
 0x2ee   : > { %3091 = vmatpush.msra.mxu0 %v2598_v63  ;;  %v10676_v17 = vpop.f32.mrf.mxu1 }
 0x2f0   : > { %3092 = vmatpush.msra.mxu0 %v2595_v59  ;;  %2193 = vmatmul.f32.gmra.mxu2 %v1799_v4  ;;  %v10674_v50 = vpop.f32.mrf.mxu3  ;;  %v1811_v4 = vld [vmem:[#allocation10 + $0x310] sm:$0xff] }
 0x2f2   : > { %3093 = vmatpush.msra.mxu0 %v2592_v48  ;;  %v1803_v48 = vld [vmem:[#allocation10 + $0x2d0] sm:$0xff] }
 0x2f4   : > { %3094 = vmatpush.msra.mxu0 %v10650_v31  ;;  %v1875_v31 = vld [vmem:[#allocation12 + $0x160] sm:$0xff] }
 0x2f5   : > { %3607 = vmatmul.f32.gmra.mxu3 %v10180_v24  ;;  %1960 = vperm.xlu2 %9159, %v1875_v31   ;;  %v1882_v31 = vld [vmem:[#allocation12 + $0x198] sm:$0xff] }
 0x2f6   : > { %3095 = vmatpush.msra.mxu0 %v10641_v8  ;;  %v10684_v60 = vpop.f32.mrf.mxu1  ;;  %1995 = vperm.xlu0 %9157, %v1882_v31  }
 0x2f8   : > { %3096 = vmatpush.msra.mxu0 %v10632_v54  ;;  %2196 = vmatmul.f32.gmra.mxu2 %v1801_v19  ;;  %v10682_v47 = vpop.f32.mrf.mxu3  ;;  %v1805_v54 = vld [vmem:[#allocation10 + $0x2e0] sm:$0xff] }
 0x2fd   : > { %3610 = vmatmul.f32.gmra.mxu3 %v10195_v15  ;;  %v1807_v15 = vld [vmem:[#allocation10 + $0x2f0] sm:$0xff] }
 0x2fe   : > { %v10689_v24 = vpop.f32.mrf.mxu1 }
 0x300   : > { %2199 = vmatmul.f32.gmra.mxu2 %v1803_v48  ;;  %v10687_v53 = vpop.f32.mrf.mxu3  ;;  %v1906_v48 = vpop.permute.xlu0 %1905 }
 0x305   : > { %3613 = vmatmul.f32.gmra.mxu3 %v10207_v51  ;;  %v1809_v51 = vld [vmem:[#allocation10 + $0x300] sm:$0xff] }
 0x306   : > { %v10694_v7 = vpop.f32.mrf.mxu1 }
 0x308   : > { %2202 = vmatmul.f32.gmra.mxu2 %v1805_v54  ;;  %v10692_v8 = vpop.f32.mrf.mxu3 }
 0x30d   : > { %3616 = vmatmul.f32.gmra.mxu3 %v10220_v23  ;;  %v1878_v23 = vld [vmem:[#allocation12 + $0x178] sm:$0xff] }
 0x30e   : > { %v10697_v35 = vpop.f32.mrf.mxu1  ;;  %1975 = vperm.xlu2 %9159, %v1878_v23  }
 0x310   : > { %2205 = vmatmul.f32.gmra.mxu2 %v1807_v15  ;;  %v2677_v59 = vpop.f32.mrf.mxu3 }
 0x313   : > { %v2158_v62 = vpop.f32.mrf.mxu2 }
 0x314   : > { %v2159_v63 = vadd.f32 %v2158_v62, %v1896_v18 }
 0x315   : > { %3619 = vmatmul.f32.gmra.mxu3 %v10227_v44 }
 0x316   : > { %v2269_v46 = vadd.f32 %v10448_v34, %v2159_v63  ;;  %v10701_v61 = vpop.f32.mrf.mxu1 }
 0x318   : > { %v2361_v28 = vmul.f32 0.5, %v2269_v46  ;;  %2208 = vmatmul.f32.gmra.mxu2 %v1809_v51  ;;  %v2680_v5 = vpop.f32.mrf.mxu3  ;;  %v1911_v46 = vpop.permute.xlu1 %1910 }
 0x31a   : > { %9222 = vtanh.f32 %v2361_v28  ;;  %v1883_v28 = vld [vmem:[#allocation12 + $0x1a0] sm:$0xff] }
 0x31b   : > { %v2161_v42 = vpop.f32.mrf.mxu2  ;;  %2000 = vperm.xlu1 %9158, %v1883_v28  }
 0x31c   : > { %v2162_v0 = vadd.f32 %v2161_v42, %v1901_v27 }
 0x31d   : > { %3622 = vmatmul.f32.gmra.mxu3 %v10234_v12  ;;  %v1813_v12 = vld [vmem:[#allocation10 + $0x320] sm:$0xff] }
 0x31e   : > { %v2272_v44 = vadd.f32 %v10457_v10, %v2162_v0  ;;  %v10705_v18 = vpop.f32.mrf.mxu1 }
 0x320   : > { %v9223_v20 = vpop.eup %9222  ;;  %v2362_v19 = vmul.f32 0.5, %v2272_v44  ;;  %2211 = vmatmul.f32.gmra.mxu2 %v1811_v4  ;;  %v2683_v34 = vpop.f32.mrf.mxu3 }
 0x321   : > { %v2423_v52 = vadd.f32 1.0, %v9223_v20 }
 0x322   : > { %9224 = vtanh.f32 %v2362_v19 }
 0x323   : > { %v2454_v54 = vmul.f32 0.5, %v2423_v52  ;;  %v2164_v57 = vpop.f32.mrf.mxu2  ;;  %v1916_v52 = vpop.permute.xlu2 %1915 }
 0x324   : > { %v2165_v15 = vadd.f32 %v2164_v57, %v1906_v48  ;;  %v1881_v48 = vld [vmem:[#allocation12 + $0x190] sm:$0xff] }
 0x325   : > { %8619 = vst [vmem:[%s10442_s21 + $0xf8] sm:$0xff] %v2454_v54  ;;  %3625 = vmatmul.f32.gmra.mxu3 %v10240_v21  ;;  %v1815_v21 = vld [vmem:[#allocation10 + $0x330] sm:$0xff]  ;;  %1990 = vperm.xlu2 %9159, %v1881_v48   ;;  %v1817_v54 = vld [vmem:[#allocation10 + $0x340] sm:$0xff] }
 0x326   : > { %v2275_v10 = vadd.f32 %v10466_v6, %v2165_v15  ;;  %v3579_v0 = vpop.f32.mrf.mxu1 }
 0x328   : > { %v9225_v3 = vpop.eup %9224  ;;  %v2363_v62 = vmul.f32 0.5, %v2275_v10  ;;  %2214 = vmatmul.f32.gmra.mxu2 %v1813_v12  ;;  %v2686_v63 = vpop.f32.mrf.mxu3 }
 0x329   : > { %v2424_v51 = vadd.f32 1.0, %v9225_v3  ;;  %3199 = vmatpush.msra.mxu2 %v2686_v63  ;;  %v1885_v3 = vld [vmem:[#allocation12 + $0x1b0] sm:$0xff] }
 0x32a   : > { %9226 = vtanh.f32 %v2363_v62  ;;  %2010 = vperm.xlu0 %9157, %v1885_v3  }
 0x32b   : > { %v2455_v27 = vmul.f32 0.5, %v2424_v51  ;;  %v2167_v23 = vpop.f32.mrf.mxu2  ;;  %3200 = vmatpush.msra.mxu2 %v2683_v34 }
 0x32c   : > { %v2168_v42 = vadd.f32 %v2167_v23, %v1911_v46  ;;  %v2717_v46 = vld [vmem:[#allocation10 + $0x3f0] sm:$0xff] }
 0x32d   : > { %8620 = vst [vmem:[%s10442_s21 + $0x100] sm:$0xff] %v2455_v27  ;;  %3201 = vmatpush.msra.mxu2 %v2680_v5 }
 0x32e   : > { %v2278_v6 = vadd.f32 %v10477_v11, %v2168_v42  ;;  %v3582_v11 = vpop.f32.mrf.mxu1 }
 0x32f   : > { %3202 = vmatpush.msra.mxu2 %v2677_v59  ;;  %v2715_v59 = vld [vmem:[#allocation10 + $0x3e0] sm:$0xff] }
 0x330   : > { %v9227_v4 = vpop.eup %9226  ;;  %v2364_v44 = vmul.f32 0.5, %v2278_v6  ;;  %2217 = vmatmul.f32.gmra.mxu2 %v1815_v21  ;;  %v10712_v20 = vpop.f32.mrf.mxu3  ;;  %3097 = vmatmul.f32.vlgmr.msra.gmra.mxu0 %v2715_v59  ;;  %v1886_v6 = vld [vmem:[#allocation12 + $0x1b8] sm:$0xff]  ;;  %v1884_v59 = vld [vmem:[#allocation12 + $0x1a8] sm:$0xff] }
 0x331   : > { %v2425_v19 = vadd.f32 1.0, %v9227_v4  ;;  %3203 = vmatpush.msra.mxu2 %v10692_v8  ;;  %v1926_v21 = vpop.permute.xlu1 %1925  ;;  %2015 = vperm.xlu1 %9158, %v1886_v6  }
 0x332   : > { %9228 = vtanh.f32 %v2364_v44  ;;  %2005 = vperm.xlu2 %9159, %v1884_v59  }
 0x333   : > { %v2456_v34 = vmul.f32 0.5, %v2425_v19  ;;  %v2170_v31 = vpop.f32.mrf.mxu2  ;;  %3204 = vmatpush.msra.mxu2 %v10687_v53  ;;  %v1921_v53 = vpop.permute.xlu0 %1920 }
 0x334   : > { %v2171_v5 = vadd.f32 %v2170_v31, %v1916_v52  ;;  %v2719_v52 = vld [vmem:[#allocation10 + $0x400] sm:$0xff] }
 0x335   : > { %8621 = vst [vmem:[%s10442_s21 + $0x108] sm:$0xff] %v2456_v34  ;;  %3205 = vmatpush.msra.mxu2 %v10682_v47  ;;  %v1888_v34 = vld [vmem:[#allocation12 + $0x1c8] sm:$0xff] }
 0x336   : > { %v2281_v57 = vadd.f32 %v10487_v43, %v2171_v5  ;;  %v3585_v51 = vpop.f32.mrf.mxu1  ;;  %v1819_v43 = vld [vmem:[#allocation10 + $0x350] sm:$0xff]  ;;  %2025 = vperm.xlu0 %9157, %v1888_v34   ;;  %v2804_v34 = vld [vmem:[#allocation12 + $0x200] sm:$0xff] }
 0x337   : > { %3206 = vmatpush.msra.mxu2 %v10674_v50  ;;  %4021 = vmatpush.msra.mxu1 %v3585_v51 }
 0x338   : > { %v9229_v8 = vpop.eup %9228  ;;  %v2365_v15 = vmul.f32 0.5, %v2281_v57  ;;  %2220 = vmatmul.f32.gmra.mxu2 %v1817_v54  ;;  %v10720_v12 = vpop.f32.mrf.mxu3  ;;  %3100 = vmatmul.f32.gmra.mxu0 %v2717_v46  ;;  %v1823_v57 = vld [vmem:[#allocation10 + $0x370] sm:$0xff]  ;;  %v2723_v46 = vld [vmem:[#allocation10 + $0x420] sm:$0xff] }
 0x339   : > { %v2426_v10 = vadd.f32 1.0, %v9229_v8  ;;  %4022 = vmatpush.msra.mxu1 %v3582_v11  ;;  %v1931_v11 = vpop.permute.xlu2 %1930 }
 0x33a   : > { %9230 = vtanh.f32 %v2365_v15  ;;  %v1889_v15 = vld [vmem:[#allocation12 + $0x1d0] sm:$0xff] }
 0x33b   : > { %v2457_v62 = vmul.f32 0.5, %v2426_v10  ;;  %v2173_v63 = vpop.f32.mrf.mxu2  ;;  %4023 = vmatpush.msra.mxu1 %v3579_v0  ;;  %v1891_v10 = vld [vmem:[#allocation12 + $0x1e0] sm:$0xff]  ;;  %2030 = vperm.xlu1 %9158, %v1889_v15  }
 0x33c   : > { %v2174_v47 = vadd.f32 %v2173_v63, %v1921_v53  ;;  %v1936_v63 = vpop.permute.xlu0 %1935 }
 0x33d   : > { %8622 = vst [vmem:[%s10442_s21 + $0x110] sm:$0xff] %v2457_v62  ;;  %4024 = vmatpush.msra.mxu1 %v10705_v18 }
 0x33e   : > { %v2284_v50 = vadd.f32 %v10498_v25, %v2174_v47  ;;  %v1821_v25 = vld [vmem:[#allocation10 + $0x360] sm:$0xff]  ;;  %2040 = vperm.xlu0 %9157, %v1891_v10   ;;  %v2807_v10 = vld [vmem:[#allocation12 + $0x218] sm:$0xff] }
 0x33f   : > { %4025 = vmatpush.msra.mxu1 %v10701_v61 }
 0x340   : > { %v9231_v28 = vpop.eup %9230  ;;  %v2366_v27 = vmul.f32 0.5, %v2284_v50  ;;  %2223 = vmatmul.f32.gmra.mxu2 %v1819_v43  ;;  %v10724_v23 = vpop.f32.mrf.mxu3  ;;  %3103 = vmatmul.f32.gmra.mxu0 %v2719_v52  ;;  %v1825_v43 = vld [vmem:[#allocation10 + $0x380] sm:$0xff]  ;;  %v1892_v50 = vld [vmem:[#allocation12 + $0x1e8] sm:$0x1] }
 0x341   : > { %v2427_v42 = vadd.f32 1.0, %v9231_v28  ;;  %4026 = vmatpush.msra.mxu1 %v10697_v35  ;;  %v2721_v35 = vld [vmem:[#allocation10 + $0x410] sm:$0xff]  ;;  %v2803_v28 = vld [vmem:[#allocation12 + $0x1f8] sm:$0xff] }
 0x342   : > { %9232 = vtanh.f32 %v2366_v27 }
 0x343   : > { %v2458_v4 = vmul.f32 0.5, %v2427_v42  ;;  %v2176_v44 = vpop.f32.mrf.mxu2  ;;  %4027 = vmatpush.msra.mxu1 %v10694_v7  ;;  %2045 = vperm.xlu1 %9158, %v1892_v50  }
 0x344   : > { %v2177_v19 = vadd.f32 %v2176_v44, %v1926_v21 }
 0x345   : > { %8623 = vst [vmem:[%s10442_s21 + $0x118] sm:$0xff] %v2458_v4  ;;  %4028 = vmatpush.msra.mxu1 %v10689_v24  ;;  %v1941_v4 = vpop.permute.xlu1 %1940 }
 0x346   : > { %v2287_v48 = vadd.f32 %v10509_v39, %v2177_v19  ;;  %2840 = vperm.xlu0 %9157, %v2803_v28   ;;  %v1890_v28 = vld [vmem:[#allocation12 + $0x1d8] sm:$0xff] }
 0x348   : > { %v9233_v0 = vpop.eup %9232  ;;  %v2367_v31 = vmul.f32 0.5, %v2287_v48  ;;  %2226 = vmatmul.f32.gmra.mxu2 %v1821_v25  ;;  %v10731_v5 = vpop.f32.mrf.mxu3  ;;  %3106 = vmatmul.f32.gmra.mxu0 %v2721_v35  ;;  %v2725_v25 = vld [vmem:[#allocation10 + $0x430] sm:$0xff] }
 0x349   : > { %v2428_v18 = vadd.f32 1.0, %v9233_v0  ;;  %v1827_v48 = vld [vmem:[#allocation10 + $0x390] sm:$0xff] }
 0x34a   : > { %9234 = vtanh.f32 %v2367_v31  ;;  %v2806_v0 = vld [vmem:[#allocation12 + $0x210] sm:$0xff] }
 0x34b   : > { %v2459_v61 = vmul.f32 0.5, %v2428_v18  ;;  %v2179_v54 = vpop.f32.mrf.mxu2  ;;  %2845 = vperm.xlu1 %9158, %v2804_v34  }
 0x34c   : > { %v2180_v39 = vadd.f32 %v2179_v54, %v1931_v11  ;;  %v1887_v54 = vld [vmem:[#allocation12 + $0x1c0] sm:$0xff] }
 0x34d   : > { %8624 = vst [vmem:[%s10442_s21 + $0x120] sm:$0xff] %v2459_v61  ;;  %v1946_v61 = vpop.permute.xlu2 %1945  ;;  %2020 = vperm.xlu2 %9159, %v1887_v54  }
 0x34e   : > { %v2290_v8 = vadd.f32 %v10519_v49, %v2180_v39  ;;  %2855 = vperm.xlu0 %9157, %v2806_v0   ;;  %v2813_v0 = vld [vmem:[#allocation12 + $0x248] sm:$0xff] }
 0x350   : > { %v9235_v53 = vpop.eup %9234  ;;  %v2368_v3 = vmul.f32 0.5, %v2290_v8  ;;  %2229 = vmatmul.f32.gmra.mxu2 %v1823_v57  ;;  %v10737_v7 = vpop.f32.mrf.mxu3  ;;  %3109 = vmatmul.f32.gmra.mxu0 %v2723_v46  ;;  %v2727_v8 = vld [vmem:[#allocation10 + $0x440] sm:$0xff] }
 0x351   : > { %v2429_v62 = vadd.f32 1.0, %v9235_v53  ;;  %v2809_v53 = vld [vmem:[#allocation12 + $0x228] sm:$0xff] }
 0x352   : > { %9236 = vtanh.f32 %v2368_v3 }
 0x353   : > { %v2460_v24 = vmul.f32 0.5, %v2429_v62  ;;  %v2182_v47 = vpop.f32.mrf.mxu2  ;;  %2860 = vperm.xlu1 %9158, %v2807_v10  }
 0x354   : > { %v2183_v51 = vadd.f32 %v2182_v47, %v1936_v63  ;;  %v1951_v47 = vpop.permute.xlu0 %1950 }
 0x355   : > { %8625 = vst [vmem:[%s10442_s21 + $0x128] sm:$0xff] %v2460_v24  ;;  %2035 = vperm.xlu2 %9159, %v1890_v28   ;;  %v2821_v28 = vld [vmem:[#allocation12 + $0x288] sm:$0xff] }
 0x356   : > { %v2293_v49 = vadd.f32 %v10529_v26, %v2183_v51  ;;  %2870 = vperm.xlu0 %9157, %v2809_v53  }
 0x358   : > { %v9237_v27 = vpop.eup %9236  ;;  %v2369_v42 = vmul.f32 0.5, %v2293_v49  ;;  %2232 = vmatmul.f32.gmra.mxu2 %v1825_v43  ;;  %v3538_v21 = vpop.f32.mrf.mxu3  ;;  %3112 = vmatmul.f32.gmra.mxu0 %v2725_v25  ;;  %v2729_v49 = vld [vmem:[#allocation10 + $0x450] sm:$0xff]  ;;  %v2731_v25 = vld [vmem:[#allocation10 + $0x460] sm:$0xff] }
 0x359   : > { %v2430_v6 = vadd.f32 1.0, %v9237_v27  ;;  %v2810_v27 = vld [vmem:[#allocation12 + $0x230] sm:$0xff] }
 0x35a   : > { %9238 = vtanh.f32 %v2369_v42  ;;  %v2812_v42 = vld [vmem:[#allocation12 + $0x240] sm:$0xff] }
 0x35b   : > { %v2461_v44 = vmul.f32 0.5, %v2430_v6  ;;  %v2185_v19 = vpop.f32.mrf.mxu2  ;;  %2875 = vperm.xlu1 %9158, %v2810_v27  }
 0x35c   : > { %v2186_v52 = vadd.f32 %v2185_v19, %v1941_v4 }
 0x35d   : > { %8626 = vst [vmem:[%s10442_s21 + $0x130] sm:$0xff] %v2461_v44 }
 0x35e   : > { %v2296_v26 = vadd.f32 %v10537_v38, %v2186_v52  ;;  %v1829_v38 = vld [vmem:[#allocation10 + $0x3a0] sm:$0xff]  ;;  %2885 = vperm.xlu0 %9157, %v2812_v42  }
 0x360   : > { %v9239_v31 = vpop.eup %9238  ;;  %v2370_v18 = vmul.f32 0.5, %v2296_v26  ;;  %2235 = vmatmul.f32.gmra.mxu2 %v1827_v48  ;;  %v3541_v11 = vpop.f32.mrf.mxu3  ;;  %3115 = vmatmul.f32.gmra.mxu0 %v2727_v8  ;;  %v1833_v48 = vld [vmem:[#allocation10 + $0x3c0] sm:$0xff]  ;;  %v3655_v26 = vld [vmem:[#allocation10 + $0x5d0] sm:$0xff]  ;;  %v2805_v8 = vld [vmem:[#allocation12 + $0x208] sm:$0xff] }
 0x361   : > { %v2431_v59 = vadd.f32 1.0, %v9239_v31  ;;  %v2815_v31 = vld [vmem:[#allocation12 + $0x258] sm:$0xff] }
 0x362   : > { %9240 = vtanh.f32 %v2370_v18 }
 0x363   : > { %v2462_v39 = vmul.f32 0.5, %v2431_v59  ;;  %v2188_v35 = vpop.f32.mrf.mxu2  ;;  %2890 = vperm.xlu1 %9158, %v2813_v0  }
 0x364   : > { %v2189_v57 = vadd.f32 %v2188_v35, %v1946_v61  ;;  %v1961_v61 = vpop.permute.xlu2 %1960  ;;  %v3657_v35 = vld [vmem:[#allocation10 + $0x5e0] sm:$0xff] }
 0x365   : > { %8627 = vst [vmem:[%s10442_s21 + $0x138] sm:$0xff] %v2462_v39  ;;  %v1835_v39 = vld [vmem:[#allocation10 + $0x3d0] sm:$0x1] }
 0x366   : > { %v2299_v15 = vadd.f32 %v10545_v13, %v2189_v57  ;;  %v1831_v13 = vld [vmem:[#allocation10 + $0x3b0] sm:$0xff]  ;;  %2900 = vperm.xlu0 %9157, %v2815_v31  }
 0x368   : > { %v9241_v3 = vpop.eup %9240  ;;  %v2371_v62 = vmul.f32 0.5, %v2299_v15  ;;  %2238 = vmatmul.f32.gmra.mxu2 %v1829_v38  ;;  %v3544_v63 = vpop.f32.mrf.mxu3  ;;  %3118 = vmatmul.f32.gmra.mxu0 %v2729_v49  ;;  %v2816_v38 = vld [vmem:[#allocation12 + $0x260] sm:$0xff]  ;;  %v2818_v15 = vld [vmem:[#allocation12 + $0x270] sm:$0xff] }
 0x369   : > { %v2432_v24 = vadd.f32 1.0, %v9241_v3  ;;  %4029 = vmatpush.msra.mxu1 %v3544_v63  ;;  %v1966_v63 = vpop.permute.xlu0 %1965 }
 0x36a   : > { %9242 = vtanh.f32 %v2371_v62 }
 0x36b   : > { %v2463_v51 = vmul.f32 0.5, %v2432_v24  ;;  %v2191_v46 = vpop.f32.mrf.mxu2  ;;  %4030 = vmatpush.msra.mxu1 %v3541_v11  ;;  %2905 = vperm.xlu1 %9158, %v2816_v38  }
 0x36c   : > { %v2192_v43 = vadd.f32 %v2191_v46, %v1951_v47  ;;  %v2716_v46 = vld [vmem:[#allocation10 + $0x3e8] sm:$0xff] }
 0x36d   : > { %8628 = vst [vmem:[%s10442_s21 + $0x140] sm:$0xff] %v2463_v51  ;;  %4031 = vmatpush.msra.mxu1 %v3538_v21  ;;  %v1956_v21 = vpop.permute.xlu1 %1955 }
 0x36e   : > { %v2302_v50 = vadd.f32 %v10553_v41, %v2192_v43  ;;  %2915 = vperm.xlu0 %9157, %v2818_v15   ;;  %v3659_v43 = vld [vmem:[#allocation10 + $0x5f0] sm:$0xff] }
 0x36f   : > { %4032 = vmatpush.msra.mxu1 %v10737_v7 }
 0x370   : > { %v9243_v6 = vpop.eup %9242  ;;  %v2372_v4 = vmul.f32 0.5, %v2302_v50  ;;  %2241 = vmatmul.f32.gmra.mxu2 %v1831_v13  ;;  %v10748_v44 = vpop.f32.mrf.mxu3  ;;  %3121 = vmatmul.f32.gmra.mxu0 %v2731_v25  ;;  %v2808_v13 = vld [vmem:[#allocation12 + $0x220] sm:$0xff]  ;;  %v2819_v50 = vld [vmem:[#allocation12 + $0x278] sm:$0xff] }
 0x371   : > { %v2433_v19 = vadd.f32 1.0, %v9243_v6  ;;  %4033 = vmatpush.msra.mxu1 %v10731_v5  ;;  %v2802_v5 = vld [vmem:[#allocation12 + $0x1f0] sm:$0xff]  ;;  %v3661_v25 = vld [vmem:[#allocation10 + $0x600] sm:$0xff] }
 0x372   : > { %9244 = vtanh.f32 %v2372_v4  ;;  %2835 = vperm.xlu2 %9159, %v2802_v5   ;;  %v2824_v5 = vld [vmem:[#allocation12 + $0x2a0] sm:$0xff] }
 0x373   : > { %v2464_v41 = vmul.f32 0.5, %v2433_v19  ;;  %v2194_v52 = vpop.f32.mrf.mxu2  ;;  %4034 = vmatpush.msra.mxu1 %v10724_v23  ;;  %2920 = vperm.xlu1 %9158, %v2819_v50  }
 0x374   : > { %v2195_v7 = vadd.f32 %v2194_v52, %v1956_v21  ;;  %v2737_v52 = vld [vmem:[#allocation10 + $0x490] sm:$0xff] }
 0x375   : > { %8629 = vst [vmem:[%s10442_s21 + $0x148] sm:$0xff] %v2464_v41  ;;  %4035 = vmatpush.msra.mxu1 %v10720_v12  ;;  %v1971_v19 = vpop.permute.xlu1 %1970 }
 0x376   : > { %v2305_v34 = vadd.f32 %v10560_v55, %v2195_v7  ;;  %2930 = vperm.xlu0 %9157, %v2821_v28   ;;  %v2718_v7 = vld [vmem:[#allocation10 + $0x3f8] sm:$0xff] }
 0x377   : > { %4036 = vmatpush.msra.mxu1 %v10712_v20  ;;  %v2733_v20 = vld [vmem:[#allocation10 + $0x470] sm:$0xff] }
 0x378   : > { %v9245_v18 = vpop.eup %9244  ;;  %v2373_v11 = vmul.f32 0.5, %v2305_v34  ;;  %2244 = vmatmul.f32.gmra.mxu2 %v1833_v48  ;;  %v10756_v23 = vpop.f32.mrf.mxu3  ;;  %4037 = vmatmul.f32.vlgmr.msra.gmra.mxu1 %v3655_v26  ;;  %v2811_v26 = vld [vmem:[#allocation12 + $0x238] sm:$0xff]  ;;  %v2822_v34 = vld [vmem:[#allocation12 + $0x290] sm:$0xff] }
 0x379   : > { %v2434_v59 = vadd.f32 1.0, %v9245_v18  ;;  %3124 = vmatmul.f32.gmra.mxu0 %v2733_v20  ;;  %v3663_v20 = vld [vmem:[#allocation10 + $0x610] sm:$0xff] }
 0x37a   : > { %9246 = vtanh.f32 %v2373_v11  ;;  %2850 = vperm.xlu2 %9159, %v2805_v8   ;;  %v2827_v8 = vld [vmem:[#allocation12 + $0x2b8] sm:$0xff] }
 0x37b   : > { %v2465_v12 = vmul.f32 0.5, %v2434_v59  ;;  %v2197_v55 = vpop.f32.mrf.mxu2  ;;  %v1976_v59 = vpop.permute.xlu2 %1975  ;;  %2935 = vperm.xlu1 %9158, %v2822_v34  }
 0x37c   : > { %v2198_v54 = vadd.f32 %v2197_v55, %v1961_v61  ;;  %v2739_v55 = vld [vmem:[#allocation10 + $0x4a0] sm:$0xff] }
 0x37d   : > { %8630 = vst [vmem:[%s10442_s21 + $0x150] sm:$0xff] %v2465_v12 }
 0x37e   : > { %v2308_v57 = vadd.f32 %v10567_v40, %v2198_v54  ;;  %v2735_v40 = vld [vmem:[#allocation10 + $0x480] sm:$0xff]  ;;  %2945 = vperm.xlu0 %9157, %v2824_v5   ;;  %v2720_v54 = vld [vmem:[#allocation10 + $0x408] sm:$0xff] }
 0x380   : > { %v9247_v10 = vpop.eup %9246  ;;  %v2374_v53 = vmul.f32 0.5, %v2308_v57  ;;  %2247 = vmatmul.f32.gmra.mxu2 %v1835_v39  ;;  %v10760_v3 = vpop.f32.mrf.mxu3  ;;  %4040 = vmatmul.f32.gmra.mxu1 %v3657_v35  ;;  %v2814_v35 = vld [vmem:[#allocation12 + $0x250] sm:$0xff]  ;;  %v2825_v57 = vld [vmem:[#allocation12 + $0x2a8] sm:$0xff] }
 0x381   : > { %v2435_v62 = vadd.f32 1.0, %v9247_v10  ;;  %3127 = vmatmul.f32.gmra.mxu0 %v2735_v40  ;;  %v3665_v40 = vld [vmem:[#allocation10 + $0x620] sm:$0xff] }
 0x382   : > { %9248 = vtanh.f32 %v2374_v53  ;;  %2865 = vperm.xlu2 %9159, %v2808_v13   ;;  %v2830_v13 = vld [vmem:[#allocation12 + $0x2d0] sm:$0xff] }
 0x383   : > { %v2466_v24 = vmul.f32 0.5, %v2435_v62  ;;  %v2200_v47 = vpop.f32.mrf.mxu2  ;;  %v1981_v62 = vpop.permute.xlu0 %1980  ;;  %2950 = vperm.xlu1 %9158, %v2825_v57  }
 0x384   : > { %v2201_v51 = vadd.f32 %v2200_v47, %v1966_v63 }
 0x385   : > { %8631 = vst [vmem:[%s10442_s21 + $0x158] sm:$0xff] %v2466_v24 }
 0x386   : > { %v2311_v49 = vadd.f32 %v10577_v22, %v2201_v51  ;;  %2960 = vperm.xlu0 %9157, %v2827_v8   ;;  %v2722_v51 = vld [vmem:[#allocation10 + $0x418] sm:$0xff] }
 0x388   : > { %v9249_v27 = vpop.eup %9248  ;;  %v2375_v42 = vmul.f32 0.5, %v2311_v49  ;;  %8650 = vmatmul.msk.f32.vlgmr.msra.gmra.mxu2 %vm1108_vm0, %v2716_v46  ;;  %v10765_v6 = vpop.f32.mrf.mxu3  ;;  %4043 = vmatmul.f32.gmra.mxu1 %v3659_v43  ;;  %v2817_v43 = vld [vmem:[#allocation12 + $0x268] sm:$0xff]  ;;  %v2828_v49 = vld [vmem:[#allocation12 + $0x2c0] sm:$0xff] }
 0x389   : > { %v2436_v4 = vadd.f32 1.0, %v9249_v27  ;;  %3130 = vmatmul.f32.gmra.mxu0 %v2737_v52  ;;  %v3667_v52 = vld [vmem:[#allocation10 + $0x630] sm:$0xff] }
 0x38a   : > { %9250 = vtanh.f32 %v2375_v42  ;;  %2880 = vperm.xlu2 %9159, %v2811_v26   ;;  %v3742_v26 = vld [vmem:[#allocation12 + $0x2e8] sm:$0xff] }
 0x38b   : > { %v2467_v21 = vmul.f32 0.5, %v2436_v4  ;;  %v2203_v41 = vpop.f32.mrf.mxu2  ;;  %v1986_v4 = vpop.permute.xlu1 %1985  ;;  %2965 = vperm.xlu1 %9158, %v2828_v49  }
 0x38c   : > { %v2204_v22 = vadd.f32 %v2203_v41, %v1971_v19 }
 0x38d   : > { %8632 = vst [vmem:[%s10442_s21 + $0x160] sm:$0xff] %v2467_v21 }
 0x38e   : > { %v2314_v48 = vadd.f32 %v10589_v36, %v2204_v22  ;;  %2975 = vperm.xlu0 %9157, %v2830_v13   ;;  %v2724_v22 = vld [vmem:[#allocation10 + $0x428] sm:$0xff]  ;;  %v2749_v13 = vld [vmem:[#allocation10 + $0x4f0] sm:$0xff] }
 0x390   : > { %v9251_v0 = vpop.eup %9250  ;;  %v2376_v31 = vmul.f32 0.5, %v2314_v48  ;;  %8651 = vmatmul.msk.f32.gmra.mxu2 %vm1108_vm0, %v2718_v7  ;;  %v10770_v18 = vpop.f32.mrf.mxu3  ;;  %4046 = vmatmul.f32.gmra.mxu1 %v3661_v25  ;;  %v2820_v25 = vld [vmem:[#allocation12 + $0x280] sm:$0xff]  ;;  %v2831_v48 = vld [vmem:[#allocation12 + $0x2d8] sm:$0xff] }
 0x391   : > { %v2437_v11 = vadd.f32 1.0, %v9251_v0  ;;  %3133 = vmatmul.f32.gmra.mxu0 %v2739_v55  ;;  %v3669_v55 = vld [vmem:[#allocation10 + $0x640] sm:$0xff] }
 0x392   : > { %9252 = vtanh.f32 %v2376_v31  ;;  %2895 = vperm.xlu2 %9159, %v2814_v35   ;;  %v3743_v35 = vld [vmem:[#allocation12 + $0x2f0] sm:$0xff] }
 0x393   : > { %v2468_v61 = vmul.f32 0.5, %v2437_v11  ;;  %v2206_v12 = vpop.f32.mrf.mxu2  ;;  %v1991_v11 = vpop.permute.xlu2 %1990  ;;  %2980 = vperm.xlu1 %9158, %v2831_v48  }
 0x394   : > { %v2207_v36 = vadd.f32 %v2206_v12, %v1976_v59  ;;  %v2745_v12 = vld [vmem:[#allocation10 + $0x4d0] sm:$0xff] }
 0x395   : > { %8633 = vst [vmem:[%s10442_s21 + $0x168] sm:$0xff] %v2468_v61 }
 0x396   : > { %v2317_v39 = vadd.f32 %v10599_v14, %v2207_v36  ;;  %v2741_v14 = vld [vmem:[#allocation10 + $0x4b0] sm:$0xff]  ;;  %3775 = vperm.xlu0 %9157, %v3742_v26   ;;  %v2726_v36 = vld [vmem:[#allocation10 + $0x438] sm:$0xff] }
 0x398   : > { %v9253_v38 = vpop.eup %9252  ;;  %v2377_v15 = vmul.f32 0.5, %v2317_v39  ;;  %8652 = vmatmul.msk.f32.gmra.mxu2 %vm1108_vm0, %v2720_v54  ;;  %v3620_v10 = vpop.f32.mrf.mxu3  ;;  %4049 = vmatmul.f32.gmra.mxu1 %v3663_v20  ;;  %v2823_v39 = vld [vmem:[#allocation12 + $0x298] sm:$0xff] }
 0x399   : > { %v2438_v53 = vadd.f32 1.0, %v9253_v38  ;;  %3136 = vmatmul.f32.gmra.mxu0 %v2741_v14  ;;  %v1996_v20 = vpop.permute.xlu0 %1995 }
 0x39a   : > { %9254 = vtanh.f32 %v2377_v15  ;;  %2910 = vperm.xlu2 %9159, %v2817_v43   ;;  %v2001_v15 = vpop.permute.xlu1 %2000 }
 0x39b   : > { %v2469_v63 = vmul.f32 0.5, %v2438_v53  ;;  %v2209_v24 = vpop.f32.mrf.mxu2  ;;  %3780 = vperm.xlu1 %9158, %v3743_v35  }
 0x39c   : > { %v2210_v47 = vadd.f32 %v2209_v24, %v1981_v62  ;;  %v2747_v62 = vld [vmem:[#allocation10 + $0x4e0] sm:$0xff]  ;;  %v3656_v24 = vld [vmem:[#allocation10 + $0x5d8] sm:$0xff] }
 0x39d   : > { %8634 = vst [vmem:[%s10442_s21 + $0x170] sm:$0xff] %v2469_v63  ;;  %v2728_v63 = vld [vmem:[#allocation10 + $0x448] sm:$0xff] }
 0x39e   : > { %v2320_v46 = vadd.f32 %v10608_v1, %v2210_v47  ;;  %v2743_v1 = vld [vmem:[#allocation10 + $0x4c0] sm:$0xff]  ;;  %v3671_v47 = vld [vmem:[#allocation10 + $0x650] sm:$0xff] }
 0x3a0   : > { %v9255_v50 = vpop.eup %9254  ;;  %v2378_v28 = vmul.f32 0.5, %v2320_v46  ;;  %8653 = vmatmul.msk.f32.gmra.mxu2 %vm1108_vm0, %v2722_v51  ;;  %v3623_v27 = vpop.f32.mrf.mxu3  ;;  %4052 = vmatmul.f32.gmra.mxu1 %v3665_v40  ;;  %v2826_v51 = vld [vmem:[#allocation12 + $0x2b0] sm:$0xff] }
 0x3a1   : > { %v2439_v42 = vadd.f32 1.0, %v9255_v50  ;;  %3139 = vmatmul.f32.gmra.mxu0 %v2743_v1  ;;  %v10793_v14 = vpop.permute.xlu0 %2010  ;;  %v2730_v50 = vld [vmem:[#allocation10 + $0x458] sm:$0xff] }
 0x3a2   : > { %9256 = vtanh.f32 %v2378_v28  ;;  %2925 = vperm.xlu2 %9159, %v2820_v25   ;;  %v3658_v28 = vld [vmem:[#allocation10 + $0x5e8] sm:$0xff] }
 0x3a3   : > { %v2470_v19 = vmul.f32 0.5, %v2439_v42  ;;  %v2212_v21 = vpop.f32.mrf.mxu2  ;;  %v3673_v42 = vld [vmem:[#allocation10 + $0x660] sm:$0xff] }
 0x3a4   : > { %v2213_v41 = vadd.f32 %v2212_v21, %v1986_v4  ;;  %v2006_v4 = vpop.permute.xlu2 %2005  ;;  %v2829_v21 = vld [vmem:[#allocation12 + $0x2c8] sm:$0xff] }
 0x3a5   : > { %8635 = vst [vmem:[%s10442_s21 + $0x178] sm:$0xff] %v2470_v19 }
 0x3a6   : > { %v2323_v7 = vadd.f32 %v10614_v9, %v2213_v41  ;;  %v3745_v41 = vld [vmem:[#allocation12 + $0x300] sm:$0xff] }
 0x3a7   : > { %3790 = vperm.xlu0 %9157, %v3745_v41  }
 0x3a8   : > { %v9257_v34 = vpop.eup %9256  ;;  %v2379_v5 = vmul.f32 0.5, %v2323_v7  ;;  %8654 = vmatmul.msk.f32.gmra.mxu2 %vm1108_vm0, %v2724_v22  ;;  %v3626_v0 = vpop.f32.mrf.mxu3  ;;  %4055 = vmatmul.f32.gmra.mxu1 %v3667_v52 }
 0x3a9   : > { %v2440_v31 = vadd.f32 1.0, %v9257_v34  ;;  %4139 = vmatpush.msrb.mxu3 %v3626_v0  ;;  %3142 = vmatmul.f32.gmra.mxu0 %v2745_v12  ;;  %v10803_v19 = vpop.permute.xlu0 %2025  ;;  %v2751_v34 = vld [vmem:[#allocation10 + $0x500] sm:$0xff]  ;;  %v3660_v0 = vld [vmem:[#allocation10 + $0x5f8] sm:$0xff] }
 0x3aa   : > { %9258 = vtanh.f32 %v2379_v5  ;;  %2940 = vperm.xlu2 %9159, %v2823_v39   ;;  %v2732_v5 = vld [vmem:[#allocation10 + $0x468] sm:$0xff] }
 0x3ab   : > { %v2471_v59 = vmul.f32 0.5, %v2440_v31  ;;  %v2215_v61 = vpop.f32.mrf.mxu2  ;;  %4140 = vmatpush.msrb.mxu3 %v3623_v27 }
 0x3ac   : > { %v2216_v9 = vadd.f32 %v2215_v61, %v1991_v11  ;;  %v3675_v11 = vld [vmem:[#allocation10 + $0x670] sm:$0xff]  ;;  %v2832_v61 = vld [vmem:[#allocation12 + $0x2e0] sm:$0x1] }
 0x3ad   : > { %8636 = vst [vmem:[%s10442_s21 + $0x180] sm:$0xff] %v2471_v59  ;;  %4141 = vmatpush.msrb.mxu3 %v3620_v10  ;;  %v10786_v10 = vpop.f32.mrf.mxu0  ;;  %v2021_v59 = vpop.permute.xlu2 %2020 }
 0x3ae   : > { %v2326_v54 = vadd.f32 %v10621_v16, %v2216_v9  ;;  %v3746_v9 = vld [vmem:[#allocation12 + $0x308] sm:$0xff] }
 0x3af   : > { %4142 = vmatpush.msrb.mxu3 %v10770_v18  ;;  %3795 = vperm.xlu1 %9158, %v3746_v9  }
 0x3b0   : > { %v9259_v57 = vpop.eup %9258  ;;  %v2380_v8 = vmul.f32 0.5, %v2326_v54  ;;  %8655 = vmatmul.msk.f32.gmra.mxu2 %vm1108_vm0, %v2726_v36  ;;  %4058 = vmatmul.f32.gmra.mxu1 %v3669_v55 }
 0x3b1   : > { %v2441_v38 = vadd.f32 1.0, %v9259_v57  ;;  %4143 = vmatpush.msrb.mxu3 %v10765_v6  ;;  %3145 = vmatmul.f32.gmra.mxu0 %v2747_v62  ;;  %v10815_v54 = vpop.permute.xlu0 %2040  ;;  %v3744_v62 = vld [vmem:[#allocation12 + $0x2f8] sm:$0xff] }
 0x3b2   : > { %9260 = vtanh.f32 %v2380_v8  ;;  %2955 = vperm.xlu2 %9159, %v2826_v51   ;;  %v2753_v8 = vld [vmem:[#allocation10 + $0x510] sm:$0xff] }
 0x3b3   : > { %v2472_v16 = vmul.f32 0.5, %v2441_v38  ;;  %v2218_v18 = vpop.f32.mrf.mxu2  ;;  %4144 = vmatpush.msrb.mxu3 %v10760_v3  ;;  %v2734_v38 = vld [vmem:[#allocation10 + $0x478] sm:$0xff] }
 0x3b4   : > { %v2219_v53 = vadd.f32 %v2218_v18, %v1996_v20  ;;  %v3677_v18 = vld [vmem:[#allocation10 + $0x680] sm:$0xff] }
 0x3b5   : > { %8637 = vst [vmem:[%s10442_s21 + $0x188] sm:$0xff] %v2472_v16  ;;  %4145 = vmatpush.msrb.mxu3 %v10756_v23  ;;  %v10797_v23 = vpop.permute.xlu1 %2015 }
 0x3b6   : > { %v2329_v6 = vadd.f32 %v10628_v2, %v2219_v53  ;;  %v10799_v2 = vpop.f32.mrf.mxu0  ;;  %v10824_v53 = vpop.permute.xlu2 %2035 }
 0x3b7   : > { %4146 = vmatpush.msrb.mxu3 %v10748_v44 }
 0x3b8   : > { %v9261_v40 = vpop.eup %9260  ;;  %v2381_v46 = vmul.f32 0.5, %v2329_v6  ;;  %8656 = vmatmul.msk.f32.gmra.mxu2 %vm1108_vm0, %v2728_v63  ;;  %8712 = vmatmul.msk.f32.vlgmr.msrb.gmra.mxu3 %vm1108_vm0, %v3656_v24 }
 0x3b9   : > { %v2442_v3 = vadd.f32 1.0, %v9261_v40  ;;  %4061 = vmatmul.f32.gmra.mxu1 %v3671_v47  ;;  %3148 = vmatmul.f32.gmra.mxu0 %v2749_v13  ;;  %v3679_v13 = vld [vmem:[#allocation10 + $0x690] sm:$0xff] }
 0x3ba   : > { %9262 = vtanh.f32 %v2381_v46  ;;  %2970 = vperm.xlu2 %9159, %v2829_v21   ;;  %v2755_v46 = vld [vmem:[#allocation10 + $0x520] sm:$0xff] }
 0x3bb   : > { %v2473_v43 = vmul.f32 0.5, %v2442_v3  ;;  %v2221_v44 = vpop.f32.mrf.mxu2 }
 0x3bc   : > { %v2222_v49 = vadd.f32 %v2221_v44, %v2001_v15  ;;  %v3662_v15 = vld [vmem:[#allocation10 + $0x608] sm:$0xff]  ;;  %v3664_v44 = vld [vmem:[#allocation10 + $0x618] sm:$0xff] }
 0x3bd   : > { %8638 = vst [vmem:[%s10442_s21 + $0x190] sm:$0xff] %v2473_v43  ;;  %v2736_v43 = vld [vmem:[#allocation10 + $0x488] sm:$0xff] }
 0x3be   : > { %v2332_v27 = vadd.f32 %v10637_v32, %v2222_v49  ;;  %v10807_v7 = vpop.f32.mrf.mxu0  ;;  %v10809_v32 = vpop.permute.xlu1 %2030 }
 0x3c0   : > { %v9263_v1 = vpop.eup %9262  ;;  %v2382_v22 = vmul.f32 0.5, %v2332_v27  ;;  %8657 = vmatmul.msk.f32.gmra.mxu2 %vm1108_vm0, %v2730_v50  ;;  %8713 = vmatmul.msk.f32.gmra.mxu3 %vm1108_vm0, %v3658_v28  ;;  %v3748_v50 = vld [vmem:[#allocation12 + $0x318] sm:$0xff] }
 0x3c1   : > { %v2443_v52 = vadd.f32 1.0, %v9263_v1  ;;  %4064 = vmatmul.f32.gmra.mxu1 %v3673_v42  ;;  %3151 = vmatmul.f32.gmra.mxu0 %v2751_v34  ;;  %v2757_v1 = vld [vmem:[#allocation10 + $0x530] sm:$0xff] }
 0x3c2   : > { %9264 = vtanh.f32 %v2382_v22  ;;  %2985 = vperm.xlu2 %9159, %v2832_v61   ;;  %3805 = vperm.xlu0 %9157, %v3748_v50   ;;  %v2738_v22 = vld [vmem:[#allocation10 + $0x498] sm:$0xff] }
 0x3c3   : > { %v2474_v25 = vmul.f32 0.5, %v2443_v52  ;;  %v2224_v48 = vpop.f32.mrf.mxu2  ;;  %v3666_v52 = vld [vmem:[#allocation10 + $0x628] sm:$0xff] }
 0x3c4   : > { %v2225_v26 = vadd.f32 %v2224_v48, %v2006_v4 }
 0x3c5   : > { %8639 = vst [vmem:[%s10442_s21 + $0x198] sm:$0xff] %v2474_v25 }
 0x3c6   : > { %v2335_v31 = vadd.f32 %v10646_v29, %v2225_v26  ;;  %v10817_v20 = vpop.f32.mrf.mxu0  ;;  %v10819_v35 = vpop.permute.xlu1 %2045  ;;  %v3681_v26 = vld [vmem:[#allocation10 + $0x6a0] sm:$0xff] }
 0x3c8   : > { %v9265_v12 = vpop.eup %9264  ;;  %v2383_v36 = vmul.f32 0.5, %v2335_v31  ;;  %8658 = vmatmul.msk.f32.gmra.mxu2 %vm1108_vm0, %v2732_v5  ;;  %8714 = vmatmul.msk.f32.gmra.mxu3 %vm1108_vm0, %v3660_v0  ;;  %v3749_v5 = vld [vmem:[#allocation12 + $0x320] sm:$0xff] }
 0x3c9   : > { %v2444_v55 = vadd.f32 1.0, %v9265_v12  ;;  %4067 = vmatmul.f32.gmra.mxu1 %v3675_v11  ;;  %3154 = vmatmul.f32.gmra.mxu0 %v2753_v8 }
 0x3ca   : > { %9266 = vtanh.f32 %v2383_v36  ;;  %3785 = vperm.xlu2 %9159, %v3744_v62   ;;  %3810 = vperm.xlu1 %9158, %v3749_v5   ;;  %v2759_v36 = vld [vmem:[#allocation10 + $0x540] sm:$0xff]  ;;  %v3752_v5 = vld [vmem:[#allocation12 + $0x338] sm:$0xff] }
 0x3cb   : > { %v2475_v29 = vmul.f32 0.5, %v2444_v55  ;;  %v2227_v39 = vpop.f32.mrf.mxu2  ;;  %v2740_v55 = vld [vmem:[#allocation10 + $0x4a8] sm:$0xff] }
 0x3cc   : > { %v2228_v57 = vadd.f32 %v2227_v39, %v10793_v14 }
 0x3cd   : > { %8640 = vst [vmem:[%s10442_s21 + $0x1a0] sm:$0xff] %v2475_v29  ;;  %v3668_v29 = vld [vmem:[#allocation10 + $0x638] sm:$0xff] }
 0x3ce   : > { %v2338_v16 = vadd.f32 %v10652_v30, %v2228_v57  ;;  %v10828_v47 = vpop.f32.mrf.mxu0  ;;  %v10830_v30 = vpop.permute.xlu0 %2840  ;;  %v3683_v57 = vld [vmem:[#allocation10 + $0x6b0] sm:$0xff] }
 0x3cf   : > { %v10833_v3 = vpop.permute.xlu1 %2845 }
 0x3d0   : > { %v9267_v63 = vpop.eup %9266  ;;  %v2384_v24 = vmul.f32 0.5, %v2338_v16  ;;  %8659 = vmatmul.msk.f32.gmra.mxu2 %vm1108_vm0, %v2734_v38  ;;  %8715 = vmatmul.msk.f32.gmra.mxu3 %vm1108_vm0, %v3662_v15  ;;  %v3747_v38 = vld [vmem:[#allocation12 + $0x310] sm:$0xff] }
 0x3d1   : > { %v2445_v6 = vadd.f32 1.0, %v9267_v63  ;;  %4070 = vmatmul.f32.gmra.mxu1 %v3677_v18  ;;  %3157 = vmatmul.f32.gmra.mxu0 %v2755_v46 }
 0x3d2   : > { %9268 = vtanh.f32 %v2384_v24  ;;  %3800 = vperm.xlu2 %9159, %v3747_v38   ;;  %3825 = vperm.xlu1 %9158, %v3752_v5  }
 0x3d3   : > { %v2476_v14 = vmul.f32 0.5, %v2445_v6  ;;  %v2230_v51 = vpop.f32.mrf.mxu2  ;;  %v2761_v6 = vld [vmem:[#allocation10 + $0x550] sm:$0xff] }
 0x3d4   : > { %v2231_v40 = vadd.f32 %v2230_v51, %v10797_v23  ;;  %v10839_v23 = vpop.permute.xlu2 %2835  ;;  %v3670_v51 = vld [vmem:[#allocation10 + $0x648] sm:$0xff] }
 0x3d5   : > { %8641 = vst [vmem:[%s10442_s21 + $0x1a8] sm:$0xff] %v2476_v14  ;;  %v2742_v14 = vld [vmem:[#allocation10 + $0x4b8] sm:$0xff] }
 0x3d6   : > { %v2341_v49 = vadd.f32 %v10655_v56, %v2231_v40  ;;  %v10841_v4 = vpop.f32.mrf.mxu0  ;;  %v10844_v25 = vpop.permute.xlu0 %2855 }
 0x3d7   : > { %v10847_v34 = vpop.permute.xlu1 %2860 }
 0x3d8   : > { %v9269_v28 = vpop.eup %9268  ;;  %v2385_v27 = vmul.f32 0.5, %v2341_v49  ;;  %8660 = vmatmul.msk.f32.gmra.mxu2 %vm1108_vm0, %v2736_v43  ;;  %8716 = vmatmul.msk.f32.gmra.mxu3 %vm1108_vm0, %v3664_v44  ;;  %v3685_v43 = vld [vmem:[#allocation10 + $0x6c0] sm:$0xff]  ;;  %v3751_v44 = vld [vmem:[#allocation12 + $0x330] sm:$0xff] }
 0x3d9   : > { %v2446_v42 = vadd.f32 1.0, %v9269_v28  ;;  %4073 = vmatmul.f32.gmra.mxu1 %v3679_v13  ;;  %3160 = vmatmul.f32.gmra.mxu0 %v2757_v1  ;;  %v3672_v1 = vld [vmem:[#allocation10 + $0x658] sm:$0xff] }
 0x3da   : > { %9270 = vtanh.f32 %v2385_v27  ;;  %3820 = vperm.xlu0 %9157, %v3751_v44   ;;  %v2748_v44 = vld [vmem:[#allocation10 + $0x4e8] sm:$0xff] }
 0x3db   : > { %v2477_v21 = vmul.f32 0.5, %v2446_v42  ;;  %v2233_v41 = vpop.f32.mrf.mxu2 }
 0x3dc   : > { %v2234_v56 = vadd.f32 %v2233_v41, %v2021_v59  ;;  %v2763_v41 = vld [vmem:[#allocation10 + $0x560] sm:$0xff] }
 0x3dd   : > { %8642 = vst [vmem:[%s10442_s21 + $0x1b0] sm:$0xff] %v2477_v21 }
 0x3de   : > { %v2344_v48 = vadd.f32 %v10658_v45, %v2234_v56  ;;  %v10851_v59 = vpop.f32.mrf.mxu0  ;;  %v10853_v45 = vpop.permute.xlu2 %2850  ;;  %v2744_v56 = vld [vmem:[#allocation10 + $0x4c8] sm:$0xff] }
 0x3df   : > { %v10858_v8 = vpop.permute.xlu0 %2870  ;;  %v10862_v18 = vpop.permute.xlu1 %2875 }
 0x3e0   : > { %v9271_v0 = vpop.eup %9270  ;;  %v2386_v31 = vmul.f32 0.5, %v2344_v48  ;;  %8661 = vmatmul.msk.f32.gmra.mxu2 %vm1108_vm0, %v2738_v22  ;;  %8717 = vmatmul.msk.f32.gmra.mxu3 %vm1108_vm0, %v3666_v52  ;;  %v3687_v48 = vld [vmem:[#allocation10 + $0x6d0] sm:$0xff] }
 0x3e1   : > { %v2447_v11 = vadd.f32 1.0, %v9271_v0  ;;  %4076 = vmatmul.f32.gmra.mxu1 %v3681_v26  ;;  %3163 = vmatmul.f32.gmra.mxu0 %v2759_v36 }
 0x3e2   : > { %9272 = vtanh.f32 %v2386_v31 }
 0x3e3   : > { %v2478_v61 = vmul.f32 0.5, %v2447_v11  ;;  %v2236_v9 = vpop.f32.mrf.mxu2 }
 0x3e4   : > { %v2237_v12 = vadd.f32 %v2236_v9, %v10803_v19 }
 0x3e5   : > { %8643 = vst [vmem:[%s10442_s21 + $0x1b8] sm:$0xff] %v2478_v61 }
 0x3e6   : > { %v2347_v39 = vadd.f32 %v10661_v33, %v2237_v12  ;;  %v10864_v62 = vpop.f32.mrf.mxu0  ;;  %v10868_v40 = vpop.permute.xlu2 %2865 }
 0x3e7   : > { %v10877_v27 = vpop.permute.xlu1 %2890 }
 0x3e8   : > { %v9273_v15 = vpop.eup %9272  ;;  %v2387_v16 = vmul.f32 0.5, %v2347_v39  ;;  %8662 = vmatmul.msk.f32.gmra.mxu2 %vm1108_vm0, %v2740_v55  ;;  %8718 = vmatmul.msk.f32.gmra.mxu3 %vm1108_vm0, %v3668_v29  ;;  %v2746_v29 = vld [vmem:[#allocation10 + $0x4d8] sm:$0xff]  ;;  %v3674_v39 = vld [vmem:[#allocation10 + $0x668] sm:$0xff] }
 0x3e9   : > { %v2448_v19 = vadd.f32 1.0, %v9273_v15  ;;  %4079 = vmatmul.f32.gmra.mxu1 %v3683_v57  ;;  %3166 = vmatmul.f32.gmra.mxu0 %v2761_v6  ;;  %v3689_v15 = vld [vmem:[#allocation10 + $0x6e0] sm:$0xff] }
 0x3ea   : > { %9274 = vtanh.f32 %v2387_v16  ;;  %v3750_v16 = vld [vmem:[#allocation12 + $0x328] sm:$0xff] }
 0x3eb   : > { %v2479_v33 = vmul.f32 0.5, %v2448_v19  ;;  %v2239_v63 = vpop.f32.mrf.mxu2  ;;  %3815 = vperm.xlu2 %9159, %v3750_v16   ;;  %v3102_v16 = vadd.f32 %v10799_v2, %v10830_v30 }
 0x3ec   : > { %v2240_v24 = vadd.f32 %v2239_v63, %v10809_v32  ;;  %v10873_v32 = vpop.permute.xlu0 %2885 }
 0x3ed   : > { %8644 = vst [vmem:[%s10442_s21 + $0x1c0] sm:$0xff] %v2479_v33 }
 0x3ee   : > { %v2350_v46 = vadd.f32 %v10665_v58, %v2240_v24  ;;  %v10875_v28 = vpop.f32.mrf.mxu0  ;;  %v10884_v26 = vpop.permute.xlu2 %2880 }
 0x3ef   : > { %v10893_v55 = vpop.permute.xlu1 %2905 }
 0x3f0   : > { %v9275_v49 = vpop.eup %9274  ;;  %v2388_v13 = vmul.f32 0.5, %v2350_v46  ;;  %8663 = vmatmul.msk.f32.gmra.mxu2 %vm1108_vm0, %v2742_v14  ;;  %8719 = vmatmul.msk.f32.gmra.mxu3 %vm1108_vm0, %v3670_v51  ;;  %v5655_v51 = vld [vmem:[#allocation9 + $0x2f0] sm:$0xff]  ;;  %v2767_v46 = vld [vmem:[#allocation10 + $0x580] sm:$0xff] }
 0x3f1   : > { %v2449_v50 = vadd.f32 1.0, %v9275_v49  ;;  %4082 = vmatmul.f32.gmra.mxu1 %v3685_v43  ;;  %3169 = vmatmul.f32.gmra.mxu0 %v2763_v41  ;;  %v3676_v49 = vld [vmem:[#allocation10 + $0x678] sm:$0xff]  ;;  %v3754_v41 = vld [vmem:[#allocation12 + $0x348] sm:$0xff] }
 0x3f2   : > { %9276 = vtanh.f32 %v2388_v13  ;;  %5698 = vmatpush.msra.mxu3 %v5655_v51  ;;  %3835 = vperm.xlu0 %9157, %v3754_v41   ;;  %v2771_v51 = vld [vmem:[#allocation10 + $0x5a0] sm:$0xff] }
 0x3f3   : > { %v2480_v58 = vmul.f32 0.5, %v2449_v50  ;;  %v2242_v42 = vpop.f32.mrf.mxu2 }
 0x3f4   : > { %v2243_v21 = vadd.f32 %v2242_v42, %v10824_v53  ;;  %v10890_v12 = vpop.permute.xlu0 %2900  ;;  %v3691_v42 = vld [vmem:[#allocation10 + $0x6f0] sm:$0xff] }
 0x3f5   : > { %8645 = vst [vmem:[%s10442_s21 + $0x1c8] sm:$0xff] %v2480_v58  ;;  %v10881_v22 = vpop.f32.mrf.mxu1 }
 0x3f6   : > { %v2353_v52 = vadd.f32 %v10671_v37, %v2243_v21  ;;  %v10888_v11 = vpop.f32.mrf.mxu0  ;;  %v2765_v37 = vld [vmem:[#allocation10 + $0x570] sm:$0xff]  ;;  %v10901_v63 = vpop.permute.xlu2 %2895 }
 0x3f7   : > { %v10912_v21 = vpop.permute.xlu1 %2920 }
 0x3f8   : > { %v9277_v0 = vpop.eup %9276  ;;  %v2389_v31 = vmul.f32 0.5, %v2353_v52  ;;  %8664 = vmatmul.msk.f32.gmra.mxu2 %vm1108_vm0, %v2744_v56  ;;  %8720 = vmatmul.msk.f32.gmra.mxu3 %vm1108_vm0, %v3672_v1  ;;  %12404 = vst [vmem:[#allocation18_spill] sm:$0xff] %v10912_v21 }
 0x3f9   : > { %v2450_v53 = vadd.f32 1.0, %v9277_v0  ;;  %4085 = vmatmul.f32.gmra.mxu1 %v3687_v48  ;;  %3172 = vmatmul.f32.gmra.mxu0 %v2765_v37  ;;  %v3693_v37 = vld [vmem:[#allocation10 + $0x700] sm:$0xff] }
 0x3fa   : > { %9278 = vtanh.f32 %v2389_v31 }
 0x3fb   : > { %v2481_v61 = vmul.f32 0.5, %v2450_v53  ;;  %v2245_v9 = vpop.f32.mrf.mxu2  ;;  %v2769_v53 = vld [vmem:[#allocation10 + $0x590] sm:$0xff] }
 0x3fc   : > { %v2246_v36 = vadd.f32 %v2245_v9, %v10815_v54  ;;  %v10909_v50 = vpop.permute.xlu0 %2915  ;;  %v3678_v9 = vld [vmem:[#allocation10 + $0x688] sm:$0xff] }
 0x3fd   : > { %8646 = vst [vmem:[%s10442_s21 + $0x1d0] sm:$0xff] %v2481_v61  ;;  %v10896_v57 = vpop.f32.mrf.mxu1  ;;  %v2750_v61 = vld [vmem:[#allocation10 + $0x4f8] sm:$0xff] }
 0x3fe   : > { %v2356_v38 = vadd.f32 %v10676_v17, %v2246_v36  ;;  %v10903_v24 = vpop.f32.mrf.mxu0  ;;  %v4719_v17 = vld [vmem:[#allocation9 + $0x170] sm:$0xff]  ;;  %12403 = vst [vmem:[#allocation17_spill] sm:$0xff] %v10909_v50  ;;  %v10920_v0 = vpop.permute.xlu2 %2910 }
 0x3ff   : > { %4762 = vmatpush.msrb.mxu2 %v4719_v17  ;;  %12405 = vst [vmem:[#allocation19_spill] sm:$0xff] %v10920_v0  ;;  %v4399_v50 = vld [vmem:[#allocation7 + $0x10] sm:$0xff] }
 0x400   : > { %v9279_v19 = vpop.eup %9278  ;;  %v2390_v33 = vmul.f32 0.5, %v2356_v38  ;;  %8665 = vmatmul.msk.f32.gmra.mxu2 %vm1108_vm0, %v2746_v29  ;;  %8721 = vmatmul.msk.f32.gmra.mxu3 %vm1108_vm0, %v3674_v39  ;;  %v4715_v29 = vld [vmem:[#allocation9 + $0x150] sm:$0xff] }
 0x401   : > { %v2451_v54 = vadd.f32 1.0, %v9279_v19  ;;  %4088 = vmatmul.f32.gmra.mxu1 %v3689_v15  ;;  %3175 = vmatmul.f32.gmra.mxu0 %v2767_v46  ;;  %v3755_v38 = vld [vmem:[#allocation12 + $0x350] sm:$0xff]  ;;  %v10940_v19 = vpop.permute.xlu1 %2935  ;;  %v4406_v46 = vld [vmem:[#allocation6] sm:$0xff] }
 0x402   : > { %9280 = vtanh.f32 %v2390_v33  ;;  %12407 = vst [vmem:[#allocation21_spill] sm:$0xff] %v10940_v19  ;;  %3840 = vperm.xlu1 %9158, %v3755_v38   ;;  %v10971_v38 = vstv %s10938_s7 }
 0x403   : > { %v2482_v6 = vmul.f32 0.5, %v2451_v54  ;;  %v2248_v14 = vpop.f32.mrf.mxu2  ;;  %v4712_v54 = vld [vmem:[#allocation9 + $0x138] sm:$0xff] }
 0x404   : > { %v2249_v43 = vadd.f32 %v2248_v14, %v10819_v35  ;;  %v3099_v35 = vadd.f32 %v10786_v10, %v10839_v23  ;;  %v4718_v23 = vld [vmem:[#allocation9 + $0x168] sm:$0xff]  ;;  %v10931_v39 = vpop.permute.xlu0 %2930  ;;  %v4709_v14 = vld [vmem:[#allocation9 + $0x120] sm:$0xff] }
 0x405   : > { %8647 = vst [vmem:[%s10442_s21 + $0x1d8] sm:$0xff] %v2482_v6  ;;  %v10907_v13 = vpop.f32.mrf.mxu1  ;;  %4721 = vmatpush.msrb.mxu0 %v4718_v23 }
 0x406   : > { %v2359_v58 = vadd.f32 %v10684_v60, %v2249_v43  ;;  %v10918_v60 = vpop.f32.mrf.mxu0  ;;  %12406 = vst [vmem:[#allocation20_spill] sm:$0xff] %v10931_v39  ;;  %v10948_v43 = vstv %s10923_s18  ;;  %s11004_s18 = sld [smem:[%s10044_s13 + %s9899_s17]] }
 0x407   : > { %4722 = vmatpush.msrb.mxu0 %v4715_v29  ;;  %v4415_v41 = vmul.f32 %v10948_v43, %v4406_v46  ;;  %v4458_v29 = vld [vmem:[#allocation6 + $0x80] sm:$0xff]  ;;  %v3682_v46 = vld [vmem:[#allocation10 + $0x6a8] sm:$0xff] }
 0x408   : > { %v9281_v56 = vpop.eup %9280  ;;  %v2391_v1 = vmul.f32 0.5, %v2359_v58  ;;  %8666 = vmatmul.msk.f32.gmra.mxu2 %vm1108_vm0, %v2748_v44  ;;  %8722 = vmatmul.msk.f32.gmra.mxu3 %vm1108_vm0, %v3676_v49  ;;  %v2752_v44 = vld [vmem:[#allocation10 + $0x508] sm:$0xff]  ;;  %v3680_v49 = vld [vmem:[#allocation10 + $0x698] sm:$0xff] }
 0x409   : > { %v2452_v52 = vadd.f32 1.0, %v9281_v56  ;;  %4091 = vmatmul.f32.gmra.mxu1 %v3691_v42  ;;  %3178 = vmatmul.f32.gmra.mxu0 %v2769_v53  ;;  %v4706_v42 = vld [vmem:[#allocation9 + $0x108] sm:$0xff]  ;;  %v10957_v56 = vpop.permute.xlu2 %2925 }
 0x40a   : > { %9282 = vtanh.f32 %v2391_v1  ;;  %4723 = vmatpush.msrb.mxu0 %v4712_v54  ;;  %12408 = vst [vmem:[#allocation22_spill] sm:$0xff] %v10957_v56  ;;  %v4467_v54 = vmul.f32 %v10971_v38, %v4458_v29  ;;  %v4640_v56 = vld [vmem:[#allocation6 + $0x240] sm:$0xff] }
 0x40b   : > { %v2483_v48 = vmul.f32 0.5, %v2452_v52  ;;  %v3208_v5 = vpop.f32.mrf.mxu2  ;;  %v3695_v52 = vld [vmem:[#allocation10 + $0x710] sm:$0xff] }
 0x40c   : > { %v3209_v31 = vadd.f32 %v3208_v5, %v3099_v35  ;;  %4724 = vmatpush.msrb.mxu0 %v4709_v14  ;;  %v4432_v5 = vld [vmem:[#allocation6 + $0x40] sm:$0xff]  ;;  %v10987_v14 = vpop.permute.xlu1 %2950  ;;  %v11044_v21 = vstv %s11004_s18 }
 0x40d   : > { %8648 = vst [vmem:[%s10442_s21 + $0x1e0] sm:$0xff] %v2483_v48  ;;  %v10926_v10 = vpop.f32.mrf.mxu1  ;;  %v4397_v48 = vld [vmem:[#allocation7] sm:$0xff] }
 0x40e   : > { %v3301_v36 = vmul.f32 0.5, %v3209_v31  ;;  %v10942_v6 = vpop.f32.mrf.mxu0  ;;  %v10960_v31 = vstv %s10929_s20  ;;  %4725 = vmatpush.msrb.mxu0 %v4706_v42  ;;  %12410 = vst [vmem:[#allocation24_spill] sm:$0xff] %v10987_v14  ;;  %v5652_v42 = vld [vmem:[#allocation9 + $0x2d8] sm:$0xff] }
 0x40f   : > { %v4441_v23 = vmul.f32 %v10960_v31, %v4432_v5  ;;  %v4510_v5 = vld [vmem:[#allocation6 + $0x100] sm:$0xff]  ;;  %5699 = vmatpush.msra.mxu3 %v5652_v42  ;;  %v3108_v42 = vadd.f32 %v10817_v20, %v10853_v45  ;;  %v4688_v45 = vld [vmem:[#allocation9 + $0x78] sm:$0xff] }
 0x410   : > { %v9283_v15 = vpop.eup %9282  ;;  %8667 = vmatmul.msk.f32.gmra.mxu2 %vm1108_vm0, %v2750_v61  ;;  %8723 = vmatmul.msk.f32.gmra.mxu3 %vm1108_vm0, %v3678_v9  ;;  %9284 = vtanh.f32 %v3301_v36  ;;  %v4703_v61 = vld [vmem:[#allocation9 + $0xf0] sm:$0xff]  ;;  %v4423_v9 = vadd.f32 %v4415_v41, %v4397_v48  ;;  %v3105_v36 = vadd.f32 %v10807_v7, %v10833_v3  ;;  %v4484_v7 = vld [vmem:[#allocation6 + $0xc0] sm:$0xff]  ;;  %v10982_v3 = vstv %s10945_s16 }
 0x411   : > { %v2453_v33 = vadd.f32 1.0, %v9283_v15  ;;  %4094 = vmatmul.f32.gmra.mxu1 %v3693_v37  ;;  %3181 = vmatmul.f32.gmra.mxu0 %v2771_v51  ;;  %v3753_v37 = vld [vmem:[#allocation12 + $0x340] sm:$0xff]  ;;  %v2754_v51 = vld [vmem:[#allocation10 + $0x518] sm:$0xff]  ;;  %v4493_v48 = vmul.f32 %v10982_v3, %v4484_v7  ;;  %v4398_v7 = vld [vmem:[#allocation7 + $0x8] sm:$0xff] }
 0x412   : > { %4726 = vmatpush.msrb.mxu0 %v4703_v61  ;;  %3830 = vperm.xlu2 %9159, %v3753_v37  }
 0x413   : > { %v2484_v2 = vmul.f32 0.5, %v2453_v33  ;;  %v3211_v30 = vpop.f32.mrf.mxu2  ;;  %v4449_v33 = vadd.f32 %v4441_v23, %v4423_v9  ;;  %v3697_v9 = vld [vmem:[#allocation10 + $0x720] sm:$0xff]  ;;  %v4694_v23 = vld [vmem:[#allocation9 + $0xa8] sm:$0xff] }
 0x414   : > { %v3212_v17 = vadd.f32 %v3211_v30, %v3102_v16  ;;  %v4700_v16 = vld [vmem:[#allocation9 + $0xd8] sm:$0xff] }
 0x415   : > { %8649 = vst [vmem:[%s10442_s21 + $0x1e8] sm:$0x1] %v2484_v2  ;;  %v10954_v58 = vpop.f32.mrf.mxu1  ;;  %v10977_v2 = vpop.permute.xlu0 %2945  ;;  %4727 = vmatpush.msrb.mxu0 %v4700_v16 }
 0x416   : > { %v9285_v1 = vpop.eup %9284  ;;  %v3302_v35 = vmul.f32 0.5, %v3212_v17  ;;  %12409 = vst [vmem:[#allocation23_spill] sm:$0xff] %v10977_v2  ;;  %v10979_v30 = vpop.f32.mrf.mxu0  ;;  %v11022_v2 = vstv %s10985_s24 }
 0x417   : > { %v3363_v53 = vadd.f32 1.0, %v9285_v1  ;;  %v4697_v1 = vld [vmem:[#allocation9 + $0xc0] sm:$0xff] }
 0x418   : > { %8668 = vmatmul.msk.f32.gmra.mxu2 %vm1108_vm0, %v2752_v44  ;;  %8724 = vmatmul.msk.f32.gmra.mxu3 %vm1108_vm0, %v3680_v49  ;;  %9286 = vtanh.f32 %v3302_v35  ;;  %v4716_v44 = vld [vmem:[#allocation9 + $0x158] sm:$0xff]  ;;  %v5654_v49 = vld [vmem:[#allocation9 + $0x2e8] sm:$0xff]  ;;  %v2773_v35 = vld [vmem:[#allocation10 + $0x5b0] sm:$0xff] }
 0x419   : > { %4097 = vmatmul.f32.gmra.mxu1 %v3695_v52  ;;  %v3394_v15 = vmul.f32 0.5, %v3363_v53  ;;  %4763 = vmatpush.msrb.mxu2 %v4716_v44  ;;  %v4475_v52 = vadd.f32 %v4467_v54, %v4449_v33  ;;  %v10992_v53 = vstv %s10951_s12  ;;  %v4536_v33 = vld [vmem:[#allocation6 + $0x140] sm:$0xff]  ;;  %v11001_v54 = vstv %s10963_s11  ;;  %v4433_v44 = vld [vmem:[#allocation6 + $0x48] sm:$0xff] }
 0x41a   : > { %5657 = vmatpush.msrb.mxu1 %v5654_v49  ;;  %4728 = vmatpush.msrb.mxu0 %v4697_v1  ;;  %v4519_v37 = vmul.f32 %v10992_v53, %v4510_v5  ;;  %v4691_v1 = vld [vmem:[#allocation9 + $0x90] sm:$0xff]  ;;  %v4562_v5 = vld [vmem:[#allocation6 + $0x180] sm:$0xff] }
 0x41b   : > { %v3214_v17 = vpop.f32.mrf.mxu2  ;;  %8681 = vst [vmem:[%s10442_s21 + $0x1f0] sm:$0xff] %v3394_v15  ;;  %3184 = vmatmul.f32.gmra.mxu0 %v2773_v35  ;;  %v4501_v16 = vadd.f32 %v4493_v48, %v4475_v52  ;;  %v4442_v35 = vmul.f32 %v10960_v31, %v4433_v44  ;;  %v11011_v52 = vpop.permute.xlu2 %2940  ;;  %v3757_v44 = vld [vmem:[#allocation12 + $0x360] sm:$0xff] }
 0x41c   : > { %v3215_v41 = vadd.f32 %v3214_v17, %v3105_v36  ;;  %v4407_v36 = vld [vmem:[#allocation6 + $0x8] sm:$0xff]  ;;  %4729 = vmatpush.msrb.mxu0 %v4694_v23  ;;  %12411 = vst [vmem:[#allocation25_spill] sm:$0xff] %v11011_v52  ;;  %3850 = vperm.xlu0 %9157, %v3757_v44   ;;  %v11034_v52 = vstv %s10995_s14  ;;  %v11036_v44 = vpop.permute.xlu1 %2965 }
 0x41d   : > { %v10997_v61 = vpop.f32.mrf.mxu1  ;;  %v4416_v17 = vmul.f32 %v10948_v43, %v4407_v36  ;;  %v4527_v48 = vadd.f32 %v4519_v37, %v4501_v16  ;;  %v11016_v36 = vstv %s10974_s26  ;;  %v4485_v16 = vld [vmem:[#allocation6 + $0xc8] sm:$0xff]  ;;  %12413 = vst [vmem:[#allocation27_spill] sm:$0xff] %v11036_v44 }
 0x41e   : > { %v9287_v29 = vpop.eup %9286  ;;  %v3303_v15 = vmul.f32 0.5, %v3215_v41  ;;  %v4545_v41 = vmul.f32 %v11001_v54, %v4536_v33  ;;  %4730 = vmatpush.msrb.mxu0 %v4691_v1  ;;  %v4571_v23 = vmul.f32 %v11016_v36, %v4562_v5  ;;  %v4459_v33 = vld [vmem:[#allocation6 + $0x88] sm:$0xff]  ;;  %v11019_v14 = vpop.f32.mrf.mxu0  ;;  %v4685_v1 = vld [vmem:[#allocation9 + $0x60] sm:$0xff] }
 0x41f   : > { %v3364_v49 = vadd.f32 1.0, %v9287_v29  ;;  %v4424_v29 = vadd.f32 %v4416_v17, %v4398_v7  ;;  %v2756_v7 = vld [vmem:[#allocation10 + $0x528] sm:$0xff]  ;;  %v3684_v17 = vld [vmem:[#allocation10 + $0x6b8] sm:$0xff]  ;;  %v2775_v5 = vld [vmem:[#allocation10 + $0x5c0] sm:$0x1] }
 0x420   : > { %8669 = vmatmul.msk.f32.gmra.mxu2 %vm1108_vm0, %v2754_v51  ;;  %8725 = vmatmul.msk.f32.gmra.mxu3 %vm1108_vm0, %v3682_v46  ;;  %9288 = vtanh.f32 %v3303_v15  ;;  %v4553_v51 = vadd.f32 %v4545_v41, %v4527_v48  ;;  %v4588_v46 = vld [vmem:[#allocation6 + $0x1c0] sm:$0xff]  ;;  %v4468_v15 = vmul.f32 %v10971_v38, %v4459_v33  ;;  %v11030_v41 = vpop.permute.xlu0 %2960  ;;  %v4537_v44 = vld [vmem:[#allocation6 + $0x148] sm:$0xff] }
 0x421   : > { %v3395_v20 = vmul.f32 0.5, %v3364_v49  ;;  %4100 = vmatmul.f32.gmra.mxu1 %v3697_v9  ;;  %v4450_v37 = vadd.f32 %v4442_v35, %v4424_v29  ;;  %v11028_v49 = vadd.f32 %v10828_v47, %v10844_v25  ;;  %4731 = vmatpush.msrb.mxu0 %v4688_v45  ;;  %12412 = vst [vmem:[#allocation26_spill] sm:$0xff] %v11030_v41  ;;  %v4614_v33 = vld [vmem:[#allocation6 + $0x200] sm:$0xff]  ;;  %v3699_v47 = vld [vmem:[#allocation10 + $0x730] sm:$0xff]  ;;  %v4682_v25 = vld [vmem:[#allocation9 + $0x48] sm:$0xff] }
 0x422   : > { %v4579_v35 = vadd.f32 %v4571_v23, %v4553_v51  ;;  %v4597_v29 = vmul.f32 %v11022_v2, %v4588_v46  ;;  %v4623_v45 = vmul.f32 %v11034_v52, %v4614_v33  ;;  %v4408_v51 = vld [vmem:[#allocation6 + $0x10] sm:$0xff] }
 0x423   : > { %8682 = vst [vmem:[%s10442_s21 + $0x1f8] sm:$0xff] %v3395_v20  ;;  %v3217_v9 = vpop.f32.mrf.mxu2  ;;  %v4511_v20 = vld [vmem:[#allocation6 + $0x108] sm:$0xff]  ;;  %4732 = vmatpush.msrb.mxu0 %v4685_v1  ;;  %v4476_v41 = vadd.f32 %v4468_v15, %v4450_v37  ;;  %v4417_v1 = vmul.f32 %v10948_v43, %v4408_v51  ;;  %v4679_v33 = vld [vmem:[#allocation9 + $0x30] sm:$0xff]  ;;  %v4649_v37 = vmul.f32 %v11044_v21, %v4640_v56 }
 0x424   : > { %v3218_v48 = vadd.f32 %v3217_v9, %v3108_v42  ;;  %v4494_v42 = vmul.f32 %v10982_v3, %v4485_v16  ;;  %v4520_v23 = vmul.f32 %v10992_v53, %v4511_v20  ;;  %3187 = vmatmul.f32.gmra.mxu0 %v2775_v5  ;;  %v4605_v39 = vadd.f32 %v4597_v29, %v4579_v35  ;;  %v4434_v20 = vld [vmem:[#allocation6 + $0x50] sm:$0xff]  ;;  %v4563_v5 = vld [vmem:[#allocation6 + $0x188] sm:$0xff] }
 0x425   : > { %v11038_v19 = vpop.f32.mrf.mxu1  ;;  %4733 = vmatpush.msrb.mxu0 %v4682_v25  ;;  %v4546_v16 = vmul.f32 %v11001_v54, %v4537_v44  ;;  %v4425_v35 = vadd.f32 %v4417_v1, %v4399_v50  ;;  %v4443_v29 = vmul.f32 %v10960_v31, %v4434_v20  ;;  %v4676_v25 = vld [vmem:[#allocation9 + $0x18] sm:$0xff]  ;;  %v3758_v44 = vld [vmem:[#allocation12 + $0x368] sm:$0xff]  ;;  %v4713_v1 = vld [vmem:[#allocation9 + $0x140] sm:$0xff] }
 0x426   : > { %v9289_v46 = vpop.eup %9288  ;;  %v3304_v9 = vmul.f32 0.5, %v3218_v48  ;;  %v4502_v15 = vadd.f32 %v4494_v42, %v4476_v41  ;;  %v4631_v48 = vadd.f32 %v4623_v45, %v4605_v39  ;;  %v4460_v41 = vld [vmem:[#allocation6 + $0x90] sm:$0xff]  ;;  %v11052_v42 = vpop.permute.xlu2 %2955  ;;  %v4589_v39 = vld [vmem:[#allocation6 + $0x1c8] sm:$0xff]  ;;  %3855 = vperm.xlu1 %9158, %v3758_v44   ;;  %4764 = vmatpush.msrb.mxu2 %v4713_v1  ;;  %v4673_v20 = vld [vmem:[#allocation9] sm:$0xff] }
 0x427   : > { %v3365_v0 = vadd.f32 1.0, %v9289_v46  ;;  %4734 = vmatpush.msrb.mxu0 %v4679_v33  ;;  %12414 = vst [vmem:[#allocation28_spill] sm:$0xff] %v11052_v42  ;;  %v11054_v46 = vpop.f32.mrf.mxu0  ;;  %v4451_v45 = vadd.f32 %v4443_v29, %v4425_v35  ;;  %v4469_v50 = vmul.f32 %v10971_v38, %v4460_v41  ;;  %v5649_v33 = vld [vmem:[#allocation9 + $0x2c0] sm:$0xff]  ;;  %v4598_v35 = vmul.f32 %v11022_v2, %v4589_v39  ;;  %v4615_v29 = vld [vmem:[#allocation6 + $0x208] sm:$0xff]  ;;  %v4538_v42 = vld [vmem:[#allocation6 + $0x150] sm:$0xff] }
 0x428   : > { %8670 = vmatmul.msk.f32.gmra.mxu2 %vm1108_vm0, %v2756_v7  ;;  %8726 = vmatmul.msk.f32.gmra.mxu3 %vm1108_vm0, %v3684_v17  ;;  %9290 = vtanh.f32 %v3304_v9  ;;  %v4528_v56 = vadd.f32 %v4520_v23, %v4502_v15  ;;  %12415 = vst [vmem:[#allocation29_spill] sm:$0xff] %v11054_v46  ;;  %v4657_v7 = vadd.f32 %v4649_v37, %v4631_v48  ;;  %v4486_v9 = vld [vmem:[#allocation6 + $0xd0] sm:$0xff]  ;;  %v3686_v41 = vld [vmem:[#allocation10 + $0x6c8] sm:$0xff]  ;;  %v11071_v1 = vpop.permute.xlu0 %2975  ;;  %v4400_v46 = vld [vmem:[#allocation7 + $0x18] sm:$0xff] }
 0x429   : > { %v3396_v51 = vmul.f32 0.5, %v3365_v0  ;;  %4103 = vmatmul.f32.gmra.mxu1 %v3699_v47  ;;  %v4572_v17 = vmul.f32 %v11016_v36, %v4563_v5  ;;  %v2758_v47 = vld [vmem:[#allocation10 + $0x538] sm:$0xff]  ;;  %v11061_v23 = vadd.f32 %v10841_v4, %v10847_v34  ;;  %v5651_v15 = vld [vmem:[#allocation9 + $0x2d0] sm:$0xff]  ;;  %4735 = vmatpush.msrb.mxu0 %v4676_v25  ;;  %v3701_v4 = vld [vmem:[#allocation10 + $0x740] sm:$0xff]  ;;  %v4624_v34 = vmul.f32 %v11034_v52, %v4615_v29 }
 0x42a   : > { %5700 = vmatpush.msra.mxu3 %v5649_v33  ;;  %v11064_v48 = vmax.f32 %v4657_v7, 0.0  ;;  %v4554_v5 = vadd.f32 %v4546_v16, %v4528_v56  ;;  %5658 = vmatpush.msrb.mxu1 %v5651_v15  ;;  %v4477_v25 = vadd.f32 %v4469_v50, %v4451_v45  ;;  %12416 = vst [vmem:[#allocation30_spill] sm:$0xff] %v11071_v1  ;;  %v4641_v39 = vld [vmem:[#allocation6 + $0x248] sm:$0xff]  ;;  %v4435_v1 = vld [vmem:[#allocation6 + $0x58] sm:$0xff] }
 0x42b   : > { %8683 = vst [vmem:[%s10442_s21 + $0x200] sm:$0xff] %v3396_v51  ;;  %v3220_v0 = vpop.f32.mrf.mxu2  ;;  %v4512_v51 = vld [vmem:[#allocation6 + $0x110] sm:$0xff]  ;;  %4736 = vmatpush.msrb.mxu0 %v4673_v20  ;;  %v11076_v20 = vpop.permute.xlu1 %2980  ;;  %v4650_v50 = vmul.f32 %v11044_v21, %v4641_v39  ;;  %v4547_v29 = vmul.f32 %v11001_v54, %v4538_v42 }
 0x42c   : > { %v3221_v37 = vadd.f32 %v3220_v0, %v11028_v49  ;;  %v4495_v49 = vmul.f32 %v10982_v3, %v4486_v9  ;;  %v4409_v0 = vld [vmem:[#allocation6 + $0x18] sm:$0xff]  ;;  %4737 = vmatmul.f32.vlgmr.msrb.gmra.mxu0 %v11064_v48  ;;  %v4580_v56 = vadd.f32 %v4572_v17, %v4554_v5  ;;  %v4521_v33 = vmul.f32 %v10992_v53, %v4512_v51 }
 0x42d   : > { %v11067_v44 = vpop.f32.mrf.mxu1  ;;  %v4418_v15 = vmul.f32 %v10948_v43, %v4409_v0  ;;  %12417 = vst [vmem:[#allocation31_spill] sm:$0xff] %v11076_v20  ;;  %v4444_v51 = vmul.f32 %v10960_v31, %v4435_v1  ;;  %v4590_v20 = vld [vmem:[#allocation6 + $0x1d0] sm:$0xff] }
 0x42e   : > { %v9291_v7 = vpop.eup %9290  ;;  %v3305_v16 = vmul.f32 0.5, %v3221_v37  ;;  %v4503_v9 = vadd.f32 %v4495_v49, %v4477_v25  ;;  %v4606_v17 = vadd.f32 %v4598_v35, %v4580_v56  ;;  %v4564_v37 = vld [vmem:[#allocation6 + $0x190] sm:$0xff]  ;;  %v4461_v25 = vld [vmem:[#allocation6 + $0x98] sm:$0xff]  ;;  %v4599_v1 = vmul.f32 %v11022_v2, %v4590_v20 }
 0x42f   : > { %v3366_v45 = vadd.f32 1.0, %v9291_v7  ;;  %v4426_v5 = vadd.f32 %v4418_v15, %v4400_v46  ;;  %v4573_v39 = vmul.f32 %v11016_v36, %v4564_v37  ;;  %v3756_v49 = vld [vmem:[#allocation12 + $0x358] sm:$0xff]  ;;  %v11084_v42 = vpop.f32.mrf.mxu0  ;;  %v4410_v37 = vld [vmem:[#allocation6 + $0x20] sm:$0xff] }
 0x430   : > { %9292 = vtanh.f32 %v3305_v16  ;;  %8671 = vmatmul.msk.f32.gmra.mxu2 %vm1108_vm0, %v2758_v47  ;;  %8727 = vmatmul.msk.f32.gmra.mxu3 %vm1108_vm0, %v3686_v41  ;;  %v4529_v7 = vadd.f32 %v4521_v33, %v4503_v9  ;;  %12418 = vst [vmem:[#allocation32_spill] sm:$0xff] %v11084_v42  ;;  %v4632_v16 = vadd.f32 %v4624_v34, %v4606_v17  ;;  %v4487_v35 = vld [vmem:[#allocation6 + $0xd8] sm:$0xff]  ;;  %v3776_v42 = vpop.permute.xlu0 %3775 }
 0x431   : > { %v3397_v0 = vmul.f32 0.5, %v3366_v45  ;;  %4106 = vmatmul.f32.gmra.mxu1 %v3701_v4  ;;  %v4452_v47 = vadd.f32 %v4444_v51, %v4426_v5  ;;  %v4470_v41 = vmul.f32 %v10971_v38, %v4461_v25  ;;  %3845 = vperm.xlu2 %9159, %v3756_v49   ;;  %v11089_v4 = vpop.permute.xlu2 %2970  ;;  %v4616_v45 = vld [vmem:[#allocation6 + $0x210] sm:$0xff]  ;;  %v4496_v34 = vmul.f32 %v10982_v3, %v4487_v35  ;;  %v4513_v17 = vld [vmem:[#allocation6 + $0x118] sm:$0xff]  ;;  %v2760_v5 = vld [vmem:[#allocation10 + $0x548] sm:$0xff] }
 0x432   : > { %v4555_v56 = vadd.f32 %v4547_v29, %v4529_v7  ;;  %12419 = vst [vmem:[#allocation33_spill] sm:$0xff] %v11089_v4  ;;  %v4658_v15 = vadd.f32 %v4650_v50, %v4632_v16  ;;  %v3688_v51 = vld [vmem:[#allocation10 + $0x6d8] sm:$0xff]  ;;  %v3703_v25 = vld [vmem:[#allocation10 + $0x750] sm:$0xff]  ;;  %v4522_v29 = vmul.f32 %v10992_v53, %v4513_v17  ;;  %v4419_v20 = vmul.f32 %v10948_v43, %v4410_v37  ;;  %v4436_v37 = vld [vmem:[#allocation6 + $0x60] sm:$0xff] }
 0x433   : > { %8684 = vst [vmem:[%s10442_s21 + $0x208] sm:$0xff] %v3397_v0  ;;  %v3223_v46 = vpop.f32.mrf.mxu2  ;;  %v4478_v9 = vadd.f32 %v4470_v41, %v4452_v47  ;;  %v4625_v0 = vmul.f32 %v11034_v52, %v4616_v45  ;;  %v4642_v47 = vld [vmem:[#allocation6 + $0x250] sm:$0xff]  ;;  %v4539_v35 = vld [vmem:[#allocation6 + $0x158] sm:$0xff] }
 0x434   : > { %v3224_v33 = vadd.f32 %v3223_v46, %v11061_v23  ;;  %v4581_v49 = vadd.f32 %v4573_v39, %v4555_v56  ;;  %v3117_v23 = vadd.f32 %v10851_v59, %v10868_v40  ;;  %v11100_v16 = vmax.f32 %v4658_v15, 0.0  ;;  %v4401_v46 = vld [vmem:[#allocation7 + $0x20] sm:$0xff]  ;;  %v4565_v40 = vld [vmem:[#allocation6 + $0x198] sm:$0xff] }
 0x435   : > { %v4504_v41 = vadd.f32 %v4496_v34, %v4478_v9  ;;  %v4651_v45 = vmul.f32 %v11044_v21, %v4642_v47  ;;  %v4548_v17 = vmul.f32 %v11001_v54, %v4539_v35  ;;  %v4445_v15 = vmul.f32 %v10960_v31, %v4436_v37  ;;  %v3781_v9 = vpop.permute.xlu1 %3780  ;;  %v5646_v37 = vld [vmem:[#allocation9 + $0x2a8] sm:$0xff] }
 0x436   : > { %v9293_v7 = vpop.eup %9292  ;;  %v3306_v4 = vmul.f32 0.5, %v3224_v33  ;;  %v11098_v50 = vpop.f32.mrf.mxu1  ;;  %v4607_v56 = vadd.f32 %v4599_v1, %v4581_v49  ;;  %v4427_v33 = vadd.f32 %v4419_v20, %v4401_v46  ;;  %4740 = vmatmul.f32.gmra.mxu0 %v11100_v16  ;;  %v4574_v49 = vmul.f32 %v11016_v36, %v4565_v40  ;;  %5701 = vmatpush.msra.mxu3 %v5646_v37 }
 0x437   : > { %v3367_v39 = vadd.f32 1.0, %v9293_v7  ;;  %v4530_v59 = vadd.f32 %v4522_v29, %v4504_v41  ;;  %v4462_v7 = vld [vmem:[#allocation6 + $0xa0] sm:$0xff]  ;;  %v11109_v47 = vpop.f32.mrf.mxu0  ;;  %v4039_v35 = vadd.f32 %v10881_v22, %v3776_v42  ;;  %v4617_v42 = vld [vmem:[#allocation6 + $0x218] sm:$0xff] }
 0x438   : > { %9294 = vtanh.f32 %v3306_v4  ;;  %8672 = vmatmul.msk.f32.gmra.mxu2 %vm1108_vm0, %v2760_v5  ;;  %8728 = vmatmul.msk.f32.gmra.mxu3 %vm1108_vm0, %v3688_v51  ;;  %v4633_v1 = vadd.f32 %v4625_v0, %v4607_v56  ;;  %v3760_v4 = vld [vmem:[#allocation12 + $0x378] sm:$0xff]  ;;  %12420 = vst [vmem:[#allocation34_spill] sm:$0xff] %v11109_v47  ;;  %v4453_v29 = vadd.f32 %v4445_v15, %v4427_v33  ;;  %v4488_v41 = vld [vmem:[#allocation6 + $0xe0] sm:$0xff]  ;;  %v4437_v47 = vld [vmem:[#allocation6 + $0x68] sm:$0xff] }
 0x439   : > { %v3398_v34 = vmul.f32 0.5, %v3367_v39  ;;  %4109 = vmatmul.f32.gmra.mxu1 %v3703_v25  ;;  %v4556_v5 = vadd.f32 %v4548_v17, %v4530_v59  ;;  %v4591_v51 = vld [vmem:[#allocation6 + $0x1d8] sm:$0xff]  ;;  %v4471_v20 = vmul.f32 %v10971_v38, %v4462_v7  ;;  %3865 = vperm.xlu0 %9157, %v3760_v4   ;;  %v11116_v25 = vadd.f32 %v10864_v62, %v10858_v8  ;;  %v4710_v39 = vld [vmem:[#allocation9 + $0x128] sm:$0xff] }
 0x43a   : > { %v5648_v56 = vld [vmem:[#allocation9 + $0x2b8] sm:$0xff]  ;;  %v4659_v40 = vadd.f32 %v4651_v45, %v4633_v1  ;;  %v4600_v17 = vmul.f32 %v11022_v2, %v4591_v51  ;;  %v11120_v59 = vadd.f32 %v10896_v57, %v3781_v9  ;;  %4765 = vmatpush.msrb.mxu2 %v4710_v39  ;;  %v3690_v62 = vld [vmem:[#allocation10 + $0x6e8] sm:$0xff]  ;;  %v4626_v4 = vmul.f32 %v11034_v52, %v4617_v42  ;;  %v11127_v9 = vpop.permute.xlu2 %2985 }
 0x43b   : > { %8685 = vst [vmem:[%s10442_s21 + $0x210] sm:$0xff] %v3398_v34  ;;  %v3226_v0 = vpop.f32.mrf.mxu2  ;;  %v4148_v46 = vpop.f32.mrf.mxu3  ;;  %5659 = vmatpush.msrb.mxu1 %v5648_v56  ;;  %v4582_v22 = vadd.f32 %v4574_v49, %v4556_v5  ;;  %v4479_v15 = vadd.f32 %v4471_v20, %v4453_v29  ;;  %v4514_v34 = vld [vmem:[#allocation6 + $0x120] sm:$0xff]  ;;  %v2762_v8 = vld [vmem:[#allocation10 + $0x558] sm:$0xff]  ;;  %v4497_v45 = vmul.f32 %v10982_v3, %v4488_v41  ;;  %v4411_v57 = vld [vmem:[#allocation6 + $0x28] sm:$0xff] }
 0x43c   : > { %v3227_v33 = vadd.f32 %v3226_v0, %v3117_v23  ;;  %v11122_v7 = vmax.f32 %v4659_v40, 0.0  ;;  %v4523_v1 = vmul.f32 %v10992_v53, %v4514_v34  ;;  %12421 = vst [vmem:[#allocation35_spill] sm:$0xff] %v11127_v9  ;;  %v3705_v5 = vld [vmem:[#allocation10 + $0x760] sm:$0xff]  ;;  %v4643_v20 = vld [vmem:[#allocation6 + $0x258] sm:$0xff]  ;;  %v4149_v39 = vadd.f32 %v4148_v46, %v4039_v35  ;;  %v4402_v34 = vld [vmem:[#allocation7 + $0x28] sm:$0xff] }
 0x43d   : > { %v4608_v29 = vadd.f32 %v4600_v17, %v4582_v22  ;;  %v4540_v0 = vld [vmem:[#allocation6 + $0x160] sm:$0xff]  ;;  %v4420_v56 = vmul.f32 %v10948_v43, %v4411_v57  ;;  %v4652_v40 = vmul.f32 %v11044_v21, %v4643_v20  ;;  %v4505_v41 = vadd.f32 %v4497_v45, %v4479_v15 }
 0x43e   : > { %v9295_v23 = vpop.eup %9294  ;;  %v3307_v51 = vmul.f32 0.5, %v3227_v33  ;;  %v11129_v49 = vpop.f32.mrf.mxu1  ;;  %v4549_v42 = vmul.f32 %v11001_v54, %v4540_v0  ;;  %v4566_v17 = vld [vmem:[#allocation6 + $0x1a0] sm:$0xff]  ;;  %v4241_v22 = vmul.f32 0.5, %v4149_v39  ;;  %4743 = vmatmul.f32.gmra.mxu0 %v11122_v7  ;;  %v4446_v57 = vmul.f32 %v10960_v31, %v4437_v47  ;;  %v5642_v0 = vld [vmem:[#allocation9 + $0x288] sm:$0xff] }
 0x43f   : > { %v3368_v37 = vadd.f32 1.0, %v9295_v23  ;;  %v4634_v33 = vadd.f32 %v4626_v4, %v4608_v29  ;;  %v4428_v9 = vadd.f32 %v4420_v56, %v4402_v34  ;;  %v5645_v46 = vld [vmem:[#allocation9 + $0x2a0] sm:$0xff]  ;;  %v4531_v15 = vadd.f32 %v4523_v1, %v4505_v41  ;;  %v4463_v23 = vld [vmem:[#allocation6 + $0xa8] sm:$0xff]  ;;  %v3692_v34 = vld [vmem:[#allocation10 + $0x6f8] sm:$0xff] }
 0x440   : > { %9296 = vtanh.f32 %v3307_v51  ;;  %8673 = vmatmul.msk.f32.gmra.mxu2 %vm1108_vm0, %v2762_v8  ;;  %8729 = vmatmul.msk.f32.gmra.mxu3 %vm1108_vm0, %v3690_v62  ;;  %v4575_v45 = vmul.f32 %v11016_v36, %v4566_v17  ;;  %v3761_v51 = vld [vmem:[#allocation12 + $0x380] sm:$0xff]  ;;  %v11139_v8 = vpop.f32.mrf.mxu0  ;;  %v4472_v29 = vmul.f32 %v10971_v38, %v4463_v23  ;;  %v4489_v47 = vld [vmem:[#allocation6 + $0xe8] sm:$0xff] }
 0x441   : > { %v3399_v35 = vmul.f32 0.5, %v3368_v37  ;;  %4112 = vmatmul.f32.gmra.mxu1 %v3705_v5  ;;  %12422 = vst [vmem:[#allocation36_spill] sm:$0xff] %v11139_v8  ;;  %v4660_v62 = vadd.f32 %v4652_v40, %v4634_v33  ;;  %v4592_v4 = vld [vmem:[#allocation6 + $0x1e0] sm:$0xff]  ;;  %9298 = vtanh.f32 %v4241_v22  ;;  %3870 = vperm.xlu1 %9158, %v3761_v51   ;;  %v4557_v1 = vadd.f32 %v4549_v42, %v4531_v15  ;;  %v2764_v41 = vld [vmem:[#allocation10 + $0x568] sm:$0xff] }
 0x442   : > { %5660 = vmatpush.msrb.mxu1 %v5645_v46  ;;  %v4601_v39 = vmul.f32 %v11022_v2, %v4592_v4  ;;  %v4454_v56 = vadd.f32 %v4446_v57, %v4428_v9  ;;  %v4618_v40 = vld [vmem:[#allocation6 + $0x220] sm:$0xff]  ;;  %v4498_v33 = vmul.f32 %v10982_v3, %v4489_v47  ;;  %v4515_v23 = vld [vmem:[#allocation6 + $0x128] sm:$0xff]  ;;  %v4412_v9 = vld [vmem:[#allocation6 + $0x30] sm:$0xff]  ;;  %v3786_v8 = vpop.permute.xlu2 %3785 }
 0x443   : > { %8686 = vst [vmem:[%s10442_s21 + $0x218] sm:$0xff] %v3399_v35  ;;  %v3229_v5 = vpop.f32.mrf.mxu2  ;;  %v4151_v20 = vpop.f32.mrf.mxu3  ;;  %v11147_v22 = vmax.f32 %v4660_v62, 0.0  ;;  %v5639_v35 = vld [vmem:[#allocation9 + $0x270] sm:$0xff]  ;;  %v4583_v46 = vadd.f32 %v4575_v45, %v4557_v1  ;;  %v4627_v42 = vmul.f32 %v11034_v52, %v4618_v40 }
 0x444   : > { %v3230_v37 = vadd.f32 %v3229_v5, %v11116_v25  ;;  %5661 = vmatpush.msrb.mxu1 %v5642_v0  ;;  %v4152_v17 = vadd.f32 %v4151_v20, %v11120_v59  ;;  %v4480_v15 = vadd.f32 %v4472_v29, %v4454_v56  ;;  %v3707_v4 = vld [vmem:[#allocation10 + $0x770] sm:$0xff]  ;;  %v4644_v5 = vld [vmem:[#allocation6 + $0x260] sm:$0xff]  ;;  %v4524_v0 = vmul.f32 %v10992_v53, %v4515_v23  ;;  %v5636_v20 = vld [vmem:[#allocation9 + $0x258] sm:$0xff] }
 0x445   : > { %12423 = vst [vmem:[#allocation37_spill] sm:$0xff] %v11147_v22  ;;  %v4421_v59 = vmul.f32 %v10948_v43, %v4412_v9  ;;  %v4609_v45 = vadd.f32 %v4601_v39, %v4583_v46  ;;  %v4653_v1 = vmul.f32 %v11044_v21, %v4644_v5  ;;  %v4541_v56 = vld [vmem:[#allocation6 + $0x168] sm:$0xff]  ;;  %v4403_v40 = vld [vmem:[#allocation7 + $0x30] sm:$0xff]  ;;  %v3791_v5 = vpop.permute.xlu0 %3790 }
 0x446   : > { %v9297_v57 = vpop.eup %9296  ;;  %v3308_v51 = vmul.f32 0.5, %v3230_v37  ;;  %v11150_v25 = vpop.f32.mrf.mxu1  ;;  %5662 = vmatpush.msrb.mxu1 %v5639_v35  ;;  %v4242_v47 = vmul.f32 0.5, %v4152_v17  ;;  %v4506_v29 = vadd.f32 %v4498_v33, %v4480_v15  ;;  %v4550_v17 = vmul.f32 %v11001_v54, %v4541_v56  ;;  %v4438_v23 = vld [vmem:[#allocation6 + $0x70] sm:$0xff]  ;;  %4746 = vmatmul.f32.gmra.mxu0 %v11147_v22  ;;  %v4704_v56 = vld [vmem:[#allocation9 + $0xf8] sm:$0xff] }
 0x447   : > { %12424 = vst [vmem:[#allocation38_spill] sm:$0xff] %v11150_v25  ;;  %v3369_v62 = vadd.f32 1.0, %v9297_v57  ;;  %v9299_v37 = vpop.eup %9298  ;;  %v3123_v25 = vadd.f32 %v10875_v28, %v10862_v18  ;;  %v4429_v35 = vadd.f32 %v4421_v59, %v4403_v40  ;;  %v4707_v46 = vld [vmem:[#allocation9 + $0x110] sm:$0xff]  ;;  %v4635_v33 = vadd.f32 %v4627_v42, %v4609_v45  ;;  %v4567_v57 = vld [vmem:[#allocation6 + $0x1a8] sm:$0xff]  ;;  %v5633_v28 = vld [vmem:[#allocation9 + $0x240] sm:$0xff] }
 0x448   : > { %9300 = vtanh.f32 %v3308_v51  ;;  %8674 = vmatmul.msk.f32.gmra.mxu2 %vm1108_vm0, %v2764_v41  ;;  %8730 = vmatmul.msk.f32.gmra.mxu3 %vm1108_vm0, %v3692_v34  ;;  %v4303_v15 = vadd.f32 1.0, %v9299_v37  ;;  %v4532_v9 = vadd.f32 %v4524_v0, %v4506_v29  ;;  %v11161_v18 = vpop.f32.mrf.mxu0  ;;  %v4576_v41 = vmul.f32 %v11016_v36, %v4567_v57  ;;  %v4464_v51 = vld [vmem:[#allocation6 + $0xb0] sm:$0xff]  ;;  %v2766_v45 = vld [vmem:[#allocation10 + $0x578] sm:$0xff] }
 0x449   : > { %v3400_v39 = vmul.f32 0.5, %v3369_v62  ;;  %4115 = vmatmul.f32.gmra.mxu1 %v3707_v4  ;;  %4766 = vmatpush.msrb.mxu2 %v4707_v46  ;;  %12425 = vst [vmem:[#allocation39_spill] sm:$0xff] %v11161_v18  ;;  %9302 = vtanh.f32 %v4242_v47  ;;  %v4447_v34 = vmul.f32 %v10960_v31, %v4438_v23  ;;  %v4045_v4 = vadd.f32 %v10907_v13, %v3786_v8  ;;  %v3759_v59 = vld [vmem:[#allocation12 + $0x370] sm:$0xff]  ;;  %v5630_v13 = vld [vmem:[#allocation9 + $0x228] sm:$0xff]  ;;  %v3709_v46 = vld [vmem:[#allocation10 + $0x780] sm:$0xff] }
 0x44a   : > { %5663 = vmatpush.msrb.mxu1 %v5636_v20  ;;  %v11169_v42 = vadd.f32 %v10888_v11, %v10884_v26  ;;  %v3694_v20 = vld [vmem:[#allocation10 + $0x708] sm:$0xff]  ;;  %v5643_v29 = vld [vmem:[#allocation9 + $0x290] sm:$0xff]  ;;  %v4661_v40 = vadd.f32 %v4653_v1, %v4635_v33  ;;  %v4334_v47 = vmul.f32 0.5, %v4303_v15  ;;  %v4558_v37 = vadd.f32 %v4550_v17, %v4532_v9  ;;  %3860 = vperm.xlu2 %9159, %v3759_v59   ;;  %v4701_v18 = vld [vmem:[#allocation9 + $0xe0] sm:$0xff] }
 0x44b   : > { %8687 = vst [vmem:[%s10442_s21 + $0x220] sm:$0xff] %v3400_v39  ;;  %v3232_v0 = vpop.f32.mrf.mxu2  ;;  %v4154_v62 = vpop.f32.mrf.mxu3  ;;  %5702 = vmatpush.msra.mxu3 %v5643_v29  ;;  %4767 = vmatpush.msrb.mxu2 %v4704_v56  ;;  %v4593_v8 = vld [vmem:[#allocation6 + $0x1e8] sm:$0xff]  ;;  %v4455_v39 = vadd.f32 %v4447_v34, %v4429_v35  ;;  %v4473_v26 = vmul.f32 %v10971_v38, %v4464_v51  ;;  %v4490_v11 = vld [vmem:[#allocation6 + $0xf0] sm:$0xff]  ;;  %v4720_v22 = vld [vmem:[#allocation9 + $0x178] sm:$0xff] }
 0x44c   : > { %v3233_v23 = vadd.f32 %v3232_v0, %v3123_v25  ;;  %5664 = vmatpush.msrb.mxu1 %v5633_v28  ;;  %v11172_v57 = vmax.f32 %v4661_v40, 0.0  ;;  %8743 = vst [vmem:[%s10442_s21 + $0x2e8] sm:$0xff] %v4334_v47  ;;  %v4584_v1 = vadd.f32 %v4576_v41, %v4558_v37  ;;  %v4602_v17 = vmul.f32 %v11022_v2, %v4593_v8  ;;  %v4619_v35 = vld [vmem:[#allocation6 + $0x228] sm:$0xff]  ;;  %v4516_v51 = vld [vmem:[#allocation6 + $0x130] sm:$0xff]  ;;  %v4413_v59 = vld [vmem:[#allocation6 + $0x38] sm:$0xff] }
 0x44d   : > { %v4499_v25 = vmul.f32 %v10982_v3, %v4490_v11  ;;  %4768 = vmatpush.msrb.mxu2 %v4701_v18  ;;  %4803 = vmatpush.msra.mxu0 %v4720_v22  ;;  %v4481_v34 = vadd.f32 %v4473_v26, %v4455_v39  ;;  %v4155_v28 = vadd.f32 %v4154_v62, %v4045_v4  ;;  %v4698_v41 = vld [vmem:[#allocation9 + $0xc8] sm:$0xff]  ;;  %v4717_v56 = vld [vmem:[#allocation9 + $0x160] sm:$0xff]  ;;  %v5627_v22 = vld [vmem:[#allocation9 + $0x210] sm:$0xff] }
 0x44e   : > { %v9301_v33 = vpop.eup %9300  ;;  %v3309_v15 = vmul.f32 0.5, %v3233_v23  ;;  %v11177_v9 = vpop.f32.mrf.mxu1  ;;  %v11180_v0 = vadd.f32 %v10926_v10, %v3791_v5  ;;  %5665 = vmatpush.msrb.mxu1 %v5630_v13  ;;  %v4610_v40 = vadd.f32 %v4602_v17, %v4584_v1  ;;  %v4628_v47 = vmul.f32 %v11034_v52, %v4619_v35  ;;  %v4645_v37 = vld [vmem:[#allocation6 + $0x268] sm:$0xff]  ;;  %4749 = vmatmul.f32.gmra.mxu0 %v11172_v57  ;;  %v4542_v39 = vld [vmem:[#allocation6 + $0x170] sm:$0xff]  ;;  %v4404_v11 = vld [vmem:[#allocation7 + $0x38] sm:$0xff] }
 0x44f   : > { %v3370_v29 = vadd.f32 1.0, %v9301_v33  ;;  %v4525_v23 = vmul.f32 %v10992_v53, %v4516_v51  ;;  %v9303_v18 = vpop.eup %9302  ;;  %v4654_v10 = vmul.f32 %v11044_v21, %v4645_v37  ;;  %v4507_v4 = vadd.f32 %v4499_v25, %v4481_v34  ;;  %v4568_v26 = vld [vmem:[#allocation6 + $0x1b0] sm:$0xff]  ;;  %4769 = vmatpush.msrb.mxu2 %v4698_v41  ;;  %4804 = vmatpush.msra.mxu0 %v4717_v56  ;;  %v5624_v17 = vld [vmem:[#allocation9 + $0x1f8] sm:$0xff]  ;;  %v2768_v34 = vld [vmem:[#allocation10 + $0x588] sm:$0xff] }
 0x450   : > { %9304 = vtanh.f32 %v3309_v15  ;;  %8675 = vmatmul.msk.f32.gmra.mxu2 %vm1108_vm0, %v2766_v45  ;;  %8731 = vmatmul.msk.f32.gmra.mxu3 %vm1108_vm0, %v3694_v20  ;;  %v4243_v5 = vmul.f32 0.5, %v4155_v28  ;;  %v4636_v13 = vadd.f32 %v4628_v47, %v4610_v40  ;;  %v4304_v8 = vadd.f32 1.0, %v9303_v18  ;;  %v4695_v45 = vld [vmem:[#allocation9 + $0xb0] sm:$0xff]  ;;  %v4714_v20 = vld [vmem:[#allocation9 + $0x148] sm:$0xff]  ;;  %v3696_v51 = vld [vmem:[#allocation10 + $0x718] sm:$0xff]  ;;  %v11193_v40 = vpop.f32.mrf.mxu0 }
 0x451   : > { %v3401_v62 = vmul.f32 0.5, %v3370_v29  ;;  %4118 = vmatmul.f32.gmra.mxu1 %v3709_v46  ;;  %v4422_v1 = vmul.f32 %v10948_v43, %v4413_v59  ;;  %v4533_v33 = vadd.f32 %v4525_v23, %v4507_v4  ;;  %v4551_v25 = vmul.f32 %v11001_v54, %v4542_v39  ;;  %v4594_v43 = vld [vmem:[#allocation6 + $0x1f0] sm:$0xff]  ;;  %v4439_v41 = vld [vmem:[#allocation6 + $0x78] sm:$0xff]  ;;  %4770 = vmatpush.msrb.mxu2 %v4695_v45  ;;  %v5621_v23 = vld [vmem:[#allocation9 + $0x1e0] sm:$0xff]  ;;  %v3796_v39 = vpop.permute.xlu1 %3795 }
 0x452   : > { %v4577_v46 = vmul.f32 %v11016_v36, %v4568_v26  ;;  %9306 = vtanh.f32 %v4243_v5  ;;  %5666 = vmatpush.msrb.mxu1 %v5627_v22  ;;  %v4662_v28 = vadd.f32 %v4654_v10, %v4636_v13  ;;  %v4335_v29 = vmul.f32 0.5, %v4304_v8  ;;  %4805 = vmatpush.msra.mxu0 %v4714_v20  ;;  %v4692_v47 = vld [vmem:[#allocation9 + $0x98] sm:$0xff]  ;;  %v4711_v37 = vld [vmem:[#allocation9 + $0x130] sm:$0xff] }
 0x453   : > { %8688 = vst [vmem:[%s10442_s21 + $0x228] sm:$0xff] %v3401_v62  ;;  %v3235_v15 = vpop.f32.mrf.mxu2  ;;  %v4157_v35 = vpop.f32.mrf.mxu3  ;;  %v4430_v59 = vadd.f32 %v4422_v1, %v4404_v11  ;;  %v4559_v18 = vadd.f32 %v4551_v25, %v4533_v33  ;;  %v4603_v4 = vmul.f32 %v11022_v2, %v4594_v43  ;;  %v3129_v22 = vadd.f32 %v10903_v24, %v10873_v32  ;;  %v4620_v5 = vld [vmem:[#allocation6 + $0x230] sm:$0xff]  ;;  %v4465_v62 = vld [vmem:[#allocation6 + $0xb8] sm:$0xff]  ;;  %v4689_v32 = vld [vmem:[#allocation9 + $0x80] sm:$0xff] }
 0x454   : > { %v3236_v56 = vadd.f32 %v3235_v15, %v11169_v42  ;;  %5667 = vmatpush.msrb.mxu1 %v5624_v17  ;;  %v11198_v10 = vmax.f32 %v4662_v28, 0.0  ;;  %8744 = vst [vmem:[%s10442_s21 + $0x2f0] sm:$0xff] %v4335_v29  ;;  %v4448_v42 = vmul.f32 %v10960_v31, %v4439_v41  ;;  %v4491_v13 = vld [vmem:[#allocation6 + $0xf8] sm:$0xff]  ;;  %v4158_v8 = vadd.f32 %v4157_v35, %v11180_v0  ;;  %v3711_v45 = vld [vmem:[#allocation10 + $0x790] sm:$0xff] }
 0x455   : > { %4771 = vmatpush.msrb.mxu2 %v4692_v47  ;;  %4806 = vmatpush.msra.mxu0 %v4711_v37  ;;  %v4585_v24 = vadd.f32 %v4577_v46, %v4559_v18  ;;  %v4629_v20 = vmul.f32 %v11034_v52, %v4620_v5  ;;  %v4474_v17 = vmul.f32 %v10971_v38, %v4465_v62  ;;  %v4708_v31 = vld [vmem:[#allocation9 + $0x118] sm:$0xff]  ;;  %v4646_v25 = vld [vmem:[#allocation6 + $0x270] sm:$0xff]  ;;  %v5618_v46 = vld [vmem:[#allocation9 + $0x1c8] sm:$0xff] }
 0x456   : > { %v9305_v26 = vpop.eup %9304  ;;  %v3310_v11 = vmul.f32 0.5, %v3236_v56  ;;  %v11203_v1 = vpop.f32.mrf.mxu1  ;;  %5668 = vmatpush.msrb.mxu1 %v5621_v23  ;;  %v4456_v15 = vadd.f32 %v4448_v42, %v4430_v59  ;;  %v4500_v0 = vmul.f32 %v10982_v3, %v4491_v13  ;;  %v4517_v35 = vld [vmem:[#allocation6 + $0x138] sm:$0xff]  ;;  %v4244_v28 = vmul.f32 0.5, %v4158_v8  ;;  %4752 = vmatmul.f32.gmra.mxu0 %v11198_v10  ;;  %v4686_v3 = vld [vmem:[#allocation9 + $0x68] sm:$0xff]  ;;  %v5615_v59 = vld [vmem:[#allocation9 + $0x1b0] sm:$0xff] }
 0x457   : > { %v3371_v33 = vadd.f32 1.0, %v9305_v26  ;;  %v4611_v43 = vadd.f32 %v4603_v4, %v4585_v24  ;;  %v4655_v41 = vmul.f32 %v11044_v21, %v4646_v25  ;;  %v4543_v38 = vld [vmem:[#allocation6 + $0x178] sm:$0xff]  ;;  %v4051_v56 = vadd.f32 %v10954_v58, %v3796_v39  ;;  %4772 = vmatpush.msrb.mxu2 %v4689_v32  ;;  %4807 = vmatpush.msra.mxu0 %v4708_v31  ;;  %v4683_v18 = vld [vmem:[#allocation9 + $0x50] sm:$0xff]  ;;  %v4702_v32 = vld [vmem:[#allocation9 + $0xe8] sm:$0xff] }
 0x458   : > { %v9307_v29 = vpop.eup %9306  ;;  %9308 = vtanh.f32 %v3310_v11  ;;  %8676 = vmatmul.msk.f32.gmra.mxu2 %vm1108_vm0, %v2768_v34  ;;  %8732 = vmatmul.msk.f32.gmra.mxu3 %vm1108_vm0, %v3696_v51  ;;  %v4482_v23 = vadd.f32 %v4474_v17, %v4456_v15  ;;  %v4526_v34 = vmul.f32 %v10992_v53, %v4517_v35  ;;  %v4705_v51 = vld [vmem:[#allocation9 + $0x100] sm:$0xff]  ;;  %v4569_v5 = vld [vmem:[#allocation6 + $0x1b8] sm:$0xff]  ;;  %v4552_v39 = vmul.f32 %v11001_v54, %v4543_v38  ;;  %v3763_v11 = vld [vmem:[#allocation12 + $0x390] sm:$0xff] }
 0x459   : > { %v3402_v47 = vmul.f32 0.5, %v3371_v33  ;;  %4121 = vmatmul.f32.gmra.mxu1 %v3711_v45  ;;  %v4305_v37 = vadd.f32 1.0, %v9307_v29  ;;  %v4637_v4 = vadd.f32 %v4629_v20, %v4611_v43  ;;  %9310 = vtanh.f32 %v4244_v28  ;;  %v5640_v62 = vld [vmem:[#allocation9 + $0x278] sm:$0xff]  ;;  %4773 = vmatpush.msrb.mxu2 %v4686_v3  ;;  %v11216_v45 = vpop.f32.mrf.mxu0  ;;  %v3698_v33 = vld [vmem:[#allocation10 + $0x728] sm:$0xff]  ;;  %v3713_v29 = vld [vmem:[#allocation10 + $0x7a0] sm:$0xff] }
 0x45a   : > { %5669 = vmatpush.msrb.mxu1 %v5618_v46  ;;  %v4508_v8 = vadd.f32 %v4500_v0, %v4482_v23  ;;  %v4595_v26 = vld [vmem:[#allocation6 + $0x1f8] sm:$0xff]  ;;  %5703 = vmatpush.msra.mxu3 %v5640_v62  ;;  %v4578_v25 = vmul.f32 %v11016_v36, %v4569_v5  ;;  %v3801_v0 = vpop.permute.xlu2 %3800  ;;  %v4699_v38 = vld [vmem:[#allocation9 + $0xd0] sm:$0xff] }
 0x45b   : > { %8689 = vst [vmem:[%s10442_s21 + $0x230] sm:$0xff] %v3402_v47  ;;  %v3238_v58 = vpop.f32.mrf.mxu2  ;;  %v4160_v42 = vpop.f32.mrf.mxu3  ;;  %v4336_v13 = vmul.f32 0.5, %v4305_v37  ;;  %v5612_v24 = vld [vmem:[#allocation9 + $0x198] sm:$0xff]  ;;  %v4663_v20 = vadd.f32 %v4655_v41, %v4637_v4  ;;  %4808 = vmatpush.msra.mxu0 %v4705_v51  ;;  %4774 = vmatpush.msrb.mxu2 %v4683_v18  ;;  %v4604_v43 = vmul.f32 %v11022_v2, %v4595_v26  ;;  %v5609_v47 = vld [vmem:[#allocation9 + $0x180] sm:$0xff] }
 0x45c   : > { %v3239_v53 = vadd.f32 %v3238_v58, %v3129_v22  ;;  %v2770_v17 = vld [vmem:[#allocation10 + $0x598] sm:$0xff]  ;;  %5670 = vmatpush.msrb.mxu1 %v5615_v59  ;;  %v4534_v31 = vadd.f32 %v4526_v34, %v4508_v8  ;;  %v4161_v54 = vadd.f32 %v4160_v42, %v4051_v56  ;;  %3880 = vperm.xlu0 %9157, %v3763_v11   ;;  %v4677_v2 = vld [vmem:[#allocation9 + $0x20] sm:$0xff]  ;;  %v3762_v42 = vld [vmem:[#allocation12 + $0x388] sm:$0xff] }
 0x45d   : > { %8745 = vst [vmem:[%s10442_s21 + $0x2f8] sm:$0xff] %v4336_v13  ;;  %v4621_v15 = vld [vmem:[#allocation6 + $0x238] sm:$0xff]  ;;  %4809 = vmatpush.msra.mxu0 %v4702_v32  ;;  %v11223_v3 = vmax.f32 %v4663_v20, 0.0  ;;  %v3132_v37 = vadd.f32 %v10918_v60, %v10877_v27  ;;  %v4054_v51 = vadd.f32 %v10997_v61, %v3801_v0  ;;  %v4674_v60 = vld [vmem:[#allocation9 + $0x8] sm:$0xff]  ;;  %v4693_v61 = vld [vmem:[#allocation9 + $0xa0] sm:$0xff]  ;;  %3875 = vperm.xlu2 %9159, %v3762_v42  }
 0x45e   : > { %v9309_v35 = vpop.eup %9308  ;;  %v3311_v22 = vmul.f32 0.5, %v3239_v53  ;;  %v11220_v28 = vpop.f32.mrf.mxu1  ;;  %v4680_v46 = vld [vmem:[#allocation9 + $0x38] sm:$0xff]  ;;  %5671 = vmatpush.msrb.mxu1 %v5612_v24  ;;  %v4560_v36 = vadd.f32 %v4552_v39, %v4534_v31  ;;  %v4245_v56 = vmul.f32 0.5, %v4161_v54  ;;  %v4630_v23 = vmul.f32 %v11034_v52, %v4621_v15  ;;  %v2772_v32 = vld [vmem:[#allocation10 + $0x5a8] sm:$0xff]  ;;  %v3715_v15 = vld [vmem:[#allocation10 + $0x7b0] sm:$0x1] }
 0x45f   : > { %v3372_v41 = vadd.f32 1.0, %v9309_v35  ;;  %v9311_v59 = vpop.eup %9310  ;;  %v4647_v34 = vld [vmem:[#allocation6 + $0x278] sm:$0xff]  ;;  %4775 = vmatpush.msrb.mxu2 %v4680_v46  ;;  %4810 = vmatpush.msra.mxu0 %v4699_v38  ;;  %v4687_v46 = vld [vmem:[#allocation9 + $0x70] sm:$0xff]  ;;  %v3766_v38 = vld [vmem:[#allocation12 + $0x3a8] sm:$0xff] }
 0x460   : > { %9312 = vtanh.f32 %v3311_v22  ;;  %8677 = vmatmul.msk.f32.gmra.mxu2 %vm1108_vm0, %v2770_v17  ;;  %8733 = vmatmul.msk.f32.gmra.mxu3 %vm1108_vm0, %v3698_v33  ;;  %v4696_v4 = vld [vmem:[#allocation9 + $0xb8] sm:$0xff]  ;;  %v4586_v5 = vadd.f32 %v4578_v25, %v4560_v36  ;;  %v4306_v58 = vadd.f32 1.0, %v9311_v59  ;;  %v4656_v8 = vmul.f32 %v11044_v21, %v4647_v34  ;;  %v3806_v17 = vpop.permute.xlu0 %3805  ;;  %v4690_v21 = vld [vmem:[#allocation9 + $0x88] sm:$0xff] }
 0x461   : > { %v3403_v18 = vmul.f32 0.5, %v3372_v41  ;;  %4124 = vmatmul.f32.gmra.mxu1 %v3713_v29  ;;  %9314 = vtanh.f32 %v4245_v56  ;;  %v3764_v27 = vld [vmem:[#allocation12 + $0x398] sm:$0xff]  ;;  %4755 = vmatmul.f32.gmra.mxu0 %v11223_v3  ;;  %v11234_v11 = vpop.f32.mrf.mxu0  ;;  %v3135_v29 = vadd.f32 %v10942_v6, %v10901_v63  ;;  %v4057_v41 = vadd.f32 %v11038_v19, %v3806_v17  ;;  %v4681_v19 = vld [vmem:[#allocation9 + $0x40] sm:$0xff] }
 0x462   : > { %5672 = vmatpush.msrb.mxu1 %v5609_v47  ;;  %4776 = vmatpush.msrb.mxu2 %v4677_v2  ;;  %v4612_v52 = vadd.f32 %v4604_v43, %v4586_v5  ;;  %v4337_v39 = vmul.f32 0.5, %v4306_v58  ;;  %v3700_v24 = vld [vmem:[#allocation10 + $0x738] sm:$0xff] }
 0x463   : > { %8690 = vst [vmem:[%s10442_s21 + $0x238] sm:$0xff] %v3403_v18  ;;  %v3241_v62 = vpop.f32.mrf.mxu2  ;;  %v4163_v13 = vpop.f32.mrf.mxu3  ;;  %4811 = vmatpush.msra.mxu0 %v4696_v4  ;;  %3885 = vperm.xlu1 %9158, %v3764_v27   ;;  %v4684_v56 = vld [vmem:[#allocation9 + $0x58] sm:$0xff]  ;;  %v3702_v18 = vld [vmem:[#allocation10 + $0x748] sm:$0xff] }
 0x464   : > { %v3242_v26 = vadd.f32 %v3241_v62, %v3132_v37  ;;  %v4164_v53 = vadd.f32 %v4163_v13, %v4054_v51  ;;  %4777 = vmatpush.msrb.mxu2 %v4674_v60  ;;  %v4638_v20 = vadd.f32 %v4630_v23, %v4612_v52  ;;  %8746 = vst [vmem:[%s10442_s21 + $0x300] sm:$0xff] %v4337_v39  ;;  %v5637_v37 = vld [vmem:[#allocation9 + $0x260] sm:$0xff]  ;;  %v2774_v51 = vld [vmem:[#allocation10 + $0x5b8] sm:$0xff]  ;;  %v3811_v4 = vpop.permute.xlu1 %3810  ;;  %v4678_v60 = vld [vmem:[#allocation9 + $0x28] sm:$0xff] }
 0x465   : > { %4812 = vmatpush.msra.mxu0 %v4693_v61  ;;  %3895 = vperm.xlu0 %9157, %v3766_v38   ;;  %v3138_v61 = vadd.f32 %v10979_v30, %v10890_v12  ;;  %v4675_v52 = vld [vmem:[#allocation9 + $0x10] sm:$0xff]  ;;  %v4060_v39 = vadd.f32 %v11067_v44, %v3811_v4  ;;  %v2776_v44 = vld [vmem:[#allocation10 + $0x5c8] sm:$0x1] }
 0x466   : > { %v9313_v33 = vpop.eup %9312  ;;  %v3312_v31 = vmul.f32 0.5, %v3242_v26  ;;  %v11237_v25 = vpop.f32.mrf.mxu1  ;;  %v4246_v54 = vmul.f32 0.5, %v4164_v53  ;;  %v4664_v22 = vadd.f32 %v4656_v8, %v4638_v20  ;;  %5704 = vmatpush.msra.mxu3 %v5637_v37  ;;  %v3767_v26 = vld [vmem:[#allocation12 + $0x3b0] sm:$0xff]  ;;  %v3706_v37 = vld [vmem:[#allocation10 + $0x768] sm:$0xff] }
 0x467   : > { %v9315_v0 = vpop.eup %9314  ;;  %v3373_v35 = vadd.f32 1.0, %v9313_v33  ;;  %4813 = vmatpush.msra.mxu0 %v4690_v21  ;;  %v3704_v33 = vld [vmem:[#allocation10 + $0x758] sm:$0xff] }
 0x468   : > { %9316 = vtanh.f32 %v3312_v31  ;;  %8678 = vmatmul.msk.f32.gmra.mxu2 %vm1108_vm0, %v2772_v32  ;;  %8734 = vmatmul.msk.f32.gmra.mxu3 %vm1108_vm0, %v3700_v24  ;;  %v4307_v43 = vadd.f32 1.0, %v9315_v0  ;;  %v11244_v36 = vmax.f32 %v4664_v22, 0.0  ;;  %v3816_v31 = vpop.permute.xlu2 %3815 }
 0x469   : > { %v3404_v47 = vmul.f32 0.5, %v3373_v35  ;;  %4127 = vmatmul.f32.gmra.mxu1 %v3715_v15  ;;  %9318 = vtanh.f32 %v4246_v54  ;;  %4814 = vmatpush.msra.mxu0 %v4687_v46  ;;  %v11248_v23 = vpop.f32.mrf.mxu0 }
 0x46a   : > { %v4338_v63 = vmul.f32 0.5, %v4307_v43  ;;  %4758 = vmatmul.f32.gmra.mxu0 %v11244_v36  ;;  %v4063_v43 = vadd.f32 %v11098_v50, %v3816_v31  ;;  %v3708_v31 = vld [vmem:[#allocation10 + $0x778] sm:$0xff] }
 0x46b   : > { %8691 = vst [vmem:[%s10442_s21 + $0x240] sm:$0xff] %v3404_v47  ;;  %v3244_v6 = vpop.f32.mrf.mxu2  ;;  %v4166_v59 = vpop.f32.mrf.mxu3  ;;  %4815 = vmatpush.msra.mxu0 %v4684_v56  ;;  %3900 = vperm.xlu1 %9158, %v3767_v26   ;;  %v5631_v26 = vld [vmem:[#allocation9 + $0x230] sm:$0xff] }
 0x46c   : > { %v3245_v2 = vadd.f32 %v3244_v6, %v3135_v29  ;;  %8747 = vst [vmem:[%s10442_s21 + $0x308] sm:$0xff] %v4338_v63  ;;  %v4167_v34 = vadd.f32 %v4166_v59, %v4057_v41  ;;  %v3141_v29 = vadd.f32 %v11019_v14, %v10893_v55  ;;  %v3765_v41 = vld [vmem:[#allocation12 + $0x3a0] sm:$0xff]  ;;  %v5634_v55 = vld [vmem:[#allocation9 + $0x248] sm:$0xff]  ;;  %v5656_v59 = vld [vmem:[#allocation9 + $0x2f8] sm:$0xff] }
 0x46d   : > { %4816 = vmatpush.msra.mxu0 %v4681_v19  ;;  %3890 = vperm.xlu2 %9159, %v3765_v41   ;;  %v5641_v41 = vld [vmem:[#allocation9 + $0x280] sm:$0xff] }
 0x46e   : > { %v9317_v5 = vpop.eup %9316  ;;  %v3313_v58 = vmul.f32 0.5, %v3245_v2  ;;  %v11251_v27 = vpop.f32.mrf.mxu1  ;;  %v4247_v42 = vmul.f32 0.5, %v4167_v34  ;;  %5705 = vmatpush.msra.mxu3 %v5634_v55  ;;  %5739 = vmatpush.msra.mxu1 %v5656_v59 }
 0x46f   : > { %v9319_v62 = vpop.eup %9318  ;;  %v3374_v13 = vadd.f32 1.0, %v9317_v5  ;;  %4817 = vmatpush.msra.mxu0 %v4678_v60  ;;  %v3821_v2 = vpop.permute.xlu0 %3820  ;;  %v12426_v60 = vld [vmem:[#allocation19_spill] sm:$0xff] }
 0x470   : > { %9320 = vtanh.f32 %v3313_v58  ;;  %8679 = vmatmul.msk.f32.gmra.mxu2 %vm1108_vm0, %v2774_v51  ;;  %8735 = vmatmul.msk.f32.gmra.mxu3 %vm1108_vm0, %v3702_v18  ;;  %v4308_v8 = vadd.f32 1.0, %v9319_v62  ;;  %v5653_v18 = vld [vmem:[#allocation9 + $0x2e0] sm:$0xff] }
 0x471   : > { %v3405_v53 = vmul.f32 0.5, %v3374_v13  ;;  %5673 = vmatmul.f32.vlgmr.msrb.gmra.mxu1 %v11064_v48  ;;  %9322 = vtanh.f32 %v4247_v42  ;;  %4818 = vmatpush.msra.mxu0 %v4675_v52  ;;  %v11261_v20 = vpop.f32.mrf.mxu0  ;;  %v12427_v42 = vld [vmem:[#allocation29_spill] sm:$0xff]  ;;  %v5650_v13 = vld [vmem:[#allocation9 + $0x2c8] sm:$0xff]  ;;  %v4066_v52 = vadd.f32 %v11129_v49, %v3821_v2  ;;  %v5628_v49 = vld [vmem:[#allocation9 + $0x218] sm:$0xff] }
 0x472   : > { %v4339_v32 = vmul.f32 0.5, %v4308_v8  ;;  %4819 = vmatmul.f32.vlgmr.msra.gmra.mxu0 %v11064_v48  ;;  %5740 = vmatpush.msra.mxu1 %v5653_v18  ;;  %v3144_v62 = vadd.f32 %v12427_v42, %v12426_v60  ;;  %v3769_v8 = vld [vmem:[#allocation12 + $0x3c0] sm:$0xff] }
 0x473   : > { %8692 = vst [vmem:[%s10442_s21 + $0x248] sm:$0xff] %v3405_v53  ;;  %v3247_v12 = vpop.f32.mrf.mxu2  ;;  %v4169_v30 = vpop.f32.mrf.mxu3  ;;  %3910 = vperm.xlu0 %9157, %v3769_v8   ;;  %v5647_v53 = vld [vmem:[#allocation9 + $0x2b0] sm:$0xff]  ;;  %5706 = vmatpush.msra.mxu3 %v5631_v26  ;;  %v12431_v2 = vld [vmem:[#allocation37_spill] sm:$0xff] }
 0x474   : > { %v3248_v24 = vadd.f32 %v3247_v12, %v3138_v61  ;;  %8748 = vst [vmem:[%s10442_s21 + $0x310] sm:$0xff] %v4339_v32  ;;  %v4170_v17 = vadd.f32 %v4169_v30, %v4060_v39  ;;  %5741 = vmatpush.msra.mxu1 %v5650_v13 }
 0x475   : > { %5707 = vmatpush.msra.mxu3 %v5628_v49  ;;  %v12432_v49 = vld [vmem:[#allocation18_spill] sm:$0xff] }
 0x476   : > { %v9321_v15 = vpop.eup %9320  ;;  %v3314_v21 = vmul.f32 0.5, %v3248_v24  ;;  %v11264_v54 = vpop.f32.mrf.mxu1  ;;  %v4248_v0 = vmul.f32 0.5, %v4170_v17  ;;  %5742 = vmatpush.msra.mxu1 %v5647_v53  ;;  %v5613_v53 = vld [vmem:[#allocation9 + $0x1a0] sm:$0xff] }
 0x477   : > { %v9323_v35 = vpop.eup %9322  ;;  %v3375_v22 = vadd.f32 1.0, %v9321_v15  ;;  %v3826_v15 = vpop.permute.xlu1 %3825 }
 0x478   : > { %9324 = vtanh.f32 %v3314_v21  ;;  %8680 = vmatmul.msk.f32.gmra.mxu2 %vm1108_vm0, %v2776_v44  ;;  %8736 = vmatmul.msk.f32.gmra.mxu3 %vm1108_vm0, %v3704_v33  ;;  %v4309_v46 = vadd.f32 1.0, %v9323_v35  ;;  %v5644_v44 = vld [vmem:[#allocation9 + $0x298] sm:$0xff] }
 0x479   : > { %v3406_v38 = vmul.f32 0.5, %v3375_v22  ;;  %5676 = vmatmul.f32.gmra.mxu1 %v11100_v16  ;;  %9326 = vtanh.f32 %v4248_v0  ;;  %v11274_v6 = vpop.f32.mrf.mxu0  ;;  %v5625_v22 = vld [vmem:[#allocation9 + $0x200] sm:$0xff] }
 0x47a   : > { %v4340_v47 = vmul.f32 0.5, %v4309_v46  ;;  %4822 = vmatmul.f32.gmra.mxu0 %v11100_v16  ;;  %5743 = vmatpush.msra.mxu1 %v5644_v44  ;;  %v12433_v44 = vld [vmem:[#allocation34_spill] sm:$0xff] }
 0x47b   : > { %8693 = vst [vmem:[%s10442_s21 + $0x250] sm:$0xff] %v3406_v38  ;;  %v3250_v56 = vpop.f32.mrf.mxu2  ;;  %v4172_v63 = vpop.f32.mrf.mxu3  ;;  %5708 = vmatpush.msra.mxu3 %v5625_v22  ;;  %v12428_v38 = vld [vmem:[#allocation17_spill] sm:$0xff] }
 0x47c   : > { %v3251_v14 = vadd.f32 %v3250_v56, %v3141_v29  ;;  %8749 = vst [vmem:[%s10442_s21 + $0x318] sm:$0xff] %v4340_v47  ;;  %v4173_v50 = vadd.f32 %v4172_v63, %v4063_v43  ;;  %v12429_v47 = vld [vmem:[#allocation32_spill] sm:$0xff]  ;;  %v5622_v63 = vld [vmem:[#allocation9 + $0x1e8] sm:$0xff]  ;;  %5744 = vmatpush.msra.mxu1 %v5641_v41 }
 0x47d   : > { %v3147_v56 = vadd.f32 %v12429_v47, %v12428_v38  ;;  %5709 = vmatpush.msra.mxu3 %v5622_v63  ;;  %v5626_v38 = vld [vmem:[#allocation9 + $0x208] sm:$0xff]  ;;  %v3712_v63 = vld [vmem:[#allocation10 + $0x798] sm:$0xff] }
 0x47e   : > { %v9325_v19 = vpop.eup %9324  ;;  %v3315_v34 = vmul.f32 0.5, %v3251_v14  ;;  %v11277_v51 = vpop.f32.mrf.mxu1  ;;  %v4249_v4 = vmul.f32 0.5, %v4173_v50  ;;  %v12430_v14 = vld [vmem:[#allocation38_spill] sm:$0xff] }
 0x47f   : > { %v9327_v5 = vpop.eup %9326  ;;  %v3376_v58 = vadd.f32 1.0, %v9325_v19  ;;  %v4069_v59 = vadd.f32 %v12430_v14, %v3826_v15  ;;  %v3770_v50 = vld [vmem:[#allocation12 + $0x3c8] sm:$0xff] }
 0x480   : > { %9328 = vtanh.f32 %v3315_v34  ;;  %8737 = vmatmul.msk.f32.gmra.mxu3 %vm1108_vm0, %v3706_v37  ;;  %4778 = vmatmul.f32.vlgmr.msrb.gmra.mxu2 %v11064_v48  ;;  %v4310_v61 = vadd.f32 1.0, %v9327_v5  ;;  %v5638_v19 = vld [vmem:[#allocation9 + $0x268] sm:$0xff]  ;;  %v5619_v34 = vld [vmem:[#allocation9 + $0x1d0] sm:$0xff] }
 0x481   : > { %v3407_v39 = vmul.f32 0.5, %v3376_v58  ;;  %5679 = vmatmul.f32.gmra.mxu1 %v11122_v7  ;;  %9330 = vtanh.f32 %v4249_v4  ;;  %v11287_v17 = vpop.f32.mrf.mxu0  ;;  %3915 = vperm.xlu1 %9158, %v3770_v50   ;;  %v5635_v58 = vld [vmem:[#allocation9 + $0x250] sm:$0xff] }
 0x482   : > { %v4341_v32 = vmul.f32 0.5, %v4310_v61  ;;  %4825 = vmatmul.f32.gmra.mxu0 %v11122_v7  ;;  %5710 = vmatpush.msra.mxu3 %v5619_v34  ;;  %v3710_v61 = vld [vmem:[#allocation10 + $0x788] sm:$0xff]  ;;  %v4954_v34 = vld [vmem:[#allocation12] sm:$0xff] }
 0x483   : > { %8694 = vst [vmem:[%s10442_s21 + $0x258] sm:$0xff] %v3407_v39  ;;  %v3253_v12 = vpop.f32.mrf.mxu2  ;;  %v4175_v30 = vpop.f32.mrf.mxu3  ;;  %5745 = vmatpush.msra.mxu1 %v5638_v19  ;;  %v3772_v19 = vld [vmem:[#allocation12 + $0x3d8] sm:$0x1] }
 0x484   : > { %v3254_v24 = vadd.f32 %v3253_v12, %v3144_v62  ;;  %8750 = vst [vmem:[%s10442_s21 + $0x320] sm:$0xff] %v4341_v32  ;;  %v4176_v33 = vadd.f32 %v4175_v30, %v4066_v52  ;;  %v5616_v62 = vld [vmem:[#allocation9 + $0x1b8] sm:$0xff]  ;;  %v3831_v52 = vpop.permute.xlu2 %3830  ;;  %3925 = vperm.xlu0 %9157, %v3772_v19  }
 0x485   : > { %5711 = vmatpush.msra.mxu3 %v5616_v62  ;;  %5746 = vmatpush.msra.mxu1 %v5635_v58  ;;  %v12434_v58 = vld [vmem:[#allocation22_spill] sm:$0xff] }
 0x486   : > { %v9329_v21 = vpop.eup %9328  ;;  %v3316_v0 = vmul.f32 0.5, %v3254_v24  ;;  %v11290_v35 = vpop.f32.mrf.mxu1  ;;  %v4250_v29 = vmul.f32 0.5, %v4176_v33  ;;  %v5632_v24 = vld [vmem:[#allocation9 + $0x238] sm:$0xff]  ;;  %v3150_v33 = vadd.f32 %v12433_v44, %v12432_v49 }
 0x487   : > { %v9331_v46 = vpop.eup %9330  ;;  %v3377_v43 = vadd.f32 1.0, %v9329_v21  ;;  %5712 = vmatpush.msra.mxu3 %v5613_v53  ;;  %v4072_v21 = vadd.f32 %v11177_v9, %v3831_v52  ;;  %5747 = vmatpush.msra.mxu1 %v5632_v24  ;;  %v3841_v44 = vpop.permute.xlu1 %3840 }
 0x488   : > { %9332 = vtanh.f32 %v3316_v0  ;;  %8738 = vmatmul.msk.f32.gmra.mxu3 %vm1108_vm0, %v3708_v31  ;;  %4781 = vmatmul.f32.gmra.mxu2 %v11100_v16  ;;  %v4311_v55 = vadd.f32 1.0, %v9331_v46  ;;  %v5610_v31 = vld [vmem:[#allocation9 + $0x188] sm:$0xff]  ;;  %v3768_v0 = vld [vmem:[#allocation12 + $0x3b8] sm:$0xff] }
 0x489   : > { %v3408_v37 = vmul.f32 0.5, %v3377_v43  ;;  %5682 = vmatmul.f32.gmra.mxu1 %v12431_v2  ;;  %9334 = vtanh.f32 %v4250_v29  ;;  %v11300_v42 = vpop.f32.mrf.mxu0  ;;  %5713 = vmatpush.msra.mxu3 %v5610_v31  ;;  %v5629_v29 = vld [vmem:[#allocation9 + $0x220] sm:$0xff] }
 0x48a   : > { %v4342_v18 = vmul.f32 0.5, %v4311_v55  ;;  %4828 = vmatmul.f32.gmra.mxu0 %v12431_v2  ;;  %3905 = vperm.xlu2 %9159, %v3768_v0   ;;  %v3836_v55 = vpop.permute.xlu0 %3835  ;;  %v4957_v0 = vld [vmem:[#allocation12 + $0x18] sm:$0xff] }
 0x48b   : > { %8695 = vst [vmem:[%s10442_s21 + $0x260] sm:$0xff] %v3408_v37  ;;  %v3256_v4 = vpop.f32.mrf.mxu2  ;;  %v4178_v5 = vpop.f32.mrf.mxu3  ;;  %5748 = vmatpush.msra.mxu1 %v5629_v29  ;;  %4987 = vperm.xlu1 %9158, %v4954_v34  }
 0x48c   : > { %v3257_v60 = vadd.f32 %v3256_v4, %v3147_v56  ;;  %8751 = vst [vmem:[%s10442_s21 + $0x328] sm:$0xff] %v4342_v18  ;;  %v4179_v13 = vadd.f32 %v4178_v5, %v4069_v59  ;;  %v5623_v5 = vld [vmem:[#allocation9 + $0x1f0] sm:$0xff] }
 0x48d   : > { %5749 = vmatpush.msra.mxu1 %v5626_v38  ;;  %v12437_v38 = vld [vmem:[#allocation39_spill] sm:$0xff] }
 0x48e   : > { %v9333_v8 = vpop.eup %9332  ;;  %v3317_v39 = vmul.f32 0.5, %v3257_v60  ;;  %v11303_v26 = vpop.f32.mrf.mxu1  ;;  %v4251_v32 = vmul.f32 0.5, %v4179_v13  ;;  %v12435_v60 = vld [vmem:[#allocation36_spill] sm:$0xff] }
 0x48f   : > { %v9335_v12 = vpop.eup %9334  ;;  %v3378_v30 = vadd.f32 1.0, %v9333_v8  ;;  %v3153_v62 = vadd.f32 %v12435_v60, %v12434_v58  ;;  %v5620_v8 = vld [vmem:[#allocation9 + $0x1d8] sm:$0xff]  ;;  %5750 = vmatpush.msra.mxu1 %v5623_v5 }
 0x490   : > { %9336 = vtanh.f32 %v3317_v39  ;;  %8739 = vmatmul.msk.f32.gmra.mxu3 %vm1108_vm0, %v3710_v61  ;;  %4784 = vmatmul.f32.gmra.mxu2 %v11122_v7  ;;  %v4312_v15 = vadd.f32 1.0, %v9335_v12  ;;  %v4075_v61 = vadd.f32 %v11203_v1, %v3836_v55  ;;  %v5617_v12 = vld [vmem:[#allocation9 + $0x1c0] sm:$0xff]  ;;  %v3714_v1 = vld [vmem:[#allocation10 + $0x7a8] sm:$0xff]  ;;  %v3716_v5 = vld [vmem:[#allocation10 + $0x7b8] sm:$0x1] }
 0x491   : > { %v3409_v22 = vmul.f32 0.5, %v3378_v30  ;;  %5685 = vmatmul.f32.gmra.mxu1 %v11172_v57  ;;  %9338 = vtanh.f32 %v4251_v32  ;;  %v11313_v9 = vpop.f32.mrf.mxu0 }
 0x492   : > { %v4343_v46 = vmul.f32 0.5, %v4312_v15  ;;  %4831 = vmatmul.f32.gmra.mxu0 %v11172_v57  ;;  %5751 = vmatpush.msra.mxu1 %v5620_v8 }
 0x493   : > { %8696 = vst [vmem:[%s10442_s21 + $0x268] sm:$0xff] %v3409_v22  ;;  %v3259_v43 = vpop.f32.mrf.mxu2  ;;  %v4181_v41 = vpop.f32.mrf.mxu3  ;;  %v4956_v22 = vld [vmem:[#allocation12 + $0x10] sm:$0xff]  ;;  %5002 = vperm.xlu1 %9158, %v4957_v0  }
 0x494   : > { %v3260_v47 = vadd.f32 %v3259_v43, %v3150_v33  ;;  %8752 = vst [vmem:[%s10442_s21 + $0x330] sm:$0xff] %v4343_v46  ;;  %v4182_v56 = vadd.f32 %v4181_v41, %v4072_v21  ;;  %5752 = vmatpush.msra.mxu1 %v5617_v12  ;;  %v5614_v43 = vld [vmem:[#allocation9 + $0x1a8] sm:$0xff]  ;;  %4997 = vperm.xlu0 %9157, %v4956_v22   ;;  %v12436_v41 = vld [vmem:[#allocation20_spill] sm:$0xff]  ;;  %v3851_v22 = vpop.permute.xlu0 %3850 }
 0x496   : > { %v9337_v14 = vpop.eup %9336  ;;  %v3318_v59 = vmul.f32 0.5, %v3260_v47  ;;  %v11316_v50 = vpop.f32.mrf.mxu1  ;;  %v4252_v37 = vmul.f32 0.5, %v4182_v56  ;;  %v3156_v47 = vadd.f32 %v12437_v38, %v12436_v41  ;;  %5753 = vmatpush.msra.mxu1 %v5614_v43  ;;  %v4963_v41 = vld [vmem:[#allocation12 + $0x48] sm:$0xff]  ;;  %v4962_v38 = vld [vmem:[#allocation12 + $0x40] sm:$0xff] }
 0x497   : > { %v9339_v18 = vpop.eup %9338  ;;  %v3379_v4 = vadd.f32 1.0, %v9337_v14  ;;  %v5611_v14 = vld [vmem:[#allocation9 + $0x190] sm:$0xff] }
 0x498   : > { %9340 = vtanh.f32 %v3318_v59  ;;  %8740 = vmatmul.msk.f32.gmra.mxu3 %vm1108_vm0, %v3712_v63  ;;  %4787 = vmatmul.f32.gmra.mxu2 %v12431_v2  ;;  %v4313_v13 = vadd.f32 1.0, %v9339_v18  ;;  %v4078_v63 = vadd.f32 %v11220_v28, %v3841_v44  ;;  %v3846_v28 = vpop.permute.xlu2 %3845 }
 0x499   : > { %v3410_v52 = vmul.f32 0.5, %v3379_v4  ;;  %5688 = vmatmul.f32.gmra.mxu1 %v11198_v10  ;;  %9342 = vtanh.f32 %v4252_v37  ;;  %v11326_v24 = vpop.f32.mrf.mxu0 }
 0x49a   : > { %v4344_v39 = vmul.f32 0.5, %v4313_v13  ;;  %4834 = vmatmul.f32.gmra.mxu0 %v11198_v10  ;;  %5754 = vmatpush.msra.mxu1 %v5611_v14 }
 0x49b   : > { %8697 = vst [vmem:[%s10442_s21 + $0x270] sm:$0xff] %v3410_v52  ;;  %v3262_v53 = vpop.f32.mrf.mxu2  ;;  %v4184_v32 = vpop.f32.mrf.mxu3  ;;  %v4959_v52 = vld [vmem:[#allocation12 + $0x28] sm:$0xff] }
 0x49c   : > { %v3263_v30 = vadd.f32 %v3262_v53, %v3153_v62  ;;  %8753 = vst [vmem:[%s10442_s21 + $0x338] sm:$0xff] %v4344_v39  ;;  %v4185_v49 = vadd.f32 %v4184_v32, %v4075_v61  ;;  %v4960_v61 = vld [vmem:[#allocation12 + $0x30] sm:$0xff]  ;;  %5012 = vperm.xlu0 %9157, %v4959_v52   ;;  %v12438_v53 = vld [vmem:[#allocation21_spill] sm:$0xff] }
 0x49d   : > { %5017 = vperm.xlu1 %9158, %v4960_v61   ;;  %v3159_v32 = vadd.f32 %v11193_v40, %v12438_v53 }
 0x49e   : > { %v9341_v33 = vpop.eup %9340  ;;  %v3319_v31 = vmul.f32 0.5, %v3263_v30  ;;  %v11329_v15 = vpop.f32.mrf.mxu1  ;;  %v4253_v21 = vmul.f32 0.5, %v4185_v49  ;;  %v4081_v30 = vadd.f32 %v11237_v25, %v3846_v28  ;;  %v3771_v49 = vld [vmem:[#allocation12 + $0x3d0] sm:$0xff] }
 0x49f   : > { %v9343_v29 = vpop.eup %9342  ;;  %v3380_v46 = vadd.f32 1.0, %v9341_v33  ;;  %3920 = vperm.xlu2 %9159, %v3771_v49  }
 0x4a0   : > { %9344 = vtanh.f32 %v3319_v31  ;;  %8741 = vmatmul.msk.f32.gmra.mxu3 %vm1108_vm0, %v3714_v1  ;;  %4790 = vmatmul.f32.gmra.mxu2 %v11172_v57  ;;  %v4314_v56 = vadd.f32 1.0, %v9343_v29 }
 0x4a1   : > { %v3411_v55 = vmul.f32 0.5, %v3380_v46  ;;  %5691 = vmatmul.f32.gmra.mxu1 %v11223_v3  ;;  %9346 = vtanh.f32 %v4253_v21  ;;  %v11339_v18 = vpop.f32.mrf.mxu0 }
 0x4a2   : > { %v4345_v59 = vmul.f32 0.5, %v4314_v56  ;;  %4837 = vmatmul.f32.gmra.mxu0 %v11223_v3 }
 0x4a3   : > { %8698 = vst [vmem:[%s10442_s21 + $0x278] sm:$0xff] %v3411_v55  ;;  %v3265_v37 = vpop.f32.mrf.mxu2  ;;  %v4187_v19 = vpop.f32.mrf.mxu3 }
 0x4a4   : > { %v3266_v34 = vadd.f32 %v3265_v37, %v3156_v47  ;;  %8754 = vst [vmem:[%s10442_s21 + $0x340] sm:$0xff] %v4345_v59  ;;  %v4188_v4 = vadd.f32 %v4187_v19, %v4078_v63  ;;  %5027 = vperm.xlu0 %9157, %v4962_v38   ;;  %v12439_v63 = vld [vmem:[#allocation25_spill] sm:$0xff]  ;;  %v4084_v59 = vadd.f32 %v11251_v27, %v3851_v22  ;;  %v4969_v38 = vld [vmem:[#allocation12 + $0x78] sm:$0xff] }
 0x4a5   : > { %5032 = vperm.xlu1 %9158, %v4963_v41   ;;  %v3162_v55 = vadd.f32 %v11216_v45, %v12439_v63  ;;  %v3856_v45 = vpop.permute.xlu1 %3855  ;;  %v4966_v27 = vld [vmem:[#allocation12 + $0x60] sm:$0xff] }
 0x4a6   : > { %v9345_v58 = vpop.eup %9344  ;;  %v3320_v60 = vmul.f32 0.5, %v3266_v34  ;;  %v11342_v62 = vpop.f32.mrf.mxu1  ;;  %v4254_v13 = vmul.f32 0.5, %v4188_v4  ;;  %v4087_v49 = vadd.f32 %v11264_v54, %v3856_v45  ;;  %v4955_v54 = vld [vmem:[#allocation12 + $0x8] sm:$0xff] }
 0x4a7   : > { %v9347_v8 = vpop.eup %9346  ;;  %v3381_v39 = vadd.f32 1.0, %v9345_v58  ;;  %4992 = vperm.xlu2 %9159, %v4955_v54  }
 0x4a8   : > { %9348 = vtanh.f32 %v3320_v60  ;;  %8742 = vmatmul.msk.f32.gmra.mxu3 %vm1108_vm0, %v3716_v5  ;;  %4793 = vmatmul.f32.gmra.mxu2 %v11198_v10  ;;  %v4315_v12 = vadd.f32 1.0, %v9347_v8  ;;  %v4965_v8 = vld [vmem:[#allocation12 + $0x58] sm:$0xff] }
 0x4a9   : > { %v3412_v1 = vmul.f32 0.5, %v3381_v39  ;;  %5694 = vmatmul.f32.gmra.mxu1 %v11244_v36  ;;  %9350 = vtanh.f32 %v4254_v13  ;;  %v11352_v21 = vpop.f32.mrf.mxu0 }
 0x4aa   : > { %v4346_v44 = vmul.f32 0.5, %v4315_v12  ;;  %4840 = vmatmul.f32.gmra.mxu0 %v11244_v36 }
 0x4ab   : > { %8699 = vst [vmem:[%s10442_s21 + $0x280] sm:$0xff] %v3412_v1  ;;  %v3268_v33 = vpop.f32.mrf.mxu2  ;;  %v4190_v31 = vpop.f32.mrf.mxu3 }
 0x4ac   : > { %v3269_v40 = vadd.f32 %v3268_v33, %v3159_v32  ;;  %8755 = vst [vmem:[%s10442_s21 + $0x348] sm:$0xff] %v4346_v44  ;;  %v4191_v0 = vadd.f32 %v4190_v31, %v4081_v30  ;;  %5042 = vperm.xlu0 %9157, %v4965_v8   ;;  %v12440_v32 = vld [vmem:[#allocation23_spill] sm:$0xff]  ;;  %v4958_v8 = vld [vmem:[#allocation12 + $0x20] sm:$0xff] }
 0x4ad   : > { %5047 = vperm.xlu1 %9158, %v4966_v27   ;;  %v3165_v12 = vadd.f32 %v11234_v11, %v12440_v32  ;;  %v3861_v11 = vpop.permute.xlu2 %3860 }
 0x4ae   : > { %v9349_v29 = vpop.eup %9348  ;;  %v3321_v25 = vmul.f32 0.5, %v3269_v40  ;;  %v11355_v46 = vpop.f32.mrf.mxu1  ;;  %v4255_v43 = vmul.f32 0.5, %v4191_v0 }
 0x4af   : > { %v9351_v47 = vpop.eup %9350  ;;  %v3382_v56 = vadd.f32 1.0, %v9349_v29  ;;  %5007 = vperm.xlu2 %9159, %v4958_v8  }
 0x4b0   : > { %9352 = vtanh.f32 %v3321_v25  ;;  %4796 = vmatmul.f32.gmra.mxu2 %v11223_v3  ;;  %5714 = vmatmul.f32.vlgmr.msra.gmra.mxu3 %v11064_v48  ;;  %v4316_v14 = vadd.f32 1.0, %v9351_v47  ;;  %v4968_v47 = vld [vmem:[#allocation12 + $0x70] sm:$0xff] }
 0x4b1   : > { %v3413_v37 = vmul.f32 0.5, %v3382_v56  ;;  %5755 = vmatmul.f32.vlgmr.msra.gmra.mxu1 %v11064_v48  ;;  %9354 = vtanh.f32 %v4255_v43 }
 0x4b2   : > { %v4347_v19 = vmul.f32 0.5, %v4316_v14 }
 0x4b3   : > { %8700 = vst [vmem:[%s10442_s21 + $0x288] sm:$0xff] %v3413_v37  ;;  %v3271_v34 = vpop.f32.mrf.mxu2  ;;  %v4193_v4 = vpop.f32.mrf.mxu3  ;;  %v4090_v37 = vadd.f32 %v11277_v51, %v3861_v11 }
 0x4b4   : > { %v3272_v5 = vadd.f32 %v3271_v34, %v3162_v55  ;;  %8756 = vst [vmem:[%s10442_s21 + $0x350] sm:$0xff] %v4347_v19  ;;  %v4194_v28 = vadd.f32 %v4193_v4, %v4084_v59  ;;  %v11367_v61 = vpop.f32.mrf.mxu0  ;;  %v12441_v55 = vld [vmem:[#allocation24_spill] sm:$0xff]  ;;  %5057 = vperm.xlu0 %9157, %v4968_v47  }
 0x4b5   : > { %5062 = vperm.xlu1 %9158, %v4969_v38   ;;  %v3168_v14 = vadd.f32 %v11248_v23, %v12441_v55  ;;  %v4961_v47 = vld [vmem:[#allocation12 + $0x38] sm:$0xff] }
 0x4b6   : > { %v9353_v58 = vpop.eup %9352  ;;  %v3322_v60 = vmul.f32 0.5, %v3272_v5  ;;  %v11365_v13 = vpop.f32.mrf.mxu1  ;;  %v4256_v52 = vmul.f32 0.5, %v4194_v28 }
 0x4b7   : > { %v9355_v39 = vpop.eup %9354  ;;  %v3383_v53 = vadd.f32 1.0, %v9353_v58  ;;  %v3866_v58 = vpop.permute.xlu0 %3865  ;;  %5022 = vperm.xlu2 %9159, %v4961_v47  }
 0x4b8   : > { %9356 = vtanh.f32 %v3322_v60  ;;  %4799 = vmatmul.f32.gmra.mxu2 %v11244_v36  ;;  %5717 = vmatmul.f32.gmra.mxu3 %v11100_v16  ;;  %v4317_v30 = vadd.f32 1.0, %v9355_v39  ;;  %v4972_v39 = vld [vmem:[#allocation12 + $0x90] sm:$0xff] }
 0x4b9   : > { %v3414_v1 = vmul.f32 0.5, %v3383_v53  ;;  %5758 = vmatmul.f32.gmra.mxu1 %v11100_v16  ;;  %9358 = vtanh.f32 %v4256_v52  ;;  %v4971_v53 = vld [vmem:[#allocation12 + $0x88] sm:$0xff] }
 0x4ba   : > { %v4348_v44 = vmul.f32 0.5, %v4317_v30  ;;  %v12442_v30 = vld [vmem:[#allocation28_spill] sm:$0xff] }
 0x4bb   : > { %8701 = vst [vmem:[%s10442_s21 + $0x290] sm:$0xff] %v3414_v1  ;;  %v3274_v33 = vpop.f32.mrf.mxu2  ;;  %v4196_v31 = vpop.f32.mrf.mxu3 }
 0x4bc   : > { %v3275_v40 = vadd.f32 %v3274_v33, %v3165_v12  ;;  %8757 = vst [vmem:[%s10442_s21 + $0x358] sm:$0xff] %v4348_v44  ;;  %v4197_v0 = vadd.f32 %v4196_v31, %v4087_v49  ;;  %v11379_v43 = vpop.f32.mrf.mxu0  ;;  %v3171_v49 = vadd.f32 %v11261_v20, %v12442_v30  ;;  %v4093_v44 = vadd.f32 %v11290_v35, %v3866_v58 }
 0x4bd   : > { %5077 = vperm.xlu1 %9158, %v4972_v39   ;;  %5072 = vperm.xlu0 %9157, %v4971_v53   ;;  %v4964_v53 = vld [vmem:[#allocation12 + $0x50] sm:$0xff] }
 0x4be   : > { %v9357_v22 = vpop.eup %9356  ;;  %v3323_v29 = vmul.f32 0.5, %v3275_v40  ;;  %v11377_v25 = vpop.f32.mrf.mxu1  ;;  %v4257_v41 = vmul.f32 0.5, %v4197_v0 }
 0x4bf   : > { %v9359_v56 = vpop.eup %9358  ;;  %v3384_v63 = vadd.f32 1.0, %v9357_v22  ;;  %5037 = vperm.xlu2 %9159, %v4964_v53  }
 0x4c0   : > { %9360 = vtanh.f32 %v3323_v29  ;;  %5720 = vmatmul.f32.gmra.mxu3 %v11122_v7  ;;  %v4318_v59 = vadd.f32 1.0, %v9359_v56  ;;  %v3871_v29 = vpop.permute.xlu1 %3870  ;;  %v4975_v56 = vld [vmem:[#allocation12 + $0xa8] sm:$0xff] }
 0x4c1   : > { %v3415_v19 = vmul.f32 0.5, %v3384_v63  ;;  %5761 = vmatmul.f32.gmra.mxu1 %v11122_v7  ;;  %9362 = vtanh.f32 %v4257_v41  ;;  %v4974_v63 = vld [vmem:[#allocation12 + $0xa0] sm:$0xff] }
 0x4c2   : > { %v4349_v34 = vmul.f32 0.5, %v4318_v59  ;;  %v12443_v59 = vld [vmem:[#allocation26_spill] sm:$0xff] }
 0x4c3   : > { %8702 = vst [vmem:[%s10442_s21 + $0x298] sm:$0xff] %v3415_v19  ;;  %v3277_v4 = vpop.f32.mrf.mxu2  ;;  %v4199_v5 = vpop.f32.mrf.mxu3 }
 0x4c4   : > { %v3278_v28 = vadd.f32 %v3277_v4, %v3168_v14  ;;  %8758 = vst [vmem:[%s10442_s21 + $0x360] sm:$0xff] %v4349_v34  ;;  %v4200_v45 = vadd.f32 %v4199_v5, %v4090_v37  ;;  %v11390_v27 = vpop.f32.mrf.mxu0  ;;  %v3174_v37 = vadd.f32 %v11274_v6, %v12443_v59  ;;  %v4096_v34 = vadd.f32 %v11303_v26, %v3871_v29 }
 0x4c5   : > { %5092 = vperm.xlu1 %9158, %v4975_v56   ;;  %5087 = vperm.xlu0 %9157, %v4974_v63   ;;  %v4967_v63 = vld [vmem:[#allocation12 + $0x68] sm:$0xff] }
 0x4c6   : > { %v9361_v23 = vpop.eup %9360  ;;  %v3324_v60 = vmul.f32 0.5, %v3278_v28  ;;  %v11388_v52 = vpop.f32.mrf.mxu1  ;;  %v4258_v51 = vmul.f32 0.5, %v4200_v45 }
 0x4c7   : > { %v9363_v32 = vpop.eup %9362  ;;  %v3385_v12 = vadd.f32 1.0, %v9361_v23  ;;  %5052 = vperm.xlu2 %9159, %v4967_v63  }
 0x4c8   : > { %9364 = vtanh.f32 %v3324_v60  ;;  %5723 = vmatmul.f32.gmra.mxu3 %v12431_v2  ;;  %v4319_v1 = vadd.f32 1.0, %v9363_v32  ;;  %v3876_v60 = vpop.permute.xlu2 %3875  ;;  %v4978_v32 = vld [vmem:[#allocation12 + $0xc0] sm:$0xff] }
 0x4c9   : > { %v3416_v33 = vmul.f32 0.5, %v3385_v12  ;;  %5764 = vmatmul.f32.gmra.mxu1 %v12431_v2  ;;  %9366 = vtanh.f32 %v4258_v51  ;;  %v4977_v12 = vld [vmem:[#allocation12 + $0xb8] sm:$0xff] }
 0x4ca   : > { %v4350_v31 = vmul.f32 0.5, %v4319_v1  ;;  %v12444_v1 = vld [vmem:[#allocation27_spill] sm:$0xff] }
 0x4cb   : > { %8703 = vst [vmem:[%s10442_s21 + $0x2a0] sm:$0xff] %v3416_v33  ;;  %v3280_v40 = vpop.f32.mrf.mxu2  ;;  %v4202_v0 = vpop.f32.mrf.mxu3 }
 0x4cc   : > { %v3281_v11 = vadd.f32 %v3280_v40, %v3171_v49  ;;  %8759 = vst [vmem:[%s10442_s21 + $0x368] sm:$0xff] %v4350_v31  ;;  %v4203_v22 = vadd.f32 %v4202_v0, %v4093_v44  ;;  %v11401_v38 = vpop.f32.mrf.mxu0  ;;  %v3177_v44 = vadd.f32 %v11287_v17, %v12444_v1  ;;  %v4099_v31 = vadd.f32 %v11316_v50, %v3876_v60  ;;  %v4981_v50 = vld [vmem:[#allocation12 + $0xd8] sm:$0xff] }
 0x4cd   : > { %5107 = vperm.xlu1 %9158, %v4978_v32   ;;  %5102 = vperm.xlu0 %9157, %v4977_v12   ;;  %v4970_v12 = vld [vmem:[#allocation12 + $0x80] sm:$0xff] }
 0x4ce   : > { %v9365_v20 = vpop.eup %9364  ;;  %v3325_v41 = vmul.f32 0.5, %v3281_v11  ;;  %v11399_v54 = vpop.f32.mrf.mxu1  ;;  %v4259_v35 = vmul.f32 0.5, %v4203_v22 }
 0x4cf   : > { %v9367_v55 = vpop.eup %9366  ;;  %v3386_v14 = vadd.f32 1.0, %v9365_v20  ;;  %5067 = vperm.xlu2 %9159, %v4970_v12  }
 0x4d0   : > { %9368 = vtanh.f32 %v3325_v41  ;;  %5726 = vmatmul.f32.gmra.mxu3 %v11172_v57  ;;  %v4320_v19 = vadd.f32 1.0, %v9367_v55  ;;  %v3881_v41 = vpop.permute.xlu0 %3880  ;;  %v4980_v55 = vld [vmem:[#allocation12 + $0xd0] sm:$0xff] }
 0x4d1   : > { %v3417_v4 = vmul.f32 0.5, %v3386_v14  ;;  %5767 = vmatmul.f32.gmra.mxu1 %v11172_v57  ;;  %9370 = vtanh.f32 %v4259_v35 }
 0x4d2   : > { %v4351_v5 = vmul.f32 0.5, %v4320_v19 }
 0x4d3   : > { %8704 = vst [vmem:[%s10442_s21 + $0x2a8] sm:$0xff] %v3417_v4  ;;  %v3283_v28 = vpop.f32.mrf.mxu2  ;;  %v4205_v45 = vpop.f32.mrf.mxu3 }
 0x4d4   : > { %v3284_v58 = vadd.f32 %v3283_v28, %v3174_v37  ;;  %8760 = vst [vmem:[%s10442_s21 + $0x370] sm:$0xff] %v4351_v5  ;;  %v4206_v23 = vadd.f32 %v4205_v45, %v4096_v34  ;;  %v11412_v39 = vpop.f32.mrf.mxu0  ;;  %v12445_v37 = vld [vmem:[#allocation33_spill] sm:$0xff]  ;;  %v4102_v5 = vadd.f32 %v11329_v15, %v3881_v41  ;;  %v4984_v15 = vld [vmem:[#allocation12 + $0xf0] sm:$0x1] }
 0x4d5   : > { %5122 = vperm.xlu1 %9158, %v4981_v50   ;;  %v3180_v19 = vadd.f32 %v11300_v42, %v12445_v37  ;;  %5117 = vperm.xlu0 %9157, %v4980_v55   ;;  %v4973_v50 = vld [vmem:[#allocation12 + $0x98] sm:$0xff]  ;;  %v5892_v55 = vld [vmem:[#allocation12 + $0x108] sm:$0xff] }
 0x4d6   : > { %v9369_v6 = vpop.eup %9368  ;;  %v3326_v51 = vmul.f32 0.5, %v3284_v58  ;;  %v11410_v8 = vpop.f32.mrf.mxu1  ;;  %v4260_v26 = vmul.f32 0.5, %v4206_v23 }
 0x4d7   : > { %v9371_v30 = vpop.eup %9370  ;;  %v3387_v49 = vadd.f32 1.0, %v9369_v6  ;;  %v3886_v6 = vpop.permute.xlu1 %3885  ;;  %5082 = vperm.xlu2 %9159, %v4973_v50  }
 0x4d8   : > { %9372 = vtanh.f32 %v3326_v51  ;;  %5729 = vmatmul.f32.gmra.mxu3 %v11198_v10  ;;  %v4321_v33 = vadd.f32 1.0, %v9371_v30  ;;  %v4983_v30 = vld [vmem:[#allocation12 + $0xe8] sm:$0xff] }
 0x4d9   : > { %v3418_v40 = vmul.f32 0.5, %v3387_v49  ;;  %5770 = vmatmul.f32.gmra.mxu1 %v11198_v10  ;;  %9374 = vtanh.f32 %v4260_v26 }
 0x4da   : > { %v4352_v0 = vmul.f32 0.5, %v4321_v33 }
 0x4db   : > { %8705 = vst [vmem:[%s10442_s21 + $0x2b0] sm:$0xff] %v3418_v40  ;;  %v3286_v11 = vpop.f32.mrf.mxu2  ;;  %v4208_v22 = vpop.f32.mrf.mxu3  ;;  %v4105_v40 = vadd.f32 %v11342_v62, %v3886_v6 }
 0x4dc   : > { %v3287_v29 = vadd.f32 %v3286_v11, %v3177_v44  ;;  %8761 = vst [vmem:[%s10442_s21 + $0x378] sm:$0xff] %v4352_v0  ;;  %v4209_v20 = vadd.f32 %v4208_v22, %v4099_v31  ;;  %v12446_v44 = vld [vmem:[#allocation30_spill] sm:$0xff] }
 0x4dd   : > { %5137 = vperm.xlu1 %9158, %v4984_v15   ;;  %v3183_v33 = vadd.f32 %v11313_v9, %v12446_v44  ;;  %5132 = vperm.xlu0 %9157, %v4983_v30   ;;  %v4976_v30 = vld [vmem:[#allocation12 + $0xb0] sm:$0xff] }
 0x4de   : > { %v9373_v17 = vpop.eup %9372  ;;  %v3327_v35 = vmul.f32 0.5, %v3287_v29  ;;  %v11421_v47 = vpop.f32.mrf.mxu1  ;;  %v4261_v56 = vmul.f32 0.5, %v4209_v20 }
 0x4df   : > { %v9375_v14 = vpop.eup %9374  ;;  %v3388_v59 = vadd.f32 1.0, %v9373_v17  ;;  %v11426_v34 = vpop.f32.mrf.mxu0  ;;  %5097 = vperm.xlu2 %9159, %v4976_v30   ;;  %v5900_v30 = vld [vmem:[#allocation12 + $0x148] sm:$0xff] }
 0x4e0   : > { %9376 = vtanh.f32 %v3327_v35  ;;  %5732 = vmatmul.f32.gmra.mxu3 %v11223_v3  ;;  %v4322_v4 = vadd.f32 1.0, %v9375_v14  ;;  %v3891_v17 = vpop.permute.xlu2 %3890  ;;  %v5891_v14 = vld [vmem:[#allocation12 + $0x100] sm:$0xff] }
 0x4e1   : > { %v3419_v28 = vmul.f32 0.5, %v3388_v59  ;;  %5773 = vmatmul.f32.gmra.mxu1 %v11223_v3  ;;  %9378 = vtanh.f32 %v4261_v56 }
 0x4e2   : > { %v4353_v45 = vmul.f32 0.5, %v4322_v4 }
 0x4e3   : > { %8706 = vst [vmem:[%s10442_s21 + $0x2b8] sm:$0xff] %v3419_v28  ;;  %v3289_v58 = vpop.f32.mrf.mxu2  ;;  %v4211_v23 = vpop.f32.mrf.mxu3  ;;  %v4108_v28 = vadd.f32 %v11355_v46, %v3891_v17  ;;  %v5895_v46 = vld [vmem:[#allocation12 + $0x120] sm:$0xff] }
 0x4e4   : > { %v3290_v60 = vadd.f32 %v3289_v58, %v3180_v19  ;;  %8762 = vst [vmem:[%s10442_s21 + $0x380] sm:$0xff] %v4353_v45  ;;  %v4212_v42 = vadd.f32 %v4211_v23, %v4102_v5  ;;  %v12447_v19 = vld [vmem:[#allocation31_spill] sm:$0xff] }
 0x4e5   : > { %5933 = vperm.xlu1 %9158, %v5892_v55   ;;  %v3186_v4 = vadd.f32 %v11326_v24, %v12447_v19  ;;  %5928 = vperm.xlu0 %9157, %v5891_v14   ;;  %v5898_v14 = vld [vmem:[#allocation12 + $0x138] sm:$0xff] }
 0x4e6   : > { %v9377_v51 = vpop.eup %9376  ;;  %v3328_v26 = vmul.f32 0.5, %v3290_v60  ;;  %v11432_v53 = vpop.f32.mrf.mxu1  ;;  %v4262_v32 = vmul.f32 0.5, %v4212_v42 }
 0x4e7   : > { %v9379_v49 = vpop.eup %9378  ;;  %v3389_v1 = vadd.f32 1.0, %v9377_v51  ;;  %v11439_v11 = vpop.f32.mrf.mxu0 }
 0x4e8   : > { %9380 = vtanh.f32 %v3328_v26  ;;  %5735 = vmatmul.f32.gmra.mxu3 %v11244_v36  ;;  %v4323_v31 = vadd.f32 1.0, %v9379_v49  ;;  %v3896_v26 = vpop.permute.xlu0 %3895  ;;  %v5894_v49 = vld [vmem:[#allocation12 + $0x118] sm:$0xff] }
 0x4e9   : > { %v3420_v0 = vmul.f32 0.5, %v3389_v1  ;;  %5776 = vmatmul.f32.gmra.mxu1 %v11244_v36  ;;  %9382 = vtanh.f32 %v4262_v32 }
 0x4ea   : > { %v4354_v22 = vmul.f32 0.5, %v4323_v31 }
 0x4eb   : > { %8707 = vst [vmem:[%s10442_s21 + $0x2c0] sm:$0xff] %v3420_v0  ;;  %v3292_v29 = vpop.f32.mrf.mxu2  ;;  %v4214_v20 = vpop.f32.mrf.mxu3  ;;  %v4111_v0 = vadd.f32 %v11365_v13, %v3896_v26  ;;  %v4979_v13 = vld [vmem:[#allocation12 + $0xc8] sm:$0xff] }
 0x4ec   : > { %v3293_v41 = vadd.f32 %v3292_v29, %v3183_v33  ;;  %8763 = vst [vmem:[%s10442_s21 + $0x388] sm:$0xff] %v4354_v22  ;;  %v4215_v9 = vadd.f32 %v4214_v20, %v4105_v40  ;;  %v12448_v33 = vld [vmem:[#allocation35_spill] sm:$0xff]  ;;  %5112 = vperm.xlu2 %9159, %v4979_v13  }
 0x4ed   : > { %5948 = vperm.xlu1 %9158, %v5895_v46   ;;  %v3189_v31 = vadd.f32 %v11339_v18, %v12448_v33  ;;  %5943 = vperm.xlu0 %9157, %v5894_v49  }
 0x4ee   : > { %v9381_v35 = vpop.eup %9380  ;;  %v3329_v56 = vmul.f32 0.5, %v3293_v41  ;;  %v11443_v63 = vpop.f32.mrf.mxu1  ;;  %v4263_v62 = vmul.f32 0.5, %v4215_v9 }
 0x4ef   : > { %v9383_v59 = vpop.eup %9382  ;;  %v3390_v37 = vadd.f32 1.0, %v9381_v35  ;;  %v11448_v58 = vpop.f32.mrf.mxu0 }
 0x4f0   : > { %9384 = vtanh.f32 %v3329_v56  ;;  %v4324_v5 = vadd.f32 1.0, %v9383_v59  ;;  %v3901_v56 = vpop.permute.xlu1 %3900  ;;  %v5897_v59 = vld [vmem:[#allocation12 + $0x130] sm:$0xff] }
 0x4f1   : > { %v3421_v45 = vmul.f32 0.5, %v3390_v37  ;;  %9386 = vtanh.f32 %v4263_v62 }
 0x4f2   : > { %v4355_v23 = vmul.f32 0.5, %v4324_v5  ;;  %v4114_v5 = vadd.f32 %v11377_v25, %v3901_v56  ;;  %v5901_v25 = vld [vmem:[#allocation12 + $0x150] sm:$0xff]  ;;  %v5890_v56 = vld [vmem:[#allocation12 + $0xf8] sm:$0xff] }
 0x4f3   : > { %8708 = vst [vmem:[%s10442_s21 + $0x2c8] sm:$0xff] %v3421_v45  ;;  %v3295_v60 = vpop.f32.mrf.mxu2  ;;  %v4217_v42 = vpop.f32.mrf.mxu3 }
 0x4f4   : > { %v3296_v6 = vadd.f32 %v3295_v60, %v3186_v4  ;;  %8764 = vst [vmem:[%s10442_s21 + $0x390] sm:$0xff] %v4355_v23  ;;  %v4218_v51 = vadd.f32 %v4217_v42, %v4108_v28 }
 0x4f5   : > { %5963 = vperm.xlu1 %9158, %v5898_v14   ;;  %5958 = vperm.xlu0 %9157, %v5897_v59  }
 0x4f6   : > { %v9385_v32 = vpop.eup %9384  ;;  %v3330_v12 = vmul.f32 0.5, %v3296_v6  ;;  %v11452_v24 = vpop.f32.mrf.mxu1  ;;  %v4264_v15 = vmul.f32 0.5, %v4218_v51 }
 0x4f7   : > { %v9387_v1 = vpop.eup %9386  ;;  %v3391_v44 = vadd.f32 1.0, %v9385_v32  ;;  %v11457_v29 = vpop.f32.mrf.mxu0 }
 0x4f8   : > { %9388 = vtanh.f32 %v3330_v12  ;;  %v4325_v40 = vadd.f32 1.0, %v9387_v1  ;;  %v3906_v51 = vpop.permute.xlu2 %3905 }
 0x4f9   : > { %v3422_v22 = vmul.f32 0.5, %v3391_v44  ;;  %9390 = vtanh.f32 %v4264_v15  ;;  %v4982_v15 = vld [vmem:[#allocation12 + $0xe0] sm:$0xff]  ;;  %v4117_v44 = vadd.f32 %v11388_v52, %v3906_v51  ;;  %v5906_v51 = vld [vmem:[#allocation12 + $0x178] sm:$0xff] }
 0x4fa   : > { %v4356_v20 = vmul.f32 0.5, %v4325_v40  ;;  %5127 = vperm.xlu2 %9159, %v4982_v15   ;;  %v5903_v52 = vld [vmem:[#allocation12 + $0x160] sm:$0xff] }
 0x4fb   : > { %8709 = vst [vmem:[%s10442_s21 + $0x2d0] sm:$0xff] %v3422_v22  ;;  %v3298_v41 = vpop.f32.mrf.mxu2  ;;  %v4220_v9 = vpop.f32.mrf.mxu3 }
 0x4fc   : > { %v3299_v17 = vadd.f32 %v3298_v41, %v3189_v31  ;;  %8765 = vst [vmem:[%s10442_s21 + $0x398] sm:$0xff] %v4356_v20  ;;  %v4221_v35 = vadd.f32 %v4220_v9, %v4111_v0  ;;  %v3911_v41 = vpop.permute.xlu0 %3910 }
 0x4fd   : > { %5978 = vperm.xlu1 %9158, %v5901_v25   ;;  %5973 = vperm.xlu0 %9157, %v5900_v30  }
 0x4fe   : > { %v9389_v62 = vpop.eup %9388  ;;  %v3331_v50 = vmul.f32 0.5, %v3299_v17  ;;  %v11461_v18 = vpop.f32.mrf.mxu1  ;;  %v4265_v55 = vmul.f32 0.5, %v4221_v35 }
 0x4ff   : > { %v9391_v37 = vpop.eup %9390  ;;  %v3392_v19 = vadd.f32 1.0, %v9389_v62  ;;  %v11464_v45 = vpop.f32.mrf.mxu0  ;;  %v5904_v62 = vld [vmem:[#allocation12 + $0x168] sm:$0xff] }
 0x500   : > { %9392 = vtanh.f32 %v3331_v50  ;;  %v4326_v4 = vadd.f32 1.0, %v9391_v37 }
 0x501   : > { %v3423_v28 = vmul.f32 0.5, %v3392_v19  ;;  %9394 = vtanh.f32 %v4265_v55  ;;  %v4120_v55 = vadd.f32 %v11399_v54, %v3911_v41 }
 0x502   : > { %v4357_v23 = vmul.f32 0.5, %v4326_v4  ;;  %5923 = vperm.xlu2 %9159, %v5890_v56   ;;  %v3916_v4 = vpop.permute.xlu1 %3915 }
 0x503   : > { %8710 = vst [vmem:[%s10442_s21 + $0x2d8] sm:$0xff] %v3423_v28  ;;  %v4223_v60 = vpop.f32.mrf.mxu3  ;;  %v11467_v42 = vpop.f32.mrf.mxu2  ;;  %v4123_v54 = vadd.f32 %v11410_v8, %v3916_v4  ;;  %v5912_v4 = vld [vmem:[#allocation12 + $0x1a8] sm:$0xff] }
 0x504   : > { %8766 = vst [vmem:[%s10442_s21 + $0x3a0] sm:$0xff] %v4357_v23  ;;  %v4224_v6 = vadd.f32 %v4223_v60, %v4114_v5  ;;  %v5893_v60 = vld [vmem:[#allocation12 + $0x110] sm:$0xff] }
 0x505   : > { %5993 = vperm.xlu1 %9158, %v5904_v62   ;;  %5988 = vperm.xlu0 %9157, %v5903_v52  }
 0x506   : > { %v9393_v26 = vpop.eup %9392  ;;  %v11470_v32 = vpop.f32.mrf.mxu1  ;;  %v4266_v12 = vmul.f32 0.5, %v4224_v6  ;;  %v5907_v6 = vld [vmem:[#allocation12 + $0x180] sm:$0xff] }
 0x507   : > { %v9395_v46 = vpop.eup %9394  ;;  %v3393_v49 = vadd.f32 1.0, %v9393_v26  ;;  %v11473_v31 = vpop.f32.mrf.mxu0 }
 0x508   : > { %v4327_v1 = vadd.f32 1.0, %v9395_v46  ;;  %9396 = vtanh.f32 %v4266_v12 }
 0x509   : > { %v3424_v33 = vmul.f32 0.5, %v3393_v49  ;;  %v3921_v49 = vpop.permute.xlu2 %3920 }
 0x50a   : > { %v4358_v40 = vmul.f32 0.5, %v4327_v1  ;;  %5938 = vperm.xlu2 %9159, %v5893_v60   ;;  %v4126_v8 = vadd.f32 %v11421_v47, %v3921_v49  ;;  %v5902_v49 = vld [vmem:[#allocation12 + $0x158] sm:$0xff] }
 0x50b   : > { %8711 = vst [vmem:[%s10442_s21 + $0x2e0] sm:$0x1] %v3424_v33  ;;  %v4226_v0 = vpop.f32.mrf.mxu3  ;;  %v11476_v22 = vpop.f32.mrf.mxu2 }
 0x50c   : > { %8767 = vst [vmem:[%s10442_s21 + $0x3a8] sm:$0xff] %v4358_v40  ;;  %v4227_v20 = vadd.f32 %v4226_v0, %v4117_v44  ;;  %v5896_v40 = vld [vmem:[#allocation12 + $0x128] sm:$0xff]  ;;  %v5910_v0 = vld [vmem:[#allocation12 + $0x198] sm:$0xff] }
 0x50d   : > { %6008 = vperm.xlu1 %9158, %v5907_v6   ;;  %6003 = vperm.xlu0 %9157, %v5906_v51  }
 0x50e   : > { %v9397_v9 = vpop.eup %9396  ;;  %v11479_v17 = vpop.f32.mrf.mxu1  ;;  %v4267_v35 = vmul.f32 0.5, %v4227_v20  ;;  %v5909_v20 = vld [vmem:[#allocation12 + $0x190] sm:$0xff] }
 0x50f   : > { %v4328_v50 = vadd.f32 1.0, %v9397_v9  ;;  %v11482_v13 = vpop.f32.mrf.mxu0 }
 0x510   : > { %9398 = vtanh.f32 %v4267_v35 }
 0x511   : > { %v4359_v14 = vmul.f32 0.5, %v4328_v50 }
 0x512   : > { %5953 = vperm.xlu2 %9159, %v5896_v40  }
 0x513   : > { %v4229_v59 = vpop.f32.mrf.mxu3  ;;  %v11484_v37 = vpop.f32.mrf.mxu2  ;;  %8768 = vst [vmem:[%s10442_s21 + $0x3b0] sm:$0xff] %v4359_v14 }
 0x514   : > { %v4230_v19 = vadd.f32 %v4229_v59, %v4120_v55  ;;  %v5899_v59 = vld [vmem:[#allocation12 + $0x140] sm:$0xff] }
 0x515   : > { %6023 = vperm.xlu1 %9158, %v5910_v0   ;;  %6018 = vperm.xlu0 %9157, %v5909_v20  }
 0x516   : > { %v9399_v5 = vpop.eup %9398  ;;  %v11487_v28 = vpop.f32.mrf.mxu1  ;;  %v4268_v23 = vmul.f32 0.5, %v4230_v19  ;;  %v5913_v19 = vld [vmem:[#allocation12 + $0x1b0] sm:$0xff] }
 0x517   : > { %v4329_v26 = vadd.f32 1.0, %v9399_v5  ;;  %v4835_v12 = vpop.f32.mrf.mxu0 }
 0x518   : > { %9400 = vtanh.f32 %v4268_v23  ;;  %v3926_v23 = vpop.permute.xlu0 %3925 }
 0x519   : > { %v4360_v15 = vmul.f32 0.5, %v4329_v26  ;;  %v4129_v47 = vadd.f32 %v11432_v53, %v3926_v23  ;;  %v5911_v23 = vld [vmem:[#allocation12 + $0x1a0] sm:$0xff] }
 0x51a   : > { %5968 = vperm.xlu2 %9159, %v5899_v59   ;;  %v6827_v59 = vld [vmem:[#allocation12 + $0x1f8] sm:$0xff] }
 0x51b   : > { %v4232_v25 = vpop.f32.mrf.mxu3  ;;  %v11490_v30 = vpop.f32.mrf.mxu2  ;;  %8769 = vst [vmem:[%s10442_s21 + $0x3b8] sm:$0xff] %v4360_v15 }
 0x51c   : > { %v4233_v46 = vadd.f32 %v4232_v25, %v4123_v54 }
 0x51d   : > { %6038 = vperm.xlu1 %9158, %v5913_v19   ;;  %6033 = vperm.xlu0 %9157, %v5912_v4   ;;  %v6826_v19 = vld [vmem:[#allocation12 + $0x1f0] sm:$0xff]  ;;  %v4873_v4 = vld [vmem:[#allocation10 + $0x28] sm:$0xff] }
 0x51e   : > { %v9401_v1 = vpop.eup %9400  ;;  %v11493_v44 = vpop.f32.mrf.mxu1  ;;  %v4269_v33 = vmul.f32 0.5, %v4233_v46 }
 0x51f   : > { %v4330_v41 = vadd.f32 1.0, %v9401_v1  ;;  %v4838_v9 = vpop.f32.mrf.mxu0  ;;  %v5916_v1 = vld [vmem:[#allocation12 + $0x1c8] sm:$0xff] }
 0x520   : > { %9402 = vtanh.f32 %v4269_v33  ;;  %v5915_v33 = vld [vmem:[#allocation12 + $0x1c0] sm:$0xff] }
 0x521   : > { %v4361_v35 = vmul.f32 0.5, %v4330_v41 }
 0x522   : > { %5983 = vperm.xlu2 %9159, %v5902_v49   ;;  %v5920_v49 = vld [vmem:[#allocation12 + $0x1e8] sm:$0x1] }
 0x523   : > { %v4235_v56 = vpop.f32.mrf.mxu3  ;;  %v11496_v62 = vpop.f32.mrf.mxu2  ;;  %8770 = vst [vmem:[%s10442_s21 + $0x3c0] sm:$0xff] %v4361_v35  ;;  %v5918_v35 = vld [vmem:[#allocation12 + $0x1d8] sm:$0xff] }
 0x524   : > { %v4236_v52 = vadd.f32 %v4235_v56, %v4126_v8 }
 0x525   : > { %6053 = vperm.xlu1 %9158, %v5916_v1   ;;  %6048 = vperm.xlu0 %9157, %v5915_v33   ;;  %v6838_v1 = vld [vmem:[#allocation12 + $0x250] sm:$0xff] }
 0x526   : > { %v9403_v50 = vpop.eup %9402  ;;  %v11499_v55 = vpop.f32.mrf.mxu1  ;;  %v4270_v14 = vmul.f32 0.5, %v4236_v52  ;;  %v4870_v33 = vld [vmem:[#allocation10 + $0x10] sm:$0xff] }
 0x527   : > { %v4331_v5 = vadd.f32 1.0, %v9403_v50  ;;  %v4841_v60 = vpop.f32.mrf.mxu0  ;;  %v4871_v50 = vld [vmem:[#allocation10 + $0x18] sm:$0xff] }
 0x528   : > { %9404 = vtanh.f32 %v4270_v14  ;;  %5351 = vmatpush.msrb.mxu0 %v4841_v60  ;;  %v5908_v14 = vld [vmem:[#allocation12 + $0x188] sm:$0xff] }
 0x529   : > { %v4362_v6 = vmul.f32 0.5, %v4331_v5  ;;  %v6829_v60 = vld [vmem:[#allocation12 + $0x208] sm:$0xff] }
 0x52a   : > { %5352 = vmatpush.msrb.mxu0 %v4838_v9  ;;  %v5905_v9 = vld [vmem:[#allocation12 + $0x170] sm:$0xff] }
 0x52b   : > { %v4238_v51 = vpop.f32.mrf.mxu3  ;;  %v4794_v26 = vpop.f32.mrf.mxu2  ;;  %8771 = vst [vmem:[%s10442_s21 + $0x3c8] sm:$0xff] %v4362_v6  ;;  %5998 = vperm.xlu2 %9159, %v5905_v9   ;;  %v5914_v6 = vld [vmem:[#allocation12 + $0x1b8] sm:$0xff] }
 0x52c   : > { %v4239_v54 = vadd.f32 %v4238_v51, %v4129_v47  ;;  %5353 = vmatpush.msrb.mxu0 %v4835_v12  ;;  %v4869_v12 = vld [vmem:[#allocation10 + $0x8] sm:$0xff]  ;;  %v6830_v47 = vld [vmem:[#allocation12 + $0x210] sm:$0xff] }
 0x52d   : > { %6063 = vperm.xlu0 %9157, %v5918_v35   ;;  %v6833_v51 = vld [vmem:[#allocation12 + $0x228] sm:$0xff]  ;;  %v6831_v35 = vld [vmem:[#allocation12 + $0x218] sm:$0xff] }
 0x52e   : > { %v9405_v15 = vpop.eup %9404  ;;  %v11503_v25 = vpop.f32.mrf.mxu1  ;;  %v4271_v46 = vmul.f32 0.5, %v4239_v54  ;;  %5354 = vmatpush.msrb.mxu0 %v11482_v13  ;;  %v5919_v13 = vld [vmem:[#allocation12 + $0x1e0] sm:$0xff] }
 0x52f   : > { %v4332_v40 = vadd.f32 1.0, %v9405_v15  ;;  %6068 = vperm.xlu1 %9158, %v5919_v13   ;;  %v6836_v54 = vld [vmem:[#allocation12 + $0x240] sm:$0xff]  ;;  %v6835_v15 = vld [vmem:[#allocation12 + $0x238] sm:$0xff] }
 0x530   : > { %9406 = vtanh.f32 %v4271_v46  ;;  %5355 = vmatpush.msrb.mxu0 %v11473_v31  ;;  %v4883_v13 = vld [vmem:[#allocation10 + $0x78] sm:$0xff] }
 0x531   : > { %v4363_v53 = vmul.f32 0.5, %v4332_v40  ;;  %v4881_v40 = vld [vmem:[#allocation10 + $0x68] sm:$0xff] }
 0x532   : > { %5356 = vmatpush.msrb.mxu0 %v11464_v45 }
 0x533   : > { %v4797_v0 = vpop.f32.mrf.mxu2  ;;  %v11507_v20 = vpop.f32.mrf.mxu3  ;;  %8772 = vst [vmem:[%s10442_s21 + $0x3d0] sm:$0xff] %v4363_v53  ;;  %6013 = vperm.xlu2 %9159, %v5908_v14   ;;  %v4885_v14 = vld [vmem:[#allocation10 + $0x88] sm:$0xff] }
 0x534   : > { %5357 = vmatpush.msrb.mxu0 %v11457_v29 }
 0x535   : > { %6859 = vperm.xlu0 %9157, %v6826_v19   ;;  %v6848_v19 = vld [vmem:[#allocation12 + $0x2a0] sm:$0xff] }
 0x536   : > { %v9407_v41 = vpop.eup %9406  ;;  %v11511_v8 = vpop.f32.mrf.mxu1  ;;  %5358 = vmatpush.msrb.mxu0 %v11448_v58 }
 0x537   : > { %v4333_v56 = vadd.f32 1.0, %v9407_v41  ;;  %8774 = vmatmul.msk.f32.vlgmr.msrb.gmra.mxu0 %vm1108_vm0, %v4869_v12  ;;  %6864 = vperm.xlu1 %9158, %v6827_v59   ;;  %v6842_v12 = vld [vmem:[#allocation12 + $0x270] sm:$0xff]  ;;  %v4872_v41 = vld [vmem:[#allocation10 + $0x20] sm:$0xff] }
 0x538   : > { %v6834_v59 = vld [vmem:[#allocation12 + $0x230] sm:$0xff] }
 0x539   : > { %v4364_v31 = vmul.f32 0.5, %v4333_v56  ;;  %v6845_v56 = vld [vmem:[#allocation12 + $0x288] sm:$0xff] }
 0x53b   : > { %v4800_v45 = vpop.f32.mrf.mxu2  ;;  %v11516_v52 = vpop.f32.mrf.mxu3  ;;  %8773 = vst [vmem:[%s10442_s21 + $0x3d8] sm:$0x1] %v4364_v31  ;;  %6028 = vperm.xlu2 %9159, %v5911_v23   ;;  %v6844_v31 = vld [vmem:[#allocation12 + $0x280] sm:$0xff]  ;;  %v4878_v23 = vld [vmem:[#allocation10 + $0x50] sm:$0xff] }
 0x53c   : > { %5233 = vmatpush.msra.mxu2 %v4800_v45  ;;  %v4874_v45 = vld [vmem:[#allocation10 + $0x30] sm:$0xff] }
 0x53d   : > { %6874 = vperm.xlu0 %9157, %v6829_v60   ;;  %v4880_v60 = vld [vmem:[#allocation10 + $0x60] sm:$0xff] }
 0x53e   : > { %5234 = vmatpush.msra.mxu2 %v4797_v0  ;;  %v11519_v29 = vpop.f32.mrf.mxu1  ;;  %v6828_v0 = vld [vmem:[#allocation12 + $0x200] sm:$0xff] }
 0x53f   : > { %8775 = vmatmul.msk.f32.gmra.mxu0 %vm1108_vm0, %v4871_v50  ;;  %6879 = vperm.xlu1 %9158, %v6830_v47   ;;  %v5805_v50 = vld [vmem:[#allocation10 + $0x1f8] sm:$0xff]  ;;  %v6854_v47 = vld [vmem:[#allocation12 + $0x2d0] sm:$0xff] }
 0x540   : > { %5235 = vmatpush.msra.mxu2 %v4794_v26  ;;  %v6832_v26 = vld [vmem:[#allocation12 + $0x220] sm:$0xff] }
 0x542   : > { %5236 = vmatpush.msra.mxu2 %v11496_v62 }
 0x543   : > { %v11523_v58 = vpop.f32.mrf.mxu3  ;;  %6043 = vperm.xlu2 %9159, %v5914_v6   ;;  %v4882_v6 = vld [vmem:[#allocation10 + $0x70] sm:$0xff] }
 0x544   : > { %5237 = vmatpush.msra.mxu2 %v11490_v30  ;;  %v4875_v30 = vld [vmem:[#allocation10 + $0x38] sm:$0xff] }
 0x545   : > { %6889 = vperm.xlu0 %9157, %v6832_v26   ;;  %v6846_v26 = vld [vmem:[#allocation12 + $0x290] sm:$0xff] }
 0x546   : > { %5238 = vmatpush.msra.mxu2 %v11484_v37  ;;  %v11527_v5 = vpop.f32.mrf.mxu1 }
 0x547   : > { %8776 = vmatmul.msk.f32.gmra.mxu0 %vm1108_vm0, %v4873_v4  ;;  %6894 = vperm.xlu1 %9158, %v6833_v51   ;;  %v4876_v4 = vld [vmem:[#allocation10 + $0x40] sm:$0xff]  ;;  %v4893_v51 = vld [vmem:[#allocation10 + $0xc8] sm:$0xff] }
 0x548   : > { %5239 = vmatpush.msra.mxu2 %v11476_v22  ;;  %v5917_v22 = vld [vmem:[#allocation12 + $0x1d0] sm:$0xff] }
 0x54a   : > { %5240 = vmatpush.msra.mxu2 %v11467_v42 }
 0x54b   : > { %v11532_v62 = vpop.f32.mrf.mxu3  ;;  %6058 = vperm.xlu2 %9159, %v5917_v22   ;;  %v5808_v22 = vld [vmem:[#allocation10 + $0x210] sm:$0xff] }
 0x54c   : > { %5241 = vmatpush.msra.mxu2 %v11439_v11  ;;  %v4877_v11 = vld [vmem:[#allocation10 + $0x48] sm:$0xff] }
 0x54d   : > { %6904 = vperm.xlu0 %9157, %v6835_v15   ;;  %v4895_v15 = vld [vmem:[#allocation10 + $0xd8] sm:$0xff] }
 0x54e   : > { %5242 = vmatpush.msra.mxu2 %v11426_v34  ;;  %v5768_v37 = vpop.f32.mrf.mxu1 }
 0x54f   : > { %8777 = vmatmul.msk.f32.gmra.mxu0 %vm1108_vm0, %v4875_v30  ;;  %6909 = vperm.xlu1 %9158, %v6836_v54   ;;  %v7762_v30 = vld [vmem:[#allocation12 + $0x2e8] sm:$0xff] }
 0x550   : > { %5243 = vmatpush.msra.mxu2 %v11412_v39  ;;  %v4868_v39 = vld [vmem:[#allocation10] sm:$0xff]  ;;  %v5815_v54 = vld [vmem:[#allocation10 + $0x248] sm:$0xff] }
 0x552   : > { %5244 = vmatpush.msra.mxu2 %v11401_v38 }
 0x553   : > { %v5727_v42 = vpop.f32.mrf.mxu3  ;;  %6073 = vperm.xlu2 %9159, %v5920_v49   ;;  %v5810_v49 = vld [vmem:[#allocation10 + $0x220] sm:$0xff] }
 0x554   : > { %5245 = vmatpush.msra.mxu2 %v11390_v27  ;;  %v4879_v27 = vld [vmem:[#allocation10 + $0x58] sm:$0xff] }
 0x555   : > { %6919 = vperm.xlu0 %9157, %v6838_v1   ;;  %v4897_v1 = vld [vmem:[#allocation10 + $0xe8] sm:$0xff] }
 0x556   : > { %5246 = vmatpush.msra.mxu2 %v11379_v43  ;;  %v5771_v34 = vpop.f32.mrf.mxu1  ;;  %v6839_v43 = vld [vmem:[#allocation12 + $0x258] sm:$0xff] }
 0x557   : > { %8778 = vmatmul.msk.f32.gmra.mxu0 %vm1108_vm0, %v4877_v11  ;;  %6924 = vperm.xlu1 %9158, %v6839_v43   ;;  %v7764_v11 = vld [vmem:[#allocation12 + $0x2f8] sm:$0xff] }
 0x558   : > { %5247 = vmatpush.msra.mxu2 %v11367_v61  ;;  %v5817_v43 = vld [vmem:[#allocation10 + $0x258] sm:$0xff] }
 0x55a   : > { %5248 = vmatpush.msra.mxu2 %v11352_v21  ;;  %v6841_v21 = vld [vmem:[#allocation12 + $0x268] sm:$0xff] }
 0x55b   : > { %5249 = vmatmul.f32.vlgmr.msra.gmra.mxu2 %v4868_v39  ;;  %v5730_v38 = vpop.f32.mrf.mxu3  ;;  %6869 = vperm.xlu2 %9159, %v6828_v0   ;;  %v6849_v39 = vld [vmem:[#allocation12 + $0x2a8] sm:$0xff]  ;;  %v5812_v0 = vld [vmem:[#allocation10 + $0x230] sm:$0xff] }
 0x55d   : > { %6934 = vperm.xlu0 %9157, %v6841_v21   ;;  %v5819_v21 = vld [vmem:[#allocation10 + $0x268] sm:$0xff] }
 0x55e   : > { %v5774_v46 = vpop.f32.mrf.mxu1 }
 0x55f   : > { %8779 = vmatmul.msk.f32.gmra.mxu0 %vm1108_vm0, %v4879_v27  ;;  %6939 = vperm.xlu1 %9158, %v6842_v12   ;;  %v7767_v27 = vld [vmem:[#allocation12 + $0x310] sm:$0xff]  ;;  %v11576_v12 = vpop.permute.xlu2 %4992 }
 0x563   : > { %5252 = vmatmul.f32.gmra.mxu2 %v4870_v33  ;;  %v5733_v61 = vpop.f32.mrf.mxu3  ;;  %6884 = vperm.xlu2 %9159, %v6831_v35   ;;  %v6852_v33 = vld [vmem:[#allocation12 + $0x2c0] sm:$0xff]  ;;  %v11580_v35 = vpop.permute.xlu1 %4987 }
 0x565   : > { %6949 = vperm.xlu0 %9157, %v6844_v31   ;;  %v4890_v31 = vld [vmem:[#allocation10 + $0xb0] sm:$0xff] }
 0x566   : > { %v5777_v53 = vpop.f32.mrf.mxu1 }
 0x567   : > { %6287 = vmatpush.msrb.mxu1 %v5777_v53  ;;  %8780 = vmatmul.msk.f32.gmra.mxu0 %vm1108_vm0, %v4881_v40  ;;  %v7770_v40 = vld [vmem:[#allocation12 + $0x328] sm:$0xff]  ;;  %v4888_v53 = vld [vmem:[#allocation10 + $0xa0] sm:$0xff] }
 0x568   : > { %6954 = vperm.xlu1 %9158, %v6845_v56   ;;  %v7773_v56 = vld [vmem:[#allocation12 + $0x340] sm:$0xff] }
 0x569   : > { %6288 = vmatpush.msrb.mxu1 %v5774_v46  ;;  %v4886_v46 = vld [vmem:[#allocation10 + $0x90] sm:$0xff] }
 0x56b   : > { %5255 = vmatmul.f32.gmra.mxu2 %v4872_v41  ;;  %v5736_v9 = vpop.f32.mrf.mxu3  ;;  %6289 = vmatpush.msrb.mxu1 %v5771_v34  ;;  %v4884_v34 = vld [vmem:[#allocation10 + $0x80] sm:$0xff]  ;;  %v4899_v41 = vld [vmem:[#allocation10 + $0xf8] sm:$0xff] }
 0x56c   : > { %6169 = vmatpush.msrb.mxu3 %v5736_v9  ;;  %6899 = vperm.xlu2 %9159, %v6834_v59   ;;  %v6855_v9 = vld [vmem:[#allocation12 + $0x2d8] sm:$0xff] }
 0x56d   : > { %6290 = vmatpush.msrb.mxu1 %v5768_v37  ;;  %v6856_v37 = vld [vmem:[#allocation12 + $0x2e0] sm:$0x1]  ;;  %v5821_v59 = vld [vmem:[#allocation10 + $0x278] sm:$0xff] }
 0x56e   : > { %6170 = vmatpush.msrb.mxu3 %v5733_v61  ;;  %v7771_v61 = vld [vmem:[#allocation12 + $0x330] sm:$0xff] }
 0x56f   : > { %6291 = vmatpush.msrb.mxu1 %v11527_v5  ;;  %8781 = vmatmul.msk.f32.gmra.mxu0 %vm1108_vm0, %v4883_v13  ;;  %v6851_v5 = vld [vmem:[#allocation12 + $0x2b8] sm:$0xff]  ;;  %v7774_v13 = vld [vmem:[#allocation12 + $0x348] sm:$0xff] }
 0x570   : > { %6171 = vmatpush.msrb.mxu3 %v5730_v38  ;;  %6969 = vperm.xlu1 %9158, %v6848_v19   ;;  %v7768_v38 = vld [vmem:[#allocation12 + $0x318] sm:$0xff] }
 0x571   : > { %6292 = vmatpush.msrb.mxu1 %v11519_v29  ;;  %v6847_v29 = vld [vmem:[#allocation12 + $0x298] sm:$0xff] }
 0x572   : > { %6172 = vmatpush.msrb.mxu3 %v5727_v42  ;;  %6964 = vperm.xlu0 %9157, %v6847_v29   ;;  %v7765_v42 = vld [vmem:[#allocation12 + $0x300] sm:$0xff]  ;;  %v4901_v29 = vld [vmem:[#allocation10 + $0x108] sm:$0xff] }
 0x573   : > { %5258 = vmatmul.f32.gmra.mxu2 %v4874_v45  ;;  %6293 = vmatpush.msrb.mxu1 %v11511_v8  ;;  %v4887_v8 = vld [vmem:[#allocation10 + $0x98] sm:$0xff]  ;;  %v5814_v45 = vld [vmem:[#allocation10 + $0x240] sm:$0xff] }
 0x574   : > { %6173 = vmatpush.msrb.mxu3 %v11532_v62  ;;  %v5804_v62 = vld [vmem:[#allocation10 + $0x1f0] sm:$0xff] }
 0x575   : > { %6294 = vmatpush.msrb.mxu1 %v11503_v25  ;;  %v5807_v25 = vld [vmem:[#allocation10 + $0x208] sm:$0xff] }
 0x576   : > { %6174 = vmatpush.msrb.mxu3 %v11523_v58  ;;  %8836 = vmatmul.msk.f32.vlgmr.msrb.gmra.mxu1 %vm1108_vm0, %v5805_v50  ;;  %v6837_v58 = vld [vmem:[#allocation12 + $0x248] sm:$0xff]  ;;  %v11582_v50 = vpop.permute.xlu0 %4997 }
 0x577   : > { %8782 = vmatmul.msk.f32.gmra.mxu0 %vm1108_vm0, %v4885_v14  ;;  %6914 = vperm.xlu2 %9159, %v6837_v58   ;;  %v11585_v14 = vpop.permute.xlu2 %5007  ;;  %v4892_v58 = vld [vmem:[#allocation10 + $0xc0] sm:$0xff] }
 0x578   : > { %6175 = vmatpush.msrb.mxu3 %v11516_v52  ;;  %v6850_v52 = vld [vmem:[#allocation12 + $0x2b0] sm:$0xff]  ;;  %6984 = vperm.xlu1 %9158, %v6851_v5  }
 0x579   : > { %v5816_v5 = vld [vmem:[#allocation10 + $0x250] sm:$0xff] }
 0x57a   : > { %6176 = vmatpush.msrb.mxu3 %v11507_v20  ;;  %6979 = vperm.xlu0 %9157, %v6850_v52   ;;  %v6840_v20 = vld [vmem:[#allocation12 + $0x260] sm:$0xff]  ;;  %v11590_v52 = vpop.permute.xlu1 %5002 }
 0x57b   : > { %5261 = vmatmul.f32.gmra.mxu2 %v4876_v4  ;;  %v7763_v4 = vld [vmem:[#allocation12 + $0x2f0] sm:$0xff] }
 0x57c   : > { %6177 = vmatpush.msrb.mxu3 %v11499_v55  ;;  %v5809_v55 = vld [vmem:[#allocation10 + $0x218] sm:$0xff] }
 0x57e   : > { %6178 = vmatpush.msrb.mxu3 %v11493_v44  ;;  %8837 = vmatmul.msk.f32.gmra.mxu1 %vm1108_vm0, %v5807_v25  ;;  %v4889_v44 = vld [vmem:[#allocation10 + $0xa8] sm:$0xff]  ;;  %v7777_v25 = vld [vmem:[#allocation12 + $0x360] sm:$0xff] }
 0x57f   : > { %8783 = vmatmul.msk.f32.gmra.mxu0 %vm1108_vm0, %v4887_v8  ;;  %6929 = vperm.xlu2 %9159, %v6840_v20   ;;  %v7776_v8 = vld [vmem:[#allocation12 + $0x358] sm:$0xff] }
 0x580   : > { %6179 = vmatpush.msrb.mxu3 %v11487_v28  ;;  %v6853_v28 = vld [vmem:[#allocation12 + $0x2c8] sm:$0xff]  ;;  %6999 = vperm.xlu1 %9158, %v6854_v47   ;;  %v4903_v47 = vld [vmem:[#allocation10 + $0x118] sm:$0xff] }
 0x582   : > { %6180 = vmatpush.msrb.mxu3 %v11479_v17  ;;  %6994 = vperm.xlu0 %9157, %v6853_v28   ;;  %v6843_v17 = vld [vmem:[#allocation12 + $0x278] sm:$0xff]  ;;  %v7766_v28 = vld [vmem:[#allocation12 + $0x308] sm:$0xff] }
 0x583   : > { %5264 = vmatmul.f32.gmra.mxu2 %v4878_v23  ;;  %v11593_v23 = vpop.permute.xlu0 %5012 }
 0x584   : > { %6181 = vmatpush.msrb.mxu3 %v11470_v32  ;;  %v4891_v32 = vld [vmem:[#allocation10 + $0xb8] sm:$0xff] }
 0x586   : > { %6182 = vmatpush.msrb.mxu3 %v11461_v18  ;;  %8838 = vmatmul.msk.f32.gmra.mxu1 %vm1108_vm0, %v5809_v55  ;;  %v5811_v18 = vld [vmem:[#allocation10 + $0x228] sm:$0xff] }
 0x587   : > { %8784 = vmatmul.msk.f32.gmra.mxu0 %vm1108_vm0, %v4889_v44  ;;  %6944 = vperm.xlu2 %9159, %v6843_v17   ;;  %v5823_v55 = vld [vmem:[#allocation10 + $0x288] sm:$0xff]  ;;  %v11595_v44 = vpop.permute.xlu2 %5022  ;;  %v11601_v17 = vpop.permute.xlu1 %5017 }
 0x588   : > { %6183 = vmatpush.msrb.mxu3 %v11452_v24  ;;  %v5806_v24 = vld [vmem:[#allocation10 + $0x200] sm:$0xff]  ;;  %7795 = vperm.xlu1 %9158, %v7762_v30   ;;  %v5825_v30 = vld [vmem:[#allocation10 + $0x298] sm:$0xff] }
 0x58a   : > { %6184 = vmatpush.msrb.mxu3 %v11443_v63  ;;  %7009 = vperm.xlu0 %9157, %v6856_v37   ;;  %v5813_v63 = vld [vmem:[#allocation10 + $0x238] sm:$0xff] }
 0x58b   : > { %5267 = vmatmul.f32.gmra.mxu2 %v4880_v60  ;;  %6185 = vmatmul.f32.vlgmr.msrb.gmra.mxu3 %v5804_v62  ;;  %v7780_v60 = vld [vmem:[#allocation12 + $0x378] sm:$0xff]  ;;  %v7779_v62 = vld [vmem:[#allocation12 + $0x370] sm:$0xff]  ;;  %v11603_v37 = vpop.permute.xlu0 %5027 }
 0x58e   : > { %8839 = vmatmul.msk.f32.gmra.mxu1 %vm1108_vm0, %v5811_v18  ;;  %v4894_v18 = vld [vmem:[#allocation10 + $0xd0] sm:$0xff] }
 0x58f   : > { %8785 = vmatmul.msk.f32.gmra.mxu0 %vm1108_vm0, %v4891_v32  ;;  %6959 = vperm.xlu2 %9159, %v6846_v26   ;;  %v5818_v32 = vld [vmem:[#allocation10 + $0x260] sm:$0xff]  ;;  %v11608_v26 = vpop.permute.xlu2 %5037 }
 0x590   : > { %7810 = vperm.xlu1 %9158, %v7765_v42   ;;  %v7782_v42 = vld [vmem:[#allocation12 + $0x388] sm:$0xff] }
 0x592   : > { %7805 = vperm.xlu0 %9157, %v7764_v11   ;;  %v4896_v11 = vld [vmem:[#allocation10 + $0xe0] sm:$0xff] }
 0x593   : > { %5270 = vmatmul.f32.gmra.mxu2 %v4882_v6  ;;  %6188 = vmatmul.f32.gmra.mxu3 %v5806_v24  ;;  %v4905_v24 = vld [vmem:[#allocation10 + $0x128] sm:$0xff] }
 0x596   : > { %8840 = vmatmul.msk.f32.gmra.mxu1 %vm1108_vm0, %v5813_v63  ;;  %v7769_v63 = vld [vmem:[#allocation12 + $0x320] sm:$0xff] }
 0x597   : > { %8786 = vmatmul.msk.f32.gmra.mxu0 %vm1108_vm0, %v4893_v51  ;;  %6974 = vperm.xlu2 %9159, %v6849_v39   ;;  %v7783_v51 = vld [vmem:[#allocation12 + $0x390] sm:$0xff]  ;;  %v4907_v39 = vld [vmem:[#allocation10 + $0x138] sm:$0xff] }
 0x598   : > { %7825 = vperm.xlu1 %9158, %v7768_v38   ;;  %v7772_v38 = vld [vmem:[#allocation12 + $0x338] sm:$0xff] }
 0x59a   : > { %7820 = vperm.xlu0 %9157, %v7767_v27   ;;  %v7786_v27 = vld [vmem:[#allocation12 + $0x3a8] sm:$0xff] }
 0x59b   : > { %5273 = vmatmul.f32.gmra.mxu2 %v4884_v34  ;;  %6191 = vmatmul.f32.gmra.mxu3 %v5808_v22  ;;  %v5820_v34 = vld [vmem:[#allocation10 + $0x270] sm:$0xff]  ;;  %v5827_v22 = vld [vmem:[#allocation10 + $0x2a8] sm:$0xff] }
 0x59e   : > { %8841 = vmatmul.msk.f32.gmra.mxu1 %vm1108_vm0, %v5815_v54  ;;  %v11611_v54 = vpop.permute.xlu1 %5032 }
 0x59f   : > { %8787 = vmatmul.msk.f32.gmra.mxu0 %vm1108_vm0, %v4895_v15  ;;  %6989 = vperm.xlu2 %9159, %v6852_v33   ;;  %v11618_v33 = vpop.permute.xlu2 %5052 }
 0x5a0   : > { %7840 = vperm.xlu1 %9158, %v7771_v61   ;;  %v5829_v61 = vld [vmem:[#allocation10 + $0x2b8] sm:$0xff] }
 0x5a2   : > { %7835 = vperm.xlu0 %9157, %v7770_v40  }
 0x5a3   : > { %5276 = vmatmul.f32.gmra.mxu2 %v4886_v46  ;;  %6194 = vmatmul.f32.gmra.mxu3 %v5810_v49  ;;  %v11616_v46 = vpop.permute.xlu0 %5042  ;;  %v7785_v49 = vld [vmem:[#allocation12 + $0x3a0] sm:$0xff] }
 0x5a6   : > { %8842 = vmatmul.msk.f32.gmra.mxu1 %vm1108_vm0, %v5817_v43  ;;  %v4898_v43 = vld [vmem:[#allocation10 + $0xf0] sm:$0xff] }
 0x5a7   : > { %8788 = vmatmul.msk.f32.gmra.mxu0 %vm1108_vm0, %v4897_v1  ;;  %7004 = vperm.xlu2 %9159, %v6855_v9   ;;  %v5822_v1 = vld [vmem:[#allocation10 + $0x280] sm:$0xff]  ;;  %v7788_v9 = vld [vmem:[#allocation12 + $0x3b8] sm:$0xff] }
 0x5a8   : > { %7855 = vperm.xlu1 %9158, %v7774_v13   ;;  %v4900_v13 = vld [vmem:[#allocation10 + $0x100] sm:$0xff] }
 0x5aa   : > { %7850 = vperm.xlu0 %9157, %v7773_v56   ;;  %v5824_v56 = vld [vmem:[#allocation10 + $0x290] sm:$0xff] }
 0x5ab   : > { %5279 = vmatmul.f32.gmra.mxu2 %v4888_v53  ;;  %6197 = vmatmul.f32.gmra.mxu3 %v5812_v0  ;;  %v4909_v53 = vld [vmem:[#allocation10 + $0x148] sm:$0xff]  ;;  %v7775_v0 = vld [vmem:[#allocation12 + $0x350] sm:$0xff] }
 0x5ae   : > { %8843 = vmatmul.msk.f32.gmra.mxu1 %vm1108_vm0, %v5819_v21  ;;  %v7789_v21 = vld [vmem:[#allocation12 + $0x3c0] sm:$0xff] }
 0x5af   : > { %8789 = vmatmul.msk.f32.gmra.mxu0 %vm1108_vm0, %v4899_v41  ;;  %7800 = vperm.xlu2 %9159, %v7763_v4   ;;  %v11624_v41 = vpop.permute.xlu1 %5047 }
 0x5b0   : > { %7870 = vperm.xlu1 %9158, %v7777_v25   ;;  %v7778_v25 = vld [vmem:[#allocation12 + $0x368] sm:$0xff] }
 0x5b2   : > { %7865 = vperm.xlu0 %9157, %v7776_v8   ;;  %v7792_v8 = vld [vmem:[#allocation12 + $0x3d8] sm:$0x1] }
 0x5b3   : > { %5282 = vmatmul.f32.gmra.mxu2 %v4890_v31  ;;  %6200 = vmatmul.f32.gmra.mxu3 %v5814_v45  ;;  %v11626_v31 = vpop.permute.xlu0 %5057  ;;  %v11629_v45 = vpop.permute.xlu2 %5067 }
 0x5b4   : > { %v11588_v19 = vpop.f32.mrf.mxu0 }
 0x5b6   : > { %8844 = vmatmul.msk.f32.gmra.mxu1 %vm1108_vm0, %v5821_v59  ;;  %v5831_v59 = vld [vmem:[#allocation10 + $0x2c8] sm:$0xff] }
 0x5b7   : > { %8790 = vmatmul.msk.f32.gmra.mxu0 %vm1108_vm0, %v4901_v29  ;;  %7815 = vperm.xlu2 %9159, %v7766_v28   ;;  %v5826_v28 = vld [vmem:[#allocation10 + $0x2a0] sm:$0xff] }
 0x5b8   : > { %7885 = vperm.xlu1 %9158, %v7780_v60   ;;  %v6590_v60 = vld [vmem:[#allocation9 + $0x468] sm:$0xff] }
 0x5b9   : > { %6593 = vmatpush.msrb.mxu2 %v6590_v60 }
 0x5ba   : > { %7880 = vperm.xlu0 %9157, %v7779_v62   ;;  %v7526_v62 = vld [vmem:[#allocation9 + $0x5e8] sm:$0xff] }
 0x5bb   : > { %5285 = vmatmul.f32.gmra.mxu2 %v4892_v58  ;;  %6203 = vmatmul.f32.gmra.mxu3 %v5816_v5  ;;  %v4902_v5 = vld [vmem:[#allocation10 + $0x110] sm:$0xff] }
 0x5bc   : > { %v11598_v20 = vpop.f32.mrf.mxu0  ;;  %7529 = vmatpush.msra.mxu3 %v7526_v62 }
 0x5be   : > { %8845 = vmatmul.msk.f32.gmra.mxu1 %vm1108_vm0, %v5823_v55  ;;  %v4911_v55 = vld [vmem:[#allocation10 + $0x158] sm:$0xff] }
 0x5bf   : > { %8791 = vmatmul.msk.f32.gmra.mxu0 %vm1108_vm0, %v4903_v47  ;;  %7830 = vperm.xlu2 %9159, %v7769_v63   ;;  %v7791_v47 = vld [vmem:[#allocation12 + $0x3d0] sm:$0xff]  ;;  %v11641_v63 = vpop.permute.xlu2 %5082 }
 0x5c0   : > { %7900 = vperm.xlu1 %9158, %v7783_v51  }
 0x5c2   : > { %7895 = vperm.xlu0 %9157, %v7782_v42  }
 0x5c3   : > { %5288 = vmatmul.f32.gmra.mxu2 %v4894_v18  ;;  %6206 = vmatmul.f32.gmra.mxu3 %v5818_v32  ;;  %v11635_v18 = vpop.permute.xlu1 %5062 }
 0x5c4   : > { %v11606_v6 = vpop.f32.mrf.mxu0 }
 0x5c6   : > { %8846 = vmatmul.msk.f32.gmra.mxu1 %vm1108_vm0, %v5825_v30  ;;  %v11639_v30 = vpop.permute.xlu0 %5072 }
 0x5c7   : > { %8792 = vmatmul.msk.f32.gmra.mxu0 %vm1108_vm0, %v4905_v24  ;;  %7845 = vperm.xlu2 %9159, %v7772_v38   ;;  %v5833_v24 = vld [vmem:[#allocation10 + $0x2d8] sm:$0xff] }
 0x5c8   : > { %7915 = vperm.xlu1 %9158, %v7786_v27  }
 0x5ca   : > { %7910 = vperm.xlu0 %9157, %v7785_v49  }
 0x5cb   : > { %5291 = vmatmul.f32.gmra.mxu2 %v4896_v11  ;;  %6209 = vmatmul.f32.gmra.mxu3 %v5820_v34  ;;  %v4913_v34 = vld [vmem:[#allocation10 + $0x168] sm:$0xff]  ;;  %v11649_v49 = vpop.permute.xlu1 %5077 }
 0x5cc   : > { %v11614_v15 = vpop.f32.mrf.mxu0 }
 0x5ce   : > { %8847 = vmatmul.msk.f32.gmra.mxu1 %vm1108_vm0, %v5827_v22  ;;  %v4904_v22 = vld [vmem:[#allocation10 + $0x120] sm:$0xff] }
 0x5cf   : > { %8793 = vmatmul.msk.f32.gmra.mxu0 %vm1108_vm0, %v4907_v39  ;;  %7860 = vperm.xlu2 %9159, %v7775_v0   ;;  %v5828_v39 = vld [vmem:[#allocation10 + $0x2b0] sm:$0xff] }
 0x5d0   : > { %7930 = vperm.xlu1 %9158, %v7789_v21  }
 0x5d2   : > { %7925 = vperm.xlu0 %9157, %v7788_v9   ;;  %v11656_v9 = vpop.permute.xlu2 %5097 }
 0x5d3   : > { %5294 = vmatmul.f32.gmra.mxu2 %v4898_v43  ;;  %6212 = vmatmul.f32.gmra.mxu3 %v5822_v1  ;;  %v5835_v1 = vld [vmem:[#allocation10 + $0x2e8] sm:$0xff]  ;;  %v11664_v60 = vpop.permute.xlu1 %5092 }
 0x5d4   : > { %v11622_v40 = vpop.f32.mrf.mxu0 }
 0x5d6   : > { %8848 = vmatmul.msk.f32.gmra.mxu1 %vm1108_vm0, %v5829_v61 }
 0x5d7   : > { %8794 = vmatmul.msk.f32.gmra.mxu0 %vm1108_vm0, %v4909_v53  ;;  %7875 = vperm.xlu2 %9159, %v7778_v25   ;;  %v11651_v53 = vpop.permute.xlu0 %5087  ;;  %v6587_v25 = vld [vmem:[#allocation9 + $0x450] sm:$0xff] }
 0x5d8   : > { %7945 = vperm.xlu1 %9158, %v7792_v8   ;;  %v7523_v8 = vld [vmem:[#allocation9 + $0x5d0] sm:$0xff]  ;;  %6594 = vmatpush.msrb.mxu2 %v6587_v25 }
 0x5d9   : > { %7530 = vmatpush.msra.mxu3 %v7523_v8  ;;  %v6584_v8 = vld [vmem:[#allocation9 + $0x438] sm:$0xff] }
 0x5da   : > { %7940 = vperm.xlu0 %9157, %v7791_v47   ;;  %6595 = vmatpush.msrb.mxu2 %v6584_v8 }
 0x5db   : > { %5297 = vmatmul.f32.gmra.mxu2 %v4900_v13  ;;  %6215 = vmatmul.f32.gmra.mxu3 %v5824_v56  ;;  %v4906_v56 = vld [vmem:[#allocation10 + $0x130] sm:$0xff] }
 0x5dc   : > { %v11632_v4 = vpop.f32.mrf.mxu0 }
 0x5de   : > { %v5250_v29 = vpop.f32.mrf.mxu2  ;;  %8849 = vmatmul.msk.f32.gmra.mxu1 %vm1108_vm0, %v5831_v59  ;;  %v4915_v59 = vld [vmem:[#allocation10 + $0x178] sm:$0xff] }
 0x5df   : > { %v5251_v58 = vadd.f32 %v5250_v29, %v11580_v35  ;;  %8795 = vmatmul.msk.f32.gmra.mxu0 %vm1108_vm0, %v4911_v55  ;;  %v5830_v29 = vld [vmem:[#allocation10 + $0x2c0] sm:$0xff] }
 0x5e1   : > { %v5361_v32 = vadd.f32 %v11588_v19, %v5251_v58  ;;  %v7781_v19 = vld [vmem:[#allocation12 + $0x380] sm:$0xff] }
 0x5e2   : > { %7890 = vperm.xlu2 %9159, %v7781_v19   ;;  %v4917_v19 = vld [vmem:[#allocation10 + $0x188] sm:$0xff] }
 0x5e3   : > { %v5453_v35 = vmul.f32 0.5, %v5361_v32  ;;  %5300 = vmatmul.f32.gmra.mxu2 %v4902_v5  ;;  %6218 = vmatmul.f32.gmra.mxu3 %v5826_v28 }
 0x5e4   : > { %v11644_v42 = vpop.f32.mrf.mxu0 }
 0x5e5   : > { %9408 = vtanh.f32 %v5453_v35  ;;  %v7787_v35 = vld [vmem:[#allocation12 + $0x3b0] sm:$0xff] }
 0x5e6   : > { %v5253_v51 = vpop.f32.mrf.mxu2  ;;  %8850 = vmatmul.msk.f32.gmra.mxu1 %vm1108_vm0, %v5833_v24  ;;  %v11669_v24 = vpop.permute.xlu0 %5102 }
 0x5e7   : > { %v5254_v11 = vadd.f32 %v5253_v51, %v11576_v12  ;;  %8796 = vmatmul.msk.f32.gmra.mxu0 %vm1108_vm0, %v4913_v34  ;;  %v5832_v34 = vld [vmem:[#allocation10 + $0x2d0] sm:$0xff] }
 0x5e9   : > { %v5364_v38 = vadd.f32 %v11598_v20, %v5254_v11  ;;  %v7784_v20 = vld [vmem:[#allocation12 + $0x398] sm:$0xff]  ;;  %v4908_v11 = vld [vmem:[#allocation10 + $0x140] sm:$0xff] }
 0x5ea   : > { %7905 = vperm.xlu2 %9159, %v7784_v20   ;;  %v7790_v20 = vld [vmem:[#allocation12 + $0x3c8] sm:$0xff] }
 0x5eb   : > { %v9409_v27 = vpop.eup %9408  ;;  %v5454_v43 = vmul.f32 0.5, %v5364_v38  ;;  %5303 = vmatmul.f32.gmra.mxu2 %v4904_v22  ;;  %6221 = vmatmul.f32.gmra.mxu3 %v5828_v39  ;;  %v11673_v22 = vpop.permute.xlu2 %5112 }
 0x5ec   : > { %v5515_v61 = vadd.f32 1.0, %v9409_v27  ;;  %v11654_v21 = vpop.f32.mrf.mxu0 }
 0x5ed   : > { %9410 = vtanh.f32 %v5454_v43 }
 0x5ee   : > { %v5546_v12 = vmul.f32 0.5, %v5515_v61  ;;  %v5256_v0 = vpop.f32.mrf.mxu2  ;;  %8851 = vmatmul.msk.f32.gmra.mxu1 %vm1108_vm0, %v5835_v1  ;;  %v5839_v1 = vld [vmem:[#allocation10 + $0x308] sm:$0xff] }
 0x5ef   : > { %v5257_v13 = vadd.f32 %v5256_v0, %v11582_v50  ;;  %8797 = vmatmul.msk.f32.gmra.mxu0 %vm1108_vm0, %v4915_v59  ;;  %v5837_v50 = vld [vmem:[#allocation10 + $0x2f8] sm:$0xff]  ;;  %v5834_v59 = vld [vmem:[#allocation10 + $0x2e0] sm:$0xff] }
 0x5f0   : > { %8805 = vst [vmem:[%s10442_s21 + $0x3e0] sm:$0xff] %v5546_v12 }
 0x5f1   : > { %v5367_v58 = vadd.f32 %v11606_v6, %v5257_v13 }
 0x5f2   : > { %7920 = vperm.xlu2 %9159, %v7787_v35  }
 0x5f3   : > { %v9411_v5 = vpop.eup %9410  ;;  %v5455_v55 = vmul.f32 0.5, %v5367_v58  ;;  %5306 = vmatmul.f32.gmra.mxu2 %v4906_v56  ;;  %6224 = vmatmul.f32.gmra.mxu3 %v5830_v29  ;;  %v11662_v47 = vpop.f32.mrf.mxu1  ;;  %v4910_v56 = vld [vmem:[#allocation10 + $0x150] sm:$0xff]  ;;  %v7520_v58 = vld [vmem:[#allocation9 + $0x5b8] sm:$0xff] }
 0x5f4   : > { %v5516_v28 = vadd.f32 1.0, %v9411_v5  ;;  %v11667_v6 = vpop.f32.mrf.mxu0  ;;  %v11686_v29 = vpop.permute.xlu0 %5117  ;;  %v4919_v5 = vld [vmem:[#allocation10 + $0x198] sm:$0xff]  ;;  %7531 = vmatpush.msra.mxu3 %v7520_v58 }
 0x5f5   : > { %9412 = vtanh.f32 %v5455_v55 }
 0x5f6   : > { %v5547_v62 = vmul.f32 0.5, %v5516_v28  ;;  %v5259_v32 = vpop.f32.mrf.mxu2  ;;  %8852 = vmatmul.msk.f32.gmra.mxu1 %vm1108_vm0, %v5837_v50  ;;  %v11689_v50 = vpop.permute.xlu2 %5127 }
 0x5f7   : > { %v5260_v51 = vadd.f32 %v5259_v32, %v11590_v52  ;;  %8798 = vmatmul.msk.f32.gmra.mxu0 %vm1108_vm0, %v4917_v19 }
 0x5f8   : > { %8806 = vst [vmem:[%s10442_s21 + $0x3e8] sm:$0xff] %v5547_v62  ;;  %v5841_v62 = vld [vmem:[#allocation10 + $0x318] sm:$0xff] }
 0x5f9   : > { %v5370_v39 = vadd.f32 %v11614_v15, %v5260_v51  ;;  %v11682_v15 = vpop.permute.xlu1 %5107 }
 0x5fa   : > { %7935 = vperm.xlu2 %9159, %v7790_v20   ;;  %v5843_v20 = vld [vmem:[#allocation10 + $0x328] sm:$0xff] }
 0x5fb   : > { %v9413_v38 = vpop.eup %9412  ;;  %v5456_v27 = vmul.f32 0.5, %v5370_v39  ;;  %5309 = vmatmul.f32.gmra.mxu2 %v4908_v11  ;;  %6227 = vmatmul.f32.gmra.mxu3 %v5832_v34  ;;  %v11677_v43 = vpop.f32.mrf.mxu1  ;;  %v4912_v11 = vld [vmem:[#allocation10 + $0x160] sm:$0xff]  ;;  %v5836_v34 = vld [vmem:[#allocation10 + $0x2f0] sm:$0xff] }
 0x5fc   : > { %v5517_v52 = vadd.f32 1.0, %v9413_v38  ;;  %v11680_v0 = vpop.f32.mrf.mxu0 }
 0x5fd   : > { %9414 = vtanh.f32 %v5456_v27  ;;  %v4921_v27 = vld [vmem:[#allocation10 + $0x1a8] sm:$0xff] }
 0x5fe   : > { %v5548_v61 = vmul.f32 0.5, %v5517_v52  ;;  %v5262_v12 = vpop.f32.mrf.mxu2  ;;  %8853 = vmatmul.msk.f32.gmra.mxu1 %vm1108_vm0, %v5839_v1  ;;  %v11702_v52 = vpop.permute.xlu0 %5132 }
 0x5ff   : > { %v5263_v13 = vadd.f32 %v5262_v12, %v11585_v14  ;;  %8799 = vmatmul.msk.f32.gmra.mxu0 %vm1108_vm0, %v4919_v5 }
 0x600   : > { %8807 = vst [vmem:[%s10442_s21 + $0x3f0] sm:$0xff] %v5548_v61 }
 0x601   : > { %v5373_v25 = vadd.f32 %v11622_v40, %v5263_v13  ;;  %v11699_v39 = vpop.permute.xlu1 %5122  ;;  %v6591_v13 = vld [vmem:[#allocation9 + $0x470] sm:$0xff] }
 0x602   : > { %6634 = vmatpush.msra.mxu0 %v6591_v13  ;;  %v5845_v13 = vld [vmem:[#allocation10 + $0x338] sm:$0xff] }
 0x603   : > { %v9415_v55 = vpop.eup %9414  ;;  %v5457_v28 = vmul.f32 0.5, %v5373_v25  ;;  %5312 = vmatmul.f32.gmra.mxu2 %v4910_v56  ;;  %6230 = vmatmul.f32.gmra.mxu3 %v5834_v59  ;;  %v11691_v14 = vpop.f32.mrf.mxu1  ;;  %v6588_v59 = vld [vmem:[#allocation9 + $0x458] sm:$0xff] }
 0x604   : > { %v5518_v32 = vadd.f32 1.0, %v9415_v55  ;;  %v11695_v51 = vpop.f32.mrf.mxu0  ;;  %v5924_v56 = vpop.permute.xlu2 %5923  ;;  %6635 = vmatpush.msra.mxu0 %v6588_v59 }
 0x605   : > { %9416 = vtanh.f32 %v5457_v28  ;;  %v6585_v28 = vld [vmem:[#allocation9 + $0x440] sm:$0xff] }
 0x606   : > { %v5549_v40 = vmul.f32 0.5, %v5518_v32  ;;  %v5265_v35 = vpop.f32.mrf.mxu2  ;;  %8854 = vmatmul.msk.f32.gmra.mxu1 %vm1108_vm0, %v5841_v62  ;;  %v4914_v62 = vld [vmem:[#allocation10 + $0x170] sm:$0xff]  ;;  %v5838_v32 = vld [vmem:[#allocation10 + $0x300] sm:$0xff]  ;;  %6636 = vmatpush.msra.mxu0 %v6585_v28 }
 0x607   : > { %v5266_v19 = vadd.f32 %v5265_v35, %v11593_v23  ;;  %8800 = vmatmul.msk.f32.gmra.mxu0 %vm1108_vm0, %v4921_v27  ;;  %v4916_v28 = vld [vmem:[#allocation10 + $0x180] sm:$0xff] }
 0x608   : > { %8808 = vst [vmem:[%s10442_s21 + $0x3f8] sm:$0xff] %v5549_v40 }
 0x609   : > { %v5376_v38 = vadd.f32 %v11632_v4, %v5266_v19  ;;  %v6581_v19 = vld [vmem:[#allocation9 + $0x420] sm:$0xff]  ;;  %v11714_v27 = vpop.permute.xlu1 %5137 }
 0x60a   : > { %6596 = vmatpush.msrb.mxu2 %v6581_v19  ;;  %v6573_v19 = vld [vmem:[#allocation9 + $0x3e0] sm:$0xff] }
 0x60b   : > { %v9417_v1 = vpop.eup %9416  ;;  %v5458_v61 = vmul.f32 0.5, %v5376_v38  ;;  %5315 = vmatmul.f32.gmra.mxu2 %v4912_v11  ;;  %6233 = vmatmul.f32.gmra.mxu3 %v5836_v34  ;;  %v11704_v12 = vpop.f32.mrf.mxu1  ;;  %v7517_v11 = vld [vmem:[#allocation9 + $0x5a0] sm:$0xff]  ;;  %v4923_v34 = vld [vmem:[#allocation10 + $0x1b8] sm:$0xff]  ;;  %v6582_v38 = vld [vmem:[#allocation9 + $0x428] sm:$0xff] }
 0x60c   : > { %v5519_v23 = vadd.f32 1.0, %v9417_v1  ;;  %v11709_v55 = vpop.f32.mrf.mxu0  ;;  %7532 = vmatpush.msra.mxu3 %v7517_v11  ;;  %6637 = vmatpush.msra.mxu0 %v6582_v38 }
 0x60d   : > { %9418 = vtanh.f32 %v5458_v61 }
 0x60e   : > { %v5550_v4 = vmul.f32 0.5, %v5519_v23  ;;  %v5268_v25 = vpop.f32.mrf.mxu2  ;;  %v6186_v8 = vpop.f32.mrf.mxu3  ;;  %8855 = vmatmul.msk.f32.gmra.mxu1 %vm1108_vm0, %v5843_v20 }
 0x60f   : > { %v5269_v58 = vadd.f32 %v5268_v25, %v11601_v17  ;;  %v6187_v5 = vadd.f32 %v6186_v8, %v5924_v56  ;;  %8801 = vmatmul.msk.f32.gmra.mxu0 %vm1108_vm0, %v4923_v34  ;;  %v5929_v23 = vpop.permute.xlu0 %5928  ;;  %v6576_v25 = vld [vmem:[#allocation9 + $0x3f8] sm:$0xff] }
 0x610   : > { %8809 = vst [vmem:[%s10442_s21 + $0x400] sm:$0xff] %v5550_v4 }
 0x611   : > { %v5379_v40 = vadd.f32 %v11644_v42, %v5269_v58  ;;  %v6297_v35 = vadd.f32 %v11662_v47, %v6187_v5  ;;  %v6579_v47 = vld [vmem:[#allocation9 + $0x410] sm:$0xff] }
 0x612   : > { %6638 = vmatpush.msra.mxu0 %v6579_v47 }
 0x613   : > { %v9419_v17 = vpop.eup %9418  ;;  %v5459_v1 = vmul.f32 0.5, %v5379_v40  ;;  %v6389_v61 = vmul.f32 0.5, %v6297_v35  ;;  %5318 = vmatmul.f32.gmra.mxu2 %v4914_v62  ;;  %6236 = vmatmul.f32.gmra.mxu3 %v5838_v32  ;;  %v11716_v20 = vpop.f32.mrf.mxu1  ;;  %v5840_v62 = vld [vmem:[#allocation10 + $0x310] sm:$0xff]  ;;  %v4925_v35 = vld [vmem:[#allocation10 + $0x1c8] sm:$0xff] }
 0x614   : > { %v5520_v42 = vadd.f32 1.0, %v9419_v17  ;;  %v11721_v5 = vpop.f32.mrf.mxu0  ;;  %6639 = vmatpush.msra.mxu0 %v6576_v25  ;;  %v5847_v17 = vld [vmem:[#allocation10 + $0x348] sm:$0xff] }
 0x615   : > { %9420 = vtanh.f32 %v5459_v1 }
 0x616   : > { %v5551_v56 = vmul.f32 0.5, %v5520_v42  ;;  %9422 = vtanh.f32 %v6389_v61  ;;  %v5271_v59 = vpop.f32.mrf.mxu2  ;;  %v6189_v4 = vpop.f32.mrf.mxu3  ;;  %8856 = vmatmul.msk.f32.gmra.mxu1 %vm1108_vm0, %v5845_v13  ;;  %v6570_v13 = vld [vmem:[#allocation9 + $0x3c8] sm:$0xff]  ;;  %6640 = vmatpush.msra.mxu0 %v6573_v19 }
 0x617   : > { %v5272_v8 = vadd.f32 %v5271_v59, %v11595_v44  ;;  %v6190_v58 = vadd.f32 %v6189_v4, %v5929_v23  ;;  %8802 = vmatmul.msk.f32.gmra.mxu0 %vm1108_vm0, %v4925_v35  ;;  %v5934_v42 = vpop.permute.xlu1 %5933  ;;  %v6567_v59 = vld [vmem:[#allocation9 + $0x3b0] sm:$0xff] }
 0x618   : > { %8810 = vst [vmem:[%s10442_s21 + $0x408] sm:$0xff] %v5551_v56  ;;  %6641 = vmatpush.msra.mxu0 %v6570_v13 }
 0x619   : > { %v5382_v32 = vadd.f32 %v11654_v21, %v5272_v8  ;;  %v6300_v40 = vadd.f32 %v11677_v43, %v6190_v58  ;;  %v6578_v43 = vld [vmem:[#allocation9 + $0x408] sm:$0xff] }
 0x61a   : > { %6597 = vmatpush.msrb.mxu2 %v6578_v43  ;;  %6642 = vmatpush.msra.mxu0 %v6567_v59 }
 0x61b   : > { %v9421_v11 = vpop.eup %9420  ;;  %v5460_v34 = vmul.f32 0.5, %v5382_v32  ;;  %v6390_v38 = vmul.f32 0.5, %v6300_v40  ;;  %5321 = vmatmul.f32.gmra.mxu2 %v4916_v28  ;;  %6239 = vmatmul.f32.gmra.mxu3 %v5840_v62  ;;  %v11726_v44 = vpop.f32.mrf.mxu1  ;;  %v6575_v28 = vld [vmem:[#allocation9 + $0x3f0] sm:$0xff]  ;;  %v5842_v32 = vld [vmem:[#allocation10 + $0x320] sm:$0xff]  ;;  %v4927_v40 = vld [vmem:[#allocation10 + $0x1d8] sm:$0xff] }
 0x61c   : > { %v9423_v1 = vpop.eup %9422  ;;  %v5521_v61 = vadd.f32 1.0, %v9421_v11  ;;  %v11731_v58 = vpop.f32.mrf.mxu0  ;;  %v4918_v62 = vld [vmem:[#allocation10 + $0x190] sm:$0xff]  ;;  %6598 = vmatpush.msrb.mxu2 %v6575_v28 }
 0x61d   : > { %v6451_v21 = vadd.f32 1.0, %v9423_v1  ;;  %9424 = vtanh.f32 %v5460_v34  ;;  %v7527_v11 = vld [vmem:[#allocation9 + $0x5f0] sm:$0xff]  ;;  %v7514_v34 = vld [vmem:[#allocation9 + $0x588] sm:$0xff] }
 0x61e   : > { %v5552_v47 = vmul.f32 0.5, %v5521_v61  ;;  %9426 = vtanh.f32 %v6390_v38  ;;  %v5274_v23 = vpop.f32.mrf.mxu2  ;;  %v6192_v56 = vpop.f32.mrf.mxu3  ;;  %8857 = vmatmul.msk.f32.gmra.mxu1 %vm1108_vm0, %v5847_v17  ;;  %v6572_v38 = vld [vmem:[#allocation9 + $0x3d8] sm:$0xff]  ;;  %7533 = vmatpush.msra.mxu3 %v7514_v34 }
 0x61f   : > { %v6482_v4 = vmul.f32 0.5, %v6451_v21  ;;  %v5275_v25 = vadd.f32 %v5274_v23, %v11603_v37  ;;  %v6193_v8 = vadd.f32 %v6192_v56, %v5934_v42  ;;  %7570 = vmatpush.msra.mxu1 %v7527_v11  ;;  %v6564_v37 = vld [vmem:[#allocation9 + $0x398] sm:$0xff]  ;;  %v6569_v21 = vld [vmem:[#allocation9 + $0x3c0] sm:$0xff]  ;;  %8803 = vmatmul.msk.f32.gmra.mxu0 %vm1108_vm0, %v4927_v40  ;;  %v6566_v56 = vld [vmem:[#allocation9 + $0x3a8] sm:$0xff] }
 0x620   : > { %8811 = vst [vmem:[%s10442_s21 + $0x410] sm:$0xff] %v5552_v47  ;;  %v5849_v42 = vld [vmem:[#allocation10 + $0x358] sm:$0xff]  ;;  %6599 = vmatpush.msrb.mxu2 %v6572_v38  ;;  %v5939_v47 = vpop.permute.xlu2 %5938  ;;  %6643 = vmatpush.msra.mxu0 %v6564_v37  ;;  %v5844_v11 = vld [vmem:[#allocation10 + $0x330] sm:$0xff]  ;;  %v4929_v37 = vld [vmem:[#allocation10 + $0x1e8] sm:$0x1] }
 0x621   : > { %8867 = vst [vmem:[%s10442_s21 + $0x4d8] sm:$0xff] %v6482_v4  ;;  %v5385_v35 = vadd.f32 %v11667_v6, %v5275_v25  ;;  %v6303_v19 = vadd.f32 %v11691_v14, %v6193_v8  ;;  %v6561_v14 = vld [vmem:[#allocation9 + $0x380] sm:$0xff]  ;;  %v6558_v8 = vld [vmem:[#allocation9 + $0x368] sm:$0xff] }
 0x622   : > { %6600 = vmatpush.msrb.mxu2 %v6569_v21  ;;  %6644 = vmatpush.msra.mxu0 %v6561_v14 }
 0x623   : > { %v9425_v17 = vpop.eup %9424  ;;  %v5461_v1 = vmul.f32 0.5, %v5385_v35  ;;  %v6391_v61 = vmul.f32 0.5, %v6303_v19  ;;  %5324 = vmatmul.f32.gmra.mxu2 %v4918_v62  ;;  %6242 = vmatmul.f32.gmra.mxu3 %v5842_v32  ;;  %v11737_v13 = vpop.f32.mrf.mxu1  ;;  %v6563_v35 = vld [vmem:[#allocation9 + $0x390] sm:$0xff]  ;;  %v4920_v19 = vld [vmem:[#allocation10 + $0x1a0] sm:$0xff] }
 0x624   : > { %v9427_v43 = vpop.eup %9426  ;;  %v5522_v6 = vadd.f32 1.0, %v9425_v17  ;;  %v11742_v40 = vpop.f32.mrf.mxu0  ;;  %6601 = vmatpush.msrb.mxu2 %v6566_v56  ;;  %6645 = vmatpush.msra.mxu0 %v6558_v8  ;;  %v6560_v17 = vld [vmem:[#allocation9 + $0x378] sm:$0xff]  ;;  %v6554_v56 = vld [vmem:[#allocation9 + $0x348] sm:$0xff]  ;;  %v6549_v8 = vld [vmem:[#allocation9 + $0x320] sm:$0xff] }
 0x625   : > { %v6452_v23 = vadd.f32 1.0, %v9427_v43  ;;  %9428 = vtanh.f32 %v5461_v1  ;;  %v6555_v1 = vld [vmem:[#allocation9 + $0x350] sm:$0xff]  ;;  %v5851_v43 = vld [vmem:[#allocation10 + $0x368] sm:$0xff] }
 0x626   : > { %v5553_v59 = vmul.f32 0.5, %v5522_v6  ;;  %9430 = vtanh.f32 %v6391_v61  ;;  %v5277_v4 = vpop.f32.mrf.mxu2  ;;  %v6195_v25 = vpop.f32.mrf.mxu3  ;;  %8858 = vmatmul.msk.f32.gmra.mxu1 %vm1108_vm0, %v5849_v42  ;;  %6602 = vmatpush.msrb.mxu2 %v6563_v35  ;;  %v6557_v6 = vld [vmem:[#allocation9 + $0x360] sm:$0xff] }
 0x627   : > { %v6483_v28 = vmul.f32 0.5, %v6452_v23  ;;  %v5278_v62 = vadd.f32 %v5277_v4, %v11611_v54  ;;  %v6196_v32 = vadd.f32 %v6195_v25, %v5939_v47  ;;  %8804 = vmatmul.msk.f32.gmra.mxu0 %vm1108_vm0, %v4929_v37 }
 0x628   : > { %8812 = vst [vmem:[%s10442_s21 + $0x418] sm:$0xff] %v5553_v59  ;;  %6603 = vmatpush.msrb.mxu2 %v6560_v17  ;;  %6646 = vmatpush.msra.mxu0 %v6555_v1  ;;  %v7524_v17 = vld [vmem:[#allocation9 + $0x5d8] sm:$0xff]  ;;  %v7511_v1 = vld [vmem:[#allocation9 + $0x570] sm:$0xff] }
 0x629   : > { %8868 = vst [vmem:[%s10442_s21 + $0x4e0] sm:$0xff] %v6483_v28  ;;  %v5388_v34 = vadd.f32 %v11680_v0, %v5278_v62  ;;  %v6306_v38 = vadd.f32 %v11704_v12, %v6196_v32  ;;  %v6552_v0 = vld [vmem:[#allocation9 + $0x338] sm:$0xff]  ;;  %v5944_v12 = vpop.permute.xlu0 %5943  ;;  %7571 = vmatpush.msra.mxu1 %v7524_v17  ;;  %7534 = vmatpush.msra.mxu3 %v7511_v1  ;;  %v5855_v1 = vld [vmem:[#allocation10 + $0x388] sm:$0xff] }
 0x62a   : > { %6604 = vmatpush.msrb.mxu2 %v6557_v6  ;;  %6647 = vmatpush.msra.mxu0 %v6552_v0  ;;  %v5853_v6 = vld [vmem:[#allocation10 + $0x378] sm:$0xff] }
 0x62b   : > { %v9429_v54 = vpop.eup %9428  ;;  %v5462_v61 = vmul.f32 0.5, %v5388_v34  ;;  %v6392_v42 = vmul.f32 0.5, %v6306_v38  ;;  %5327 = vmatmul.f32.gmra.mxu2 %v4920_v19  ;;  %6245 = vmatmul.f32.gmra.mxu3 %v5844_v11  ;;  %v11748_v21 = vpop.f32.mrf.mxu1  ;;  %v4922_v19 = vld [vmem:[#allocation10 + $0x1b0] sm:$0xff]  ;;  %v5846_v11 = vld [vmem:[#allocation10 + $0x340] sm:$0xff]  ;;  %v6546_v34 = vld [vmem:[#allocation9 + $0x308] sm:$0xff] }
 0x62c   : > { %v9431_v14 = vpop.eup %9430  ;;  %v5523_v47 = vadd.f32 1.0, %v9429_v54  ;;  %v11753_v35 = vpop.f32.mrf.mxu0  ;;  %6605 = vmatpush.msrb.mxu2 %v6554_v56  ;;  %6648 = vmatpush.msra.mxu0 %v6549_v8  ;;  %v6551_v54 = vld [vmem:[#allocation9 + $0x330] sm:$0xff] }
 0x62d   : > { %v6453_v23 = vadd.f32 1.0, %v9431_v14  ;;  %9432 = vtanh.f32 %v5462_v61  ;;  %v6548_v14 = vld [vmem:[#allocation9 + $0x318] sm:$0xff] }
 0x62e   : > { %v5554_v59 = vmul.f32 0.5, %v5523_v47  ;;  %9434 = vtanh.f32 %v6392_v42  ;;  %v5280_v4 = vpop.f32.mrf.mxu2  ;;  %v6198_v25 = vpop.f32.mrf.mxu3  ;;  %8859 = vmatmul.msk.f32.gmra.mxu1 %vm1108_vm0, %v5851_v43  ;;  %6649 = vmatpush.msra.mxu0 %v6546_v34  ;;  %v7521_v34 = vld [vmem:[#allocation9 + $0x5c0] sm:$0xff] }
 0x62f   : > { %v6484_v28 = vmul.f32 0.5, %v6453_v23  ;;  %v5281_v62 = vadd.f32 %v5280_v4, %v11608_v26  ;;  %v6199_v32 = vadd.f32 %v6198_v25, %v5944_v12  ;;  %6606 = vmatpush.msrb.mxu2 %v6551_v54  ;;  %6650 = vmatmul.f32.vlgmr.msra.gmra.mxu0 %v11064_v48  ;;  %v6545_v12 = vld [vmem:[#allocation9 + $0x300] sm:$0xff] }
 0x630   : > { %8813 = vst [vmem:[%s10442_s21 + $0x420] sm:$0xff] %v5554_v59  ;;  %7572 = vmatpush.msra.mxu1 %v7521_v34 }
 0x631   : > { %8869 = vst [vmem:[%s10442_s21 + $0x4e8] sm:$0xff] %v6484_v28  ;;  %v5391_v38 = vadd.f32 %v11695_v51, %v5281_v62  ;;  %v6309_v37 = vadd.f32 %v11716_v20, %v6199_v32  ;;  %v5949_v51 = vpop.permute.xlu1 %5948  ;;  %6607 = vmatpush.msrb.mxu2 %v6548_v14  ;;  %v4924_v62 = vld [vmem:[#allocation10 + $0x1c0] sm:$0xff]  ;;  %v5848_v32 = vld [vmem:[#allocation10 + $0x350] sm:$0xff] }
 0x633   : > { %v9433_v26 = vpop.eup %9432  ;;  %v5463_v61 = vmul.f32 0.5, %v5391_v38  ;;  %v6393_v42 = vmul.f32 0.5, %v6309_v37  ;;  %5330 = vmatmul.f32.gmra.mxu2 %v4922_v19  ;;  %6248 = vmatmul.f32.gmra.mxu3 %v5846_v11  ;;  %v11759_v43 = vpop.f32.mrf.mxu1 }
 0x634   : > { %v9435_v47 = vpop.eup %9434  ;;  %v5524_v0 = vadd.f32 1.0, %v9433_v26  ;;  %v11764_v28 = vpop.f32.mrf.mxu0  ;;  %6608 = vmatpush.msrb.mxu2 %v6545_v12  ;;  %v4926_v12 = vld [vmem:[#allocation10 + $0x1d0] sm:$0xff] }
 0x635   : > { %v6454_v20 = vadd.f32 1.0, %v9435_v47  ;;  %9436 = vtanh.f32 %v5463_v61  ;;  %v5954_v61 = vpop.permute.xlu2 %5953 }
 0x636   : > { %v5555_v23 = vmul.f32 0.5, %v5524_v0  ;;  %9438 = vtanh.f32 %v6393_v42  ;;  %v5283_v56 = vpop.f32.mrf.mxu2  ;;  %v6201_v59 = vpop.f32.mrf.mxu3  ;;  %8860 = vmatmul.msk.f32.gmra.mxu1 %vm1108_vm0, %v5853_v6 }
 0x637   : > { %v6485_v4 = vmul.f32 0.5, %v6454_v20  ;;  %v5284_v25 = vadd.f32 %v5283_v56, %v11616_v46  ;;  %v6202_v8 = vadd.f32 %v6201_v59, %v5949_v51  ;;  %6653 = vmatmul.f32.gmra.mxu0 %v11100_v16  ;;  %v7518_v20 = vld [vmem:[#allocation9 + $0x5a8] sm:$0xff] }
 0x638   : > { %8814 = vst [vmem:[%s10442_s21 + $0x428] sm:$0xff] %v5555_v23  ;;  %v5850_v23 = vld [vmem:[#allocation10 + $0x360] sm:$0xff]  ;;  %7573 = vmatpush.msra.mxu1 %v7518_v20  ;;  %v7503_v20 = vld [vmem:[#allocation9 + $0x530] sm:$0xff] }
 0x639   : > { %8870 = vst [vmem:[%s10442_s21 + $0x4f0] sm:$0xff] %v6485_v4  ;;  %v5394_v19 = vadd.f32 %v11709_v55, %v5284_v25  ;;  %v6312_v11 = vadd.f32 %v11726_v44, %v6202_v8  ;;  %v7508_v4 = vld [vmem:[#allocation9 + $0x558] sm:$0xff]  ;;  %v7515_v25 = vld [vmem:[#allocation9 + $0x590] sm:$0xff] }
 0x63a   : > { %7535 = vmatpush.msra.mxu3 %v7508_v4  ;;  %7574 = vmatpush.msra.mxu1 %v7515_v25 }
 0x63b   : > { %v9437_v38 = vpop.eup %9436  ;;  %v5464_v37 = vmul.f32 0.5, %v5394_v19  ;;  %v6394_v17 = vmul.f32 0.5, %v6312_v11  ;;  %5333 = vmatmul.f32.gmra.mxu2 %v4924_v62  ;;  %6251 = vmatmul.f32.gmra.mxu3 %v5848_v32  ;;  %v11770_v46 = vpop.f32.mrf.mxu1  ;;  %v5857_v19 = vld [vmem:[#allocation10 + $0x398] sm:$0xff] }
 0x63c   : > { %v9439_v54 = vpop.eup %9438  ;;  %v5525_v26 = vadd.f32 1.0, %v9437_v38  ;;  %v11775_v51 = vpop.f32.mrf.mxu0  ;;  %v7512_v11 = vld [vmem:[#allocation9 + $0x578] sm:$0xff] }
 0x63d   : > { %v6455_v42 = vadd.f32 1.0, %v9439_v54  ;;  %9440 = vtanh.f32 %v5464_v37  ;;  %7575 = vmatpush.msra.mxu1 %v7512_v11  ;;  %v5959_v37 = vpop.permute.xlu0 %5958  ;;  %v7497_v11 = vld [vmem:[#allocation9 + $0x500] sm:$0xff] }
 0x63e   : > { %v5556_v55 = vmul.f32 0.5, %v5525_v26  ;;  %9442 = vtanh.f32 %v6394_v17  ;;  %v5286_v44 = vpop.f32.mrf.mxu2  ;;  %v6204_v6 = vpop.f32.mrf.mxu3  ;;  %8861 = vmatmul.msk.f32.gmra.mxu1 %vm1108_vm0, %v5855_v1 }
 0x63f   : > { %v6486_v14 = vmul.f32 0.5, %v6455_v42  ;;  %v5287_v47 = vadd.f32 %v5286_v44, %v11624_v41  ;;  %v6205_v0 = vadd.f32 %v6204_v6, %v5954_v61  ;;  %6656 = vmatmul.f32.gmra.mxu0 %v11122_v7  ;;  %v7506_v44 = vld [vmem:[#allocation9 + $0x548] sm:$0xff]  ;;  %v4928_v6 = vld [vmem:[#allocation10 + $0x1e0] sm:$0x1] }
 0x640   : > { %8815 = vst [vmem:[%s10442_s21 + $0x430] sm:$0xff] %v5556_v55 }
 0x641   : > { %8871 = vst [vmem:[%s10442_s21 + $0x4f8] sm:$0xff] %v6486_v14  ;;  %v5397_v56 = vadd.f32 %v11721_v5, %v5287_v47  ;;  %v6315_v59 = vadd.f32 %v11737_v13, %v6205_v0  ;;  %v7509_v13 = vld [vmem:[#allocation9 + $0x560] sm:$0xff]  ;;  %v5852_v14 = vld [vmem:[#allocation10 + $0x370] sm:$0xff] }
 0x642   : > { %7576 = vmatpush.msra.mxu1 %v7509_v13  ;;  %v5854_v13 = vld [vmem:[#allocation10 + $0x380] sm:$0xff] }
 0x643   : > { %v9441_v8 = vpop.eup %9440  ;;  %v5465_v62 = vmul.f32 0.5, %v5397_v56  ;;  %v6395_v41 = vmul.f32 0.5, %v6315_v59  ;;  %5336 = vmatmul.f32.gmra.mxu2 %v4926_v12  ;;  %6254 = vmatmul.f32.gmra.mxu3 %v5850_v23  ;;  %v11781_v32 = vpop.f32.mrf.mxu1  ;;  %v5859_v59 = vld [vmem:[#allocation10 + $0x3a8] sm:$0xff] }
 0x644   : > { %v9443_v34 = vpop.eup %9442  ;;  %v5526_v38 = vadd.f32 1.0, %v9441_v8  ;;  %v11786_v55 = vpop.f32.mrf.mxu0  ;;  %7577 = vmatpush.msra.mxu1 %v7506_v44  ;;  %v7500_v8 = vld [vmem:[#allocation9 + $0x518] sm:$0xff] }
 0x645   : > { %v6456_v5 = vadd.f32 1.0, %v9443_v34  ;;  %9444 = vtanh.f32 %v5465_v62  ;;  %v5964_v62 = vpop.permute.xlu1 %5963 }
 0x646   : > { %v5557_v17 = vmul.f32 0.5, %v5526_v38  ;;  %9446 = vtanh.f32 %v6395_v41  ;;  %v5289_v1 = vpop.f32.mrf.mxu2  ;;  %v6207_v54 = vpop.f32.mrf.mxu3  ;;  %8862 = vmatmul.msk.f32.gmra.mxu1 %vm1108_vm0, %v5857_v19 }
 0x647   : > { %v6487_v26 = vmul.f32 0.5, %v6456_v5  ;;  %v5290_v61 = vadd.f32 %v5289_v1, %v11618_v33  ;;  %v6208_v42 = vadd.f32 %v6207_v54, %v5959_v37  ;;  %7578 = vmatpush.msra.mxu1 %v7503_v20  ;;  %6659 = vmatmul.f32.gmra.mxu0 %v12431_v2  ;;  %v7505_v54 = vld [vmem:[#allocation9 + $0x540] sm:$0xff] }
 0x648   : > { %8816 = vst [vmem:[%s10442_s21 + $0x438] sm:$0xff] %v5557_v17  ;;  %7536 = vmatpush.msra.mxu3 %v7505_v54 }
 0x649   : > { %8872 = vst [vmem:[%s10442_s21 + $0x500] sm:$0xff] %v6487_v26  ;;  %v5400_v47 = vadd.f32 %v11731_v58, %v5290_v61  ;;  %v6318_v0 = vadd.f32 %v11748_v21, %v6208_v42  ;;  %7579 = vmatpush.msra.mxu1 %v7500_v8  ;;  %v7494_v26 = vld [vmem:[#allocation9 + $0x4e8] sm:$0xff] }
 0x64b   : > { %v9445_v12 = vpop.eup %9444  ;;  %v5466_v23 = vmul.f32 0.5, %v5400_v47  ;;  %v6396_v56 = vmul.f32 0.5, %v6318_v0  ;;  %5339 = vmatmul.f32.gmra.mxu2 %v4928_v6  ;;  %6257 = vmatmul.f32.gmra.mxu3 %v5852_v14  ;;  %v11792_v33 = vpop.f32.mrf.mxu1  ;;  %v5861_v6 = vld [vmem:[#allocation10 + $0x3b8] sm:$0xff]  ;;  %v7491_v0 = vld [vmem:[#allocation9 + $0x4d0] sm:$0xff] }
 0x64c   : > { %v9447_v4 = vpop.eup %9446  ;;  %v5527_v25 = vadd.f32 1.0, %v9445_v12  ;;  %v11797_v5 = vpop.f32.mrf.mxu0  ;;  %7580 = vmatpush.msra.mxu1 %v7497_v11  ;;  %v6592_v12 = vld [vmem:[#allocation9 + $0x478] sm:$0xff] }
 0x64d   : > { %v6457_v41 = vadd.f32 1.0, %v9447_v4  ;;  %9448 = vtanh.f32 %v5466_v23  ;;  %v7488_v4 = vld [vmem:[#allocation9 + $0x4b8] sm:$0xff]  ;;  %6675 = vmatpush.msra.mxu2 %v6592_v12 }
 0x64e   : > { %v5558_v58 = vmul.f32 0.5, %v5527_v25  ;;  %9450 = vtanh.f32 %v6396_v56  ;;  %v5292_v21 = vpop.f32.mrf.mxu2  ;;  %v6210_v19 = vpop.f32.mrf.mxu3  ;;  %8863 = vmatmul.msk.f32.gmra.mxu1 %vm1108_vm0, %v5859_v59 }
 0x64f   : > { %v6488_v34 = vmul.f32 0.5, %v6457_v41  ;;  %v5293_v38 = vadd.f32 %v5292_v21, %v11626_v31  ;;  %v6211_v37 = vadd.f32 %v6210_v19, %v5964_v62  ;;  %7581 = vmatpush.msra.mxu1 %v7494_v26  ;;  %6662 = vmatmul.f32.gmra.mxu0 %v11172_v57  ;;  %v7499_v21 = vld [vmem:[#allocation9 + $0x510] sm:$0xff]  ;;  %v5863_v26 = vld [vmem:[#allocation10 + $0x3c8] sm:$0xff] }
 0x650   : > { %8817 = vst [vmem:[%s10442_s21 + $0x440] sm:$0xff] %v5558_v58  ;;  %v6589_v58 = vld [vmem:[#allocation9 + $0x460] sm:$0xff]  ;;  %v5856_v19 = vld [vmem:[#allocation10 + $0x390] sm:$0xff] }
 0x651   : > { %8873 = vst [vmem:[%s10442_s21 + $0x508] sm:$0xff] %v6488_v34  ;;  %v5403_v17 = vadd.f32 %v11742_v40, %v5293_v38  ;;  %v6321_v1 = vadd.f32 %v11759_v43, %v6211_v37  ;;  %v5969_v40 = vpop.permute.xlu2 %5968  ;;  %v7502_v43 = vld [vmem:[#allocation9 + $0x528] sm:$0xff]  ;;  %7582 = vmatpush.msra.mxu1 %v7491_v0  ;;  %6676 = vmatpush.msra.mxu2 %v6589_v58  ;;  %v7485_v38 = vld [vmem:[#allocation9 + $0x4a0] sm:$0xff] }
 0x652   : > { %7537 = vmatpush.msra.mxu3 %v7502_v43  ;;  %v6586_v37 = vld [vmem:[#allocation9 + $0x448] sm:$0xff] }
 0x653   : > { %v9449_v61 = vpop.eup %9448  ;;  %v5467_v42 = vmul.f32 0.5, %v5403_v17  ;;  %v6397_v44 = vmul.f32 0.5, %v6321_v1  ;;  %6260 = vmatmul.f32.gmra.mxu3 %v5854_v13  ;;  %6609 = vmatmul.f32.vlgmr.msrb.gmra.mxu2 %v11064_v48  ;;  %v11804_v31 = vpop.f32.mrf.mxu1  ;;  %v7490_v0 = vld [vmem:[#allocation9 + $0x4c8] sm:$0xff] }
 0x654   : > { %v9451_v14 = vpop.eup %9450  ;;  %v5528_v47 = vadd.f32 1.0, %v9449_v61  ;;  %v11809_v41 = vpop.f32.mrf.mxu0  ;;  %7538 = vmatpush.msra.mxu3 %v7499_v21  ;;  %7583 = vmatpush.msra.mxu1 %v7488_v4  ;;  %v6583_v61 = vld [vmem:[#allocation9 + $0x430] sm:$0xff]  ;;  %v6577_v4 = vld [vmem:[#allocation9 + $0x400] sm:$0xff]  ;;  %v6574_v21 = vld [vmem:[#allocation9 + $0x3e8] sm:$0xff] }
 0x655   : > { %v6458_v20 = vadd.f32 1.0, %v9451_v14  ;;  %9452 = vtanh.f32 %v5467_v42  ;;  %v7493_v42 = vld [vmem:[#allocation9 + $0x4e0] sm:$0xff]  ;;  %6677 = vmatpush.msra.mxu2 %v6586_v37  ;;  %v5865_v37 = vld [vmem:[#allocation10 + $0x3d8] sm:$0x1] }
 0x656   : > { %v5559_v23 = vmul.f32 0.5, %v5528_v47  ;;  %9454 = vtanh.f32 %v6397_v44  ;;  %v5295_v56 = vpop.f32.mrf.mxu2  ;;  %v6213_v59 = vpop.f32.mrf.mxu3  ;;  %8864 = vmatmul.msk.f32.gmra.mxu1 %vm1108_vm0, %v5861_v6  ;;  %v6580_v47 = vld [vmem:[#allocation9 + $0x418] sm:$0xff] }
 0x657   : > { %v6489_v25 = vmul.f32 0.5, %v6458_v20  ;;  %v5296_v8 = vadd.f32 %v5295_v56, %v11635_v18  ;;  %v6214_v62 = vadd.f32 %v6213_v59, %v5969_v40  ;;  %v7496_v18 = vld [vmem:[#allocation9 + $0x4f8] sm:$0xff]  ;;  %7584 = vmatpush.msra.mxu1 %v7485_v38  ;;  %v5974_v6 = vpop.permute.xlu0 %5973  ;;  %6665 = vmatmul.f32.gmra.mxu0 %v11198_v10 }
 0x658   : > { %8818 = vst [vmem:[%s10442_s21 + $0x448] sm:$0xff] %v5559_v23  ;;  %7539 = vmatpush.msra.mxu3 %v7496_v18  ;;  %6678 = vmatpush.msra.mxu2 %v6583_v61  ;;  %v6571_v18 = vld [vmem:[#allocation9 + $0x3d0] sm:$0xff] }
 0x659   : > { %8874 = vst [vmem:[%s10442_s21 + $0x510] sm:$0xff] %v6489_v25  ;;  %v5406_v11 = vadd.f32 %v11753_v35, %v5296_v8  ;;  %v6324_v34 = vadd.f32 %v11770_v46, %v6214_v62  ;;  %v7482_v46 = vld [vmem:[#allocation9 + $0x488] sm:$0xff]  ;;  %v7487_v25 = vld [vmem:[#allocation9 + $0x4b0] sm:$0xff]  ;;  %v5858_v8 = vld [vmem:[#allocation10 + $0x3a0] sm:$0xff] }
 0x65a   : > { %7540 = vmatpush.msra.mxu3 %v7493_v42  ;;  %7585 = vmatpush.msra.mxu1 %v7482_v46 }
 0x65b   : > { %v9453_v13 = vpop.eup %9452  ;;  %v5468_v17 = vmul.f32 0.5, %v5406_v11  ;;  %v6398_v1 = vmul.f32 0.5, %v6324_v34  ;;  %6263 = vmatmul.f32.gmra.mxu3 %v5856_v19  ;;  %6612 = vmatmul.f32.gmra.mxu2 %v11100_v16  ;;  %v11816_v54 = vpop.f32.mrf.mxu1  ;;  %v7484_v19 = vld [vmem:[#allocation9 + $0x498] sm:$0xff] }
 0x65c   : > { %v9455_v35 = vpop.eup %9454  ;;  %v5529_v44 = vadd.f32 1.0, %v9453_v13  ;;  %v11821_v59 = vpop.f32.mrf.mxu0  ;;  %7541 = vmatpush.msra.mxu3 %v7490_v0  ;;  %6679 = vmatpush.msra.mxu2 %v6580_v47  ;;  %v6565_v47 = vld [vmem:[#allocation9 + $0x3a0] sm:$0xff]  ;;  %v5860_v0 = vld [vmem:[#allocation10 + $0x3b0] sm:$0xff] }
 0x65d   : > { %v6459_v14 = vadd.f32 1.0, %v9455_v35  ;;  %9456 = vtanh.f32 %v5468_v17 }
 0x65e   : > { %v5560_v40 = vmul.f32 0.5, %v5529_v44  ;;  %9458 = vtanh.f32 %v6398_v1  ;;  %v5298_v20 = vpop.f32.mrf.mxu2  ;;  %v6216_v43 = vpop.f32.mrf.mxu3  ;;  %8865 = vmatmul.msk.f32.gmra.mxu1 %vm1108_vm0, %v5863_v26  ;;  %7542 = vmatpush.msra.mxu3 %v7487_v25  ;;  %v6568_v26 = vld [vmem:[#allocation9 + $0x3b8] sm:$0xff] }
 0x65f   : > { %v6490_v12 = vmul.f32 0.5, %v6459_v14  ;;  %v5299_v23 = vadd.f32 %v5298_v20, %v11629_v45  ;;  %v6217_v56 = vadd.f32 %v6216_v43, %v5974_v6  ;;  %6680 = vmatpush.msra.mxu2 %v6577_v4  ;;  %6668 = vmatmul.f32.gmra.mxu0 %v11223_v3  ;;  %v6562_v43 = vld [vmem:[#allocation9 + $0x388] sm:$0xff]  ;;  %v6559_v4 = vld [vmem:[#allocation9 + $0x370] sm:$0xff] }
 0x660   : > { %8819 = vst [vmem:[%s10442_s21 + $0x450] sm:$0xff] %v5560_v40  ;;  %7543 = vmatpush.msra.mxu3 %v7484_v19 }
 0x661   : > { %8875 = vst [vmem:[%s10442_s21 + $0x518] sm:$0xff] %v6490_v12  ;;  %v5409_v62 = vadd.f32 %v11764_v28, %v5299_v23  ;;  %v6327_v58 = vadd.f32 %v11781_v32, %v6217_v56  ;;  %6681 = vmatpush.msra.mxu2 %v6574_v21  ;;  %v7481_v28 = vld [vmem:[#allocation9 + $0x480] sm:$0xff]  ;;  %v5979_v32 = vpop.permute.xlu1 %5978 }
 0x662   : > { %7544 = vmatpush.msra.mxu3 %v7481_v28 }
 0x663   : > { %v9457_v45 = vpop.eup %9456  ;;  %v5469_v11 = vmul.f32 0.5, %v5409_v62  ;;  %v6399_v34 = vmul.f32 0.5, %v6327_v58  ;;  %6266 = vmatmul.f32.gmra.mxu3 %v5858_v8  ;;  %6615 = vmatmul.f32.gmra.mxu2 %v11122_v7  ;;  %v11828_v38 = vpop.f32.mrf.mxu1 }
 0x664   : > { %v9459_v13 = vpop.eup %9458  ;;  %v5530_v17 = vadd.f32 1.0, %v9457_v45  ;;  %6682 = vmatpush.msra.mxu2 %v6571_v18  ;;  %v11833_v14 = vpop.f32.mrf.mxu0  ;;  %v6553_v18 = vld [vmem:[#allocation9 + $0x340] sm:$0xff] }
 0x665   : > { %v6460_v1 = vadd.f32 1.0, %v9459_v13  ;;  %9460 = vtanh.f32 %v5469_v11  ;;  %v5984_v62 = vpop.permute.xlu2 %5983  ;;  %v5862_v13 = vld [vmem:[#allocation10 + $0x3c0] sm:$0xff] }
 0x666   : > { %v5561_v61 = vmul.f32 0.5, %v5530_v17  ;;  %9462 = vtanh.f32 %v6399_v34  ;;  %v5301_v42 = vpop.f32.mrf.mxu2  ;;  %v6219_v35 = vpop.f32.mrf.mxu3  ;;  %8866 = vmatmul.msk.f32.gmra.mxu1 %vm1108_vm0, %v5865_v37  ;;  %6683 = vmatpush.msra.mxu2 %v6568_v26 }
 0x667   : > { %v6491_v44 = vmul.f32 0.5, %v6460_v1  ;;  %v5302_v46 = vadd.f32 %v5301_v42, %v11639_v30  ;;  %v6220_v6 = vadd.f32 %v6219_v35, %v5979_v32  ;;  %6671 = vmatmul.f32.gmra.mxu0 %v11244_v36  ;;  %v6550_v32 = vld [vmem:[#allocation9 + $0x328] sm:$0xff]  ;;  %v6547_v42 = vld [vmem:[#allocation9 + $0x310] sm:$0xff] }
 0x668   : > { %8820 = vst [vmem:[%s10442_s21 + $0x458] sm:$0xff] %v5561_v61  ;;  %6684 = vmatpush.msra.mxu2 %v6565_v47 }
 0x669   : > { %8876 = vst [vmem:[%s10442_s21 + $0x520] sm:$0xff] %v6491_v44  ;;  %v5412_v40 = vadd.f32 %v11775_v51, %v5302_v46  ;;  %v6330_v20 = vadd.f32 %v11792_v33, %v6220_v6  ;;  %v6556_v51 = vld [vmem:[#allocation9 + $0x358] sm:$0xff]  ;;  %v5989_v46 = vpop.permute.xlu0 %5988 }
 0x66a   : > { %6685 = vmatpush.msra.mxu2 %v6562_v43 }
 0x66b   : > { %v9461_v12 = vpop.eup %9460  ;;  %v5470_v23 = vmul.f32 0.5, %v5412_v40  ;;  %v6400_v56 = vmul.f32 0.5, %v6330_v20  ;;  %6269 = vmatmul.f32.gmra.mxu3 %v5860_v0  ;;  %6618 = vmatmul.f32.gmra.mxu2 %v12431_v2  ;;  %v11840_v30 = vpop.f32.mrf.mxu1 }
 0x66c   : > { %v9463_v25 = vpop.eup %9462  ;;  %v5531_v8 = vadd.f32 1.0, %v9461_v12  ;;  %6686 = vmatpush.msra.mxu2 %v6559_v4  ;;  %v11845_v37 = vpop.f32.mrf.mxu0  ;;  %v5864_v12 = vld [vmem:[#allocation10 + $0x3d0] sm:$0x1] }
 0x66d   : > { %v6461_v58 = vadd.f32 1.0, %v9463_v25  ;;  %9464 = vtanh.f32 %v5470_v23 }
 0x66e   : > { %v5562_v33 = vmul.f32 0.5, %v5531_v8  ;;  %9466 = vtanh.f32 %v6400_v56  ;;  %v5304_v21 = vpop.f32.mrf.mxu2  ;;  %v6222_v19 = vpop.f32.mrf.mxu3  ;;  %7586 = vmatmul.f32.vlgmr.msra.gmra.mxu1 %v11064_v48  ;;  %6687 = vmatpush.msra.mxu2 %v6556_v51 }
 0x66f   : > { %v6492_v45 = vmul.f32 0.5, %v6461_v58  ;;  %v5305_v11 = vadd.f32 %v5304_v21, %v11649_v49  ;;  %v6223_v34 = vadd.f32 %v6222_v19, %v5984_v62  ;;  %v5994_v51 = vpop.permute.xlu1 %5993 }
 0x670   : > { %8821 = vst [vmem:[%s10442_s21 + $0x460] sm:$0xff] %v5562_v33  ;;  %6688 = vmatpush.msra.mxu2 %v6553_v18 }
 0x671   : > { %8877 = vst [vmem:[%s10442_s21 + $0x528] sm:$0xff] %v6492_v45  ;;  %v5415_v17 = vadd.f32 %v11786_v55, %v5305_v11  ;;  %v6333_v28 = vadd.f32 %v11804_v31, %v6223_v34 }
 0x672   : > { %6689 = vmatpush.msra.mxu2 %v6550_v32 }
 0x673   : > { %v9465_v1 = vpop.eup %9464  ;;  %v5471_v26 = vmul.f32 0.5, %v5415_v17  ;;  %v6401_v61 = vmul.f32 0.5, %v6333_v28  ;;  %6272 = vmatmul.f32.gmra.mxu3 %v5862_v13  ;;  %6621 = vmatmul.f32.gmra.mxu2 %v11172_v57  ;;  %v11852_v49 = vpop.f32.mrf.mxu1 }
 0x674   : > { %v9467_v35 = vpop.eup %9466  ;;  %v5532_v44 = vadd.f32 1.0, %v9465_v1  ;;  %6690 = vmatpush.msra.mxu2 %v6547_v42  ;;  %v11856_v43 = vpop.f32.mrf.mxu0 }
 0x675   : > { %v6462_v55 = vadd.f32 1.0, %v9467_v35  ;;  %9468 = vtanh.f32 %v5471_v26 }
 0x676   : > { %v5563_v31 = vmul.f32 0.5, %v5532_v44  ;;  %9470 = vtanh.f32 %v6401_v61  ;;  %v5307_v6 = vpop.f32.mrf.mxu2  ;;  %v6225_v47 = vpop.f32.mrf.mxu3  ;;  %7589 = vmatmul.f32.gmra.mxu1 %v11100_v16 }
 0x677   : > { %v6493_v0 = vmul.f32 0.5, %v6462_v55  ;;  %v5308_v40 = vadd.f32 %v5307_v6, %v11641_v63  ;;  %v6226_v20 = vadd.f32 %v6225_v47, %v5989_v46  ;;  %v5999_v61 = vpop.permute.xlu2 %5998  ;;  %v7525_v6 = vld [vmem:[#allocation9 + $0x5e0] sm:$0xff] }
 0x678   : > { %8822 = vst [vmem:[%s10442_s21 + $0x468] sm:$0xff] %v5563_v31 }
 0x679   : > { %8878 = vst [vmem:[%s10442_s21 + $0x530] sm:$0xff] %v6493_v0  ;;  %v5418_v23 = vadd.f32 %v11797_v5, %v5308_v40  ;;  %v6336_v56 = vadd.f32 %v11816_v54, %v6226_v20  ;;  %v7522_v20 = vld [vmem:[#allocation9 + $0x5c8] sm:$0xff] }
 0x67b   : > { %v9469_v4 = vpop.eup %9468  ;;  %v5472_v25 = vmul.f32 0.5, %v5418_v23  ;;  %v6402_v8 = vmul.f32 0.5, %v6336_v56  ;;  %6275 = vmatmul.f32.gmra.mxu3 %v5864_v12  ;;  %6624 = vmatmul.f32.gmra.mxu2 %v11198_v10  ;;  %v11863_v62 = vpop.f32.mrf.mxu1 }
 0x67c   : > { %v9471_v63 = vpop.eup %9470  ;;  %v5533_v58 = vadd.f32 1.0, %v9469_v4  ;;  %v11871_v13 = vpop.f32.mrf.mxu0  ;;  %v7519_v4 = vld [vmem:[#allocation9 + $0x5b0] sm:$0xff] }
 0x67d   : > { %v6463_v33 = vadd.f32 1.0, %v9471_v63  ;;  %9472 = vtanh.f32 %v5472_v25  ;;  %v7516_v63 = vld [vmem:[#allocation9 + $0x598] sm:$0xff] }
 0x67e   : > { %v5564_v21 = vmul.f32 0.5, %v5533_v58  ;;  %9474 = vtanh.f32 %v6402_v8  ;;  %v5310_v5 = vpop.f32.mrf.mxu2  ;;  %v6228_v19 = vpop.f32.mrf.mxu3  ;;  %7592 = vmatmul.f32.gmra.mxu1 %v11122_v7 }
 0x67f   : > { %v6494_v54 = vmul.f32 0.5, %v6463_v33  ;;  %v5311_v45 = vadd.f32 %v5310_v5, %v11651_v53  ;;  %v6229_v11 = vadd.f32 %v6228_v19, %v5994_v51 }
 0x680   : > { %8823 = vst [vmem:[%s10442_s21 + $0x470] sm:$0xff] %v5564_v21 }
 0x681   : > { %8879 = vst [vmem:[%s10442_s21 + $0x538] sm:$0xff] %v6494_v54  ;;  %v5421_v34 = vadd.f32 %v11809_v41, %v5311_v45  ;;  %v6339_v18 = vadd.f32 %v11828_v38, %v6229_v11  ;;  %v7528_v41 = vld [vmem:[#allocation9 + $0x5f8] sm:$0xff]  ;;  %v7513_v54 = vld [vmem:[#allocation9 + $0x580] sm:$0xff] }
 0x682   : > { %7611 = vmatpush.msrb.mxu3 %v7528_v41 }
 0x683   : > { %v9473_v17 = vpop.eup %9472  ;;  %v5473_v28 = vmul.f32 0.5, %v5421_v34  ;;  %v6403_v32 = vmul.f32 0.5, %v6339_v18  ;;  %6627 = vmatmul.f32.gmra.mxu2 %v11223_v3  ;;  %7545 = vmatmul.f32.vlgmr.msra.gmra.mxu3 %v11064_v48  ;;  %v11875_v1 = vpop.f32.mrf.mxu1  ;;  %v7510_v18 = vld [vmem:[#allocation9 + $0x568] sm:$0xff] }
 0x684   : > { %v9475_v26 = vpop.eup %9474  ;;  %v5534_v53 = vadd.f32 1.0, %v9473_v17  ;;  %7612 = vmatpush.msrb.mxu3 %v7525_v6  ;;  %v11883_v40 = vpop.f32.mrf.mxu0 }
 0x685   : > { %v6464_v42 = vadd.f32 1.0, %v9475_v26  ;;  %9476 = vtanh.f32 %v5473_v28  ;;  %v7507_v26 = vld [vmem:[#allocation9 + $0x550] sm:$0xff] }
 0x686   : > { %v5565_v38 = vmul.f32 0.5, %v5534_v53  ;;  %9478 = vtanh.f32 %v6403_v32  ;;  %v5313_v35 = vpop.f32.mrf.mxu2  ;;  %v6231_v44 = vpop.f32.mrf.mxu3  ;;  %7595 = vmatmul.f32.gmra.mxu1 %v12431_v2  ;;  %7613 = vmatpush.msrb.mxu3 %v7522_v20  ;;  %v7498_v20 = vld [vmem:[#allocation9 + $0x508] sm:$0xff] }
 0x687   : > { %v6495_v46 = vmul.f32 0.5, %v6464_v42  ;;  %v5314_v55 = vadd.f32 %v5313_v35, %v11664_v60  ;;  %v6232_v31 = vadd.f32 %v6231_v44, %v5999_v61  ;;  %v7504_v42 = vld [vmem:[#allocation9 + $0x538] sm:$0xff] }
 0x688   : > { %8824 = vst [vmem:[%s10442_s21 + $0x478] sm:$0xff] %v5565_v38  ;;  %7614 = vmatpush.msrb.mxu3 %v7519_v4  ;;  %v7495_v4 = vld [vmem:[#allocation9 + $0x4f0] sm:$0xff] }
 0x689   : > { %8880 = vst [vmem:[%s10442_s21 + $0x540] sm:$0xff] %v6495_v46  ;;  %v5424_v47 = vadd.f32 %v11821_v59, %v5314_v55  ;;  %v6342_v0 = vadd.f32 %v11840_v30, %v6232_v31  ;;  %v6004_v59 = vpop.permute.xlu0 %6003  ;;  %v7501_v31 = vld [vmem:[#allocation9 + $0x520] sm:$0xff] }
 0x68a   : > { %7615 = vmatpush.msrb.mxu3 %v7516_v63 }
 0x68b   : > { %v9477_v12 = vpop.eup %9476  ;;  %v5474_v23 = vmul.f32 0.5, %v5424_v47  ;;  %v6404_v56 = vmul.f32 0.5, %v6342_v0  ;;  %6630 = vmatmul.f32.gmra.mxu2 %v11244_v36  ;;  %7548 = vmatmul.f32.gmra.mxu3 %v11100_v16  ;;  %v11887_v60 = vpop.f32.mrf.mxu1 }
 0x68c   : > { %v9479_v25 = vpop.eup %9478  ;;  %v5535_v8 = vadd.f32 1.0, %v9477_v12  ;;  %7616 = vmatpush.msrb.mxu3 %v7513_v54  ;;  %v11895_v34 = vpop.f32.mrf.mxu0 }
 0x68d   : > { %v6465_v30 = vadd.f32 1.0, %v9479_v25  ;;  %9480 = vtanh.f32 %v5474_v23 }
 0x68e   : > { %v5566_v58 = vmul.f32 0.5, %v5535_v8  ;;  %9482 = vtanh.f32 %v6404_v56  ;;  %v5316_v51 = vpop.f32.mrf.mxu2  ;;  %v6234_v33 = vpop.f32.mrf.mxu3  ;;  %7598 = vmatmul.f32.gmra.mxu1 %v11172_v57  ;;  %7617 = vmatpush.msrb.mxu3 %v7510_v18 }
 0x68f   : > { %v6496_v21 = vmul.f32 0.5, %v6465_v30  ;;  %v5317_v5 = vadd.f32 %v5316_v51, %v11656_v9  ;;  %v6235_v19 = vadd.f32 %v6234_v33, %v6004_v59  ;;  %v7492_v59 = vld [vmem:[#allocation9 + $0x4d8] sm:$0xff] }
 0x690   : > { %8825 = vst [vmem:[%s10442_s21 + $0x480] sm:$0xff] %v5566_v58  ;;  %7618 = vmatpush.msrb.mxu3 %v7507_v26 }
 0x691   : > { %8881 = vst [vmem:[%s10442_s21 + $0x548] sm:$0xff] %v6496_v21  ;;  %v5427_v45 = vadd.f32 %v11833_v14, %v5317_v5  ;;  %v6345_v11 = vadd.f32 %v11852_v49, %v6235_v19  ;;  %v6009_v14 = vpop.permute.xlu1 %6008  ;;  %v7489_v5 = vld [vmem:[#allocation9 + $0x4c0] sm:$0xff] }
 0x692   : > { %7619 = vmatpush.msrb.mxu3 %v7504_v42 }
 0x693   : > { %v9481_v17 = vpop.eup %9480  ;;  %v5475_v28 = vmul.f32 0.5, %v5427_v45  ;;  %v6405_v32 = vmul.f32 0.5, %v6345_v11  ;;  %6691 = vmatmul.f32.vlgmr.msra.gmra.mxu2 %v11064_v48  ;;  %7551 = vmatmul.f32.gmra.mxu3 %v11122_v7  ;;  %v11899_v9 = vpop.f32.mrf.mxu1  ;;  %v7486_v11 = vld [vmem:[#allocation9 + $0x4a8] sm:$0xff] }
 0x694   : > { %v9483_v53 = vpop.eup %9482  ;;  %v5536_v61 = vadd.f32 1.0, %v9481_v17  ;;  %7620 = vmatpush.msrb.mxu3 %v7501_v31  ;;  %v11907_v0 = vpop.f32.mrf.mxu0 }
 0x695   : > { %v6466_v49 = vadd.f32 1.0, %v9483_v53  ;;  %9484 = vtanh.f32 %v5475_v28 }
 0x696   : > { %v5567_v41 = vmul.f32 0.5, %v5536_v61  ;;  %9486 = vtanh.f32 %v6405_v32  ;;  %v5319_v38 = vpop.f32.mrf.mxu2  ;;  %v6237_v35 = vpop.f32.mrf.mxu3  ;;  %7601 = vmatmul.f32.gmra.mxu1 %v11198_v10  ;;  %7621 = vmatpush.msrb.mxu3 %v7498_v20  ;;  %v7483_v32 = vld [vmem:[#allocation9 + $0x490] sm:$0xff] }
 0x697   : > { %v6497_v44 = vmul.f32 0.5, %v6466_v49  ;;  %v5320_v46 = vadd.f32 %v5319_v38, %v11669_v24  ;;  %v6238_v55 = vadd.f32 %v6237_v35, %v6009_v14 }
 0x698   : > { %8826 = vst [vmem:[%s10442_s21 + $0x488] sm:$0xff] %v5567_v41  ;;  %7622 = vmatpush.msrb.mxu3 %v7495_v4 }
 0x699   : > { %8882 = vst [vmem:[%s10442_s21 + $0x550] sm:$0xff] %v6497_v44  ;;  %v5430_v6 = vadd.f32 %v11845_v37, %v5320_v46  ;;  %v6348_v47 = vadd.f32 %v11863_v62, %v6238_v55  ;;  %v6014_v37 = vpop.permute.xlu2 %6013 }
 0x69a   : > { %7623 = vmatpush.msrb.mxu3 %v7492_v59 }
 0x69b   : > { %v9485_v12 = vpop.eup %9484  ;;  %v5476_v23 = vmul.f32 0.5, %v5430_v6  ;;  %v6406_v56 = vmul.f32 0.5, %v6348_v47  ;;  %6694 = vmatmul.f32.gmra.mxu2 %v11100_v16  ;;  %7554 = vmatmul.f32.gmra.mxu3 %v12431_v2  ;;  %v11911_v24 = vpop.f32.mrf.mxu1 }
 0x69c   : > { %v9487_v25 = vpop.eup %9486  ;;  %v5537_v8 = vadd.f32 1.0, %v9485_v12  ;;  %7624 = vmatpush.msrb.mxu3 %v7489_v5  ;;  %v11919_v45 = vpop.f32.mrf.mxu0 }
 0x69d   : > { %v6467_v62 = vadd.f32 1.0, %v9487_v25  ;;  %9488 = vtanh.f32 %v5476_v23  ;;  %v6024_v12 = vpop.permute.xlu1 %6023 }
 0x69e   : > { %v5568_v30 = vmul.f32 0.5, %v5537_v8  ;;  %9490 = vtanh.f32 %v6406_v56  ;;  %v5322_v63 = vpop.f32.mrf.mxu2  ;;  %v6240_v58 = vpop.f32.mrf.mxu3  ;;  %7604 = vmatmul.f32.gmra.mxu1 %v11223_v3  ;;  %7625 = vmatpush.msrb.mxu3 %v7486_v11 }
 0x69f   : > { %v6498_v51 = vmul.f32 0.5, %v6467_v62  ;;  %v5323_v33 = vadd.f32 %v5322_v63, %v11682_v15  ;;  %v6241_v21 = vadd.f32 %v6240_v58, %v6014_v37 }
 0x6a0   : > { %8827 = vst [vmem:[%s10442_s21 + $0x490] sm:$0xff] %v5568_v30  ;;  %7626 = vmatpush.msrb.mxu3 %v7483_v32 }
 0x6a1   : > { %8883 = vst [vmem:[%s10442_s21 + $0x558] sm:$0xff] %v6498_v51  ;;  %v5433_v19 = vadd.f32 %v11856_v43, %v5323_v33  ;;  %v6351_v54 = vadd.f32 %v11875_v1, %v6241_v21  ;;  %v6019_v1 = vpop.permute.xlu0 %6018  ;;  %v6029_v21 = vpop.permute.xlu2 %6028 }
 0x6a3   : > { %v9489_v18 = vpop.eup %9488  ;;  %v5477_v17 = vmul.f32 0.5, %v5433_v19  ;;  %v6407_v28 = vmul.f32 0.5, %v6351_v54  ;;  %6697 = vmatmul.f32.gmra.mxu2 %v11122_v7  ;;  %7557 = vmatmul.f32.gmra.mxu3 %v11172_v57  ;;  %v11923_v15 = vpop.f32.mrf.mxu1 }
 0x6a4   : > { %v9491_v26 = vpop.eup %9490  ;;  %v5538_v43 = vadd.f32 1.0, %v9489_v18  ;;  %v11931_v46 = vpop.f32.mrf.mxu0 }
 0x6a5   : > { %v6468_v53 = vadd.f32 1.0, %v9491_v26  ;;  %9492 = vtanh.f32 %v5477_v17 }
 0x6a6   : > { %v5569_v61 = vmul.f32 0.5, %v5538_v43  ;;  %9494 = vtanh.f32 %v6407_v28  ;;  %v5325_v14 = vpop.f32.mrf.mxu2  ;;  %v6243_v49 = vpop.f32.mrf.mxu3  ;;  %7607 = vmatmul.f32.gmra.mxu1 %v11244_v36 }
 0x6a7   : > { %v6499_v42 = vmul.f32 0.5, %v6468_v53  ;;  %v5326_v41 = vadd.f32 %v5325_v14, %v11673_v22  ;;  %v6244_v38 = vadd.f32 %v6243_v49, %v6019_v1 }
 0x6a8   : > { %8828 = vst [vmem:[%s10442_s21 + $0x498] sm:$0xff] %v5569_v61 }
 0x6a9   : > { %8884 = vst [vmem:[%s10442_s21 + $0x560] sm:$0xff] %v6499_v42  ;;  %v5436_v35 = vadd.f32 %v11871_v13, %v5326_v41  ;;  %v6354_v44 = vadd.f32 %v11887_v60, %v6244_v38  ;;  %v6034_v14 = vpop.permute.xlu0 %6033 }
 0x6ab   : > { %v9493_v55 = vpop.eup %9492  ;;  %v5478_v31 = vmul.f32 0.5, %v5436_v35  ;;  %v6408_v6 = vmul.f32 0.5, %v6354_v44  ;;  %6700 = vmatmul.f32.gmra.mxu2 %v12431_v2  ;;  %7560 = vmatmul.f32.gmra.mxu3 %v11198_v10  ;;  %v11935_v47 = vpop.f32.mrf.mxu1 }
 0x6ac   : > { %v9495_v22 = vpop.eup %9494  ;;  %v5539_v20 = vadd.f32 1.0, %v9493_v55  ;;  %v11942_v59 = vpop.f32.mrf.mxu0 }
 0x6ad   : > { %v6469_v23 = vadd.f32 1.0, %v9495_v22  ;;  %9496 = vtanh.f32 %v5478_v31 }
 0x6ae   : > { %v5570_v13 = vmul.f32 0.5, %v5539_v20  ;;  %9498 = vtanh.f32 %v6408_v6  ;;  %v5328_v60 = vpop.f32.mrf.mxu2  ;;  %v6246_v56 = vpop.f32.mrf.mxu3 }
 0x6af   : > { %v6500_v4 = vmul.f32 0.5, %v6469_v23  ;;  %v5329_v25 = vadd.f32 %v5328_v60, %v11686_v29  ;;  %v6247_v8 = vadd.f32 %v6246_v56, %v6024_v12 }
 0x6b0   : > { %8829 = vst [vmem:[%s10442_s21 + $0x4a0] sm:$0xff] %v5570_v13  ;;  %v6039_v13 = vpop.permute.xlu1 %6038 }
 0x6b1   : > { %8885 = vst [vmem:[%s10442_s21 + $0x568] sm:$0xff] %v6500_v4  ;;  %v5439_v37 = vadd.f32 %v11883_v40, %v5329_v25  ;;  %v6357_v62 = vadd.f32 %v11899_v9, %v6247_v8 }
 0x6b3   : > { %v9497_v30 = vpop.eup %9496  ;;  %v5479_v63 = vmul.f32 0.5, %v5439_v37  ;;  %v6409_v58 = vmul.f32 0.5, %v6357_v62  ;;  %6703 = vmatmul.f32.gmra.mxu2 %v11172_v57  ;;  %7563 = vmatmul.f32.gmra.mxu3 %v11223_v3  ;;  %v11946_v51 = vpop.f32.mrf.mxu1 }
 0x6b4   : > { %v9499_v29 = vpop.eup %9498  ;;  %v5540_v33 = vadd.f32 1.0, %v9497_v30  ;;  %v11953_v32 = vpop.f32.mrf.mxu0 }
 0x6b5   : > { %v6470_v5 = vadd.f32 1.0, %v9499_v29  ;;  %9500 = vtanh.f32 %v5479_v63 }
 0x6b6   : > { %v5571_v40 = vmul.f32 0.5, %v5540_v33  ;;  %9502 = vtanh.f32 %v6409_v58  ;;  %v5331_v9 = vpop.f32.mrf.mxu2  ;;  %v6249_v19 = vpop.f32.mrf.mxu3 }
 0x6b7   : > { %v6501_v54 = vmul.f32 0.5, %v6470_v5  ;;  %v5332_v11 = vadd.f32 %v5331_v9, %v11699_v39  ;;  %v6250_v18 = vadd.f32 %v6249_v19, %v6029_v21  ;;  %v6044_v21 = vpop.permute.xlu2 %6043 }
 0x6b8   : > { %8830 = vst [vmem:[%s10442_s21 + $0x4a8] sm:$0xff] %v5571_v40 }
 0x6b9   : > { %8886 = vst [vmem:[%s10442_s21 + $0x570] sm:$0xff] %v6501_v54  ;;  %v5442_v17 = vadd.f32 %v11895_v34, %v5332_v11  ;;  %v6360_v28 = vadd.f32 %v11911_v24, %v6250_v18 }
 0x6bb   : > { %v9501_v26 = vpop.eup %9500  ;;  %v5480_v43 = vmul.f32 0.5, %v5442_v17  ;;  %v6410_v1 = vmul.f32 0.5, %v6360_v28  ;;  %6706 = vmatmul.f32.gmra.mxu2 %v11198_v10  ;;  %7566 = vmatmul.f32.gmra.mxu3 %v11244_v36  ;;  %v11957_v53 = vpop.f32.mrf.mxu1 }
 0x6bc   : > { %v9503_v39 = vpop.eup %9502  ;;  %v5541_v61 = vadd.f32 1.0, %v9501_v26  ;;  %v11964_v31 = vpop.f32.mrf.mxu0 }
 0x6bd   : > { %v6471_v49 = vadd.f32 1.0, %v9503_v39  ;;  %9504 = vtanh.f32 %v5480_v43  ;;  %v6049_v39 = vpop.permute.xlu0 %6048 }
 0x6be   : > { %v5572_v34 = vmul.f32 0.5, %v5541_v61  ;;  %9506 = vtanh.f32 %v6410_v1  ;;  %v5334_v24 = vpop.f32.mrf.mxu2  ;;  %v6252_v42 = vpop.f32.mrf.mxu3 }
 0x6bf   : > { %v6502_v41 = vmul.f32 0.5, %v6471_v49  ;;  %v5335_v38 = vadd.f32 %v5334_v24, %v11689_v50  ;;  %v6253_v35 = vadd.f32 %v6252_v42, %v6034_v14 }
 0x6c0   : > { %8831 = vst [vmem:[%s10442_s21 + $0x4b0] sm:$0xff] %v5572_v34 }
 0x6c1   : > { %8887 = vst [vmem:[%s10442_s21 + $0x578] sm:$0xff] %v6502_v41  ;;  %v5445_v44 = vadd.f32 %v11907_v0, %v5335_v38  ;;  %v6363_v55 = vadd.f32 %v11923_v15, %v6253_v35 }
 0x6c3   : > { %v9505_v6 = vpop.eup %9504  ;;  %v5481_v22 = vmul.f32 0.5, %v5445_v44  ;;  %v6411_v20 = vmul.f32 0.5, %v6363_v55  ;;  %6709 = vmatmul.f32.gmra.mxu2 %v11223_v3  ;;  %7627 = vmatmul.f32.vlgmr.msrb.gmra.mxu3 %v11064_v48  ;;  %v11968_v12 = vpop.f32.mrf.mxu1 }
 0x6c4   : > { %v9507_v50 = vpop.eup %9506  ;;  %v5542_v23 = vadd.f32 1.0, %v9505_v6  ;;  %v11975_v62 = vpop.f32.mrf.mxu0 }
 0x6c5   : > { %v6472_v60 = vadd.f32 1.0, %v9507_v50  ;;  %9508 = vtanh.f32 %v5481_v22  ;;  %v6054_v55 = vpop.permute.xlu1 %6053 }
 0x6c6   : > { %v5573_v0 = vmul.f32 0.5, %v5542_v23  ;;  %9510 = vtanh.f32 %v6411_v20  ;;  %v5337_v15 = vpop.f32.mrf.mxu2  ;;  %v6255_v56 = vpop.f32.mrf.mxu3 }
 0x6c7   : > { %v6503_v4 = vmul.f32 0.5, %v6472_v60  ;;  %v5338_v25 = vadd.f32 %v5337_v15, %v11702_v52  ;;  %v6256_v8 = vadd.f32 %v6255_v56, %v6039_v13 }
 0x6c8   : > { %8832 = vst [vmem:[%s10442_s21 + $0x4b8] sm:$0xff] %v5573_v0 }
 0x6c9   : > { %8888 = vst [vmem:[%s10442_s21 + $0x580] sm:$0xff] %v6503_v4  ;;  %v5448_v37 = vadd.f32 %v11919_v45, %v5338_v25  ;;  %v6366_v48 = vadd.f32 %v11935_v47, %v6256_v8  ;;  %v6059_v4 = vpop.permute.xlu2 %6058 }
 0x6cb   : > { %v9509_v30 = vpop.eup %9508  ;;  %v5482_v63 = vmul.f32 0.5, %v5448_v37  ;;  %v6412_v58 = vmul.f32 0.5, %v6366_v48  ;;  %6712 = vmatmul.f32.gmra.mxu2 %v11244_v36  ;;  %7630 = vmatmul.f32.gmra.mxu3 %v11100_v16  ;;  %v11979_v29 = vpop.f32.mrf.mxu1 }
 0x6cc   : > { %v9511_v52 = vpop.eup %9510  ;;  %v5543_v33 = vadd.f32 1.0, %v9509_v30  ;;  %v11986_v18 = vpop.f32.mrf.mxu0 }
 0x6cd   : > { %v6473_v5 = vadd.f32 1.0, %v9511_v52  ;;  %9512 = vtanh.f32 %v5482_v63 }
 0x6ce   : > { %v5574_v45 = vmul.f32 0.5, %v5543_v33  ;;  %9514 = vtanh.f32 %v6412_v58  ;;  %v5340_v47 = vpop.f32.mrf.mxu2  ;;  %v6258_v40 = vpop.f32.mrf.mxu3 }
 0x6cf   : > { %v6504_v9 = vmul.f32 0.5, %v6473_v5  ;;  %v5341_v19 = vadd.f32 %v5340_v47, %v11714_v27  ;;  %v6259_v54 = vadd.f32 %v6258_v40, %v6044_v21  ;;  %v6064_v33 = vpop.permute.xlu0 %6063 }
 0x6d0   : > { %8833 = vst [vmem:[%s10442_s21 + $0x4c0] sm:$0xff] %v5574_v45 }
 0x6d1   : > { %8889 = vst [vmem:[%s10442_s21 + $0x588] sm:$0xff] %v6504_v9  ;;  %v5451_v11 = vadd.f32 %v11931_v46, %v5341_v19  ;;  %v6369_v16 = vadd.f32 %v11946_v51, %v6259_v54  ;;  %v6069_v54 = vpop.permute.xlu1 %6068 }
 0x6d3   : > { %v9513_v17 = vpop.eup %9512  ;;  %v5483_v28 = vmul.f32 0.5, %v5451_v11  ;;  %v6413_v26 = vmul.f32 0.5, %v6369_v16  ;;  %7633 = vmatmul.f32.gmra.mxu3 %v11122_v7  ;;  %v11989_v43 = vpop.f32.mrf.mxu1 }
 0x6d4   : > { %v9515_v1 = vpop.eup %9514  ;;  %v5544_v27 = vadd.f32 1.0, %v9513_v17  ;;  %v6666_v7 = vpop.f32.mrf.mxu0 }
 0x6d5   : > { %v6474_v61 = vadd.f32 1.0, %v9515_v1  ;;  %9516 = vtanh.f32 %v5483_v28  ;;  %v6074_v1 = vpop.permute.xlu2 %6073 }
 0x6d6   : > { %v5575_v14 = vmul.f32 0.5, %v5544_v27  ;;  %9518 = vtanh.f32 %v6413_v26  ;;  %v6261_v46 = vpop.f32.mrf.mxu3  ;;  %v11991_v51 = vpop.f32.mrf.mxu2 }
 0x6d7   : > { %v6505_v49 = vmul.f32 0.5, %v6474_v61  ;;  %v6262_v34 = vadd.f32 %v6261_v46, %v6049_v39 }
 0x6d8   : > { %8834 = vst [vmem:[%s10442_s21 + $0x4c8] sm:$0xff] %v5575_v14 }
 0x6d9   : > { %8890 = vst [vmem:[%s10442_s21 + $0x590] sm:$0xff] %v6505_v49  ;;  %v6372_v24 = vadd.f32 %v11957_v53, %v6262_v34 }
 0x6db   : > { %v9517_v42 = vpop.eup %9516  ;;  %v6414_v41 = vmul.f32 0.5, %v6372_v24  ;;  %7636 = vmatmul.f32.gmra.mxu3 %v12431_v2  ;;  %v6383_v38 = vpop.f32.mrf.mxu1 }
 0x6dc   : > { %v9519_v35 = vpop.eup %9518  ;;  %v5545_v44 = vadd.f32 1.0, %v9517_v42  ;;  %v6669_v60 = vpop.f32.mrf.mxu0 }
 0x6dd   : > { %v6475_v6 = vadd.f32 1.0, %v9519_v35  ;;  %9520 = vtanh.f32 %v6414_v41 }
 0x6de   : > { %v5576_v22 = vmul.f32 0.5, %v5545_v44  ;;  %v6264_v20 = vpop.f32.mrf.mxu3  ;;  %v11997_v50 = vpop.f32.mrf.mxu2 }
 0x6df   : > { %v6506_v23 = vmul.f32 0.5, %v6475_v6  ;;  %v6265_v13 = vadd.f32 %v6264_v20, %v6054_v55  ;;  %v6740_v20 = vld [vmem:[#allocation10 + $0x3e0] sm:$0xff] }
 0x6e0   : > { %8835 = vst [vmem:[%s10442_s21 + $0x4d0] sm:$0x1] %v5576_v22 }
 0x6e1   : > { %8891 = vst [vmem:[%s10442_s21 + $0x598] sm:$0xff] %v6506_v23  ;;  %v6375_v53 = vadd.f32 %v11968_v12, %v6265_v13 }
 0x6e3   : > { %v9521_v0 = vpop.eup %9520  ;;  %v6415_v2 = vmul.f32 0.5, %v6375_v53  ;;  %7639 = vmatmul.f32.gmra.mxu3 %v11172_v57  ;;  %v6386_v15 = vpop.f32.mrf.mxu1 }
 0x6e4   : > { %v6476_v56 = vadd.f32 1.0, %v9521_v0  ;;  %v6672_v63 = vpop.f32.mrf.mxu0 }
 0x6e5   : > { %9522 = vtanh.f32 %v6415_v2  ;;  %7105 = vmatpush.msrb.mxu0 %v6672_v63  ;;  %v6750_v63 = vld [vmem:[#allocation10 + $0x430] sm:$0xff] }
 0x6e6   : > { %v6507_v25 = vmul.f32 0.5, %v6476_v56  ;;  %v6267_v8 = vpop.f32.mrf.mxu3  ;;  %v12003_v37 = vpop.f32.mrf.mxu2  ;;  %v6744_v56 = vld [vmem:[#allocation10 + $0x400] sm:$0xff] }
 0x6e7   : > { %v6268_v48 = vadd.f32 %v6267_v8, %v6059_v4  ;;  %7106 = vmatpush.msrb.mxu0 %v6669_v60  ;;  %v6742_v60 = vld [vmem:[#allocation10 + $0x3f0] sm:$0xff] }
 0x6e8   : > { %8892 = vst [vmem:[%s10442_s21 + $0x5a0] sm:$0xff] %v6507_v25 }
 0x6e9   : > { %v6378_v30 = vadd.f32 %v11979_v29, %v6268_v48  ;;  %7107 = vmatpush.msrb.mxu0 %v6666_v7 }
 0x6eb   : > { %v9523_v12 = vpop.eup %9522  ;;  %v6416_v58 = vmul.f32 0.5, %v6378_v30  ;;  %7642 = vmatmul.f32.gmra.mxu3 %v11198_v10  ;;  %v12008_v52 = vpop.f32.mrf.mxu1  ;;  %7108 = vmatpush.msrb.mxu0 %v11986_v18 }
 0x6ec   : > { %v6477_v57 = vadd.f32 1.0, %v9523_v12 }
 0x6ed   : > { %9524 = vtanh.f32 %v6416_v58  ;;  %7109 = vmatpush.msrb.mxu0 %v11975_v62 }
 0x6ee   : > { %v6508_v21 = vmul.f32 0.5, %v6477_v57  ;;  %v6270_v5 = vpop.f32.mrf.mxu3  ;;  %v6619_v45 = vpop.f32.mrf.mxu2  ;;  %v7676_v57 = vld [vmem:[#allocation10 + $0x5d0] sm:$0xff] }
 0x6ef   : > { %v6271_v47 = vadd.f32 %v6270_v5, %v6064_v33  ;;  %7110 = vmatpush.msrb.mxu0 %v11964_v31  ;;  %v6754_v5 = vld [vmem:[#allocation10 + $0x450] sm:$0xff] }
 0x6f0   : > { %8893 = vst [vmem:[%s10442_s21 + $0x5a8] sm:$0xff] %v6508_v21 }
 0x6f1   : > { %v6381_v29 = vadd.f32 %v11989_v43, %v6271_v47  ;;  %7111 = vmatpush.msrb.mxu0 %v11953_v32 }
 0x6f3   : > { %v9525_v40 = vpop.eup %9524  ;;  %v6417_v10 = vmul.f32 0.5, %v6381_v29  ;;  %7645 = vmatmul.f32.gmra.mxu3 %v11223_v3  ;;  %v12014_v9 = vpop.f32.mrf.mxu1  ;;  %7112 = vmatpush.msrb.mxu0 %v11942_v59  ;;  %v6756_v29 = vld [vmem:[#allocation10 + $0x460] sm:$0xff] }
 0x6f4   : > { %v6478_v19 = vadd.f32 1.0, %v9525_v40  ;;  %v6741_v40 = vld [vmem:[#allocation10 + $0x3e8] sm:$0xff] }
 0x6f5   : > { %9526 = vtanh.f32 %v6417_v10  ;;  %v7680_v10 = vld [vmem:[#allocation10 + $0x5f0] sm:$0xff] }
 0x6f6   : > { %v6509_v11 = vmul.f32 0.5, %v6478_v19  ;;  %v6273_v16 = vpop.f32.mrf.mxu3  ;;  %v6622_v17 = vpop.f32.mrf.mxu2  ;;  %v6758_v19 = vld [vmem:[#allocation10 + $0x470] sm:$0xff] }
 0x6f7   : > { %v6274_v28 = vadd.f32 %v6273_v16, %v6069_v54  ;;  %v6743_v54 = vld [vmem:[#allocation10 + $0x3f8] sm:$0xff] }
 0x6f8   : > { %8894 = vst [vmem:[%s10442_s21 + $0x5b0] sm:$0xff] %v6509_v11  ;;  %v7682_v11 = vld [vmem:[#allocation10 + $0x600] sm:$0xff] }
 0x6f9   : > { %v6384_v18 = vadd.f32 %v6383_v38, %v6274_v28  ;;  %v6745_v28 = vld [vmem:[#allocation10 + $0x408] sm:$0xff] }
 0x6fb   : > { %v9527_v3 = vpop.eup %9526  ;;  %v6418_v26 = vmul.f32 0.5, %v6384_v18  ;;  %7648 = vmatmul.f32.gmra.mxu3 %v11244_v36  ;;  %v7593_v62 = vpop.f32.mrf.mxu1  ;;  %v7684_v18 = vld [vmem:[#allocation10 + $0x610] sm:$0xff] }
 0x6fc   : > { %v6479_v43 = vadd.f32 1.0, %v9527_v3 }
 0x6fd   : > { %9528 = vtanh.f32 %v6418_v26  ;;  %v6762_v26 = vld [vmem:[#allocation10 + $0x490] sm:$0xff] }
 0x6fe   : > { %v6510_v31 = vmul.f32 0.5, %v6479_v43  ;;  %v6276_v27 = vpop.f32.mrf.mxu3  ;;  %v6625_v39 = vpop.f32.mrf.mxu2  ;;  %v7686_v43 = vld [vmem:[#allocation10 + $0x620] sm:$0xff] }
 0x6ff   : > { %v6277_v61 = vadd.f32 %v6276_v27, %v6074_v1  ;;  %v6749_v27 = vld [vmem:[#allocation10 + $0x428] sm:$0xff] }
 0x700   : > { %8895 = vst [vmem:[%s10442_s21 + $0x5b8] sm:$0xff] %v6510_v31  ;;  %v6764_v31 = vld [vmem:[#allocation10 + $0x4a0] sm:$0xff] }
 0x701   : > { %v6387_v14 = vadd.f32 %v6386_v15, %v6277_v61 }
 0x703   : > { %v9529_v32 = vpop.eup %9528  ;;  %v6419_v46 = vmul.f32 0.5, %v6387_v14  ;;  %v7596_v49 = vpop.f32.mrf.mxu1  ;;  %v6766_v14 = vld [vmem:[#allocation10 + $0x4b0] sm:$0xff] }
 0x704   : > { %v6480_v59 = vadd.f32 1.0, %v9529_v32  ;;  %v6751_v32 = vld [vmem:[#allocation10 + $0x438] sm:$0xff] }
 0x705   : > { %9530 = vtanh.f32 %v6419_v46  ;;  %v7690_v46 = vld [vmem:[#allocation10 + $0x640] sm:$0xff] }
 0x706   : > { %v6511_v34 = vmul.f32 0.5, %v6480_v59  ;;  %v6628_v24 = vpop.f32.mrf.mxu2  ;;  %v7546_v36 = vpop.f32.mrf.mxu3  ;;  %v6753_v59 = vld [vmem:[#allocation10 + $0x448] sm:$0xff] }
 0x708   : > { %8896 = vst [vmem:[%s10442_s21 + $0x5c0] sm:$0xff] %v6511_v34  ;;  %v7692_v34 = vld [vmem:[#allocation10 + $0x650] sm:$0xff] }
 0x70b   : > { %v9531_v7 = vpop.eup %9530  ;;  %v7599_v42 = vpop.f32.mrf.mxu1 }
 0x70c   : > { %v6481_v41 = vadd.f32 1.0, %v9531_v7  ;;  %v6755_v7 = vld [vmem:[#allocation10 + $0x458] sm:$0xff] }
 0x70e   : > { %v6512_v38 = vmul.f32 0.5, %v6481_v41  ;;  %v6631_v35 = vpop.f32.mrf.mxu2  ;;  %v7549_v44 = vpop.f32.mrf.mxu3  ;;  %v7679_v41 = vld [vmem:[#allocation10 + $0x5e8] sm:$0xff] }
 0x70f   : > { %7113 = vmatpush.msrb.mxu0 %v6631_v35  ;;  %v6757_v35 = vld [vmem:[#allocation10 + $0x468] sm:$0xff] }
 0x710   : > { %8897 = vst [vmem:[%s10442_s21 + $0x5c8] sm:$0x1] %v6512_v38  ;;  %v6772_v38 = vld [vmem:[#allocation10 + $0x4e0] sm:$0xff] }
 0x711   : > { %7114 = vmatpush.msrb.mxu0 %v6628_v24  ;;  %v7677_v24 = vld [vmem:[#allocation10 + $0x5d8] sm:$0xff] }
 0x713   : > { %7115 = vmatpush.msrb.mxu0 %v6625_v39  ;;  %v7602_v55 = vpop.f32.mrf.mxu1  ;;  %v7688_v39 = vld [vmem:[#allocation10 + $0x630] sm:$0xff] }
 0x715   : > { %7116 = vmatpush.msrb.mxu0 %v6622_v17  ;;  %v6760_v17 = vld [vmem:[#allocation10 + $0x480] sm:$0xff] }
 0x716   : > { %v12025_v6 = vpop.f32.mrf.mxu2  ;;  %v7552_v22 = vpop.f32.mrf.mxu3 }
 0x717   : > { %7117 = vmatpush.msrb.mxu0 %v6619_v45  ;;  %v7678_v45 = vld [vmem:[#allocation10 + $0x5e0] sm:$0xff] }
 0x719   : > { %7118 = vmatpush.msrb.mxu0 %v12003_v37  ;;  %v6748_v37 = vld [vmem:[#allocation10 + $0x420] sm:$0xff] }
 0x71b   : > { %7119 = vmatpush.msrb.mxu0 %v11997_v50  ;;  %v7605_v23 = vpop.f32.mrf.mxu1 }
 0x71d   : > { %7120 = vmatpush.msrb.mxu0 %v11991_v51  ;;  %v6746_v51 = vld [vmem:[#allocation10 + $0x410] sm:$0xff] }
 0x71e   : > { %v6695_v13 = vpop.f32.mrf.mxu2  ;;  %7121 = vmatmul.f32.vlgmr.msrb.gmra.mxu0 %v6740_v20  ;;  %v7555_v53 = vpop.f32.mrf.mxu3  ;;  %v6759_v20 = vld [vmem:[#allocation10 + $0x478] sm:$0xff] }
 0x723   : > { %v7608_v0 = vpop.f32.mrf.mxu1 }
 0x724   : > { %8041 = vmatpush.msrb.mxu1 %v7608_v0  ;;  %v6761_v0 = vld [vmem:[#allocation10 + $0x488] sm:$0xff] }
 0x726   : > { %v6698_v2 = vpop.f32.mrf.mxu2  ;;  %7124 = vmatmul.f32.gmra.mxu0 %v6742_v60  ;;  %v7558_v15 = vpop.f32.mrf.mxu3  ;;  %8042 = vmatpush.msrb.mxu1 %v7605_v23  ;;  %v7698_v23 = vld [vmem:[#allocation10 + $0x680] sm:$0xff] }
 0x727   : > { %v6776_v60 = vld [vmem:[#allocation10 + $0x500] sm:$0xff] }
 0x728   : > { %8043 = vmatpush.msrb.mxu1 %v7602_v55  ;;  %v7681_v55 = vld [vmem:[#allocation10 + $0x5f8] sm:$0xff] }
 0x72a   : > { %8044 = vmatpush.msrb.mxu1 %v7599_v42  ;;  %v7694_v42 = vld [vmem:[#allocation10 + $0x660] sm:$0xff] }
 0x72c   : > { %8045 = vmatpush.msrb.mxu1 %v7596_v49  ;;  %v6768_v49 = vld [vmem:[#allocation10 + $0x4c0] sm:$0xff] }
 0x72e   : > { %v6701_v4 = vpop.f32.mrf.mxu2  ;;  %7127 = vmatmul.f32.gmra.mxu0 %v6744_v56  ;;  %v7561_v50 = vpop.f32.mrf.mxu3  ;;  %8046 = vmatpush.msrb.mxu1 %v7593_v62  ;;  %v6747_v62 = vld [vmem:[#allocation10 + $0x418] sm:$0xff] }
 0x72f   : > { %v7685_v56 = vld [vmem:[#allocation10 + $0x618] sm:$0xff] }
 0x730   : > { %8047 = vmatpush.msrb.mxu1 %v12014_v9 }
 0x732   : > { %8048 = vmatpush.msrb.mxu1 %v12008_v52  ;;  %v6752_v52 = vld [vmem:[#allocation10 + $0x440] sm:$0xff] }
 0x736   : > { %v6704_v25 = vpop.f32.mrf.mxu2  ;;  %7130 = vmatmul.f32.gmra.mxu0 %v6746_v51  ;;  %v7564_v8 = vpop.f32.mrf.mxu3  ;;  %v6763_v51 = vld [vmem:[#allocation10 + $0x498] sm:$0xff] }
 0x73e   : > { %v6707_v48 = vpop.f32.mrf.mxu2  ;;  %7133 = vmatmul.f32.gmra.mxu0 %v6748_v37  ;;  %v7567_v30 = vpop.f32.mrf.mxu3  ;;  %v7687_v37 = vld [vmem:[#allocation10 + $0x628] sm:$0xff] }
 0x73f   : > { %8049 = vmatpush.msrb.mxu1 %v7567_v30 }
 0x741   : > { %8050 = vmatpush.msrb.mxu1 %v7564_v8  ;;  %v7702_v8 = vld [vmem:[#allocation10 + $0x6a0] sm:$0xff] }
 0x743   : > { %8051 = vmatpush.msrb.mxu1 %v7561_v50  ;;  %v6778_v50 = vld [vmem:[#allocation10 + $0x510] sm:$0xff] }
 0x745   : > { %8052 = vmatpush.msrb.mxu1 %v7558_v15  ;;  %v7700_v15 = vld [vmem:[#allocation10 + $0x690] sm:$0xff] }
 0x746   : > { %v6710_v12 = vpop.f32.mrf.mxu2  ;;  %7136 = vmatmul.f32.gmra.mxu0 %v6750_v63  ;;  %v12032_v58 = vpop.f32.mrf.mxu3  ;;  %v6780_v63 = vld [vmem:[#allocation10 + $0x520] sm:$0xff] }
 0x747   : > { %8053 = vmatpush.msrb.mxu1 %v7555_v53 }
 0x749   : > { %8054 = vmatpush.msrb.mxu1 %v7552_v22  ;;  %v6774_v22 = vld [vmem:[#allocation10 + $0x4f0] sm:$0xff] }
 0x74b   : > { %8055 = vmatpush.msrb.mxu1 %v7549_v44  ;;  %v7696_v44 = vld [vmem:[#allocation10 + $0x670] sm:$0xff] }
 0x74d   : > { %8056 = vmatpush.msrb.mxu1 %v7546_v36  ;;  %v6770_v36 = vld [vmem:[#allocation10 + $0x4d0] sm:$0xff] }
 0x74e   : > { %v6713_v33 = vpop.f32.mrf.mxu2  ;;  %7139 = vmatmul.f32.gmra.mxu0 %v6752_v52  ;;  %v7631_v21 = vpop.f32.mrf.mxu3  ;;  %8057 = vmatmul.f32.vlgmr.msrb.gmra.mxu1 %v7676_v57  ;;  %v7704_v52 = vld [vmem:[#allocation10 + $0x6b0] sm:$0xff]  ;;  %v7689_v57 = vld [vmem:[#allocation10 + $0x638] sm:$0xff] }
 0x74f   : > { %7223 = vmatpush.msrb.mxu2 %v6713_v33 }
 0x751   : > { %7224 = vmatpush.msrb.mxu2 %v6710_v12  ;;  %v6765_v12 = vld [vmem:[#allocation10 + $0x4a8] sm:$0xff] }
 0x753   : > { %7225 = vmatpush.msrb.mxu2 %v6707_v48 }
 0x755   : > { %7226 = vmatpush.msrb.mxu2 %v6704_v25  ;;  %v12060_v25 = vpop.permute.xlu2 %6869 }
 0x756   : > { %7142 = vmatmul.f32.gmra.mxu0 %v6754_v5  ;;  %v7634_v47 = vpop.f32.mrf.mxu3  ;;  %8060 = vmatmul.f32.gmra.mxu1 %v7678_v45  ;;  %v6782_v45 = vld [vmem:[#allocation10 + $0x530] sm:$0xff] }
 0x757   : > { %7227 = vmatpush.msrb.mxu2 %v6701_v4  ;;  %v12058_v4 = vpop.permute.xlu0 %6859 }
 0x759   : > { %7228 = vmatpush.msrb.mxu2 %v6698_v2  ;;  %v12054_v2 = vpop.permute.xlu1 %6864 }
 0x75b   : > { %7229 = vmatpush.msrb.mxu2 %v6695_v13  ;;  %v7683_v13 = vld [vmem:[#allocation10 + $0x608] sm:$0xff] }
 0x75d   : > { %7230 = vmatpush.msrb.mxu2 %v12025_v6  ;;  %v12070_v33 = vpop.permute.xlu2 %6884 }
 0x75e   : > { %7145 = vmatmul.f32.gmra.mxu0 %v6756_v29  ;;  %8898 = vmatmul.msk.f32.vlgmr.msrb.gmra.mxu2 %vm1108_vm0, %v6741_v40  ;;  %v7637_v9 = vpop.f32.mrf.mxu3  ;;  %v7706_v29 = vld [vmem:[#allocation10 + $0x6c0] sm:$0xff]  ;;  %v7691_v40 = vld [vmem:[#allocation10 + $0x648] sm:$0xff] }
 0x75f   : > { %8063 = vmatmul.f32.gmra.mxu1 %v7680_v10 }
 0x761   : > { %v12064_v30 = vpop.permute.xlu1 %6879 }
 0x766   : > { %7148 = vmatmul.f32.gmra.mxu0 %v6758_v19  ;;  %8899 = vmatmul.msk.f32.gmra.mxu2 %vm1108_vm0, %v6743_v54  ;;  %v7640_v16 = vpop.f32.mrf.mxu3 }
 0x767   : > { %8066 = vmatmul.f32.gmra.mxu1 %v7682_v11  ;;  %v6784_v11 = vld [vmem:[#allocation10 + $0x540] sm:$0xff] }
 0x769   : > { %v12076_v5 = vpop.permute.xlu1 %6894 }
 0x76e   : > { %7151 = vmatmul.f32.gmra.mxu0 %v6760_v17  ;;  %8900 = vmatmul.msk.f32.gmra.mxu2 %vm1108_vm0, %v6745_v28  ;;  %v7643_v3 = vpop.f32.mrf.mxu3  ;;  %v7708_v17 = vld [vmem:[#allocation10 + $0x6d0] sm:$0xff]  ;;  %v7693_v28 = vld [vmem:[#allocation10 + $0x658] sm:$0xff] }
 0x76f   : > { %8069 = vmatmul.f32.gmra.mxu1 %v7684_v18 }
 0x771   : > { %v12086_v54 = vpop.permute.xlu1 %6909 }
 0x776   : > { %7154 = vmatmul.f32.gmra.mxu0 %v6762_v26  ;;  %8901 = vmatmul.msk.f32.gmra.mxu2 %vm1108_vm0, %v6747_v62  ;;  %v7646_v1 = vpop.f32.mrf.mxu3 }
 0x777   : > { %8072 = vmatmul.f32.gmra.mxu1 %v7686_v43  ;;  %v6786_v43 = vld [vmem:[#allocation10 + $0x550] sm:$0xff] }
 0x77e   : > { %7157 = vmatmul.f32.gmra.mxu0 %v6764_v31  ;;  %8902 = vmatmul.msk.f32.gmra.mxu2 %vm1108_vm0, %v6749_v27  ;;  %v7649_v61 = vpop.f32.mrf.mxu3  ;;  %v12098_v31 = vpop.permute.xlu1 %6924  ;;  %v7710_v27 = vld [vmem:[#allocation10 + $0x6e0] sm:$0xff] }
 0x77f   : > { %8075 = vmatmul.f32.gmra.mxu1 %v7688_v39  ;;  %8159 = vmatpush.msra.mxu3 %v7649_v61  ;;  %v7695_v39 = vld [vmem:[#allocation10 + $0x668] sm:$0xff] }
 0x781   : > { %8160 = vmatpush.msra.mxu3 %v7646_v1  ;;  %v6771_v1 = vld [vmem:[#allocation10 + $0x4d8] sm:$0xff] }
 0x783   : > { %8161 = vmatpush.msra.mxu3 %v7643_v3 }
 0x785   : > { %8162 = vmatpush.msra.mxu3 %v7640_v16  ;;  %v6769_v16 = vld [vmem:[#allocation10 + $0x4c8] sm:$0xff] }
 0x786   : > { %7160 = vmatmul.f32.gmra.mxu0 %v6766_v14  ;;  %8903 = vmatmul.msk.f32.gmra.mxu2 %vm1108_vm0, %v6751_v32  ;;  %v6788_v14 = vld [vmem:[#allocation10 + $0x560] sm:$0xff]  ;;  %v6773_v32 = vld [vmem:[#allocation10 + $0x4e8] sm:$0xff] }
 0x787   : > { %8078 = vmatmul.f32.gmra.mxu1 %v7690_v46  ;;  %8163 = vmatpush.msra.mxu3 %v7637_v9  ;;  %v12082_v9 = vpop.permute.xlu2 %6899 }
 0x789   : > { %8164 = vmatpush.msra.mxu3 %v7634_v47  ;;  %v6767_v47 = vld [vmem:[#allocation10 + $0x4b8] sm:$0xff] }
 0x78b   : > { %8165 = vmatpush.msra.mxu3 %v7631_v21 }
 0x78d   : > { %8166 = vmatpush.msra.mxu3 %v12032_v58  ;;  %v12068_v58 = vpop.permute.xlu0 %6874 }
 0x78e   : > { %7163 = vmatmul.f32.gmra.mxu0 %v6768_v49  ;;  %8904 = vmatmul.msk.f32.gmra.mxu2 %vm1108_vm0, %v6753_v59  ;;  %v7712_v59 = vld [vmem:[#allocation10 + $0x6f0] sm:$0xff] }
 0x78f   : > { %8081 = vmatmul.f32.gmra.mxu1 %v7692_v34  ;;  %8960 = vmatmul.msk.f32.vlgmr.msra.gmra.mxu3 %vm1108_vm0, %v7677_v24  ;;  %v12092_v3 = vpop.permute.xlu2 %6914  ;;  %v7697_v34 = vld [vmem:[#allocation10 + $0x678] sm:$0xff] }
 0x795   : > { %v12078_v10 = vpop.permute.xlu0 %6889 }
 0x796   : > { %7166 = vmatmul.f32.gmra.mxu0 %v6770_v36  ;;  %8905 = vmatmul.msk.f32.gmra.mxu2 %vm1108_vm0, %v6755_v7  ;;  %v12110_v36 = vpop.permute.xlu1 %6939 }
 0x797   : > { %8084 = vmatmul.f32.gmra.mxu1 %v7694_v42  ;;  %8961 = vmatmul.msk.f32.gmra.mxu3 %vm1108_vm0, %v7679_v41  ;;  %v12104_v46 = vpop.permute.xlu2 %6929 }
 0x79b   : > { %v12048_v6 = vpop.f32.mrf.mxu0 }
 0x79c   : > { %v7123_v7 = vadd.f32 %v12048_v6, %v12058_v4  ;;  %v6792_v4 = vld [vmem:[#allocation10 + $0x580] sm:$0xff] }
 0x79d   : > { %v12090_v18 = vpop.permute.xlu0 %6904 }
 0x79e   : > { %7169 = vmatmul.f32.gmra.mxu0 %v6772_v38  ;;  %8906 = vmatmul.msk.f32.gmra.mxu2 %vm1108_vm0, %v6757_v35  ;;  %v6790_v38 = vld [vmem:[#allocation10 + $0x570] sm:$0xff]  ;;  %v6775_v35 = vld [vmem:[#allocation10 + $0x4f8] sm:$0xff]  ;;  %v12126_v6 = vpop.permute.xlu1 %6954 }
 0x79f   : > { %8087 = vmatmul.f32.gmra.mxu1 %v7696_v44  ;;  %8962 = vmatmul.msk.f32.gmra.mxu3 %vm1108_vm0, %v7681_v55 }
 0x7a3   : > { %v12052_v53 = vpop.f32.mrf.mxu0 }
 0x7a5   : > { %v12102_v61 = vpop.permute.xlu0 %6919 }
 0x7a6   : > { %7172 = vmatmul.f32.gmra.mxu0 %v6774_v22  ;;  %8907 = vmatmul.msk.f32.gmra.mxu2 %vm1108_vm0, %v6759_v20  ;;  %v7714_v22 = vld [vmem:[#allocation10 + $0x700] sm:$0xff]  ;;  %v7699_v20 = vld [vmem:[#allocation10 + $0x688] sm:$0xff] }
 0x7a7   : > { %8090 = vmatmul.f32.gmra.mxu1 %v7698_v23  ;;  %8963 = vmatmul.msk.f32.gmra.mxu3 %vm1108_vm0, %v7683_v13  ;;  %v12118_v23 = vpop.permute.xlu2 %6944 }
 0x7ab   : > { %v12062_v48 = vpop.f32.mrf.mxu0 }
 0x7ad   : > { %v12116_v44 = vpop.permute.xlu0 %6934 }
 0x7ae   : > { %7175 = vmatmul.f32.gmra.mxu0 %v6776_v60  ;;  %8908 = vmatmul.msk.f32.gmra.mxu2 %vm1108_vm0, %v6761_v0  ;;  %v7126_v0 = vadd.f32 %v12052_v53, %v12054_v2  ;;  %v7129_v2 = vadd.f32 %v12062_v48, %v12060_v25 }
 0x7af   : > { %8093 = vmatmul.f32.gmra.mxu1 %v7700_v15  ;;  %8964 = vmatmul.msk.f32.gmra.mxu3 %vm1108_vm0, %v7685_v56  ;;  %v12134_v53 = vpop.permute.xlu2 %6959 }
 0x7b3   : > { %v12073_v21 = vpop.f32.mrf.mxu0 }
 0x7b6   : > { %7178 = vmatmul.f32.gmra.mxu0 %v6778_v50  ;;  %8909 = vmatmul.msk.f32.gmra.mxu2 %vm1108_vm0, %v6763_v51  ;;  %v6777_v50 = vld [vmem:[#allocation10 + $0x508] sm:$0xff] }
 0x7b7   : > { %8096 = vmatmul.f32.gmra.mxu1 %v7702_v8  ;;  %8965 = vmatmul.msk.f32.gmra.mxu3 %vm1108_vm0, %v7687_v37  ;;  %v7716_v37 = vld [vmem:[#allocation10 + $0x710] sm:$0xff] }
 0x7bb   : > { %v12084_v19 = vpop.f32.mrf.mxu0 }
 0x7be   : > { %7181 = vmatmul.f32.gmra.mxu0 %v6780_v63  ;;  %8910 = vmatmul.msk.f32.gmra.mxu2 %vm1108_vm0, %v6765_v12  ;;  %v7701_v63 = vld [vmem:[#allocation10 + $0x698] sm:$0xff] }
 0x7bf   : > { %8099 = vmatmul.f32.gmra.mxu1 %v7704_v52  ;;  %8966 = vmatmul.msk.f32.gmra.mxu3 %vm1108_vm0, %v7689_v57  ;;  %v12130_v52 = vpop.permute.xlu0 %6949 }
 0x7c3   : > { %v12096_v62 = vpop.f32.mrf.mxu0 }
 0x7c6   : > { %7184 = vmatmul.f32.gmra.mxu0 %v6782_v45  ;;  %8911 = vmatmul.msk.f32.gmra.mxu2 %vm1108_vm0, %v6767_v47 }
 0x7c7   : > { %8102 = vmatmul.f32.gmra.mxu1 %v7706_v29  ;;  %8967 = vmatmul.msk.f32.gmra.mxu3 %vm1108_vm0, %v7691_v40  ;;  %v12143_v40 = vpop.permute.xlu1 %6969  ;;  %v12147_v48 = vpop.permute.xlu0 %6964 }
 0x7cb   : > { %v12094_v26 = vpop.f32.mrf.mxu1  ;;  %v12108_v24 = vpop.f32.mrf.mxu0 }
 0x7ce   : > { %7187 = vmatmul.f32.gmra.mxu0 %v6784_v11  ;;  %8912 = vmatmul.msk.f32.gmra.mxu2 %vm1108_vm0, %v6769_v16  ;;  %v6794_v16 = vld [vmem:[#allocation10 + $0x590] sm:$0xff] }
 0x7cf   : > { %8105 = vmatmul.f32.gmra.mxu1 %v7708_v17  ;;  %8968 = vmatmul.msk.f32.gmra.mxu3 %vm1108_vm0, %v7693_v28  ;;  %v6779_v17 = vld [vmem:[#allocation10 + $0x518] sm:$0xff] }
 0x7d3   : > { %v12106_v49 = vpop.f32.mrf.mxu1  ;;  %v12123_v60 = vpop.f32.mrf.mxu0 }
 0x7d6   : > { %7190 = vmatmul.f32.gmra.mxu0 %v6786_v43  ;;  %8913 = vmatmul.msk.f32.gmra.mxu2 %vm1108_vm0, %v6771_v1  ;;  %v7718_v1 = vld [vmem:[#allocation10 + $0x720] sm:$0xff] }
 0x7d7   : > { %8108 = vmatmul.f32.gmra.mxu1 %v7710_v27  ;;  %8969 = vmatmul.msk.f32.gmra.mxu3 %vm1108_vm0, %v7695_v39  ;;  %v7703_v27 = vld [vmem:[#allocation10 + $0x6a8] sm:$0xff] }
 0x7db   : > { %v12140_v47 = vpop.f32.mrf.mxu0 }
 0x7dc   : > { %v12120_v13 = vpop.f32.mrf.mxu1 }
 0x7de   : > { %7193 = vmatmul.f32.gmra.mxu0 %v6788_v14  ;;  %8914 = vmatmul.msk.f32.gmra.mxu2 %vm1108_vm0, %v6773_v32  ;;  %v7132_v14 = vadd.f32 %v12073_v21, %v12068_v58  ;;  %v7135_v21 = vadd.f32 %v12084_v19, %v12064_v30 }
 0x7df   : > { %8111 = vmatmul.f32.gmra.mxu1 %v7712_v59  ;;  %8970 = vmatmul.msk.f32.gmra.mxu3 %vm1108_vm0, %v7697_v34  ;;  %v12152_v59 = vpop.permute.xlu2 %6974 }
 0x7e1   : > { %v7232_v42 = vpop.f32.mrf.mxu2 }
 0x7e2   : > { %v7233_v41 = vadd.f32 %v7232_v42, %v7123_v7 }
 0x7e3   : > { %v12156_v42 = vpop.f32.mrf.mxu0 }
 0x7e4   : > { %v7325_v55 = vmul.f32 0.5, %v7233_v41  ;;  %v12138_v45 = vpop.f32.mrf.mxu1  ;;  %v6796_v41 = vld [vmem:[#allocation10 + $0x5a0] sm:$0xff] }
 0x7e6   : > { %9532 = vtanh.f32 %v7325_v55  ;;  %7196 = vmatmul.f32.gmra.mxu0 %v6790_v38  ;;  %8915 = vmatmul.msk.f32.gmra.mxu2 %vm1108_vm0, %v6775_v35  ;;  %v6781_v38 = vld [vmem:[#allocation10 + $0x528] sm:$0xff]  ;;  %v12158_v55 = vpop.permute.xlu1 %6984 }
 0x7e7   : > { %8114 = vmatmul.f32.gmra.mxu1 %v7714_v22  ;;  %8971 = vmatmul.msk.f32.gmra.mxu3 %vm1108_vm0, %v7699_v20  ;;  %v7720_v20 = vld [vmem:[#allocation10 + $0x730] sm:$0xff] }
 0x7e9   : > { %v7235_v15 = vpop.f32.mrf.mxu2 }
 0x7ea   : > { %v7236_v56 = vadd.f32 %v7235_v15, %v7126_v0  ;;  %v7705_v0 = vld [vmem:[#allocation10 + $0x6b8] sm:$0xff] }
 0x7ec   : > { %v9533_v51 = vpop.eup %9532  ;;  %v7326_v8 = vmul.f32 0.5, %v7236_v56  ;;  %v12154_v34 = vpop.f32.mrf.mxu1 }
 0x7ed   : > { %v7387_v12 = vadd.f32 1.0, %v9533_v51  ;;  %v6798_v51 = vld [vmem:[#allocation10 + $0x5b0] sm:$0xff] }
 0x7ee   : > { %9534 = vtanh.f32 %v7326_v8  ;;  %7199 = vmatmul.f32.gmra.mxu0 %v6792_v4  ;;  %8916 = vmatmul.msk.f32.gmra.mxu2 %vm1108_vm0, %v6777_v50  ;;  %v12165_v4 = vpop.permute.xlu0 %6979  ;;  %v6783_v8 = vld [vmem:[#allocation10 + $0x538] sm:$0xff]  ;;  %v12173_v30 = vpop.permute.xlu1 %6999 }
 0x7ef   : > { %v7418_v57 = vmul.f32 0.5, %v7387_v12  ;;  %8117 = vmatmul.f32.gmra.mxu1 %v7716_v37  ;;  %8972 = vmatmul.msk.f32.gmra.mxu3 %vm1108_vm0, %v7701_v63  ;;  %v12167_v63 = vpop.permute.xlu2 %6989 }
 0x7f1   : > { %8929 = vst [vmem:[%s10442_s21 + $0x5d0] sm:$0xff] %v7418_v57  ;;  %v7238_v29 = vpop.f32.mrf.mxu2 }
 0x7f2   : > { %v7239_v11 = vadd.f32 %v7238_v29, %v7129_v2  ;;  %v7722_v2 = vld [vmem:[#allocation10 + $0x740] sm:$0xff]  ;;  %v7707_v29 = vld [vmem:[#allocation10 + $0x6c8] sm:$0xff] }
 0x7f4   : > { %v9535_v28 = vpop.eup %9534  ;;  %v7327_v43 = vmul.f32 0.5, %v7239_v11  ;;  %v12169_v12 = vpop.f32.mrf.mxu1 }
 0x7f5   : > { %v7388_v39 = vadd.f32 1.0, %v9535_v28  ;;  %v12171_v11 = vpop.f32.mrf.mxu0 }
 0x7f6   : > { %9536 = vtanh.f32 %v7327_v43  ;;  %7202 = vmatmul.f32.gmra.mxu0 %v6794_v16  ;;  %8917 = vmatmul.msk.f32.gmra.mxu2 %vm1108_vm0, %v6779_v17  ;;  %v7138_v17 = vadd.f32 %v12096_v62, %v12070_v33 }
 0x7f7   : > { %v7419_v25 = vmul.f32 0.5, %v7388_v39  ;;  %8120 = vmatmul.f32.gmra.mxu1 %v7718_v1  ;;  %8973 = vmatmul.msk.f32.gmra.mxu3 %vm1108_vm0, %v7703_v27  ;;  %v6800_v1 = vld [vmem:[#allocation10 + $0x5c0] sm:$0x1]  ;;  %v6785_v27 = vld [vmem:[#allocation10 + $0x548] sm:$0xff] }
 0x7f9   : > { %8930 = vst [vmem:[%s10442_s21 + $0x5d8] sm:$0xff] %v7419_v25  ;;  %v7241_v32 = vpop.f32.mrf.mxu2  ;;  %v12180_v25 = vpop.permute.xlu0 %6994 }
 0x7fa   : > { %v7242_v7 = vadd.f32 %v7241_v32, %v7132_v14  ;;  %v7724_v32 = vld [vmem:[#allocation10 + $0x750] sm:$0xff] }
 0x7fc   : > { %v9537_v35 = vpop.eup %9536  ;;  %v7328_v22 = vmul.f32 0.5, %v7242_v7  ;;  %v7709_v7 = vld [vmem:[#allocation10 + $0x6d8] sm:$0xff] }
 0x7fd   : > { %v7389_v15 = vadd.f32 1.0, %v9537_v35  ;;  %v12184_v35 = vpop.f32.mrf.mxu1  ;;  %v12187_v33 = vpop.f32.mrf.mxu0 }
 0x7fe   : > { %9538 = vtanh.f32 %v7328_v22  ;;  %7205 = vmatmul.f32.gmra.mxu0 %v6796_v41  ;;  %8918 = vmatmul.msk.f32.gmra.mxu2 %vm1108_vm0, %v6781_v38  ;;  %v12182_v38 = vpop.permute.xlu2 %7004  ;;  %v7796_v22 = vpop.permute.xlu1 %7795 }
 0x7ff   : > { %v7420_v58 = vmul.f32 0.5, %v7389_v15  ;;  %8123 = vmatmul.f32.gmra.mxu1 %v7720_v20  ;;  %8974 = vmatmul.msk.f32.gmra.mxu3 %vm1108_vm0, %v7705_v0  ;;  %v7141_v20 = vadd.f32 %v12108_v24, %v12078_v10  ;;  %v8059_v0 = vadd.f32 %v12094_v26, %v7796_v22  ;;  %v7144_v24 = vadd.f32 %v12123_v60, %v12076_v5 }
 0x801   : > { %8931 = vst [vmem:[%s10442_s21 + $0x5e0] sm:$0xff] %v7420_v58  ;;  %v7244_v56 = vpop.f32.mrf.mxu2 }
 0x802   : > { %v7245_v50 = vadd.f32 %v7244_v56, %v7135_v21 }
 0x804   : > { %v9539_v37 = vpop.eup %9538  ;;  %v7329_v57 = vmul.f32 0.5, %v7245_v50  ;;  %v6787_v50 = vld [vmem:[#allocation10 + $0x558] sm:$0xff] }
 0x805   : > { %v7390_v16 = vadd.f32 1.0, %v9539_v37  ;;  %v7726_v37 = vld [vmem:[#allocation10 + $0x760] sm:$0xff] }
 0x806   : > { %9540 = vtanh.f32 %v7329_v57  ;;  %7208 = vmatmul.f32.gmra.mxu0 %v6798_v51  ;;  %8919 = vmatmul.msk.f32.gmra.mxu2 %vm1108_vm0, %v6783_v8  ;;  %v7711_v57 = vld [vmem:[#allocation10 + $0x6e8] sm:$0xff]  ;;  %v7801_v26 = vpop.permute.xlu2 %7800 }
 0x807   : > { %v7421_v19 = vmul.f32 0.5, %v7390_v16  ;;  %8126 = vmatmul.f32.gmra.mxu1 %v7722_v2  ;;  %8975 = vmatmul.msk.f32.gmra.mxu3 %vm1108_vm0, %v7707_v29  ;;  %v12194_v16 = vpop.permute.xlu0 %7009 }
 0x809   : > { %8932 = vst [vmem:[%s10442_s21 + $0x5e8] sm:$0xff] %v7421_v19  ;;  %v7247_v28 = vpop.f32.mrf.mxu2  ;;  %v12200_v19 = vpop.f32.mrf.mxu1 }
 0x80a   : > { %v7248_v43 = vadd.f32 %v7247_v28, %v7138_v17  ;;  %v8062_v17 = vadd.f32 %v12106_v49, %v7801_v26  ;;  %v12203_v28 = vpop.f32.mrf.mxu0  ;;  %v7730_v26 = vld [vmem:[#allocation10 + $0x780] sm:$0xff] }
 0x80c   : > { %v9541_v39 = vpop.eup %9540  ;;  %v7330_v14 = vmul.f32 0.5, %v7248_v43 }
 0x80d   : > { %v7391_v41 = vadd.f32 1.0, %v9541_v39 }
 0x80e   : > { %9542 = vtanh.f32 %v7330_v14  ;;  %7211 = vmatmul.f32.gmra.mxu0 %v6800_v1  ;;  %8920 = vmatmul.msk.f32.gmra.mxu2 %vm1108_vm0, %v6785_v27  ;;  %v6789_v14 = vld [vmem:[#allocation10 + $0x568] sm:$0xff] }
 0x80f   : > { %v7422_v62 = vmul.f32 0.5, %v7391_v41  ;;  %8129 = vmatmul.f32.gmra.mxu1 %v7724_v32  ;;  %8976 = vmatmul.msk.f32.gmra.mxu3 %vm1108_vm0, %v7709_v7  ;;  %v7728_v41 = vld [vmem:[#allocation10 + $0x770] sm:$0xff] }
 0x811   : > { %8933 = vst [vmem:[%s10442_s21 + $0x5f0] sm:$0xff] %v7422_v62  ;;  %v7250_v15 = vpop.f32.mrf.mxu2  ;;  %v7713_v62 = vld [vmem:[#allocation10 + $0x6f8] sm:$0xff] }
 0x812   : > { %v7251_v58 = vadd.f32 %v7250_v15, %v7141_v20  ;;  %v8168_v21 = vpop.f32.mrf.mxu3  ;;  %v7147_v15 = vadd.f32 %v12140_v47, %v12082_v9 }
 0x813   : > { %v8169_v56 = vadd.f32 %v8168_v21, %v8059_v0  ;;  %v7806_v0 = vpop.permute.xlu0 %7805 }
 0x814   : > { %v9543_v51 = vpop.eup %9542  ;;  %v7331_v8 = vmul.f32 0.5, %v7251_v58  ;;  %v8065_v21 = vadd.f32 %v12120_v13, %v7806_v0  ;;  %v7717_v0 = vld [vmem:[#allocation10 + $0x718] sm:$0xff] }
 0x815   : > { %v7392_v2 = vadd.f32 1.0, %v9543_v51  ;;  %v8261_v29 = vmul.f32 0.5, %v8169_v56 }
 0x816   : > { %9544 = vtanh.f32 %v7331_v8  ;;  %8921 = vmatmul.msk.f32.gmra.mxu2 %vm1108_vm0, %v6787_v50  ;;  %v12212_v50 = vpop.f32.mrf.mxu1 }
 0x817   : > { %v7423_v10 = vmul.f32 0.5, %v7392_v2  ;;  %9546 = vtanh.f32 %v8261_v29  ;;  %8132 = vmatmul.f32.gmra.mxu1 %v7726_v37  ;;  %8977 = vmatmul.msk.f32.gmra.mxu3 %vm1108_vm0, %v7711_v57  ;;  %v12215_v37 = vpop.f32.mrf.mxu0  ;;  %v6791_v2 = vld [vmem:[#allocation10 + $0x578] sm:$0xff] }
 0x819   : > { %8934 = vst [vmem:[%s10442_s21 + $0x5f8] sm:$0xff] %v7423_v10  ;;  %v7253_v43 = vpop.f32.mrf.mxu2 }
 0x81a   : > { %v7254_v1 = vadd.f32 %v7253_v43, %v7144_v24  ;;  %v8171_v27 = vpop.f32.mrf.mxu3  ;;  %v7715_v24 = vld [vmem:[#allocation10 + $0x708] sm:$0xff] }
 0x81b   : > { %v8172_v39 = vadd.f32 %v8171_v27, %v8062_v17  ;;  %v7150_v27 = vadd.f32 %v12156_v42, %v12090_v18 }
 0x81c   : > { %v9545_v32 = vpop.eup %9544  ;;  %v7332_v7 = vmul.f32 0.5, %v7254_v1  ;;  %v7811_v1 = vpop.permute.xlu1 %7810 }
 0x81d   : > { %v9547_v22 = vpop.eup %9546  ;;  %v7393_v20 = vadd.f32 1.0, %v9545_v32  ;;  %v8262_v5 = vmul.f32 0.5, %v8172_v39 }
 0x81e   : > { %v8323_v60 = vadd.f32 1.0, %v9547_v22  ;;  %9548 = vtanh.f32 %v7332_v7  ;;  %8922 = vmatmul.msk.f32.gmra.mxu2 %vm1108_vm0, %v6789_v14  ;;  %v8068_v14 = vadd.f32 %v12138_v45, %v7811_v1  ;;  %v6793_v22 = vld [vmem:[#allocation10 + $0x588] sm:$0xff] }
 0x81f   : > { %v7424_v49 = vmul.f32 0.5, %v7393_v20  ;;  %9550 = vtanh.f32 %v8262_v5  ;;  %8135 = vmatmul.f32.gmra.mxu1 %v7728_v41  ;;  %8978 = vmatmul.msk.f32.gmra.mxu3 %vm1108_vm0, %v7713_v62  ;;  %v12224_v5 = vpop.f32.mrf.mxu1 }
 0x820   : > { %v8354_v58 = vmul.f32 0.5, %v8323_v60 }
 0x821   : > { %8935 = vst [vmem:[%s10442_s21 + $0x600] sm:$0xff] %v7424_v49  ;;  %v7256_v56 = vpop.f32.mrf.mxu2  ;;  %v7732_v49 = vld [vmem:[#allocation10 + $0x790] sm:$0xff] }
 0x822   : > { %8991 = vst [vmem:[%s10442_s21 + $0x6c8] sm:$0xff] %v8354_v58  ;;  %v7257_v51 = vadd.f32 %v7256_v56, %v7147_v15  ;;  %v8174_v8 = vpop.f32.mrf.mxu3  ;;  %v12226_v58 = vpop.f32.mrf.mxu0 }
 0x823   : > { %v8175_v57 = vadd.f32 %v8174_v8, %v8065_v21  ;;  %v7816_v56 = vpop.permute.xlu2 %7815 }
 0x824   : > { %v9549_v29 = vpop.eup %9548  ;;  %v7333_v10 = vmul.f32 0.5, %v7257_v51  ;;  %v7153_v51 = vadd.f32 %v12171_v11, %v12086_v54 }
 0x825   : > { %v9551_v9 = vpop.eup %9550  ;;  %v7394_v47 = vadd.f32 1.0, %v9549_v29  ;;  %v8263_v13 = vmul.f32 0.5, %v8175_v57  ;;  %v8071_v57 = vadd.f32 %v12154_v34, %v7816_v56 }
 0x826   : > { %v8324_v17 = vadd.f32 1.0, %v9551_v9  ;;  %9552 = vtanh.f32 %v7333_v10  ;;  %8923 = vmatmul.msk.f32.gmra.mxu2 %vm1108_vm0, %v6791_v2 }
 0x827   : > { %v7425_v43 = vmul.f32 0.5, %v7394_v47  ;;  %9554 = vtanh.f32 %v8263_v13  ;;  %8138 = vmatmul.f32.gmra.mxu1 %v7730_v26  ;;  %8979 = vmatmul.msk.f32.gmra.mxu3 %vm1108_vm0, %v7715_v24  ;;  %v6795_v24 = vld [vmem:[#allocation10 + $0x598] sm:$0xff]  ;;  %v7734_v13 = vld [vmem:[#allocation10 + $0x7a0] sm:$0xff]  ;;  %v12235_v54 = vpop.f32.mrf.mxu1 }
 0x828   : > { %v8355_v39 = vmul.f32 0.5, %v8324_v17  ;;  %v7719_v17 = vld [vmem:[#allocation10 + $0x728] sm:$0xff] }
 0x829   : > { %8936 = vst [vmem:[%s10442_s21 + $0x608] sm:$0xff] %v7425_v43  ;;  %v7259_v32 = vpop.f32.mrf.mxu2 }
 0x82a   : > { %8992 = vst [vmem:[%s10442_s21 + $0x6d0] sm:$0xff] %v8355_v39  ;;  %v7260_v7 = vadd.f32 %v7259_v32, %v7150_v27  ;;  %v8177_v41 = vpop.f32.mrf.mxu3  ;;  %v12238_v34 = vpop.f32.mrf.mxu0  ;;  %v7156_v32 = vadd.f32 %v12187_v33, %v12092_v3 }
 0x82b   : > { %v8178_v62 = vadd.f32 %v8177_v41, %v8068_v14  ;;  %v7821_v14 = vpop.permute.xlu0 %7820  ;;  %v7826_v33 = vpop.permute.xlu1 %7825 }
 0x82c   : > { %v9553_v20 = vpop.eup %9552  ;;  %v7334_v60 = vmul.f32 0.5, %v7260_v7  ;;  %v8074_v41 = vadd.f32 %v12169_v12, %v7821_v14 }
 0x82d   : > { %v9555_v15 = vpop.eup %9554  ;;  %v7395_v18 = vadd.f32 1.0, %v9553_v20  ;;  %v8264_v45 = vmul.f32 0.5, %v8178_v62 }
 0x82e   : > { %v8325_v42 = vadd.f32 1.0, %v9555_v15  ;;  %9556 = vtanh.f32 %v7334_v60  ;;  %8924 = vmatmul.msk.f32.gmra.mxu2 %vm1108_vm0, %v6793_v22 }
 0x82f   : > { %v7426_v21 = vmul.f32 0.5, %v7395_v18  ;;  %9558 = vtanh.f32 %v8264_v45  ;;  %8141 = vmatmul.f32.gmra.mxu1 %v7732_v49  ;;  %8980 = vmatmul.msk.f32.gmra.mxu3 %vm1108_vm0, %v7717_v0  ;;  %v6797_v49 = vld [vmem:[#allocation10 + $0x5a8] sm:$0xff]  ;;  %v7736_v18 = vld [vmem:[#allocation10 + $0x7b0] sm:$0x1]  ;;  %v7721_v45 = vld [vmem:[#allocation10 + $0x738] sm:$0xff] }
 0x830   : > { %v8356_v8 = vmul.f32 0.5, %v8325_v42 }
 0x831   : > { %8937 = vst [vmem:[%s10442_s21 + $0x610] sm:$0xff] %v7426_v21  ;;  %v7262_v2 = vpop.f32.mrf.mxu2 }
 0x832   : > { %8993 = vst [vmem:[%s10442_s21 + $0x6d8] sm:$0xff] %v8356_v8  ;;  %v7263_v29 = vadd.f32 %v7262_v2, %v7153_v51  ;;  %v8180_v10 = vpop.f32.mrf.mxu3  ;;  %v7159_v51 = vadd.f32 %v12203_v28, %v12102_v61  ;;  %v12250_v8 = vpop.f32.mrf.mxu1  ;;  %v8077_v2 = vadd.f32 %v12184_v35, %v7826_v33 }
 0x833   : > { %v8181_v26 = vadd.f32 %v8180_v10, %v8071_v57 }
 0x834   : > { %v9557_v9 = vpop.eup %9556  ;;  %v7335_v47 = vmul.f32 0.5, %v7263_v29  ;;  %v12253_v29 = vpop.f32.mrf.mxu0 }
 0x835   : > { %v9559_v43 = vpop.eup %9558  ;;  %v7396_v1 = vadd.f32 1.0, %v9557_v9  ;;  %v8265_v27 = vmul.f32 0.5, %v8181_v26 }
 0x836   : > { %v8326_v11 = vadd.f32 1.0, %v9559_v43  ;;  %9560 = vtanh.f32 %v7335_v47  ;;  %8925 = vmatmul.msk.f32.gmra.mxu2 %vm1108_vm0, %v6795_v24  ;;  %v6799_v47 = vld [vmem:[#allocation10 + $0x5b8] sm:$0xff]  ;;  %v7723_v43 = vld [vmem:[#allocation10 + $0x748] sm:$0xff] }
 0x837   : > { %v7427_v39 = vmul.f32 0.5, %v7396_v1  ;;  %9562 = vtanh.f32 %v8265_v27  ;;  %8144 = vmatmul.f32.gmra.mxu1 %v7734_v13  ;;  %8981 = vmatmul.msk.f32.gmra.mxu3 %vm1108_vm0, %v7719_v17 }
 0x838   : > { %v8357_v7 = vmul.f32 0.5, %v8326_v11  ;;  %v7831_v11 = vpop.permute.xlu2 %7830 }
 0x839   : > { %8938 = vst [vmem:[%s10442_s21 + $0x618] sm:$0xff] %v7427_v39  ;;  %v7265_v62 = vpop.f32.mrf.mxu2  ;;  %v7162_v39 = vadd.f32 %v12215_v37, %v12098_v31 }
 0x83a   : > { %8994 = vst [vmem:[%s10442_s21 + $0x6e0] sm:$0xff] %v8357_v7  ;;  %v7266_v22 = vadd.f32 %v7265_v62, %v7156_v32  ;;  %v8183_v20 = vpop.f32.mrf.mxu3  ;;  %v8080_v32 = vadd.f32 %v12200_v19, %v7831_v11 }
 0x83b   : > { %v8184_v60 = vadd.f32 %v8183_v20, %v8074_v41  ;;  %v12263_v41 = vpop.f32.mrf.mxu1 }
 0x83c   : > { %v9561_v0 = vpop.eup %9560  ;;  %v7336_v15 = vmul.f32 0.5, %v7266_v22  ;;  %v12266_v20 = vpop.f32.mrf.mxu0 }
 0x83d   : > { %v9563_v42 = vpop.eup %9562  ;;  %v7397_v21 = vadd.f32 1.0, %v9561_v0  ;;  %v8266_v56 = vmul.f32 0.5, %v8184_v60 }
 0x83e   : > { %v8327_v3 = vadd.f32 1.0, %v9563_v42  ;;  %9564 = vtanh.f32 %v7336_v15  ;;  %8926 = vmatmul.msk.f32.gmra.mxu2 %vm1108_vm0, %v6797_v49  ;;  %v6801_v49 = vld [vmem:[#allocation10 + $0x5c8] sm:$0x1] }
 0x83f   : > { %v7428_v12 = vmul.f32 0.5, %v7397_v21  ;;  %9566 = vtanh.f32 %v8266_v56  ;;  %8147 = vmatmul.f32.gmra.mxu1 %v7736_v18  ;;  %8982 = vmatmul.msk.f32.gmra.mxu3 %vm1108_vm0, %v7721_v45  ;;  %v7725_v18 = vld [vmem:[#allocation10 + $0x758] sm:$0xff]  ;;  %v7836_v21 = vpop.permute.xlu0 %7835  ;;  %v7165_v56 = vadd.f32 %v12226_v58, %v12104_v46 }
 0x840   : > { %v8358_v57 = vmul.f32 0.5, %v8327_v3 }
 0x841   : > { %8939 = vst [vmem:[%s10442_s21 + $0x620] sm:$0xff] %v7428_v12  ;;  %v7268_v10 = vpop.f32.mrf.mxu2  ;;  %v8083_v12 = vadd.f32 %v12212_v50, %v7836_v21 }
 0x842   : > { %8995 = vst [vmem:[%s10442_s21 + $0x6e8] sm:$0xff] %v8358_v57  ;;  %v7269_v26 = vadd.f32 %v7268_v10, %v7159_v51  ;;  %v8186_v24 = vpop.f32.mrf.mxu3 }
 0x843   : > { %v8187_v9 = vadd.f32 %v8186_v24, %v8077_v2 }
 0x844   : > { %v9565_v13 = vpop.eup %9564  ;;  %v7337_v17 = vmul.f32 0.5, %v7269_v26  ;;  %v12275_v26 = vpop.f32.mrf.mxu1 }
 0x845   : > { %v9567_v1 = vpop.eup %9566  ;;  %v7398_v61 = vadd.f32 1.0, %v9565_v13  ;;  %v8267_v28 = vmul.f32 0.5, %v8187_v9  ;;  %v7727_v9 = vld [vmem:[#allocation10 + $0x768] sm:$0xff]  ;;  %v12277_v13 = vpop.f32.mrf.mxu0 }
 0x846   : > { %v8328_v27 = vadd.f32 1.0, %v9567_v1  ;;  %9568 = vtanh.f32 %v7337_v17  ;;  %8927 = vmatmul.msk.f32.gmra.mxu2 %vm1108_vm0, %v6799_v47  ;;  %v7168_v1 = vadd.f32 %v12238_v34, %v12116_v44 }
 0x847   : > { %v7429_v35 = vmul.f32 0.5, %v7398_v61  ;;  %9570 = vtanh.f32 %v8267_v28  ;;  %8983 = vmatmul.msk.f32.gmra.mxu3 %vm1108_vm0, %v7723_v43  ;;  %v7841_v43 = vpop.permute.xlu1 %7840 }
 0x848   : > { %v8359_v14 = vmul.f32 0.5, %v8328_v27  ;;  %v8086_v28 = vadd.f32 %v12224_v5, %v7841_v43 }
 0x849   : > { %8940 = vst [vmem:[%s10442_s21 + $0x628] sm:$0xff] %v7429_v35  ;;  %v7271_v7 = vpop.f32.mrf.mxu2 }
 0x84a   : > { %8996 = vst [vmem:[%s10442_s21 + $0x6f0] sm:$0xff] %v8359_v14  ;;  %v7272_v62 = vadd.f32 %v7271_v7, %v7162_v39  ;;  %v8189_v22 = vpop.f32.mrf.mxu3  ;;  %v7729_v7 = vld [vmem:[#allocation10 + $0x778] sm:$0xff] }
 0x84b   : > { %v8190_v60 = vadd.f32 %v8189_v22, %v8080_v32 }
 0x84c   : > { %v9569_v0 = vpop.eup %9568  ;;  %v7338_v15 = vmul.f32 0.5, %v7272_v62 }
 0x84d   : > { %v9571_v31 = vpop.eup %9570  ;;  %v7399_v37 = vadd.f32 1.0, %v9569_v0  ;;  %v8268_v45 = vmul.f32 0.5, %v8190_v60  ;;  %v12287_v34 = vpop.f32.mrf.mxu0 }
 0x84e   : > { %v8329_v19 = vadd.f32 1.0, %v9571_v31  ;;  %9572 = vtanh.f32 %v7338_v15  ;;  %8928 = vmatmul.msk.f32.gmra.mxu2 %vm1108_vm0, %v6801_v49  ;;  %v12285_v49 = vpop.f32.mrf.mxu1  ;;  %v7846_v0 = vpop.permute.xlu2 %7845  ;;  %v7171_v15 = vadd.f32 %v12253_v29, %v12110_v36  ;;  %v7174_v29 = vadd.f32 %v12266_v20, %v12118_v23 }
 0x84f   : > { %v7430_v42 = vmul.f32 0.5, %v7399_v37  ;;  %9574 = vtanh.f32 %v8268_v45  ;;  %8984 = vmatmul.msk.f32.gmra.mxu3 %vm1108_vm0, %v7725_v18  ;;  %v8089_v31 = vadd.f32 %v12235_v54, %v7846_v0  ;;  %v7851_v54 = vpop.permute.xlu0 %7850  ;;  %v7735_v0 = vld [vmem:[#allocation10 + $0x7a8] sm:$0xff] }
 0x850   : > { %v8360_v3 = vmul.f32 0.5, %v8329_v19 }
 0x851   : > { %8941 = vst [vmem:[%s10442_s21 + $0x630] sm:$0xff] %v7430_v42  ;;  %v7274_v33 = vpop.f32.mrf.mxu2 }
 0x852   : > { %8997 = vst [vmem:[%s10442_s21 + $0x6f8] sm:$0xff] %v8360_v3  ;;  %v7275_v51 = vadd.f32 %v7274_v33, %v7165_v56  ;;  %v8192_v57 = vpop.f32.mrf.mxu3  ;;  %v7731_v3 = vld [vmem:[#allocation10 + $0x788] sm:$0xff] }
 0x853   : > { %v8193_v2 = vadd.f32 %v8192_v57, %v8083_v12 }
 0x854   : > { %v9573_v10 = vpop.eup %9572  ;;  %v7339_v24 = vmul.f32 0.5, %v7275_v51 }
 0x855   : > { %v9575_v47 = vpop.eup %9574  ;;  %v7400_v46 = vadd.f32 1.0, %v9573_v10  ;;  %v8269_v58 = vmul.f32 0.5, %v8193_v2 }
 0x856   : > { %v8330_v17 = vadd.f32 1.0, %v9575_v47  ;;  %9576 = vtanh.f32 %v7339_v24  ;;  %v12298_v2 = vpop.f32.mrf.mxu1  ;;  %v8092_v24 = vadd.f32 %v12250_v8, %v7851_v54  ;;  %v7856_v8 = vpop.permute.xlu1 %7855 }
 0x857   : > { %v7431_v50 = vmul.f32 0.5, %v7400_v46  ;;  %9578 = vtanh.f32 %v8269_v58  ;;  %8985 = vmatmul.msk.f32.gmra.mxu3 %vm1108_vm0, %v7727_v9  ;;  %v12301_v9 = vpop.f32.mrf.mxu0 }
 0x858   : > { %v8361_v61 = vmul.f32 0.5, %v8330_v17 }
 0x859   : > { %8942 = vst [vmem:[%s10442_s21 + $0x638] sm:$0xff] %v7431_v50  ;;  %v7277_v27 = vpop.f32.mrf.mxu2 }
 0x85a   : > { %8998 = vst [vmem:[%s10442_s21 + $0x700] sm:$0xff] %v8361_v61  ;;  %v7278_v35 = vadd.f32 %v7277_v27, %v7168_v1  ;;  %v8195_v11 = vpop.f32.mrf.mxu3  ;;  %v7733_v1 = vld [vmem:[#allocation10 + $0x798] sm:$0xff] }
 0x85b   : > { %v8196_v39 = vadd.f32 %v8195_v11, %v8086_v28 }
 0x85c   : > { %v9577_v14 = vpop.eup %9576  ;;  %v7340_v32 = vmul.f32 0.5, %v7278_v35  ;;  %v7177_v35 = vadd.f32 %v12277_v13, %v12130_v52 }
 0x85d   : > { %v9579_v62 = vpop.eup %9578  ;;  %v7401_v22 = vadd.f32 1.0, %v9577_v14  ;;  %v8270_v60 = vmul.f32 0.5, %v8196_v39  ;;  %v8095_v39 = vadd.f32 %v12263_v41, %v7856_v8 }
 0x85e   : > { %v8331_v44 = vadd.f32 1.0, %v9579_v62  ;;  %9580 = vtanh.f32 %v7340_v32  ;;  %v12310_v32 = vpop.f32.mrf.mxu1 }
 0x85f   : > { %v7432_v5 = vmul.f32 0.5, %v7401_v22  ;;  %9582 = vtanh.f32 %v8270_v60  ;;  %8986 = vmatmul.msk.f32.gmra.mxu3 %vm1108_vm0, %v7729_v7  ;;  %v7185_v22 = vpop.f32.mrf.mxu0 }
 0x860   : > { %v8362_v18 = vmul.f32 0.5, %v8331_v44 }
 0x861   : > { %8943 = vst [vmem:[%s10442_s21 + $0x640] sm:$0xff] %v7432_v5  ;;  %v7280_v37 = vpop.f32.mrf.mxu2 }
 0x862   : > { %8999 = vst [vmem:[%s10442_s21 + $0x708] sm:$0xff] %v8362_v18  ;;  %v7281_v45 = vadd.f32 %v7280_v37, %v7171_v15  ;;  %v8198_v19 = vpop.f32.mrf.mxu3  ;;  %v7180_v37 = vadd.f32 %v12287_v34, %v12126_v6 }
 0x863   : > { %v8199_v42 = vadd.f32 %v8198_v19, %v8089_v31  ;;  %v7861_v31 = vpop.permute.xlu2 %7860 }
 0x864   : > { %v9581_v21 = vpop.eup %9580  ;;  %v7341_v56 = vmul.f32 0.5, %v7281_v45  ;;  %v8098_v19 = vadd.f32 %v12275_v26, %v7861_v31 }
 0x865   : > { %v9583_v12 = vpop.eup %9582  ;;  %v7402_v33 = vadd.f32 1.0, %v9581_v21  ;;  %v8271_v51 = vmul.f32 0.5, %v8199_v42 }
 0x866   : > { %v8332_v57 = vadd.f32 1.0, %v9583_v12  ;;  %9584 = vtanh.f32 %v7341_v56 }
 0x867   : > { %v7433_v36 = vmul.f32 0.5, %v7402_v33  ;;  %9586 = vtanh.f32 %v8271_v51  ;;  %8987 = vmatmul.msk.f32.gmra.mxu3 %vm1108_vm0, %v7731_v3  ;;  %v12319_v33 = vpop.f32.mrf.mxu1  ;;  %v7188_v54 = vpop.f32.mrf.mxu0 }
 0x868   : > { %v8363_v10 = vmul.f32 0.5, %v8332_v57  ;;  %v7737_v57 = vld [vmem:[#allocation10 + $0x7b8] sm:$0x1] }
 0x869   : > { %8944 = vst [vmem:[%s10442_s21 + $0x648] sm:$0xff] %v7433_v36  ;;  %v7283_v47 = vpop.f32.mrf.mxu2 }
 0x86a   : > { %9000 = vst [vmem:[%s10442_s21 + $0x710] sm:$0xff] %v8363_v10  ;;  %v7284_v46 = vadd.f32 %v7283_v47, %v7174_v29  ;;  %v8201_v58 = vpop.f32.mrf.mxu3  ;;  %v7866_v10 = vpop.permute.xlu0 %7865 }
 0x86b   : > { %v8202_v17 = vadd.f32 %v8201_v58, %v8092_v24  ;;  %v7183_v24 = vadd.f32 %v12301_v9, %v12134_v53 }
 0x86c   : > { %v9585_v50 = vpop.eup %9584  ;;  %v7342_v43 = vmul.f32 0.5, %v7284_v46  ;;  %v8101_v46 = vadd.f32 %v12285_v49, %v7866_v10  ;;  %v7871_v49 = vpop.permute.xlu1 %7870 }
 0x86d   : > { %v9587_v61 = vpop.eup %9586  ;;  %v7403_v23 = vadd.f32 1.0, %v9585_v50  ;;  %v8272_v20 = vmul.f32 0.5, %v8202_v17 }
 0x86e   : > { %v8333_v28 = vadd.f32 1.0, %v9587_v61  ;;  %9588 = vtanh.f32 %v7342_v43 }
 0x86f   : > { %v7434_v27 = vmul.f32 0.5, %v7403_v23  ;;  %9590 = vtanh.f32 %v8272_v20  ;;  %8988 = vmatmul.msk.f32.gmra.mxu3 %vm1108_vm0, %v7733_v1  ;;  %v7191_v53 = vpop.f32.mrf.mxu0 }
 0x870   : > { %v8364_v11 = vmul.f32 0.5, %v8333_v28 }
 0x871   : > { %8945 = vst [vmem:[%s10442_s21 + $0x650] sm:$0xff] %v7434_v27  ;;  %v7286_v14 = vpop.f32.mrf.mxu2  ;;  %v12327_v27 = vpop.f32.mrf.mxu1 }
 0x872   : > { %9001 = vst [vmem:[%s10442_s21 + $0x718] sm:$0xff] %v8364_v11  ;;  %v7287_v7 = vadd.f32 %v7286_v14, %v7177_v35  ;;  %v8204_v62 = vpop.f32.mrf.mxu3  ;;  %v7186_v35 = vadd.f32 %v7185_v22, %v12147_v48  ;;  %v7876_v48 = vpop.permute.xlu2 %7875 }
 0x873   : > { %v8205_v60 = vadd.f32 %v8204_v62, %v8095_v39  ;;  %v8104_v39 = vadd.f32 %v12298_v2, %v7871_v49  ;;  %v7189_v2 = vadd.f32 %v7188_v54, %v12143_v40  ;;  %v8107_v31 = vadd.f32 %v12310_v32, %v7876_v48  ;;  %v7881_v54 = vpop.permute.xlu0 %7880 }
 0x874   : > { %v9589_v44 = vpop.eup %9588  ;;  %v7343_v5 = vmul.f32 0.5, %v7287_v7  ;;  %v7192_v32 = vadd.f32 %v7191_v53, %v12152_v59 }
 0x875   : > { %v9591_v15 = vpop.eup %9590  ;;  %v7404_v18 = vadd.f32 1.0, %v9589_v44  ;;  %v8273_v52 = vmul.f32 0.5, %v8205_v60 }
 0x876   : > { %v8334_v13 = vadd.f32 1.0, %v9591_v15  ;;  %9592 = vtanh.f32 %v7343_v5 }
 0x877   : > { %v7435_v41 = vmul.f32 0.5, %v7404_v18  ;;  %9594 = vtanh.f32 %v8273_v52  ;;  %8989 = vmatmul.msk.f32.gmra.mxu3 %vm1108_vm0, %v7735_v0 }
 0x878   : > { %v8365_v45 = vmul.f32 0.5, %v8334_v13 }
 0x879   : > { %8946 = vst [vmem:[%s10442_s21 + $0x658] sm:$0xff] %v7435_v41  ;;  %v7289_v42 = vpop.f32.mrf.mxu2  ;;  %v12334_v22 = vpop.f32.mrf.mxu1 }
 0x87a   : > { %9002 = vst [vmem:[%s10442_s21 + $0x720] sm:$0xff] %v8365_v45  ;;  %v7290_v21 = vadd.f32 %v7289_v42, %v7180_v37  ;;  %v8207_v56 = vpop.f32.mrf.mxu3  ;;  %v7194_v37 = vpop.f32.mrf.mxu0 }
 0x87b   : > { %v8208_v3 = vadd.f32 %v8207_v56, %v8098_v19 }
 0x87c   : > { %v9593_v12 = vpop.eup %9592  ;;  %v7344_v51 = vmul.f32 0.5, %v7290_v21 }
 0x87d   : > { %v9595_v36 = vpop.eup %9594  ;;  %v7405_v29 = vadd.f32 1.0, %v9593_v12  ;;  %v8274_v6 = vmul.f32 0.5, %v8208_v3 }
 0x87e   : > { %v8335_v34 = vadd.f32 1.0, %v9595_v36  ;;  %9596 = vtanh.f32 %v7344_v51 }
 0x87f   : > { %v7436_v26 = vmul.f32 0.5, %v7405_v29  ;;  %9598 = vtanh.f32 %v8274_v6  ;;  %8990 = vmatmul.msk.f32.gmra.mxu3 %vm1108_vm0, %v7737_v57  ;;  %v8110_v6 = vadd.f32 %v12319_v33, %v7881_v54  ;;  %v7886_v33 = vpop.permute.xlu1 %7885 }
 0x880   : > { %v8366_v47 = vmul.f32 0.5, %v8335_v34 }
 0x881   : > { %8947 = vst [vmem:[%s10442_s21 + $0x660] sm:$0xff] %v7436_v26  ;;  %v7292_v58 = vpop.f32.mrf.mxu2  ;;  %v8118_v26 = vpop.f32.mrf.mxu1 }
 0x882   : > { %9003 = vst [vmem:[%s10442_s21 + $0x728] sm:$0xff] %v8366_v47  ;;  %v7293_v17 = vadd.f32 %v7292_v58, %v7183_v24  ;;  %v8210_v50 = vpop.f32.mrf.mxu3  ;;  %v7197_v47 = vpop.f32.mrf.mxu0 }
 0x883   : > { %v8211_v43 = vadd.f32 %v8210_v50, %v8101_v46 }
 0x884   : > { %v9597_v1 = vpop.eup %9596  ;;  %v7345_v61 = vmul.f32 0.5, %v7293_v17 }
 0x885   : > { %v9599_v23 = vpop.eup %9598  ;;  %v7406_v20 = vadd.f32 1.0, %v9597_v1  ;;  %v8275_v28 = vmul.f32 0.5, %v8211_v43 }
 0x886   : > { %v8336_v8 = vadd.f32 1.0, %v9599_v23  ;;  %9600 = vtanh.f32 %v7345_v61  ;;  %v7195_v23 = vadd.f32 %v7194_v37, %v12165_v4 }
 0x887   : > { %v7437_v9 = vmul.f32 0.5, %v7406_v20  ;;  %9602 = vtanh.f32 %v8275_v28  ;;  %v8113_v28 = vadd.f32 %v12327_v27, %v7886_v33  ;;  %v7891_v27 = vpop.permute.xlu2 %7890 }
 0x888   : > { %v8367_v11 = vmul.f32 0.5, %v8336_v8 }
 0x889   : > { %8948 = vst [vmem:[%s10442_s21 + $0x668] sm:$0xff] %v7437_v9  ;;  %v7295_v14 = vpop.f32.mrf.mxu2 }
 0x88a   : > { %9004 = vst [vmem:[%s10442_s21 + $0x730] sm:$0xff] %v8367_v11  ;;  %v7296_v7 = vadd.f32 %v7295_v14, %v7186_v35  ;;  %v8213_v62 = vpop.f32.mrf.mxu3  ;;  %v8121_v11 = vpop.f32.mrf.mxu1 }
 0x88b   : > { %v8214_v60 = vadd.f32 %v8213_v62, %v8104_v39 }
 0x88c   : > { %v9601_v44 = vpop.eup %9600  ;;  %v7346_v5 = vmul.f32 0.5, %v7296_v7  ;;  %v7200_v7 = vpop.f32.mrf.mxu0 }
 0x88d   : > { %v9603_v0 = vpop.eup %9602  ;;  %v7407_v15 = vadd.f32 1.0, %v9601_v44  ;;  %v8276_v18 = vmul.f32 0.5, %v8214_v60 }
 0x88e   : > { %v8337_v52 = vadd.f32 1.0, %v9603_v0  ;;  %9604 = vtanh.f32 %v7346_v5  ;;  %v7198_v5 = vadd.f32 %v7197_v47, %v12158_v55 }
 0x88f   : > { %v7438_v13 = vmul.f32 0.5, %v7407_v15  ;;  %9606 = vtanh.f32 %v8276_v18  ;;  %v8116_v15 = vadd.f32 %v12334_v22, %v7891_v27  ;;  %v7896_v22 = vpop.permute.xlu0 %7895 }
 0x890   : > { %v8368_v41 = vmul.f32 0.5, %v8337_v52 }
 0x891   : > { %8949 = vst [vmem:[%s10442_s21 + $0x670] sm:$0xff] %v7438_v13  ;;  %v7298_v45 = vpop.f32.mrf.mxu2 }
 0x892   : > { %9005 = vst [vmem:[%s10442_s21 + $0x738] sm:$0xff] %v8368_v41  ;;  %v7299_v19 = vadd.f32 %v7298_v45, %v7189_v2  ;;  %v8216_v42 = vpop.f32.mrf.mxu3 }
 0x893   : > { %v8217_v21 = vadd.f32 %v8216_v42, %v8107_v31 }
 0x894   : > { %v9605_v56 = vpop.eup %9604  ;;  %v7347_v3 = vmul.f32 0.5, %v7299_v19  ;;  %v8124_v19 = vpop.f32.mrf.mxu1 }
 0x895   : > { %v9607_v12 = vpop.eup %9606  ;;  %v7408_v51 = vadd.f32 1.0, %v9605_v56  ;;  %v8277_v57 = vmul.f32 0.5, %v8217_v21  ;;  %v7203_v55 = vpop.f32.mrf.mxu0  ;;  %v7201_v56 = vadd.f32 %v7200_v7, %v12167_v63 }
 0x896   : > { %v8338_v40 = vadd.f32 1.0, %v9607_v12  ;;  %9608 = vtanh.f32 %v7347_v3  ;;  %v8119_v12 = vadd.f32 %v8118_v26, %v7896_v22  ;;  %v7901_v63 = vpop.permute.xlu1 %7900  ;;  %v7204_v26 = vadd.f32 %v7203_v55, %v12180_v25 }
 0x897   : > { %v7439_v36 = vmul.f32 0.5, %v7408_v51  ;;  %9610 = vtanh.f32 %v8277_v57 }
 0x898   : > { %v8369_v29 = vmul.f32 0.5, %v8338_v40 }
 0x899   : > { %8950 = vst [vmem:[%s10442_s21 + $0x678] sm:$0xff] %v7439_v36  ;;  %v7301_v34 = vpop.f32.mrf.mxu2 }
 0x89a   : > { %9006 = vst [vmem:[%s10442_s21 + $0x740] sm:$0xff] %v8369_v29  ;;  %v7302_v10 = vadd.f32 %v7301_v34, %v7192_v32  ;;  %v8219_v24 = vpop.f32.mrf.mxu3 }
 0x89b   : > { %v8220_v46 = vadd.f32 %v8219_v24, %v8110_v6 }
 0x89c   : > { %v9609_v58 = vpop.eup %9608  ;;  %v7348_v17 = vmul.f32 0.5, %v7302_v10  ;;  %v8127_v47 = vpop.f32.mrf.mxu1 }
 0x89d   : > { %v9611_v50 = vpop.eup %9610  ;;  %v7409_v43 = vadd.f32 1.0, %v9609_v58  ;;  %v8278_v1 = vmul.f32 0.5, %v8220_v46  ;;  %v8122_v58 = vadd.f32 %v8121_v11, %v7901_v63 }
 0x89e   : > { %v8339_v61 = vadd.f32 1.0, %v9611_v50  ;;  %9612 = vtanh.f32 %v7348_v17  ;;  %v7206_v17 = vpop.f32.mrf.mxu0 }
 0x89f   : > { %v7440_v59 = vmul.f32 0.5, %v7409_v43  ;;  %9614 = vtanh.f32 %v8278_v1 }
 0x8a0   : > { %v8370_v20 = vmul.f32 0.5, %v8339_v61 }
 0x8a1   : > { %8951 = vst [vmem:[%s10442_s21 + $0x680] sm:$0xff] %v7440_v59  ;;  %v7304_v8 = vpop.f32.mrf.mxu2 }
 0x8a2   : > { %9007 = vst [vmem:[%s10442_s21 + $0x748] sm:$0xff] %v8370_v20  ;;  %v7305_v53 = vadd.f32 %v7304_v8, %v7195_v23  ;;  %v8222_v9 = vpop.f32.mrf.mxu3 }
 0x8a3   : > { %v8223_v49 = vadd.f32 %v8222_v9, %v8113_v28  ;;  %v7207_v9 = vadd.f32 %v7206_v17, %v12173_v30 }
 0x8a4   : > { %v9613_v35 = vpop.eup %9612  ;;  %v7349_v39 = vmul.f32 0.5, %v7305_v53  ;;  %v7906_v53 = vpop.permute.xlu2 %7905 }
 0x8a5   : > { %v9615_v14 = vpop.eup %9614  ;;  %v7410_v62 = vadd.f32 1.0, %v9613_v35  ;;  %v8279_v60 = vmul.f32 0.5, %v8223_v49  ;;  %v8125_v35 = vadd.f32 %v8124_v19, %v7906_v53 }
 0x8a6   : > { %v8340_v44 = vadd.f32 1.0, %v9615_v14  ;;  %9616 = vtanh.f32 %v7349_v39  ;;  %v8130_v39 = vpop.f32.mrf.mxu1 }
 0x8a7   : > { %v7441_v4 = vmul.f32 0.5, %v7410_v62  ;;  %9618 = vtanh.f32 %v8279_v60  ;;  %v7209_v62 = vpop.f32.mrf.mxu0 }
 0x8a8   : > { %v8371_v0 = vmul.f32 0.5, %v8340_v44 }
 0x8a9   : > { %8952 = vst [vmem:[%s10442_s21 + $0x688] sm:$0xff] %v7441_v4  ;;  %v7307_v18 = vpop.f32.mrf.mxu2 }
 0x8aa   : > { %9008 = vst [vmem:[%s10442_s21 + $0x750] sm:$0xff] %v8371_v0  ;;  %v7308_v52 = vadd.f32 %v7307_v18, %v7198_v5  ;;  %v8225_v13 = vpop.f32.mrf.mxu3  ;;  %v7911_v18 = vpop.permute.xlu0 %7910 }
 0x8ab   : > { %v8226_v48 = vadd.f32 %v8225_v13, %v8116_v15 }
 0x8ac   : > { %v9617_v2 = vpop.eup %9616  ;;  %v7350_v41 = vmul.f32 0.5, %v7308_v52  ;;  %v7210_v52 = vadd.f32 %v7209_v62, %v12182_v38 }
 0x8ad   : > { %v9619_v31 = vpop.eup %9618  ;;  %v7411_v37 = vadd.f32 1.0, %v9617_v2  ;;  %v8280_v45 = vmul.f32 0.5, %v8226_v48  ;;  %v8128_v48 = vadd.f32 %v8127_v47, %v7911_v18 }
 0x8ae   : > { %v8341_v42 = vadd.f32 1.0, %v9619_v31  ;;  %9620 = vtanh.f32 %v7350_v41  ;;  %v8133_v19 = vpop.f32.mrf.mxu1 }
 0x8af   : > { %v7442_v21 = vmul.f32 0.5, %v7411_v37  ;;  %9622 = vtanh.f32 %v8280_v45 }
 0x8b0   : > { %v8372_v3 = vmul.f32 0.5, %v8341_v42 }
 0x8b1   : > { %8953 = vst [vmem:[%s10442_s21 + $0x690] sm:$0xff] %v7442_v21  ;;  %v7310_v51 = vpop.f32.mrf.mxu2  ;;  %v7212_v21 = vpop.f32.mrf.mxu0 }
 0x8b2   : > { %9009 = vst [vmem:[%s10442_s21 + $0x758] sm:$0xff] %v8372_v3  ;;  %v7311_v57 = vadd.f32 %v7310_v51, %v7201_v56  ;;  %v8228_v40 = vpop.f32.mrf.mxu3  ;;  %v7213_v51 = vadd.f32 %v7212_v21, %v12194_v16  ;;  %v7921_v16 = vpop.permute.xlu2 %7920 }
 0x8b3   : > { %v8229_v36 = vadd.f32 %v8228_v40, %v8119_v12  ;;  %v7916_v12 = vpop.permute.xlu1 %7915  ;;  %v8134_v17 = vadd.f32 %v8133_v19, %v7921_v16 }
 0x8b4   : > { %v9621_v54 = vpop.eup %9620  ;;  %v7351_v32 = vmul.f32 0.5, %v7311_v57  ;;  %v8131_v40 = vadd.f32 %v8130_v39, %v7916_v12 }
 0x8b5   : > { %v9623_v29 = vpop.eup %9622  ;;  %v7412_v6 = vadd.f32 1.0, %v9621_v54  ;;  %v8281_v34 = vmul.f32 0.5, %v8229_v36 }
 0x8b6   : > { %v8342_v10 = vadd.f32 1.0, %v9623_v29  ;;  %9624 = vtanh.f32 %v7351_v32 }
 0x8b7   : > { %v7443_v24 = vmul.f32 0.5, %v7412_v6  ;;  %9626 = vtanh.f32 %v8281_v34 }
 0x8b8   : > { %v8373_v46 = vmul.f32 0.5, %v8342_v10 }
 0x8b9   : > { %8954 = vst [vmem:[%s10442_s21 + $0x698] sm:$0xff] %v7443_v24  ;;  %v7313_v50 = vpop.f32.mrf.mxu2 }
 0x8ba   : > { %9010 = vst [vmem:[%s10442_s21 + $0x760] sm:$0xff] %v8373_v46  ;;  %v7314_v43 = vadd.f32 %v7313_v50, %v7204_v26  ;;  %v8231_v1 = vpop.f32.mrf.mxu3  ;;  %v8136_v26 = vpop.f32.mrf.mxu1 }
 0x8bb   : > { %v8232_v61 = vadd.f32 %v8231_v1, %v8122_v58 }
 0x8bc   : > { %v9625_v59 = vpop.eup %9624  ;;  %v7352_v33 = vmul.f32 0.5, %v7314_v43 }
 0x8bd   : > { %v9627_v23 = vpop.eup %9626  ;;  %v7413_v20 = vadd.f32 1.0, %v9625_v59  ;;  %v8282_v28 = vmul.f32 0.5, %v8232_v61 }
 0x8be   : > { %v8343_v8 = vadd.f32 1.0, %v9627_v23  ;;  %9628 = vtanh.f32 %v7352_v33 }
 0x8bf   : > { %v7444_v25 = vmul.f32 0.5, %v7413_v20  ;;  %9630 = vtanh.f32 %v8282_v28  ;;  %v7926_v28 = vpop.permute.xlu0 %7925 }
 0x8c0   : > { %v8374_v49 = vmul.f32 0.5, %v8343_v8  ;;  %v8137_v53 = vadd.f32 %v8136_v26, %v7926_v28 }
 0x8c1   : > { %8955 = vst [vmem:[%s10442_s21 + $0x6a0] sm:$0xff] %v7444_v25  ;;  %v7316_v11 = vpop.f32.mrf.mxu2 }
 0x8c2   : > { %9011 = vst [vmem:[%s10442_s21 + $0x768] sm:$0xff] %v8374_v49  ;;  %v7317_v14 = vadd.f32 %v7316_v11, %v7207_v9  ;;  %v8234_v7 = vpop.f32.mrf.mxu3  ;;  %v8139_v8 = vpop.f32.mrf.mxu1 }
 0x8c3   : > { %v8235_v60 = vadd.f32 %v8234_v7, %v8125_v35 }
 0x8c4   : > { %v9629_v44 = vpop.eup %9628  ;;  %v7353_v4 = vmul.f32 0.5, %v7317_v14  ;;  %v7931_v14 = vpop.permute.xlu1 %7930 }
 0x8c5   : > { %v9631_v27 = vpop.eup %9630  ;;  %v7414_v5 = vadd.f32 1.0, %v9629_v44  ;;  %v8283_v0 = vmul.f32 0.5, %v8235_v60  ;;  %v8140_v62 = vadd.f32 %v8139_v8, %v7931_v14 }
 0x8c6   : > { %v8344_v15 = vadd.f32 1.0, %v9631_v27  ;;  %9632 = vtanh.f32 %v7353_v4 }
 0x8c7   : > { %v7445_v30 = vmul.f32 0.5, %v7414_v5  ;;  %9634 = vtanh.f32 %v8283_v0 }
 0x8c8   : > { %v8375_v13 = vmul.f32 0.5, %v8344_v15  ;;  %v7936_v15 = vpop.permute.xlu2 %7935 }
 0x8c9   : > { %8956 = vst [vmem:[%s10442_s21 + $0x6a8] sm:$0xff] %v7445_v30  ;;  %v7319_v2 = vpop.f32.mrf.mxu2 }
 0x8ca   : > { %9012 = vst [vmem:[%s10442_s21 + $0x770] sm:$0xff] %v8375_v13  ;;  %v7320_v41 = vadd.f32 %v7319_v2, %v7210_v52  ;;  %v8237_v31 = vpop.f32.mrf.mxu3  ;;  %v8142_v60 = vpop.f32.mrf.mxu1 }
 0x8cb   : > { %v8238_v37 = vadd.f32 %v8237_v31, %v8128_v48  ;;  %v8143_v18 = vadd.f32 %v8142_v60, %v7936_v15 }
 0x8cc   : > { %v9633_v45 = vpop.eup %9632  ;;  %v7354_v42 = vmul.f32 0.5, %v7320_v41 }
 0x8cd   : > { %v9635_v55 = vpop.eup %9634  ;;  %v7415_v22 = vadd.f32 1.0, %v9633_v45  ;;  %v8284_v56 = vmul.f32 0.5, %v8238_v37  ;;  %v7941_v37 = vpop.permute.xlu0 %7940 }
 0x8ce   : > { %v8345_v3 = vadd.f32 1.0, %v9635_v55  ;;  %9636 = vtanh.f32 %v7354_v42 }
 0x8cf   : > { %v7446_v38 = vmul.f32 0.5, %v7415_v22  ;;  %9638 = vtanh.f32 %v8284_v56 }
 0x8d0   : > { %v8376_v57 = vmul.f32 0.5, %v8345_v3 }
 0x8d1   : > { %8957 = vst [vmem:[%s10442_s21 + $0x6b0] sm:$0xff] %v7446_v38  ;;  %v7322_v36 = vpop.f32.mrf.mxu2  ;;  %v7946_v38 = vpop.permute.xlu1 %7945 }
 0x8d2   : > { %9013 = vst [vmem:[%s10442_s21 + $0x778] sm:$0xff] %v8376_v57  ;;  %v7323_v54 = vadd.f32 %v7322_v36, %v7213_v51  ;;  %v8240_v32 = vpop.f32.mrf.mxu3  ;;  %v8145_v48 = vpop.f32.mrf.mxu1 }
 0x8d3   : > { %v8241_v29 = vadd.f32 %v8240_v32, %v8131_v40  ;;  %v8146_v19 = vadd.f32 %v8145_v48, %v7941_v37 }
 0x8d4   : > { %v9637_v6 = vpop.eup %9636  ;;  %v7355_v34 = vmul.f32 0.5, %v7323_v54 }
 0x8d5   : > { %v9639_v10 = vpop.eup %9638  ;;  %v7416_v24 = vadd.f32 1.0, %v9637_v6  ;;  %v8285_v63 = vmul.f32 0.5, %v8241_v29 }
 0x8d6   : > { %v8346_v47 = vadd.f32 1.0, %v9639_v10  ;;  %9640 = vtanh.f32 %v7355_v34 }
 0x8d7   : > { %v7447_v46 = vmul.f32 0.5, %v7416_v24  ;;  %9642 = vtanh.f32 %v8285_v63 }
 0x8d8   : > { %v8377_v58 = vmul.f32 0.5, %v8346_v47 }
 0x8d9   : > { %8958 = vst [vmem:[%s10442_s21 + $0x6b8] sm:$0xff] %v7447_v46 }
 0x8da   : > { %9014 = vst [vmem:[%s10442_s21 + $0x780] sm:$0xff] %v8377_v58  ;;  %v8243_v50 = vpop.f32.mrf.mxu3  ;;  %v8148_v56 = vpop.f32.mrf.mxu1 }
 0x8db   : > { %v8244_v43 = vadd.f32 %v8243_v50, %v8134_v17  ;;  %v8149_v51 = vadd.f32 %v8148_v56, %v7946_v38 }
 0x8dc   : > { %v9641_v1 = vpop.eup %9640 }
 0x8dd   : > { %v9643_v61 = vpop.eup %9642  ;;  %v7417_v59 = vadd.f32 1.0, %v9641_v1  ;;  %v8286_v33 = vmul.f32 0.5, %v8244_v43 }
 0x8de   : > { %v8347_v23 = vadd.f32 1.0, %v9643_v61 }
 0x8df   : > { %v7448_v20 = vmul.f32 0.5, %v7417_v59  ;;  %9644 = vtanh.f32 %v8286_v33 }
 0x8e0   : > { %v8378_v25 = vmul.f32 0.5, %v8347_v23 }
 0x8e1   : > { %8959 = vst [vmem:[%s10442_s21 + $0x6c0] sm:$0x1] %v7448_v20 }
 0x8e2   : > { %9015 = vst [vmem:[%s10442_s21 + $0x788] sm:$0xff] %v8378_v25  ;;  %v8246_v9 = vpop.f32.mrf.mxu3 }
 0x8e3   : > { %v8247_v49 = vadd.f32 %v8246_v9, %v8137_v53 }
 0x8e5   : > { %v9645_v35 = vpop.eup %9644  ;;  %v8287_v11 = vmul.f32 0.5, %v8247_v49 }
 0x8e6   : > { %v8348_v39 = vadd.f32 1.0, %v9645_v35 }
 0x8e7   : > { %9646 = vtanh.f32 %v8287_v11 }
 0x8e8   : > { %v8379_v7 = vmul.f32 0.5, %v8348_v39 }
 0x8ea   : > { %9016 = vst [vmem:[%s10442_s21 + $0x790] sm:$0xff] %v8379_v7  ;;  %v8249_v44 = vpop.f32.mrf.mxu3 }
 0x8eb   : > { %v8250_v4 = vadd.f32 %v8249_v44, %v8140_v62 }
 0x8ed   : > { %v9647_v27 = vpop.eup %9646  ;;  %v8288_v5 = vmul.f32 0.5, %v8250_v4 }
 0x8ee   : > { %v8349_v0 = vadd.f32 1.0, %v9647_v27 }
 0x8ef   : > { %9648 = vtanh.f32 %v8288_v5 }
 0x8f0   : > { %v8380_v30 = vmul.f32 0.5, %v8349_v0 }
 0x8f2   : > { %9017 = vst [vmem:[%s10442_s21 + $0x798] sm:$0xff] %v8380_v30  ;;  %v8252_v52 = vpop.f32.mrf.mxu3 }
 0x8f3   : > { %v8253_v13 = vadd.f32 %v8252_v52, %v8143_v18 }
 0x8f5   : > { %v9649_v2 = vpop.eup %9648  ;;  %v8289_v41 = vmul.f32 0.5, %v8253_v13 }
 0x8f6   : > { %v8350_v31 = vadd.f32 1.0, %v9649_v2 }
 0x8f7   : > { %9650 = vtanh.f32 %v8289_v41 }
 0x8f8   : > { %v8381_v45 = vmul.f32 0.5, %v8350_v31 }
 0x8fa   : > { %9018 = vst [vmem:[%s10442_s21 + $0x7a0] sm:$0xff] %v8381_v45  ;;  %v8255_v42 = vpop.f32.mrf.mxu3 }
 0x8fb   : > { %v8256_v55 = vadd.f32 %v8255_v42, %v8146_v19 }
 0x8fd   : > { %v9651_v21 = vpop.eup %9650  ;;  %v8290_v22 = vmul.f32 0.5, %v8256_v55 }
 0x8fe   : > { %v8351_v3 = vadd.f32 1.0, %v9651_v21 }
 0x8ff   : > { %9652 = vtanh.f32 %v8290_v22 }
 0x900   : > { %v8382_v12 = vmul.f32 0.5, %v8351_v3 }
 0x902   : > { %9019 = vst [vmem:[%s10442_s21 + $0x7a8] sm:$0xff] %v8382_v12  ;;  %v8258_v57 = vpop.f32.mrf.mxu3 }
 0x903   : > { %v8259_v40 = vadd.f32 %v8258_v57, %v8149_v51 }
 0x905   : > { %v9653_v36 = vpop.eup %9652  ;;  %v8291_v54 = vmul.f32 0.5, %v8259_v40 }
 0x906   : > { %v8352_v32 = vadd.f32 1.0, %v9653_v36 }
 0x907   : > { %9654 = vtanh.f32 %v8291_v54 }
 0x908   : > { %v8383_v29 = vmul.f32 0.5, %v8352_v32 }
 0x90a   : > { %9020 = vst [vmem:[%s10442_s21 + $0x7b0] sm:$0xff] %v8383_v29 }
 0x90d   : > { %v9655_v6 = vpop.eup %9654 }
 0x90e   : > { %v8353_v34 = vadd.f32 1.0, %v9655_v6 }
 0x910   : > { %v8384_v10 = vmul.f32 0.5, %v8353_v34 }
 0x912   : > { %9021 = vst [vmem:[%s10442_s21 + $0x7b8] sm:$0x1] %v8384_v10 }
 0x913 PF: > { %p19_p3 = scmp.ge.s32.totalorder %s10002_s28, 4   ;;  %s12449_s21 = smov %s9859_s22 }
 0x914   : > { %s12450_s22 = smov %s9863_s23  ;;  %s12451_s23 = smov %s10013_s10 }
 0x915   : > { %s12452_s24 = smov %s10002_s28  ;;  %21 = sbr.rel (!%p19_p3) target bundleno = 6 (0x6), region = 133 }
 0x91a   :  { %8441 = vsyncpa [#allocation4], 1 }
 0x91b   :  { %8443 = vsyncpa [#allocation4 + $0x1], 1 }
 0x91c   :  { %8444 = vsyncpa [#allocation8], 1 }
 0x91d   :  { %8445 = vsyncpa [#allocation11], 1 }
 0x91e   :  { %8446 = vsyncpa [#allocation5], 1 }
 0x91f   :  { %8448 = vsyncpa [#allocation5 + $0x1], 1 }

</bundles_post_ra>
